<compile_context>
chip_gen: v5e
topology: v5e:2x2
jax: 0.10.0
libtpu: 0.0.40
codegen_flags: <defaults>
</compile_context>

<pallas_src>
import functools

import jax
import jax.numpy as jnp
from jax import lax
from jax.experimental import pallas as pl
from jax.experimental.pallas import tpu as pltpu

NUM_EMBEDDINGS = 512      # matches module config
EMBEDDING_DIM = 128       # matches module config
COMMITMENT_COST = 0.25


def _vq_kernel(x_ref, wtn_ref, whi_ref, wlo_ref, w2_ref,
               q_ref, enc_ref, hist_ref, sse_ref, *, hw_valid):
    """One (batch, spatial-tile) block of the VQ hot path.

    x_ref   : (D, T)   f32   channel-major slab straight from the NCHW input
    wtn_ref : (D, K)   bf16  pre-transposed codebook, scaled by -2
    whi_ref : (K, D)   bf16  high half of the codebook  bf16(w)
    wlo_ref : (K, D)   bf16  low  half of the codebook  bf16(w - bf16(w))
    w2_ref  : (1, K)   f32   hoisted ||w||^2
    q_ref   : (D, T)   f32   quantized rows, written back in NCHW layout
    enc_ref : (T, K)   bf16  one-hot encodings (exact 0/1)
    hist_ref: (1, K)   f32   per-tile code histogram (padded rows masked out)
    sse_ref : (1, 128) f32   per-tile sum of squared error (scalar, broadcast)
    """
    t = x_ref.shape[1]
    k = whi_ref.shape[0]

    x_cd = x_ref[...]                                   # (D, T) f32
    x = jnp.transpose(x_cd)                             # (T, D) f32, XLU transpose

    # distances up to a per-row constant: score = ||w||^2 - 2 x.w
    # (bf16 MXU matmul, f32 accumulate; -2 folded into wtn; ||x||^2 dropped).
    xw = jnp.dot(x.astype(jnp.bfloat16), wtn_ref[...],
                 preferred_element_type=jnp.float32)    # (T, K)
    score = w2_ref[...] + xw

    # first-minimal-index argmin over the codebook (matches torch.argmin).
    smin = jnp.min(score, axis=1, keepdims=True)
    col = lax.broadcasted_iota(jnp.int32, score.shape, 1)
    idx = jnp.min(jnp.where(score == smin, col, k), axis=1, keepdims=True)  # (T, 1)

    # one-hot encodings, materialized once, directly in bf16 (0/1 exact).
    enc = (col == idx).astype(jnp.bfloat16)             # (T, K)
    enc_ref[...] = enc

    # codebook "gather" as two bf16 MXU passes (exact hi/lo split of the f32 codebook).
    q = (jnp.dot(enc, whi_ref[...], preferred_element_type=jnp.float32)
         + jnp.dot(enc, wlo_ref[...], preferred_element_type=jnp.float32))  # (T, D)
    q_ref[...] = jnp.transpose(q)                        # back to (D, T) NCHW layout

    # validity mask for the (possibly ragged) last spatial tile.
    s0 = pl.program_id(1) * t
    valid_col = (s0 + lax.broadcasted_iota(jnp.int32, (t, 1), 0)) < hw_valid
    valid_lane = ((s0 + lax.broadcasted_iota(jnp.int32, (1, t), 1)) < hw_valid
                  ).astype(jnp.bfloat16)

    # fused perplexity histogram: masked column sums of the one-hot via a skinny MXU
    # dot (products are exact 0/1, accumulation in f32, so counts are exact).
    hist_ref[...] = jnp.dot(valid_lane, enc, preferred_element_type=jnp.float32)

    # per-tile sum of squared error for e_latent_loss (padded rows excluded).
    diff = q - x
    d2 = jnp.sum(diff * diff, axis=1, keepdims=True)     # (T, 1)
    sse = jnp.sum(jnp.where(valid_col, d2, 0.0), axis=0, keepdims=True)  # (1, 1)
    sse_ref[...] = jnp.broadcast_to(sse, sse_ref.shape)


def _pick_spatial_tile(hw, want):
    """Spatial tile width: lane-aligned (multiple of 128) whenever possible."""
    want = max(128, (int(want) // 128) * 128)
    if hw % 128 == 0:
        return min(hw, want)
    if hw < 128:
        return hw                            # tiny spatial extent: one full-width block
    return min((hw // 128) * 128, want)      # last tile is ragged; masked in-kernel


def vq_ema_forward(x_nchw, emb_w, commitment_cost=COMMITMENT_COST, tile_hw=1024):
    """Eval-mode forward of VectorQuantizerEMA.

    x_nchw: (B, C, H, W) float32, C == embedding_dim (NCHW, like the PyTorch module)
    emb_w:  (num_embeddings, embedding_dim) float32 codebook
    Returns (loss, quantized_nchw, perplexity, encodings); encodings are exact 0/1
    values returned in bfloat16 (dtype contract difference vs. the float32 module).
    """
    B, C, H, W = x_nchw.shape
    K, D = emb_w.shape
    assert C == D, "channel dim must equal embedding_dim"
    HW = H * W
    N = B * HW

    # NCHW consumed directly as (B, D, HW); NHWC permute happens in-kernel.
    x3 = x_nchw.astype(jnp.float32).reshape(B, D, HW)

    t_hw = _pick_spatial_tile(HW, tile_hw)
    n_t = -(-HW // t_hw)

    # One-time codebook preprocessing (hoisted out of the kernel).
    w = emb_w.astype(jnp.float32)                               # (K, D)
    w_hi = w.astype(jnp.bfloat16)                               # bf16 high half
    w_lo = (w - w_hi.astype(jnp.float32)).astype(jnp.bfloat16)  # bf16 low half
    wtn = jnp.transpose(-2.0 * w).astype(jnp.bfloat16)          # (D, K), -2 folded in
    w2 = jnp.sum(w * w, axis=1)[None, :]                        # (1, K) f32

    kernel = functools.partial(_vq_kernel, hw_valid=HW)

    q3, enc, hist, sse = pl.pallas_call(
        kernel,
        out_shape=(
            jax.ShapeDtypeStruct((B, D, HW), jnp.float32),        # quantized (NCHW slab)
            jax.ShapeDtypeStruct((B, HW, K), jnp.bfloat16),       # one-hot encodings
            jax.ShapeDtypeStruct((B, n_t, 1, K), jnp.float32),    # per-tile histogram
            jax.ShapeDtypeStruct((B, n_t, 1, 128), jnp.float32),  # per-tile sse
        ),
        grid_spec=pltpu.PrefetchScalarGridSpec(
            num_scalar_prefetch=0,
            grid=(B, n_t),
            in_specs=[
                pl.BlockSpec((None, D, t_hw), lambda b, t: (b, 0, t)),   # x slab
                pl.BlockSpec((D, K), lambda b, t: (0, 0)),               # -2 * w^T (bf16)
                pl.BlockSpec((K, D), lambda b, t: (0, 0)),               # w_hi (bf16)
                pl.BlockSpec((K, D), lambda b, t: (0, 0)),               # w_lo (bf16)
                pl.BlockSpec((1, K), lambda b, t: (0, 0)),               # ||w||^2
            ],
            out_specs=[
                pl.BlockSpec((None, D, t_hw), lambda b, t: (b, 0, t)),
                pl.BlockSpec((None, t_hw, K), lambda b, t: (b, t, 0)),
                pl.BlockSpec((None, None, 1, K), lambda b, t: (b, t, 0, 0)),
                pl.BlockSpec((None, None, 1, 128), lambda b, t: (b, t, 0, 0)),
            ],
        ),
        compiler_params=pltpu.CompilerParams(
            dimension_semantics=("parallel", "parallel"),
            vmem_limit_bytes=48 * 1024 * 1024,
        ),
    )(x3, wtn, w_hi, w_lo, w2)

    # quantized already sits in NCHW layout; straight-through forward value == quantized.
    quantized_nchw = q3.reshape(B, C, H, W)
    encodings = enc.reshape(N, K)

    # e_latent_loss = F.mse_loss(quantized.detach(), inputs), from fused per-tile sums.
    e_latent_loss = jnp.sum(sse[:, :, 0, 0]) / (N * D)
    loss = commitment_cost * e_latent_loss

    # perplexity from the fused in-kernel histogram (no HBM re-read of encodings).
    counts = jnp.sum(hist[:, :, 0, :], axis=(0, 1))              # (K,)
    avg_probs = counts / N
    perplexity = jnp.exp(-jnp.sum(avg_probs * jnp.log(avg_probs + 1e-10)))

    return loss, quantized_nchw, perplexity, encodings


def _reference(x_nchw, emb_w, commitment_cost=COMMITMENT_COST):
    """Pure-JAX f32 reference mirroring the PyTorch forward (eval mode)."""
    B, C, H, W = x_nchw.shape
    K, D = emb_w.shape
    inputs = jnp.transpose(x_nchw, (0, 2, 3, 1)).astype(jnp.float32)
    flat = inputs.reshape(-1, D)
    dist = (jnp.sum(flat ** 2, axis=1, keepdims=True)
            + jnp.sum(emb_w ** 2, axis=1)
            - 2.0 * jnp.dot(flat, emb_w.T, precision=lax.Precision.HIGHEST))
    idx = jnp.argmin(dist, axis=1)
    enc = jax.nn.one_hot(idx, K, dtype=jnp.float32)
    q = jnp.dot(enc, emb_w, precision=lax.Precision.HIGHEST).reshape(B, H, W, D)
    loss = commitment_cost * jnp.mean((q - inputs) ** 2)
    avg_probs = jnp.mean(enc, axis=0)
    perp = jnp.exp(-jnp.sum(avg_probs * jnp.log(avg_probs + 1e-10)))
    return loss, jnp.transpose(q, (0, 3, 1, 2)), perp, enc, idx, dist


if __name__ == "__main__":
    key = jax.random.PRNGKey(0)
    k_w, k_x = jax.random.split(key)

    # Deterministic "checkpoint": embedding.weight.data.normal_() analogue.
    emb_w = jax.random.normal(k_w, (NUM_EMBEDDINGS, EMBEDDING_DIM), dtype=jnp.float32)

    # Small NCHW input with C == embedding_dim. H*W = 320 is deliberately not a
    # multiple of the 256-wide spatial tile so the ragged / masked path is exercised.
    B, C, H, W = 2, EMBEDDING_DIM, 16, 20
    x = jax.random.normal(k_x, (B, C, H, W), dtype=jnp.float32)

    loss, quantized, perplexity, encodings = jax.block_until_ready(
        vq_ema_forward(x, emb_w)
    )

    N = B * H * W
    loss_r, quant_r, perp_r, enc_r, idx_r, dist_r = _reference(x, emb_w)

    assert quantized.shape == (B, C, H, W)
    assert encodings.shape == (N, NUM_EMBEDDINGS)
    enc_f32 = encodings.astype(jnp.float32)

    # every row is exactly one-hot (also proves padded-tile rows were dropped).
    assert jnp.array_equal(jnp.sum(enc_f32, axis=1), jnp.ones((N,), jnp.float32))

    # gather correctness: each quantized row equals its selected codeword.
    idx_k = jnp.argmax(enc_f32, axis=1)
    q_rows = jnp.transpose(quantized, (0, 2, 3, 1)).reshape(N, EMBEDDING_DIM)
    assert jnp.allclose(q_rows, emb_w[idx_k], rtol=1e-4, atol=1e-4)

    # assignment (near-)optimality under exact f32 distances: bf16 distance rounding
    # may only flip genuinely near-tied codewords.
    subopt = dist_r[jnp.arange(N), idx_k] - jnp.min(dist_r, axis=1)
    assert float(jnp.max(subopt)) < 2.0
    assert float(jnp.mean((idx_k != idx_r).astype(jnp.float32))) < 0.03

    # fused in-kernel histogram agrees exactly with the returned encodings.
    p_enc = jnp.mean(enc_f32, axis=0)
    perp_enc = jnp.exp(-jnp.sum(p_enc * jnp.log(p_enc + 1e-10)))
    assert jnp.allclose(perplexity, perp_enc, rtol=1e-5, atol=1e-5)

    # loss / perplexity track the exact-f32 reference.
    assert jnp.allclose(loss, loss_r, rtol=1e-3, atol=1e-4)
    assert jnp.allclose(perplexity, perp_r, rtol=1e-1)

    print("KERNEL_OK")
</pallas_src>

<mosaic_0001>
module attributes {stable_mosaic.version = 11 : i64} {
  func.func @_vq_kernel(%arg0: i32, %arg1: i32, %arg2: memref<1x128x256xf32, #tpu.memory_space<vmem>>, %arg3: memref<128x512xbf16, #tpu.memory_space<vmem>>, %arg4: memref<512x128xbf16, #tpu.memory_space<vmem>>, %arg5: memref<512x128xbf16, #tpu.memory_space<vmem>>, %arg6: memref<1x512xf32, #tpu.memory_space<vmem>>, %arg7: memref<1x128x256xf32, #tpu.memory_space<vmem>>, %arg8: memref<1x256x512xbf16, #tpu.memory_space<vmem>>, %arg9: memref<1x1x1x512xf32, #tpu.memory_space<vmem>>, %arg10: memref<1x1x1x128xf32, #tpu.memory_space<vmem>>) attributes {dimension_semantics = [#tpu.dimension_semantics<parallel>, #tpu.dimension_semantics<parallel>], iteration_bounds = array<i64: 2, 2>, scalar_prefetch = 0 : i64, scratch_operands = 0 : i64, tpu.core_type = #tpu.core_type<tc>, window_params = [{transform_indices = @transform_0, window_bounds = array<i64: 1, 128, 256>}, {pipeline_mode = #tpu.pipeline_mode<synchronous>, transform_indices = @transform_1, window_bounds = array<i64: 128, 512>}, {pipeline_mode = #tpu.pipeline_mode<synchronous>, transform_indices = @transform_2, window_bounds = array<i64: 512, 128>}, {pipeline_mode = #tpu.pipeline_mode<synchronous>, transform_indices = @transform_3, window_bounds = array<i64: 512, 128>}, {pipeline_mode = #tpu.pipeline_mode<synchronous>, transform_indices = @transform_4, window_bounds = array<i64: 1, 512>}, {transform_indices = @transform_5, window_bounds = array<i64: 1, 128, 256>}, {transform_indices = @transform_6, window_bounds = array<i64: 1, 256, 512>}, {transform_indices = @transform_7, window_bounds = array<i64: 1, 1, 1, 512>}, {transform_indices = @transform_8, window_bounds = array<i64: 1, 1, 1, 128>}]} {
    %c0 = arith.constant 0 : index
    %c0_0 = arith.constant 0 : index
    %c0_1 = arith.constant 0 : index
    %0 = vector.load %arg2[%c0, %c0_0, %c0_1] : memref<1x128x256xf32, #tpu.memory_space<vmem>>, vector<1x128x256xf32>
    %1 = vector.shape_cast %0 : vector<1x128x256xf32> to vector<128x256xf32>
    %2 = tpu.transpose %1, [1, 0] : vector<128x256xf32> -> vector<256x128xf32>
    %3 = arith.truncf %2 : vector<256x128xf32> to vector<256x128xbf16>
    %c0_2 = arith.constant 0 : index
    %c0_3 = arith.constant 0 : index
    %4 = vector.load %arg3[%c0_2, %c0_3] : memref<128x512xbf16, #tpu.memory_space<vmem>>, vector<128x512xbf16>
    %cst = arith.constant dense<0.000000e+00> : vector<256x512xf32>
    %5 = tpu.matmul %3, %4, %cst {dimension_numbers = #tpu.dot_dimension_numbers<[1], [0], [0], [1], [0, 0, 1, 1], [], []>} : vector<256x128xbf16>, vector<128x512xbf16>, vector<256x512xf32> -> vector<256x512xf32>
    %c0_4 = arith.constant 0 : index
    %c0_5 = arith.constant 0 : index
    %6 = vector.load %arg6[%c0_4, %c0_5] : memref<1x512xf32, #tpu.memory_space<vmem>>, vector<1x512xf32>
    %7 = vector.broadcast %6 : vector<1x512xf32> to vector<256x512xf32>
    %8 = arith.addf %7, %5 : vector<256x512xf32>
    %cst_6 = arith.constant dense<0x7F800000> : vector<256xf32>
    %9 = vector.multi_reduction <minimumf>, %8, %cst_6 [1] : vector<256x512xf32> to vector<256xf32>
    %10 = vector.shape_cast %9 : vector<256xf32> to vector<256x1xf32>
    %11 = tpu.iota {dimensions = array<i32: 1>} : vector<256x512xi32>
    %12 = vector.broadcast %10 : vector<256x1xf32> to vector<256x512xf32>
    %13 = arith.cmpf oeq, %8, %12 : vector<256x512xf32>
    %c512_i32 = arith.constant 512 : i32
    %14 = vector.broadcast %c512_i32 : i32 to vector<256x512xi32>
    %15 = arith.select %13, %11, %14 : vector<256x512xi1>, vector<256x512xi32>
    %cst_7 = arith.constant dense<2147483647> : vector<256xi32>
    %16 = vector.multi_reduction <minsi>, %15, %cst_7 [1] : vector<256x512xi32> to vector<256xi32>
    %17 = vector.shape_cast %16 : vector<256xi32> to vector<256x1xi32>
    %18 = vector.broadcast %17 : vector<256x1xi32> to vector<256x512xi32>
    %19 = arith.cmpi eq, %11, %18 : vector<256x512xi32>
    %20 = arith.extui %19 : vector<256x512xi1> to vector<256x512xi32>
    %21 = arith.sitofp %20 : vector<256x512xi32> to vector<256x512xf32>
    %22 = arith.truncf %21 : vector<256x512xf32> to vector<256x512xbf16>
    %c0_8 = arith.constant 0 : index
    %c0_9 = arith.constant 0 : index
    %c0_10 = arith.constant 0 : index
    %23 = vector.load %arg8[%c0_8, %c0_9, %c0_10] : memref<1x256x512xbf16, #tpu.memory_space<vmem>>, vector<1x256x512xbf16>
    %24 = vector.shape_cast %23 : vector<1x256x512xbf16> to vector<256x512xbf16>
    %25 = vector.shape_cast %22 : vector<256x512xbf16> to vector<1x256x512xbf16>
    tpu.vector_store %arg8[%c0_8, %c0_9, %c0_10], %25 {strides = array<i32>} : memref<1x256x512xbf16, #tpu.memory_space<vmem>>, vector<1x256x512xbf16>,
    %c0_11 = arith.constant 0 : index
    %c0_12 = arith.constant 0 : index
    %26 = vector.load %arg4[%c0_11, %c0_12] : memref<512x128xbf16, #tpu.memory_space<vmem>>, vector<512x128xbf16>
    %cst_13 = arith.constant dense<0.000000e+00> : vector<256x128xf32>
    %27 = tpu.matmul %22, %26, %cst_13 {dimension_numbers = #tpu.dot_dimension_numbers<[1], [0], [0], [1], [0, 0, 1, 1], [], []>} : vector<256x512xbf16>, vector<512x128xbf16>, vector<256x128xf32> -> vector<256x128xf32>
    %c0_14 = arith.constant 0 : index
    %c0_15 = arith.constant 0 : index
    %28 = vector.load %arg5[%c0_14, %c0_15] : memref<512x128xbf16, #tpu.memory_space<vmem>>, vector<512x128xbf16>
    %cst_16 = arith.constant dense<0.000000e+00> : vector<256x128xf32>
    %29 = tpu.matmul %22, %28, %cst_16 {dimension_numbers = #tpu.dot_dimension_numbers<[1], [0], [0], [1], [0, 0, 1, 1], [], []>} : vector<256x512xbf16>, vector<512x128xbf16>, vector<256x128xf32> -> vector<256x128xf32>
    %30 = arith.addf %27, %29 : vector<256x128xf32>
    %31 = tpu.transpose %30, [1, 0] : vector<256x128xf32> -> vector<128x256xf32>
    %c0_17 = arith.constant 0 : index
    %c0_18 = arith.constant 0 : index
    %c0_19 = arith.constant 0 : index
    %32 = vector.load %arg7[%c0_17, %c0_18, %c0_19] : memref<1x128x256xf32, #tpu.memory_space<vmem>>, vector<1x128x256xf32>
    %33 = vector.shape_cast %32 : vector<1x128x256xf32> to vector<128x256xf32>
    %34 = vector.shape_cast %31 : vector<128x256xf32> to vector<1x128x256xf32>
    tpu.vector_store %arg7[%c0_17, %c0_18, %c0_19], %34 {strides = array<i32>} : memref<1x128x256xf32, #tpu.memory_space<vmem>>, vector<1x128x256xf32>,
    %c256_i32 = arith.constant 256 : i32
    %35 = arith.muli %arg1, %c256_i32 : i32
    %36 = tpu.iota {dimensions = array<i32: 0>} : vector<256x1xi32>
    %37 = vector.broadcast %35 : i32 to vector<256x1xi32>
    %38 = arith.addi %37, %36 : vector<256x1xi32>
    %c320_i32 = arith.constant 320 : i32
    %39 = vector.broadcast %c320_i32 : i32 to vector<256x1xi32>
    %40 = arith.cmpi slt, %38, %39 : vector<256x1xi32>
    %41 = tpu.iota {dimensions = array<i32: 1>} : vector<1x256xi32>
    %42 = vector.broadcast %35 : i32 to vector<1x256xi32>
    %43 = arith.addi %42, %41 : vector<1x256xi32>
    %c320_i32_20 = arith.constant 320 : i32
    %44 = vector.broadcast %c320_i32_20 : i32 to vector<1x256xi32>
    %45 = arith.cmpi slt, %43, %44 : vector<1x256xi32>
    %46 = arith.extui %45 : vector<1x256xi1> to vector<1x256xi32>
    %47 = arith.sitofp %46 : vector<1x256xi32> to vector<1x256xf32>
    %48 = arith.truncf %47 : vector<1x256xf32> to vector<1x256xbf16>
    %cst_21 = arith.constant dense<0.000000e+00> : vector<1x512xf32>
    %49 = tpu.matmul %48, %22, %cst_21 {dimension_numbers = #tpu.dot_dimension_numbers<[1], [0], [0], [1], [0, 0, 1, 1], [], []>} : vector<1x256xbf16>, vector<256x512xbf16>, vector<1x512xf32> -> vector<1x512xf32>
    %c0_22 = arith.constant 0 : index
    %c0_23 = arith.constant 0 : index
    %c0_24 = arith.constant 0 : index
    %c0_25 = arith.constant 0 : index
    %50 = vector.load %arg9[%c0_22, %c0_23, %c0_24, %c0_25] : memref<1x1x1x512xf32, #tpu.memory_space<vmem>>, vector<1x1x1x512xf32>
    %51 = vector.shape_cast %50 : vector<1x1x1x512xf32> to vector<1x512xf32>
    %52 = vector.shape_cast %49 : vector<1x512xf32> to vector<1x1x1x512xf32>
    tpu.vector_store %arg9[%c0_22, %c0_23, %c0_24, %c0_25], %52 {strides = array<i32>} : memref<1x1x1x512xf32, #tpu.memory_space<vmem>>, vector<1x1x1x512xf32>,
    %53 = arith.subf %30, %2 : vector<256x128xf32>
    %54 = arith.mulf %53, %53 : vector<256x128xf32>
    %cst_26 = arith.constant dense<0.000000e+00> : vector<256xf32>
    %55 = vector.multi_reduction <add>, %54, %cst_26 [1] : vector<256x128xf32> to vector<256xf32>
    %56 = vector.shape_cast %55 : vector<256xf32> to vector<256x1xf32>
    %cst_27 = arith.constant 0.000000e+00 : f32
    %57 = vector.broadcast %cst_27 : f32 to vector<256x1xf32>
    %58 = arith.select %40, %56, %57 : vector<256x1xi1>, vector<256x1xf32>
    %cst_28 = arith.constant dense<0.000000e+00> : vector<1xf32>
    %59 = vector.multi_reduction <add>, %58, %cst_28 [0] : vector<256x1xf32> to vector<1xf32>
    %60 = vector.shape_cast %59 : vector<1xf32> to vector<1x1xf32>
    %61 = vector.shape_cast %60 : vector<1x1xf32> to vector<1x1xf32>
    %62 = vector.broadcast %61 : vector<1x1xf32> to vector<1x128xf32>
    %c0_29 = arith.constant 0 : index
    %c0_30 = arith.constant 0 : index
    %c0_31 = arith.constant 0 : index
    %c0_32 = arith.constant 0 : index
    %63 = vector.load %arg10[%c0_29, %c0_30, %c0_31, %c0_32] : memref<1x1x1x128xf32, #tpu.memory_space<vmem>>, vector<1x1x1x128xf32>
    %64 = vector.shape_cast %63 : vector<1x1x1x128xf32> to vector<1x128xf32>
    %65 = vector.shape_cast %62 : vector<1x128xf32> to vector<1x1x1x128xf32>
    tpu.vector_store %arg10[%c0_29, %c0_30, %c0_31, %c0_32], %65 {strides = array<i32>} : memref<1x1x1x128xf32, #tpu.memory_space<vmem>>, vector<1x1x1x128xf32>,
    return
  }
  func.func @transform_0(%arg0: i32, %arg1: i32) -> (i32, i32, i32) {
    %c0_i32 = arith.constant 0 : i32
    %c0_i32_0 = arith.constant 0 : i32
    return %arg0, %c0_i32, %arg1 : i32, i32, i32
  }
  func.func @transform_1(%arg0: i32, %arg1: i32) -> (i32, i32) {
    %c0_i32 = arith.constant 0 : i32
    %c0_i32_0 = arith.constant 0 : i32
    %c0_i32_1 = arith.constant 0 : i32
    return %c0_i32, %c0_i32_0 : i32, i32
  }
  func.func @transform_2(%arg0: i32, %arg1: i32) -> (i32, i32) {
    %c0_i32 = arith.constant 0 : i32
    %c0_i32_0 = arith.constant 0 : i32
    %c0_i32_1 = arith.constant 0 : i32
    return %c0_i32, %c0_i32_0 : i32, i32
  }
  func.func @transform_3(%arg0: i32, %arg1: i32) -> (i32, i32) {
    %c0_i32 = arith.constant 0 : i32
    %c0_i32_0 = arith.constant 0 : i32
    %c0_i32_1 = arith.constant 0 : i32
    return %c0_i32, %c0_i32_0 : i32, i32
  }
  func.func @transform_4(%arg0: i32, %arg1: i32) -> (i32, i32) {
    %c0_i32 = arith.constant 0 : i32
    %c0_i32_0 = arith.constant 0 : i32
    %c0_i32_1 = arith.constant 0 : i32
    return %c0_i32, %c0_i32_0 : i32, i32
  }
  func.func @transform_5(%arg0: i32, %arg1: i32) -> (i32, i32, i32) {
    %c0_i32 = arith.constant 0 : i32
    %c0_i32_0 = arith.constant 0 : i32
    return %arg0, %c0_i32, %arg1 : i32, i32, i32
  }
  func.func @transform_6(%arg0: i32, %arg1: i32) -> (i32, i32, i32) {
    %c0_i32 = arith.constant 0 : i32
    %c0_i32_0 = arith.constant 0 : i32
    return %arg0, %arg1, %c0_i32 : i32, i32, i32
  }
  func.func @transform_7(%arg0: i32, %arg1: i32) -> (i32, i32, i32, i32) {
    %c0_i32 = arith.constant 0 : i32
    %c0_i32_0 = arith.constant 0 : i32
    %c0_i32_1 = arith.constant 0 : i32
    return %arg0, %arg1, %c0_i32, %c0_i32_0 : i32, i32, i32, i32
  }
  func.func @transform_8(%arg0: i32, %arg1: i32) -> (i32, i32, i32, i32) {
    %c0_i32 = arith.constant 0 : i32
    %c0_i32_0 = arith.constant 0 : i32
    %c0_i32_1 = arith.constant 0 : i32
    return %arg0, %arg1, %c0_i32, %c0_i32_0 : i32, i32, i32, i32
  }
}

</mosaic_0001>

<bundles_post_ra>
// kernel: tpu_custom_call.1
= control target key start
LH: loop header
LB: loop body
LE: loop exit
PB: predicated region body
PF: predicated region fallthrough
CT: control target
= control target key end

     0   :  { %s12033_s0 = inlined_call_operand.vmem [shape: f32[2,128,320], index: 0, kind: input, shape index: {}]   ;;  %s12034_s1 = inlined_call_operand.vmem [shape: bf16[128,512], index: 1, kind: input, shape index: {}]   ;;  %s12035_s2 = inlined_call_operand.vmem [shape: bf16[512,128], index: 2, kind: input, shape index: {}]   ;;  %s12036_s3 = inlined_call_operand.vmem [shape: bf16[512,128], index: 3, kind: input, shape index: {}]   ;;  %s12037_s4 = inlined_call_operand.vmem [shape: f32[1,512], index: 4, kind: input, shape index: {}]   ;;  %s12038_s5 = inlined_call_operand.vmem [shape: f32[2,128,320], index: 5, kind: output, shape index: {0}]   ;;  %s12039_s6 = inlined_call_operand.hbm [shape: bf16[2,320,512], index: 6, kind: output, shape index: {1}]   ;;  %s12040_s7 = inlined_call_operand.hbm [shape: f32[2,2,1,512], index: 7, kind: output, shape index: {2}]   ;;  %s12041_s8 = inlined_call_operand.hbm [shape: f32[2,2,1,128], index: 8, kind: output, shape index: {3}]  }
   0x1   :  { %12191 = sst [smem:[#allocation129_spill]] %s12033_s0 }
   0x2   :  { %12192 = sst [smem:[#allocation130_spill]] %s12034_s1 }
   0x3   :  { %12193 = sst [smem:[#allocation131_spill]] %s12035_s2 }
   0x4   :  { %12194 = sst [smem:[#allocation132_spill]] %s12036_s3 }
   0x5   :  { %12195 = sst [smem:[#allocation133_spill]] %s12037_s4 }
   0x6   :  { %12196 = sst [smem:[#allocation134_spill]] %s12041_s8 }
   0x7   :  { %14 = vsyncpa [#allocation5], 0 }
   0x8   :  { %16 = vsyncpa [#allocation5 + $0x1], 0 }
   0x9   :  { %17 = vsyncpa [#allocation7], 0 }
   0xa   :  { %19 = vsyncpa [#allocation7 + $0x1], 0  ;;  %s7559_s27 = smov 0   ;;  %s7561_s28 = smov 0  }
   0xb   :  { %s7563_s29 = smov 0   ;;  %s7565_s30 = smov 0  }
   0xc   :  { %s7567_s9 = smov 0   ;;  %s7569_s10 = smov 0  }
   0xd   :  { %s7571_s11 = smov 0   ;;  %s7573_s12 = smov 0  }
   0xe LB: > { %12197 = sst [smem:[#allocation11_spill]] %s7347_s27  ;;  %s12043_s13 = sadd.s32 4294967295, %s7375_s12   ;;  %s7375_s12 = sphi %s7573_s12, %s25_s12   ;;  %s7371_s11 = sphi %s7571_s11, %s12620_s11   ;;  %s7367_s10 = sphi %s7569_s10, %s12619_s10   ;;  %s7363_s9 = sphi %s7567_s9, %s12618_s9   ;;  %s7359_s30 = sphi %s7565_s30, %s12617_s30   ;;  %s7355_s29 = sphi %s7563_s29, %s12616_s29   ;;  %s7351_s28 = sphi %s7561_s28, %s12622_s28   ;;  %s7347_s27 = sphi %s7559_s27, %s12621_s27  }
   0xf   : > { %12198 = sst [smem:[#allocation12_spill]] %s7355_s29  ;;  %s12042_s14 = sadd.s32 4294967294, %s7375_s12  }
  0x10   : > { %12199 = sst [smem:[#allocation13_spill]] %s7367_s10  ;;  %s34_s15 = sadd.s32 1, %s7367_s10 }
  0x11   : > { %12200 = sst [smem:[#allocation14_spill]] %s7371_s11  ;;  %p35_p0 = scmp.ge.s32.totalorder %s34_s15, 2 }
  0x12   : > { %s37_s16 = sadd.s32 1, %s7371_s11  ;;  %p53_p1 = scmp.ne.s32.totalorder %s7355_s29, %s7351_s28 }
  0x13   : > { %p54_p2 = scmp.eq.s32.totalorder %s7375_s12, 0  ;;  %s12624_s15 = smov (%p35_p0, %s34_s15), 0 }
  0x14   : > { %12201 = sst [smem:[#allocation15_spill]] %s12624_s15  ;;  %s12626_s16 = smov (!%p35_p0, %s37_s16), %s7371_s11 }
  0x15   : > { %s42_s17 = ssub.s32 %s7367_s10, %s12624_s15  ;;  %p7611_p3 = por %p54_p2, %p53_p1 }
  0x16   : > { %p39_p4 = scmp.ge.s32.totalorder %s12626_s16, 2  ;;  %p169_p5 = scmp.eq.s32.totalorder %s12043_s13, 3 }
  0x17   : > { %p202_p6 = scmp.ne.s32.totalorder %s7351_s28, %s7347_s27  ;;  %p203_p7 = scmp.eq.s32.totalorder %s12042_s14, 3 }
  0x18   : > { %s12628_s16 = smov (%p39_p4, %s12626_s16), 0  ;;  %p7623_p8 = por %p169_p5, %p53_p1 }
  0x19   : > { %12203 = sst [smem:[#allocation16_spill]] %s12628_s16  ;;  %p7627_p9 = por %p203_p7, %p202_p6 }
  0x1a   : > { %s41_s21 = ssub.s32 %s7371_s11, %s12628_s16  ;;  %s46_s23 = sadd.s32 1, %s7355_s29 }
  0x1b   : > { %s12205_s20 = scalar_select %p7627_p9, 1, 0 }
  0x1c   : > { %s43_s22 = sor.u32 %s42_s17, %s41_s21  ;;  %p6019_p11 = scmp.ge.s32.totalorder %s7375_s12, 4 }
  0x1d   : > { %12206 = sst [smem:[#allocation17_spill]] %s12205_s20  ;;  %p44_p10 = scmp.eq.s32.totalorder %s43_s22, 0 }
  0x1e   : > { %287 = sbr.rel (%p6019_p11) target bundleno = 236 (0xec), region = 32 }
  0x1f   : > { %s7635_s24 = scalar_select %p44_p10, %s7355_s29, %s46_s23  }
  0x21   : > { %12207 = sst [smem:[#allocation18_spill]] %s7635_s24 }
  0x23   : > { %290 = sbr.rel (!%p7611_p3) target bundleno = 236 (0xec), region = 36  ;;  %s292_s25 = sand.u32 (%p7611_p3), 1, %s7355_s29  }
  0x24   : > { %s6021_s26 = sshll.u32 (%p7611_p3), %s7367_s10, 1  ;;  %s6020_s14 = sshll.u32 (%p7611_p3), %s292_s25, 8 }
  0x25   : > { %s296_s13 = ssub.s32 (%p7611_p3), 3, %s6021_s26  ;;  %s6735_s16 = smul.u32 (%p7611_p3), 48, %s7371_s11 }
  0x26   : > { %p297_p12 = scmp.lt.s32.totalorder (%p7611_p3), %s296_s13, 2  ;;  %s12208_s0 = sld [smem:[#allocation129_spill]] (%p7611_p3) }
  0x27   : > { %s302_s17 = sadd.s32 (%p7611_p3), %s6735_s16, %s6021_s26  ;;  %s7650_s20 = scalar_lea.vmem (%p7611_p3), [#allocation2], %s6020_s14  }
  0x28   : > { %s12630_s13 = smov (!%p297_p12, %s296_s13), 2  ;;  %s6024_s22 = sshll.u32 %s302_s17, 3 }
  0x29   : > { %s6022_s21 = sshll.u32 %s12630_s13, 7  ;;  %s7648_s18 = sshll.u32 %s12630_s13, 3 }
  0x2a   : > { %p6026_p13 = scmp.eq.s32.totalorder %s6022_s21, 0 }
  0x2b   : > { %p309_p0 = scmp.lt.u32.totalorder (!%p6026_p13), %s7648_s18, 8 }
  0x2c   : > { %s7646_s24 = scalar_lea.vmem %s12208_s0, %s6024_s22   ;;  %308 = sbr.rel (%p6026_p13) target bundleno = 236 (0xec), region = 40 }
  0x31   : > { %312 = sbr.rel (%p309_p0) target bundleno = 212 (0xd4), region = 44  ;;  %s7654_s25 = sand.u32 (!%p309_p0), 7, %s7648_s18  }
  0x32   : > { %p359_p1 = scmp.eq.s32.totalorder (!%p309_p0), %s7654_s25, 0  ;;  %p6027_p2 = scmp.ne.s32.totalorder (!%p309_p0), %s7654_s25, 0 }
  0x36   : > { %362 = sbr.rel (%p6027_p2) target bundleno = 123 (0x7b), region = 59  ;;  %s363_s15 = sshrl.u32 (!%p6027_p2), %s7648_s18, 3 }
  0x37   : > { %s7661_s13 = sshrl.u32 (!%p6027_p2), %s363_s15, 1 }
  0x38   : > { %p6028_p3 = scmp.le.s32.totalorder (!%p6027_p2), %s7661_s13, 0 }
  0x3b   : > { %5850 = sbr.rel (%p6028_p3) target bundleno = 97 (0x61), region = 286  ;;  %s12209_s14 = smov (!%p6028_p3), %s7650_s20 }
  0x3c   : > { %s12210_s16 = smov (!%p6028_p3), %s7646_s24  ;;  %s7670_s26 = smov (!%p6028_p3), 0  }
  0x3d   : > { %s7672_s17 = smov (!%p6028_p3), 0  }
  0x40 LB: >> { %v374_v0 = vld [vmem:[%s7383_s16] sm:$0xff]  ;;  %v376_v1 = vld [vmem:[%s7383_s16 + $0x8] sm:$0xff]  ;;  %v378_v2 = vld [vmem:[%s7383_s16 + $0x18] sm:$0xff]  ;;  %s438_s21 = sadd.s32 1, %s7387_s26  ;;  %s368_s17 = sadd.s32 1, %s7391_s17   ;;  %s7391_s17 = sphi %s7672_s17, %s368_s17   ;;  %s7387_s26 = sphi %s7670_s26, %s12213_s26   ;;  %s7383_s16 = sphi %s12210_s16, %s12212_s16   ;;  %s7379_s14 = sphi %s12209_s14, %s12211_s14  }
  0x41   : >> { %375 = vst [vmem:[%s7379_s14] sm:$0xff] %v374_v0  ;;  %v380_v3 = vld [vmem:[%s7383_s16 + $0x20] sm:$0xff]  ;;  %p439_p4 = scmp.ge.s32.totalorder %s438_s21, %s7661_s13  ;;  %v382_v4 = vld [vmem:[%s7383_s16 + $0x30] sm:$0xff]  ;;  %v384_v5 = vld [vmem:[%s7383_s16 + $0x38] sm:$0xff]  ;;  %p367_p5 = scmp.ge.s32.totalorder %s368_s17, %s7661_s13 }
  0x42   : >> { %377 = vst [vmem:[%s7379_s14 + $0x8] sm:$0xff] %v376_v1  ;;  %v386_v6 = vld [vmem:[%s7383_s16 + $0x48] sm:$0xff]  ;;  %v388_v7 = vld [vmem:[%s7383_s16 + $0x50] sm:$0xff]  ;;  %v390_v8 = vld [vmem:[%s7383_s16 + $0x60] sm:$0xff] }
  0x43   : >> { %379 = vst [vmem:[%s7379_s14 + $0x10] sm:$0xff] %v378_v2  ;;  %s12632_s21 = smov (%p439_p4, %s438_s21), 0  ;;  %v392_v9 = vld [vmem:[%s7383_s16 + $0x68] sm:$0xff]  ;;  %v394_v10 = vld [vmem:[%s7383_s16 + $0x78] sm:$0xff]  ;;  %v396_v11 = vld [vmem:[%s7383_s16 + $0x80] sm:$0xff] }
  0x44   : >> { %381 = vst [vmem:[%s7379_s14 + $0x18] sm:$0xff] %v380_v3  ;;  %s6029_s22 = sshll.u32 %s12632_s21, 4  ;;  %v398_v12 = vld [vmem:[%s7383_s16 + $0x90] sm:$0xff]  ;;  %v400_v13 = vld [vmem:[%s7383_s16 + $0x98] sm:$0xff]  ;;  %v402_v14 = vld [vmem:[%s7383_s16 + $0xa8] sm:$0xff] }
  0x45   : >> { %383 = vst [vmem:[%s7379_s14 + $0x20] sm:$0xff] %v382_v4  ;;  %s7704_s23 = scalar_lea.vmem %s7646_s24, %s6029_s22   ;;  %s7707_s26 = scalar_lea.vmem %s7650_s20, %s6029_s22 [#allocation2]   ;;  %v404_v15 = vld [vmem:[%s7383_s16 + $0xb0] sm:$0xff]  ;;  %v406_v16 = vld [vmem:[%s7383_s16 + $0xc0] sm:$0xff]  ;;  %v408_v17 = vld [vmem:[%s7383_s16 + $0xc8] sm:$0xff] }
  0x46   : >> { %385 = vst [vmem:[%s7379_s14 + $0x28] sm:$0xff] %v384_v5  ;;  %v410_v18 = vld [vmem:[%s7383_s16 + $0xd8] sm:$0xff]  ;;  %v412_v19 = vld [vmem:[%s7383_s16 + $0xe0] sm:$0xff]  ;;  %v414_v20 = vld [vmem:[%s7383_s16 + $0xf0] sm:$0xff] }
  0x47   : >> { %387 = vst [vmem:[%s7379_s14 + $0x30] sm:$0xff] %v386_v6  ;;  %v416_v21 = vld [vmem:[%s7383_s16 + $0xf8] sm:$0xff]  ;;  %v418_v22 = vld [vmem:[%s7383_s16 + $0x108] sm:$0xff]  ;;  %v420_v23 = vld [vmem:[%s7383_s16 + $0x110] sm:$0xff] }
  0x48   : >> { %389 = vst [vmem:[%s7379_s14 + $0x38] sm:$0xff] %v388_v7  ;;  %v422_v24 = vld [vmem:[%s7383_s16 + $0x120] sm:$0xff]  ;;  %v424_v25 = vld [vmem:[%s7383_s16 + $0x128] sm:$0xff]  ;;  %v426_v26 = vld [vmem:[%s7383_s16 + $0x138] sm:$0xff] }
  0x49   : >> { %391 = vst [vmem:[%s7379_s14 + $0x40] sm:$0xff] %v390_v8  ;;  %v428_v27 = vld [vmem:[%s7383_s16 + $0x140] sm:$0xff]  ;;  %v430_v28 = vld [vmem:[%s7383_s16 + $0x150] sm:$0xff]  ;;  %v432_v29 = vld [vmem:[%s7383_s16 + $0x158] sm:$0xff] }
  0x4a   : >> { %393 = vst [vmem:[%s7379_s14 + $0x48] sm:$0xff] %v392_v9  ;;  %v434_v30 = vld [vmem:[%s7383_s16 + $0x168] sm:$0xff]  ;;  %v436_v31 = vld [vmem:[%s7383_s16 + $0x170] sm:$0xff]  ;;  %s12212_s16 = smov %s7704_s23 }
  0x4b   : >> { %395 = vst [vmem:[%s7379_s14 + $0x50] sm:$0xff] %v394_v10 }
  0x4c   : >> { %397 = vst [vmem:[%s7379_s14 + $0x58] sm:$0xff] %v396_v11 }
  0x4d   : >> { %399 = vst [vmem:[%s7379_s14 + $0x60] sm:$0xff] %v398_v12 }
  0x4e   : >> { %401 = vst [vmem:[%s7379_s14 + $0x68] sm:$0xff] %v400_v13 }
  0x4f   : >> { %403 = vst [vmem:[%s7379_s14 + $0x70] sm:$0xff] %v402_v14 }
  0x50   : >> { %405 = vst [vmem:[%s7379_s14 + $0x78] sm:$0xff] %v404_v15 }
  0x51   : >> { %407 = vst [vmem:[%s7379_s14 + $0x80] sm:$0xff] %v406_v16 }
  0x52   : >> { %409 = vst [vmem:[%s7379_s14 + $0x88] sm:$0xff] %v408_v17 }
  0x53   : >> { %411 = vst [vmem:[%s7379_s14 + $0x90] sm:$0xff] %v410_v18 }
  0x54   : >> { %413 = vst [vmem:[%s7379_s14 + $0x98] sm:$0xff] %v412_v19 }
  0x55   : >> { %415 = vst [vmem:[%s7379_s14 + $0xa0] sm:$0xff] %v414_v20 }
  0x56   : >> { %417 = vst [vmem:[%s7379_s14 + $0xa8] sm:$0xff] %v416_v21 }
  0x57   : >> { %419 = vst [vmem:[%s7379_s14 + $0xb0] sm:$0xff] %v418_v22 }
  0x58   : >> { %421 = vst [vmem:[%s7379_s14 + $0xb8] sm:$0xff] %v420_v23 }
  0x59   : >> { %423 = vst [vmem:[%s7379_s14 + $0xc0] sm:$0xff] %v422_v24 }
  0x5a   : >> { %425 = vst [vmem:[%s7379_s14 + $0xc8] sm:$0xff] %v424_v25 }
  0x5b   : >> { %427 = vst [vmem:[%s7379_s14 + $0xd0] sm:$0xff] %v426_v26 }
  0x5c   : >> { %429 = vst [vmem:[%s7379_s14 + $0xd8] sm:$0xff] %v428_v27  ;;  %370 = sbr.rel (!%p367_p5) target bundleno = 64 (0x40), region = 292 }
  0x5d   : >> { %431 = vst [vmem:[%s7379_s14 + $0xe0] sm:$0xff] %v430_v28 }
  0x5e   : >> { %433 = vst [vmem:[%s7379_s14 + $0xe8] sm:$0xff] %v432_v29 }
  0x5f   : >> { %435 = vst [vmem:[%s7379_s14 + $0xf0] sm:$0xff] %v434_v30 }
  0x60   : >> { %437 = vst [vmem:[%s7379_s14 + $0xf8] sm:$0xff] %v436_v31  ;;  %s12211_s14 = smov %s7707_s26  ;;  %s12213_s26 = smov %s12632_s21 }
  0x61 PF: > { %s7773_s22 = sand.u32 1, %s363_s15   ;;  %s6629_s0 = sshll.u32 %s7661_s13, 4 }
  0x62   : > { %s7777_s11 = scalar_lea.vmem %s7646_s24, %s6629_s0   ;;  %s7780_s10 = scalar_lea.vmem %s7650_s20, %s6629_s0 [#allocation2]  }
  0x63   : > { %p6034_p6 = scmp.le.s32.totalorder %s7773_s22, 0 }
  0x64   : > { %s12214_s17 = smov (!%p6034_p6), %s7780_s10  ;;  %s12215_s14 = smov (!%p6034_p6), %s7777_s11 }
  0x65   : > { %5864 = sbr.rel (%p6034_p6) target bundleno = 123 (0x7b), region = 297  ;;  %s7789_s16 = smov (!%p6034_p6), 0  }
  0x66   : > { %s7791_s21 = smov (!%p6034_p6), 0  }
  0x6a LB: >> { %v461_v32 = vld [vmem:[%s7399_s14] sm:$0xff]  ;;  %v463_v33 = vld [vmem:[%s7399_s14 + $0x18] sm:$0xff]  ;;  %v465_v34 = vld [vmem:[%s7399_s14 + $0x30] sm:$0xff]  ;;  %s493_s0 = sadd.s32 1, %s7403_s16  ;;  %s455_s21 = sadd.s32 1, %s7407_s21   ;;  %s7407_s21 = sphi %s7791_s21, %s455_s21   ;;  %s7403_s16 = sphi %s7789_s16, %s12218_s16   ;;  %s7399_s14 = sphi %s12215_s14, %s12217_s14   ;;  %s7395_s17 = sphi %s12214_s17, %s12216_s17  }
  0x6b   : >> { %462 = vst [vmem:[%s7395_s17] sm:$0xff] %v461_v32  ;;  %v467_v35 = vld [vmem:[%s7399_s14 + $0x48] sm:$0xff]  ;;  %p494_p7 = scmp.ge.s32.totalorder %s493_s0, %s7773_s22  ;;  %v469_v36 = vld [vmem:[%s7399_s14 + $0x60] sm:$0xff]  ;;  %v471_v37 = vld [vmem:[%s7399_s14 + $0x78] sm:$0xff]  ;;  %p454_p10 = scmp.ge.s32.totalorder %s455_s21, %s7773_s22 }
  0x6c   : >> { %464 = vst [vmem:[%s7395_s17 + $0x10] sm:$0xff] %v463_v33  ;;  %v473_v38 = vld [vmem:[%s7399_s14 + $0x90] sm:$0xff]  ;;  %v475_v39 = vld [vmem:[%s7399_s14 + $0xa8] sm:$0xff]  ;;  %v477_v40 = vld [vmem:[%s7399_s14 + $0xc0] sm:$0xff] }
  0x6d   : >> { %466 = vst [vmem:[%s7395_s17 + $0x20] sm:$0xff] %v465_v34  ;;  %s12634_s0 = smov (%p494_p7, %s493_s0), 0  ;;  %v479_v41 = vld [vmem:[%s7399_s14 + $0xd8] sm:$0xff]  ;;  %v481_v42 = vld [vmem:[%s7399_s14 + $0xf0] sm:$0xff]  ;;  %v483_v43 = vld [vmem:[%s7399_s14 + $0x108] sm:$0xff] }
  0x6e   : >> { %468 = vst [vmem:[%s7395_s17 + $0x30] sm:$0xff] %v467_v35  ;;  %s6035_s15 = sshll.u32 %s12634_s0, 3  ;;  %v485_v44 = vld [vmem:[%s7399_s14 + $0x120] sm:$0xff]  ;;  %v487_v45 = vld [vmem:[%s7399_s14 + $0x138] sm:$0xff]  ;;  %v489_v46 = vld [vmem:[%s7399_s14 + $0x150] sm:$0xff]  ;;  %s12218_s16 = smov %s12634_s0 }
  0x6f   : >> { %470 = vst [vmem:[%s7395_s17 + $0x40] sm:$0xff] %v469_v36  ;;  %s498_s13 = scalar_lea.vmem %s7777_s11, %s6035_s15   ;;  %s499_s23 = scalar_lea.vmem %s7780_s10, %s6035_s15 [#allocation2]   ;;  %v491_v47 = vld [vmem:[%s7399_s14 + $0x168] sm:$0xff] }
  0x70   : >> { %472 = vst [vmem:[%s7395_s17 + $0x50] sm:$0xff] %v471_v37  ;;  %s12217_s14 = smov %s498_s13 }
  0x71   : >> { %474 = vst [vmem:[%s7395_s17 + $0x60] sm:$0xff] %v473_v38 }
  0x72   : >> { %476 = vst [vmem:[%s7395_s17 + $0x70] sm:$0xff] %v475_v39 }
  0x73   : >> { %478 = vst [vmem:[%s7395_s17 + $0x80] sm:$0xff] %v477_v40 }
  0x74   : >> { %480 = vst [vmem:[%s7395_s17 + $0x90] sm:$0xff] %v479_v41 }
  0x75   : >> { %482 = vst [vmem:[%s7395_s17 + $0xa0] sm:$0xff] %v481_v42 }
  0x76   : >> { %484 = vst [vmem:[%s7395_s17 + $0xb0] sm:$0xff] %v483_v43  ;;  %457 = sbr.rel (!%p454_p10) target bundleno = 106 (0x6a), region = 303 }
  0x77   : >> { %486 = vst [vmem:[%s7395_s17 + $0xc0] sm:$0xff] %v485_v44 }
  0x78   : >> { %488 = vst [vmem:[%s7395_s17 + $0xd0] sm:$0xff] %v487_v45 }
  0x79   : >> { %490 = vst [vmem:[%s7395_s17 + $0xe0] sm:$0xff] %v489_v46 }
  0x7a   : >> { %492 = vst [vmem:[%s7395_s17 + $0xf0] sm:$0xff] %v491_v47  ;;  %s12216_s17 = smov %s499_s23 }
  0x7b PF: > { %502 = sbr.rel (%p359_p1) target bundleno = 212 (0xd4), region = 77  ;;  %s504_s26 = ssub.s32 (!%p359_p1), %s7648_s18, %s7654_s25 }
  0x7c   : > { %s508_s15 = sshrl.u32 (!%p359_p1), %s7648_s18, 3  ;;  %s7858_s23 = scalar_lea.vmem (!%p359_p1), %s7646_s24, %s504_s26 }
  0x7d   : > { %s7861_s13 = scalar_lea.vmem (!%p359_p1), %s7650_s20, %s504_s26 [#allocation2]  ;;  %s7865_s21 = sshrl.u32 (!%p359_p1), %s508_s15, 1 }
  0x7e   : > { %p6037_p11 = scmp.le.s32.totalorder (!%p359_p1), %s7865_s21, 0 }
  0x80   : > { %5878 = sbr.rel (%p6037_p11) target bundleno = 166 (0xa6), region = 308  ;;  %s12219_s10 = smov (!%p6037_p11), %s7650_s20 }
  0x81   : > { %s12220_s11 = smov (!%p6037_p11), %s7646_s24  ;;  %s7874_s22 = smov (!%p6037_p11), 0  }
  0x82   : > { %s7876_s17 = smov (!%p6037_p11), 0  }
  0x85 LB: >> { %v519_v48 = vld [vmem:[%s7415_s11] sm:$0xff]  ;;  %v521_v49 = vld [vmem:[%s7415_s11 + $0x8] sm:$0xff]  ;;  %v523_v50 = vld [vmem:[%s7415_s11 + $0x18] sm:$0xff]  ;;  %s583_s14 = sadd.s32 1, %s7419_s22  ;;  %s513_s17 = sadd.s32 1, %s7423_s17   ;;  %s7423_s17 = sphi %s7876_s17, %s513_s17   ;;  %s7419_s22 = sphi %s7874_s22, %s12223_s22   ;;  %s7415_s11 = sphi %s12220_s11, %s12222_s11   ;;  %s7411_s10 = sphi %s12219_s10, %s12221_s10  }
  0x86   : >> { %520 = vst [vmem:[%s7411_s10] sm:$0xff] %v519_v48  ;;  %v525_v51 = vld [vmem:[%s7415_s11 + $0x20] sm:$0xff]  ;;  %p584_p12 = scmp.ge.s32.totalorder %s583_s14, %s7865_s21  ;;  %v527_v52 = vld [vmem:[%s7415_s11 + $0x30] sm:$0xff]  ;;  %v529_v53 = vld [vmem:[%s7415_s11 + $0x38] sm:$0xff]  ;;  %p512_p13 = scmp.ge.s32.totalorder %s513_s17, %s7865_s21 }
  0x87   : >> { %522 = vst [vmem:[%s7411_s10 + $0x8] sm:$0xff] %v521_v49  ;;  %v531_v54 = vld [vmem:[%s7415_s11 + $0x48] sm:$0xff]  ;;  %v533_v55 = vld [vmem:[%s7415_s11 + $0x50] sm:$0xff]  ;;  %v535_v56 = vld [vmem:[%s7415_s11 + $0x60] sm:$0xff] }
  0x88   : >> { %524 = vst [vmem:[%s7411_s10 + $0x10] sm:$0xff] %v523_v50  ;;  %s12636_s14 = smov (%p584_p12, %s583_s14), 0  ;;  %v537_v57 = vld [vmem:[%s7415_s11 + $0x68] sm:$0xff]  ;;  %v539_v58 = vld [vmem:[%s7415_s11 + $0x78] sm:$0xff]  ;;  %v541_v59 = vld [vmem:[%s7415_s11 + $0x80] sm:$0xff] }
  0x89   : >> { %526 = vst [vmem:[%s7411_s10 + $0x18] sm:$0xff] %v525_v51  ;;  %s6038_s16 = sshll.u32 %s12636_s14, 4  ;;  %v543_v60 = vld [vmem:[%s7415_s11 + $0x90] sm:$0xff]  ;;  %v545_v61 = vld [vmem:[%s7415_s11 + $0x98] sm:$0xff]  ;;  %v547_v62 = vld [vmem:[%s7415_s11 + $0xa8] sm:$0xff]  ;;  %s12223_s22 = smov %s12636_s14 }
  0x8a   : >> { %528 = vst [vmem:[%s7411_s10 + $0x20] sm:$0xff] %v527_v52  ;;  %s7908_s0 = scalar_lea.vmem %s7646_s24, %s6038_s16   ;;  %s7911_s26 = scalar_lea.vmem %s7650_s20, %s6038_s16 [#allocation2]   ;;  %v549_v63 = vld [vmem:[%s7415_s11 + $0xb0] sm:$0xff]  ;;  %v551_v0 = vld [vmem:[%s7415_s11 + $0xc0] sm:$0xff]  ;;  %v553_v1 = vld [vmem:[%s7415_s11 + $0xc8] sm:$0xff] }
  0x8b   : >> { %530 = vst [vmem:[%s7411_s10 + $0x28] sm:$0xff] %v529_v53  ;;  %v555_v2 = vld [vmem:[%s7415_s11 + $0xd8] sm:$0xff]  ;;  %v557_v3 = vld [vmem:[%s7415_s11 + $0xe0] sm:$0xff]  ;;  %v559_v4 = vld [vmem:[%s7415_s11 + $0xf0] sm:$0xff] }
  0x8c   : >> { %532 = vst [vmem:[%s7411_s10 + $0x30] sm:$0xff] %v531_v54  ;;  %v561_v5 = vld [vmem:[%s7415_s11 + $0xf8] sm:$0xff]  ;;  %v563_v6 = vld [vmem:[%s7415_s11 + $0x108] sm:$0xff]  ;;  %v565_v7 = vld [vmem:[%s7415_s11 + $0x110] sm:$0xff] }
  0x8d   : >> { %534 = vst [vmem:[%s7411_s10 + $0x38] sm:$0xff] %v533_v55  ;;  %v567_v8 = vld [vmem:[%s7415_s11 + $0x120] sm:$0xff]  ;;  %v569_v9 = vld [vmem:[%s7415_s11 + $0x128] sm:$0xff]  ;;  %v571_v10 = vld [vmem:[%s7415_s11 + $0x138] sm:$0xff] }
  0x8e   : >> { %536 = vst [vmem:[%s7411_s10 + $0x40] sm:$0xff] %v535_v56  ;;  %v573_v11 = vld [vmem:[%s7415_s11 + $0x140] sm:$0xff]  ;;  %v575_v12 = vld [vmem:[%s7415_s11 + $0x150] sm:$0xff]  ;;  %v577_v13 = vld [vmem:[%s7415_s11 + $0x158] sm:$0xff] }
  0x8f   : >> { %538 = vst [vmem:[%s7411_s10 + $0x48] sm:$0xff] %v537_v57  ;;  %v579_v14 = vld [vmem:[%s7415_s11 + $0x168] sm:$0xff]  ;;  %v581_v15 = vld [vmem:[%s7415_s11 + $0x170] sm:$0xff]  ;;  %s12222_s11 = smov %s7908_s0 }
  0x90   : >> { %540 = vst [vmem:[%s7411_s10 + $0x50] sm:$0xff] %v539_v58 }
  0x91   : >> { %542 = vst [vmem:[%s7411_s10 + $0x58] sm:$0xff] %v541_v59 }
  0x92   : >> { %544 = vst [vmem:[%s7411_s10 + $0x60] sm:$0xff] %v543_v60 }
  0x93   : >> { %546 = vst [vmem:[%s7411_s10 + $0x68] sm:$0xff] %v545_v61 }
  0x94   : >> { %548 = vst [vmem:[%s7411_s10 + $0x70] sm:$0xff] %v547_v62 }
  0x95   : >> { %550 = vst [vmem:[%s7411_s10 + $0x78] sm:$0xff] %v549_v63 }
  0x96   : >> { %552 = vst [vmem:[%s7411_s10 + $0x80] sm:$0xff] %v551_v0 }
  0x97   : >> { %554 = vst [vmem:[%s7411_s10 + $0x88] sm:$0xff] %v553_v1 }
  0x98   : >> { %556 = vst [vmem:[%s7411_s10 + $0x90] sm:$0xff] %v555_v2 }
  0x99   : >> { %558 = vst [vmem:[%s7411_s10 + $0x98] sm:$0xff] %v557_v3 }
  0x9a   : >> { %560 = vst [vmem:[%s7411_s10 + $0xa0] sm:$0xff] %v559_v4 }
  0x9b   : >> { %562 = vst [vmem:[%s7411_s10 + $0xa8] sm:$0xff] %v561_v5 }
  0x9c   : >> { %564 = vst [vmem:[%s7411_s10 + $0xb0] sm:$0xff] %v563_v6 }
  0x9d   : >> { %566 = vst [vmem:[%s7411_s10 + $0xb8] sm:$0xff] %v565_v7 }
  0x9e   : >> { %568 = vst [vmem:[%s7411_s10 + $0xc0] sm:$0xff] %v567_v8 }
  0x9f   : >> { %570 = vst [vmem:[%s7411_s10 + $0xc8] sm:$0xff] %v569_v9 }
  0xa0   : >> { %572 = vst [vmem:[%s7411_s10 + $0xd0] sm:$0xff] %v571_v10 }
  0xa1   : >> { %574 = vst [vmem:[%s7411_s10 + $0xd8] sm:$0xff] %v573_v11  ;;  %515 = sbr.rel (!%p512_p13) target bundleno = 133 (0x85), region = 314 }
  0xa2   : >> { %576 = vst [vmem:[%s7411_s10 + $0xe0] sm:$0xff] %v575_v12 }
  0xa3   : >> { %578 = vst [vmem:[%s7411_s10 + $0xe8] sm:$0xff] %v577_v13 }
  0xa4   : >> { %580 = vst [vmem:[%s7411_s10 + $0xf0] sm:$0xff] %v579_v14 }
  0xa5   : >> { %582 = vst [vmem:[%s7411_s10 + $0xf8] sm:$0xff] %v581_v15  ;;  %s12221_s10 = smov %s7911_s26 }
  0xa6 PF: > { %s7977_s16 = sand.u32 1, %s508_s15   ;;  %s6631_s29 = sshll.u32 %s7865_s21, 4 }
  0xa7   : > { %s7981_s27 = scalar_lea.vmem %s7646_s24, %s6631_s29   ;;  %s7984_s8 = scalar_lea.vmem %s7650_s20, %s6631_s29 [#allocation2]  }
  0xa8   : > { %p6043_p0 = scmp.le.s32.totalorder %s7977_s16, 0 }
  0xa9   : > { %s12224_s17 = smov (!%p6043_p0), %s7984_s8  ;;  %s12225_s10 = smov (!%p6043_p0), %s7981_s27 }
  0xaa   : > { %5892 = sbr.rel (%p6043_p0) target bundleno = 192 (0xc0), region = 319  ;;  %s7993_s11 = smov (!%p6043_p0), 0  }
  0xab   : > { %s7995_s22 = smov (!%p6043_p0), 0  }
  0xaf LB: >> { %v606_v16 = vld [vmem:[%s7431_s10] sm:$0xff]  ;;  %v608_v17 = vld [vmem:[%s7431_s10 + $0x18] sm:$0xff]  ;;  %v610_v18 = vld [vmem:[%s7431_s10 + $0x30] sm:$0xff]  ;;  %s638_s29 = sadd.s32 1, %s7435_s11  ;;  %s600_s22 = sadd.s32 1, %s7439_s22   ;;  %s7439_s22 = sphi %s7995_s22, %s600_s22   ;;  %s7435_s11 = sphi %s7993_s11, %s12228_s11   ;;  %s7431_s10 = sphi %s12225_s10, %s12227_s10   ;;  %s7427_s17 = sphi %s12224_s17, %s12226_s17  }
  0xb0   : >> { %607 = vst [vmem:[%s7427_s17] sm:$0xff] %v606_v16  ;;  %v612_v19 = vld [vmem:[%s7431_s10 + $0x48] sm:$0xff]  ;;  %p639_p1 = scmp.ge.s32.totalorder %s638_s29, %s7977_s16  ;;  %v614_v20 = vld [vmem:[%s7431_s10 + $0x60] sm:$0xff]  ;;  %v616_v21 = vld [vmem:[%s7431_s10 + $0x78] sm:$0xff]  ;;  %p599_p2 = scmp.ge.s32.totalorder %s600_s22, %s7977_s16 }
  0xb1   : >> { %609 = vst [vmem:[%s7427_s17 + $0x10] sm:$0xff] %v608_v17  ;;  %v618_v22 = vld [vmem:[%s7431_s10 + $0x90] sm:$0xff]  ;;  %v620_v23 = vld [vmem:[%s7431_s10 + $0xa8] sm:$0xff]  ;;  %v622_v24 = vld [vmem:[%s7431_s10 + $0xc0] sm:$0xff] }
  0xb2   : >> { %611 = vst [vmem:[%s7427_s17 + $0x20] sm:$0xff] %v610_v18  ;;  %s12638_s29 = smov (%p639_p1, %s638_s29), 0  ;;  %v624_v25 = vld [vmem:[%s7431_s10 + $0xd8] sm:$0xff]  ;;  %v626_v26 = vld [vmem:[%s7431_s10 + $0xf0] sm:$0xff]  ;;  %v628_v27 = vld [vmem:[%s7431_s10 + $0x108] sm:$0xff] }
  0xb3   : >> { %613 = vst [vmem:[%s7427_s17 + $0x30] sm:$0xff] %v612_v19  ;;  %s6044_s15 = sshll.u32 %s12638_s29, 3  ;;  %v630_v28 = vld [vmem:[%s7431_s10 + $0x120] sm:$0xff]  ;;  %v632_v29 = vld [vmem:[%s7431_s10 + $0x138] sm:$0xff]  ;;  %v634_v30 = vld [vmem:[%s7431_s10 + $0x150] sm:$0xff]  ;;  %s12228_s11 = smov %s12638_s29 }
  0xb4   : >> { %615 = vst [vmem:[%s7427_s17 + $0x40] sm:$0xff] %v614_v20  ;;  %s643_s21 = scalar_lea.vmem %s7981_s27, %s6044_s15   ;;  %s644_s14 = scalar_lea.vmem %s7984_s8, %s6044_s15 [#allocation2]   ;;  %v636_v31 = vld [vmem:[%s7431_s10 + $0x168] sm:$0xff] }
  0xb5   : >> { %617 = vst [vmem:[%s7427_s17 + $0x50] sm:$0xff] %v616_v21  ;;  %s12227_s10 = smov %s643_s21 }
  0xb6   : >> { %619 = vst [vmem:[%s7427_s17 + $0x60] sm:$0xff] %v618_v22 }
  0xb7   : >> { %621 = vst [vmem:[%s7427_s17 + $0x70] sm:$0xff] %v620_v23 }
  0xb8   : >> { %623 = vst [vmem:[%s7427_s17 + $0x80] sm:$0xff] %v622_v24 }
  0xb9   : >> { %625 = vst [vmem:[%s7427_s17 + $0x90] sm:$0xff] %v624_v25 }
  0xba   : >> { %627 = vst [vmem:[%s7427_s17 + $0xa0] sm:$0xff] %v626_v26 }
  0xbb   : >> { %629 = vst [vmem:[%s7427_s17 + $0xb0] sm:$0xff] %v628_v27  ;;  %602 = sbr.rel (!%p599_p2) target bundleno = 175 (0xaf), region = 325 }
  0xbc   : >> { %631 = vst [vmem:[%s7427_s17 + $0xc0] sm:$0xff] %v630_v28 }
  0xbd   : >> { %633 = vst [vmem:[%s7427_s17 + $0xd0] sm:$0xff] %v632_v29 }
  0xbe   : >> { %635 = vst [vmem:[%s7427_s17 + $0xe0] sm:$0xff] %v634_v30 }
  0xbf   : >> { %637 = vst [vmem:[%s7427_s17 + $0xf0] sm:$0xff] %v636_v31  ;;  %s12226_s17 = smov %s644_s14 }
  0xc0 PF: > { %s7505_s0 = smov 1  }
  0xc1   : > { %s645_s26 = sshll.u32 %s7505_s0, %s7654_s25 }
  0xc2   : > { %s8057_s22 = sadd.s32 4294967295, %s645_s26 }
  0xc3   : > { %v655_v32 = vld [vmem:[%s7858_s23] sm:%s8057_s22]  ;;  %v657_v33 = vld [vmem:[%s7858_s23 + $0x18] sm:%s8057_s22] }
  0xc4   : > { %656 = vst [vmem:[%s7861_s13] sm:%s8057_s22] %v655_v32  ;;  %v659_v34 = vld [vmem:[%s7858_s23 + $0x30] sm:%s8057_s22] }
  0xc5   : > { %658 = vst [vmem:[%s7861_s13 + $0x10] sm:%s8057_s22] %v657_v33  ;;  %v661_v35 = vld [vmem:[%s7858_s23 + $0x48] sm:%s8057_s22] }
  0xc6   : > { %660 = vst [vmem:[%s7861_s13 + $0x20] sm:%s8057_s22] %v659_v34  ;;  %v663_v36 = vld [vmem:[%s7858_s23 + $0x60] sm:%s8057_s22] }
  0xc7   : > { %662 = vst [vmem:[%s7861_s13 + $0x30] sm:%s8057_s22] %v661_v35  ;;  %v665_v37 = vld [vmem:[%s7858_s23 + $0x78] sm:%s8057_s22] }
  0xc8   : > { %664 = vst [vmem:[%s7861_s13 + $0x40] sm:%s8057_s22] %v663_v36  ;;  %v667_v38 = vld [vmem:[%s7858_s23 + $0x90] sm:%s8057_s22] }
  0xc9   : > { %666 = vst [vmem:[%s7861_s13 + $0x50] sm:%s8057_s22] %v665_v37  ;;  %v669_v39 = vld [vmem:[%s7858_s23 + $0xa8] sm:%s8057_s22] }
  0xca   : > { %668 = vst [vmem:[%s7861_s13 + $0x60] sm:%s8057_s22] %v667_v38  ;;  %v671_v40 = vld [vmem:[%s7858_s23 + $0xc0] sm:%s8057_s22] }
  0xcb   : > { %670 = vst [vmem:[%s7861_s13 + $0x70] sm:%s8057_s22] %v669_v39  ;;  %v673_v41 = vld [vmem:[%s7858_s23 + $0xd8] sm:%s8057_s22] }
  0xcc   : > { %672 = vst [vmem:[%s7861_s13 + $0x80] sm:%s8057_s22] %v671_v40  ;;  %v675_v42 = vld [vmem:[%s7858_s23 + $0xf0] sm:%s8057_s22] }
  0xcd   : > { %674 = vst [vmem:[%s7861_s13 + $0x90] sm:%s8057_s22] %v673_v41  ;;  %v677_v43 = vld [vmem:[%s7858_s23 + $0x108] sm:%s8057_s22] }
  0xce   : > { %676 = vst [vmem:[%s7861_s13 + $0xa0] sm:%s8057_s22] %v675_v42  ;;  %v679_v44 = vld [vmem:[%s7858_s23 + $0x120] sm:%s8057_s22] }
  0xcf   : > { %678 = vst [vmem:[%s7861_s13 + $0xb0] sm:%s8057_s22] %v677_v43  ;;  %v681_v45 = vld [vmem:[%s7858_s23 + $0x138] sm:%s8057_s22] }
  0xd0   : > { %680 = vst [vmem:[%s7861_s13 + $0xc0] sm:%s8057_s22] %v679_v44  ;;  %v683_v46 = vld [vmem:[%s7858_s23 + $0x150] sm:%s8057_s22] }
  0xd1   : > { %682 = vst [vmem:[%s7861_s13 + $0xd0] sm:%s8057_s22] %v681_v45  ;;  %v685_v47 = vld [vmem:[%s7858_s23 + $0x168] sm:%s8057_s22] }
  0xd2   : > { %684 = vst [vmem:[%s7861_s13 + $0xe0] sm:%s8057_s22] %v683_v46 }
  0xd3   : > { %686 = vst [vmem:[%s7861_s13 + $0xf0] sm:%s8057_s22] %v685_v47 }
  0xd4 PF: > { %p6047_p3 = scmp.ge.u32.totalorder %s7648_s18, 8 }
  0xd5   : > { %s7506_s8 = smov (!%p6047_p3), 1  }
  0xd6   : > { %315 = sbr.rel (%p6047_p3) target bundleno = 236 (0xec), region = 48  ;;  %s316_s27 = sshll.u32 (!%p6047_p3), %s7506_s8, %s7648_s18 }
  0xd7   : > { %s8125_s25 = sadd.s32 (!%p6047_p3), 4294967295, %s316_s27 }
  0xdb   : > { %v326_v48 = vld [vmem:[%s7646_s24] sm:%s8125_s25]  ;;  %v328_v49 = vld [vmem:[%s7646_s24 + $0x18] sm:%s8125_s25] }
  0xdc   : > { %327 = vst [vmem:[%s7650_s20] sm:%s8125_s25] %v326_v48  ;;  %v330_v50 = vld [vmem:[%s7646_s24 + $0x30] sm:%s8125_s25] }
  0xdd   : > { %329 = vst [vmem:[%s7650_s20 + $0x10] sm:%s8125_s25] %v328_v49  ;;  %v332_v51 = vld [vmem:[%s7646_s24 + $0x48] sm:%s8125_s25] }
  0xde   : > { %331 = vst [vmem:[%s7650_s20 + $0x20] sm:%s8125_s25] %v330_v50  ;;  %v334_v52 = vld [vmem:[%s7646_s24 + $0x60] sm:%s8125_s25] }
  0xdf   : > { %333 = vst [vmem:[%s7650_s20 + $0x30] sm:%s8125_s25] %v332_v51  ;;  %v336_v53 = vld [vmem:[%s7646_s24 + $0x78] sm:%s8125_s25] }
  0xe0   : > { %335 = vst [vmem:[%s7650_s20 + $0x40] sm:%s8125_s25] %v334_v52  ;;  %v338_v54 = vld [vmem:[%s7646_s24 + $0x90] sm:%s8125_s25] }
  0xe1   : > { %337 = vst [vmem:[%s7650_s20 + $0x50] sm:%s8125_s25] %v336_v53  ;;  %v340_v55 = vld [vmem:[%s7646_s24 + $0xa8] sm:%s8125_s25] }
  0xe2   : > { %339 = vst [vmem:[%s7650_s20 + $0x60] sm:%s8125_s25] %v338_v54  ;;  %v342_v56 = vld [vmem:[%s7646_s24 + $0xc0] sm:%s8125_s25] }
  0xe3   : > { %341 = vst [vmem:[%s7650_s20 + $0x70] sm:%s8125_s25] %v340_v55  ;;  %v344_v57 = vld [vmem:[%s7646_s24 + $0xd8] sm:%s8125_s25] }
  0xe4   : > { %343 = vst [vmem:[%s7650_s20 + $0x80] sm:%s8125_s25] %v342_v56  ;;  %v346_v58 = vld [vmem:[%s7646_s24 + $0xf0] sm:%s8125_s25] }
  0xe5   : > { %345 = vst [vmem:[%s7650_s20 + $0x90] sm:%s8125_s25] %v344_v57  ;;  %v348_v59 = vld [vmem:[%s7646_s24 + $0x108] sm:%s8125_s25] }
  0xe6   : > { %347 = vst [vmem:[%s7650_s20 + $0xa0] sm:%s8125_s25] %v346_v58  ;;  %v350_v60 = vld [vmem:[%s7646_s24 + $0x120] sm:%s8125_s25] }
  0xe7   : > { %349 = vst [vmem:[%s7650_s20 + $0xb0] sm:%s8125_s25] %v348_v59  ;;  %v352_v61 = vld [vmem:[%s7646_s24 + $0x138] sm:%s8125_s25] }
  0xe8   : > { %351 = vst [vmem:[%s7650_s20 + $0xc0] sm:%s8125_s25] %v350_v60  ;;  %v354_v62 = vld [vmem:[%s7646_s24 + $0x150] sm:%s8125_s25] }
  0xe9   : > { %353 = vst [vmem:[%s7650_s20 + $0xd0] sm:%s8125_s25] %v352_v61  ;;  %v356_v63 = vld [vmem:[%s7646_s24 + $0x168] sm:%s8125_s25] }
  0xea   : > { %355 = vst [vmem:[%s7650_s20 + $0xe0] sm:%s8125_s25] %v354_v62 }
  0xeb   : > { %357 = vst [vmem:[%s7650_s20 + $0xf0] sm:%s8125_s25] %v356_v63 }
  0xec PF: > { %p6049_p4 = scmp.ge.s32.totalorder %s7375_s12, 1  ;;  %p689_p5 = scmp.lt.s32.totalorder %s7375_s12, 5 }
  0xee   : > { %p690_p6 = pnand %p6049_p4, %p689_p5 }
  0xf0   : > { %693 = sbr.rel (%p690_p6) target bundleno = 2480 (0x9b0), region = 102 }
  0xf5   : > { %s8194_s18 = sand.u32 1, %s7351_s28   ;;  %s12229_s1 = sld [smem:[#allocation130_spill]] }
  0xf6   : > { %s6050_s23 = sshll.u32 %s8194_s18, 8  ;;  %s12246_s4 = sld [smem:[#allocation133_spill]] }
  0xf7   : > { %s8199_s24 = scalar_lea.vmem [#allocation2], %s6050_s23  ;;  %s12295_s3 = sld [smem:[#allocation132_spill]] }
  0xf8   : > { %v758_v0 = vld [vmem:[%s8199_s24] sm:$0xff]  ;;  %v760_v1 = vld [vmem:[%s8199_s24 + $0x10] sm:$0xff]  ;;  %s6052_s27 = sshll.u32 %s8194_s18, 9  ;;  %s12362_s2 = sld [smem:[#allocation131_spill]] }
  0xf9   : > { %790 = vxpose.xlu0.b32.start [1/16] %v758_v0, 128  ;;  %v762_v2 = vld [vmem:[%s8199_s24 + $0x20] sm:$0xff]  ;;  %v764_v3 = vld [vmem:[%s8199_s24 + $0x30] sm:$0xff]  ;;  %s9387_s25 = scalar_lea.vmem [#allocation4], %s6052_s27  ;;  %s11180_s20 = scalar_lea.vmem [#allocation3], %s6050_s23  }
  0xfa   : > { %v766_v4 = vld [vmem:[%s8199_s24 + $0x40] sm:$0xff]  ;;  %v768_v5 = vld [vmem:[%s8199_s24 + $0x50] sm:$0xff]  ;;  %s12190_s23 = scalar_lea.vmem [#allocation8], %s8194_s18  ;;  %s12583_s13 = sadd.s32 4294967295, %s7375_s12  }
  0xfb   : > { %v770_v6 = vld [vmem:[%s8199_s24 + $0x60] sm:$0xff]  ;;  %v772_v7 = vld [vmem:[%s8199_s24 + $0x70] sm:$0xff]  ;;  %v6176_v17 = vld [vmem:[%s12229_s1 + $0xe8] sm:$0xf]  ;;  %s11346_s16 = sand.u32 1, %s12583_s13   ;;  %s6053_s17 = sshll.u32 %s8194_s18, 2 }
  0xfc   : > { %v774_v8 = vld [vmem:[%s8199_s24 + $0x80] sm:$0xff]  ;;  %v776_v9 = vld [vmem:[%s8199_s24 + $0x90] sm:$0xff]  ;;  %v6664_v18 = vld [vmem:[%s12229_s1 + $0xf4] sm:$0xf0]  ;;  %s11360_s10 = scalar_lea.vmem [#allocation6], %s6053_s17  ;;  %s6588_s15 = sshll.u32 (%p7623_p8), %s7359_s30, 1 }
  0xfd   : > { %v778_v10 = vld [vmem:[%s8199_s24 + $0xa0] sm:$0xff]  ;;  %v780_v11 = vld [vmem:[%s8199_s24 + $0xb0] sm:$0xff]  ;;  %v6177_v20 = vor.u32 %v6664_v18, %v6176_v17  ;;  %v6662_v21 = vld [vmem:[%s12229_s1 + $0xec] sm:$0xf]  ;;  %s6736_s21 = smul.u32 (%p7623_p8), 48, %s7363_s9  ;;  %s5221_s14 = ssub.s32 (%p7623_p8), 3, %s6588_s15 }
  0xfe   : > { %v6168_v12 = vld [vmem:[%s12229_s1 + $0xe0] sm:$0xf]  ;;  %v6663_v13 = vld [vmem:[%s12229_s1 + $0xec] sm:$0xf0]  ;;  %v6661_v14 = vld [vmem:[%s12229_s1 + $0xe4] sm:$0xf] }
  0xff   : > { %v6169_v15 = vor.u32 %v6663_v13, %v6168_v12  ;;  %v6170_v16 = vld [vmem:[%s12229_s1 + $0xf0] sm:$0xf0]  ;;  %v6178_v22 = vld [vmem:[%s12229_s1 + $0xf8] sm:$0xf0]  ;;  %v6152_v23 = vld [vmem:[%s12229_s1 + $0xc0] sm:$0xf]  ;;  %1240 = vmatpush.bf16.msra.mxu2 %v6177_v20  ;;  %s5227_s0 = sadd.s32 (%p7623_p8), %s6736_s21, %s6588_s15 }
 0x100   : > { %v6173_v19 = vor.u32 %v6661_v14, %v6170_v16  ;;  %v782_v24 = vld [vmem:[%s8199_s24 + $0xc0] sm:$0xff]  ;;  %v6181_v25 = vor.u32 %v6662_v21, %v6178_v22  ;;  %v6659_v26 = vld [vmem:[%s12229_s1 + $0xcc] sm:$0xf0]  ;;  %v6154_v28 = vld [vmem:[%s12229_s1 + $0xd0] sm:$0xf0]  ;;  %p5222_p7 = scmp.lt.s32.totalorder (%p7623_p8), %s5221_s14, 2 }
 0x101   : > { %791 = vxpose.xlu0.b32.cont [2/16] %v760_v1, 128  ;;  %1062 = vmatpush.bf16.msra.mxu0 %v6169_v15  ;;  %v6657_v27 = vld [vmem:[%s12229_s1 + $0xc4] sm:$0xf]  ;;  %v6153_v29 = vor.u32 %v6659_v26, %v6152_v23  ;;  %v6160_v31 = vld [vmem:[%s12229_s1 + $0xc8] sm:$0xf]  ;;  %v6660_v32 = vld [vmem:[%s12229_s1 + $0xd4] sm:$0xf0] }
 0x102   : > { %1151 = vmatpush.bf16.msra.mxu1 %v6173_v19  ;;  %v6157_v30 = vor.u32 %v6657_v27, %v6154_v28  ;;  %v6658_v33 = vld [vmem:[%s12229_s1 + $0xcc] sm:$0xf]  ;;  %1329 = vmatpush.bf16.msra.mxu3 %v6181_v25  ;;  %v6161_v34 = vor.u32 %v6660_v32, %v6160_v31  ;;  %v6162_v35 = vld [vmem:[%s12229_s1 + $0xd8] sm:$0xf0]  ;;  %v6136_v36 = vld [vmem:[%s12229_s1 + $0xa0] sm:$0xf] }
 0x103   : > { %v6655_v37 = vld [vmem:[%s12229_s1 + $0xac] sm:$0xf0]  ;;  %v6165_v38 = vor.u32 %v6658_v33, %v6162_v35  ;;  %v6653_v39 = vld [vmem:[%s12229_s1 + $0xa4] sm:$0xf]  ;;  %v6138_v40 = vld [vmem:[%s12229_s1 + $0xb0] sm:$0xf0] }
 0x104   : > { %v6144_v41 = vld [vmem:[%s12229_s1 + $0xa8] sm:$0xf]  ;;  %v6137_v42 = vor.u32 %v6655_v37, %v6136_v36  ;;  %v6656_v43 = vld [vmem:[%s12229_s1 + $0xb4] sm:$0xf0]  ;;  %v6654_v44 = vld [vmem:[%s12229_s1 + $0xac] sm:$0xf]  ;;  %v6141_v46 = vor.u32 %v6653_v39, %v6138_v40  ;;  %1241 = vmatpush.bf16.msra.mxu2 %v6161_v34 }
 0x105   : > { %1063 = vmatpush.bf16.msra.mxu0 %v6153_v29  ;;  %v6146_v45 = vld [vmem:[%s12229_s1 + $0xb8] sm:$0xf0]  ;;  %v6120_v47 = vld [vmem:[%s12229_s1 + $0x80] sm:$0xf]  ;;  %v6651_v48 = vld [vmem:[%s12229_s1 + $0x8c] sm:$0xf0]  ;;  %v6145_v49 = vor.u32 %v6656_v43, %v6144_v41 }
 0x106   : > { %1152 = vmatpush.bf16.msra.mxu1 %v6157_v30  ;;  %1330 = vmatpush.bf16.msra.mxu3 %v6165_v38  ;;  %v6149_v50 = vor.u32 %v6654_v44, %v6146_v45  ;;  %v6649_v51 = vld [vmem:[%s12229_s1 + $0x84] sm:$0xf]  ;;  %v6122_v52 = vld [vmem:[%s12229_s1 + $0x90] sm:$0xf0]  ;;  %v6128_v53 = vld [vmem:[%s12229_s1 + $0x88] sm:$0xf]  ;;  %v6121_v57 = vor.u32 %v6651_v48, %v6120_v47 }
 0x107   : > { %v6652_v54 = vld [vmem:[%s12229_s1 + $0x94] sm:$0xf0]  ;;  %v6650_v55 = vld [vmem:[%s12229_s1 + $0x8c] sm:$0xf]  ;;  %v6130_v56 = vld [vmem:[%s12229_s1 + $0x98] sm:$0xf0]  ;;  %v6125_v59 = vor.u32 %v6649_v51, %v6122_v52 }
 0x108   : > { %v784_v58 = vld [vmem:[%s8199_s24 + $0xd0] sm:$0xff]  ;;  %v6104_v60 = vld [vmem:[%s12229_s1 + $0x60] sm:$0xf]  ;;  %1242 = vmatpush.bf16.msra.mxu2 %v6145_v49  ;;  %v6129_v62 = vor.u32 %v6652_v54, %v6128_v53  ;;  %v6133_v63 = vor.u32 %v6650_v55, %v6130_v56  ;;  %v6645_v0 = vld [vmem:[%s12229_s1 + $0x64] sm:$0xf]  ;;  %s6591_s26 = sshll.u32 (%p7623_p8), %s5227_s0, 3 }
 0x109   : > { %792 = vxpose.xlu0.b32.cont [3/16] %v762_v2, 128  ;;  %1064 = vmatpush.bf16.msra.mxu0 %v6137_v42  ;;  %v6647_v61 = vld [vmem:[%s12229_s1 + $0x6c] sm:$0xf0]  ;;  %v6106_v1 = vld [vmem:[%s12229_s1 + $0x70] sm:$0xf0]  ;;  %v6112_v2 = vld [vmem:[%s12229_s1 + $0x68] sm:$0xf]  ;;  %s11378_s27 = scalar_lea.vmem (%p7623_p8), %s12038_s5, %s6591_s26  }
 0x10a   : > { %1153 = vmatpush.bf16.msra.mxu1 %v6141_v46  ;;  %1331 = vmatpush.bf16.msra.mxu3 %v6149_v50  ;;  %v6641_v12 = vld [vmem:[%s12229_s1 + $0x44] sm:$0xf]  ;;  %v6090_v13 = vld [vmem:[%s12229_s1 + $0x50] sm:$0xf0]  ;;  %v6096_v14 = vld [vmem:[%s12229_s1 + $0x48] sm:$0xf] }
 0x10b   : > { %v6644_v15 = vld [vmem:[%s12229_s1 + $0x54] sm:$0xf0]  ;;  %v6642_v16 = vld [vmem:[%s12229_s1 + $0x4c] sm:$0xf]  ;;  %v6098_v17 = vld [vmem:[%s12229_s1 + $0x58] sm:$0xf0]  ;;  %v6093_v19 = vor.u32 %v6641_v12, %v6090_v13 }
 0x10c   : > { %1243 = vmatpush.bf16.msra.mxu2 %v6129_v62  ;;  %v786_v20 = vld [vmem:[%s8199_s24 + $0xe0] sm:$0xff]  ;;  %v6097_v21 = vor.u32 %v6644_v15, %v6096_v14  ;;  %v6101_v22 = vor.u32 %v6642_v16, %v6098_v17  ;;  %v788_v23 = vld [vmem:[%s8199_s24 + $0xf0] sm:$0xff]  ;;  %v6080_v29 = vld [vmem:[%s12229_s1 + $0x28] sm:$0xf] }
 0x10d   : > { %1065 = vmatpush.bf16.msra.mxu0 %v6121_v57  ;;  %v6639_v25 = vld [vmem:[%s12229_s1 + $0x2c] sm:$0xf0]  ;;  %v6637_v26 = vld [vmem:[%s12229_s1 + $0x24] sm:$0xf]  ;;  %v6074_v28 = vld [vmem:[%s12229_s1 + $0x30] sm:$0xf0] }
 0x10e   : > { %1154 = vmatpush.bf16.msra.mxu1 %v6125_v59  ;;  %1332 = vmatpush.bf16.msra.mxu3 %v6133_v63  ;;  %v6640_v30 = vld [vmem:[%s12229_s1 + $0x34] sm:$0xf0]  ;;  %v6077_v31 = vor.u32 %v6637_v26, %v6074_v28  ;;  %v6638_v33 = vld [vmem:[%s12229_s1 + $0x2c] sm:$0xf]  ;;  %v6082_v34 = vld [vmem:[%s12229_s1 + $0x38] sm:$0xf0] }
 0x10f   : > { %v6081_v32 = vor.u32 %v6640_v30, %v6080_v29  ;;  %v6056_v35 = vld [vmem:[%s12229_s1] sm:$0xf]  ;;  %v6085_v36 = vor.u32 %v6638_v33, %v6082_v34  ;;  %v6635_v37 = vld [vmem:[%s12229_s1 + $0xc] sm:$0xf0]  ;;  %v6633_v38 = vld [vmem:[%s12229_s1 + $0x4] sm:$0xf] }
 0x110   : > { %v6058_v39 = vld [vmem:[%s12229_s1 + $0x10] sm:$0xf0]  ;;  %v6057_v40 = vor.u32 %v6635_v37, %v6056_v35  ;;  %v6064_v42 = vld [vmem:[%s12229_s1 + $0x8] sm:$0xf]  ;;  %v6636_v43 = vld [vmem:[%s12229_s1 + $0x14] sm:$0xf0] }
 0x111   : > { %793 = vxpose.xlu0.b32.cont [4/16] %v764_v3, 128  ;;  %v6648_v3 = vld [vmem:[%s12229_s1 + $0x74] sm:$0xf0]  ;;  %v6061_v41 = vor.u32 %v6633_v38, %v6058_v39  ;;  %v6634_v44 = vld [vmem:[%s12229_s1 + $0xc] sm:$0xf]  ;;  %v6065_v45 = vor.u32 %v6636_v43, %v6064_v42  ;;  %v6066_v46 = vld [vmem:[%s12229_s1 + $0x18] sm:$0xf0] }
 0x112   : > { %v6069_v47 = vor.u32 %v6634_v44, %v6066_v46  ;;  %v759_v48 = vld [vmem:[%s8199_s24 + $0x8] sm:$0xff]  ;;  %v761_v49 = vld [vmem:[%s8199_s24 + $0x18] sm:$0xff] }
 0x113   : > { %822 = vxpose.xlu1.b32.start [1/16] %v759_v48, 128  ;;  %v763_v50 = vld [vmem:[%s8199_s24 + $0x28] sm:$0xff]  ;;  %v765_v52 = vld [vmem:[%s8199_s24 + $0x38] sm:$0xff] }
 0x114   : > { %v767_v55 = vld [vmem:[%s8199_s24 + $0x48] sm:$0xff]  ;;  %v769_v57 = vld [vmem:[%s8199_s24 + $0x58] sm:$0xff] }
 0x115   : > { %v773_v62 = vld [vmem:[%s8199_s24 + $0x78] sm:$0xff]  ;;  %v787_v16 = vld [vmem:[%s8199_s24 + $0xe8] sm:$0xff] }
 0x116   : > { %v785_v13 = vld [vmem:[%s8199_s24 + $0xd8] sm:$0xff] }
 0x117   : > { %v789_v17 = vld [vmem:[%s8199_s24 + $0xf8] sm:$0xff] }
 0x119   : > { %794 = vxpose.xlu0.b32.cont [5/16] %v766_v4, 128  ;;  %v6646_v4 = vld [vmem:[%s12229_s1 + $0x6c] sm:$0xf] }
 0x11b   : > { %823 = vxpose.xlu1.b32.cont [2/16] %v761_v49, 128 }
 0x121   : > { %795 = vxpose.xlu0.b32.cont [6/16] %v768_v5, 128  ;;  %v6114_v5 = vld [vmem:[%s12229_s1 + $0x78] sm:$0xf0] }
 0x123   : > { %824 = vxpose.xlu1.b32.cont [3/16] %v763_v50, 128 }
 0x129   : > { %796 = vxpose.xlu0.b32.cont [7/16] %v770_v6, 128  ;;  %v6105_v6 = vor.u32 %v6647_v61, %v6104_v60  ;;  %v771_v60 = vld [vmem:[%s8199_s24 + $0x68] sm:$0xff] }
 0x12b   : > { %1066 = vmatpush.bf16.msra.mxu0 %v6105_v6  ;;  %825 = vxpose.xlu1.b32.cont [4/16] %v765_v52, 128  ;;  %v779_v6 = vld [vmem:[%s8199_s24 + $0xa8] sm:$0xff] }
 0x131   : > { %797 = vxpose.xlu0.b32.cont [8/16] %v772_v7, 128  ;;  %v6109_v7 = vor.u32 %v6645_v0, %v6106_v1  ;;  %v775_v1 = vld [vmem:[%s8199_s24 + $0x88] sm:$0xff] }
 0x133   : > { %1155 = vmatpush.bf16.msra.mxu1 %v6109_v7  ;;  %826 = vxpose.xlu1.b32.cont [5/16] %v767_v55, 128 }
 0x137   : > { %1156 = vmatpush.bf16.msra.mxu1 %v6093_v19 }
 0x139   : > { %798 = vxpose.xlu0.b32.cont [9/16] %v774_v8, 128  ;;  %v6088_v8 = vld [vmem:[%s12229_s1 + $0x40] sm:$0xf] }
 0x13b   : > { %1157 = vmatpush.bf16.msra.mxu1 %v6077_v31  ;;  %827 = vxpose.xlu1.b32.cont [6/16] %v769_v57, 128 }
 0x13f   : > { %1158 = vmatpush.bf16.msra.mxu1 %v6061_v41 }
 0x141   : > { %799 = vxpose.xlu0.b32.cont [10/16] %v776_v9, 128  ;;  %v6643_v9 = vld [vmem:[%s12229_s1 + $0x4c] sm:$0xf0] }
 0x142   : > { %v6089_v18 = vor.u32 %v6643_v9, %v6088_v8  ;;  %v781_v8 = vld [vmem:[%s8199_s24 + $0xb8] sm:$0xff] }
 0x143   : > { %828 = vxpose.xlu1.b32.cont [7/16] %v771_v60, 128 }
 0x144   : > { %1067 = vmatpush.bf16.msra.mxu0 %v6089_v18 }
 0x149   : > { %800 = vxpose.xlu0.b32.cont [11/16] %v778_v10, 128  ;;  %v6113_v10 = vor.u32 %v6648_v3, %v6112_v2  ;;  %v777_v3 = vld [vmem:[%s8199_s24 + $0x98] sm:$0xff] }
 0x14b   : > { %1244 = vmatpush.bf16.msra.mxu2 %v6113_v10  ;;  %829 = vxpose.xlu1.b32.cont [8/16] %v773_v62, 128 }
 0x14f   : > { %1245 = vmatpush.bf16.msra.mxu2 %v6097_v21 }
 0x151   : > { %801 = vxpose.xlu0.b32.cont [12/16] %v780_v11, 128  ;;  %v6117_v11 = vor.u32 %v6646_v4, %v6114_v5 }
 0x153   : > { %1333 = vmatpush.bf16.msra.mxu3 %v6117_v11  ;;  %1246 = vmatpush.bf16.msra.mxu2 %v6081_v32  ;;  %v783_v11 = vld [vmem:[%s8199_s24 + $0xc8] sm:$0xff]  ;;  %s6566_s24 = sshll.u32 %s7359_s30, 8 }
 0x154   : > { %830 = vxpose.xlu1.b32.cont [9/16] %v775_v1, 128 }
 0x157   : > { %1334 = vmatpush.bf16.msra.mxu3 %v6101_v22  ;;  %1247 = vmatpush.bf16.msra.mxu2 %v6065_v45 }
 0x159   : > { %802 = vxpose.xlu0.b32.cont [13/16] %v782_v24, 128  ;;  %v6072_v24 = vld [vmem:[%s12229_s1 + $0x20] sm:$0xf] }
 0x15a   : > { %v6073_v27 = vor.u32 %v6639_v25, %v6072_v24  ;;  %v1418_v24 = vld [vmem:[%s12246_s4] sm:$0xf] }
 0x15b   : > { %1335 = vmatpush.bf16.msra.mxu3 %v6085_v36  ;;  %v8476_v26 = vperm.slane %v1418_v24, 0  ;;  %v8478_v28 = vperm.slane %v1418_v24, 1  ;;  %v8486_v31 = vperm.slane %v1418_v24, 2  ;;  %v8488_v32 = vperm.slane %v1418_v24, 3 }
 0x15c   : > { %1068 = vmatpush.bf16.msra.mxu0 %v6073_v27  ;;  %831 = vxpose.xlu1.b32.cont [10/16] %v777_v3, 128 }
 0x15f   : > { %1336 = vmatpush.bf16.msra.mxu3 %v6069_v47 }
 0x160   : > { %1069 = vmatpush.bf16.msra.mxu0 %v6057_v40 }
 0x161   : > { %803 = vxpose.xlu0.b32.cont [14/16] %v784_v58, 128 }
 0x164   : > { %832 = vxpose.xlu1.b32.cont [11/16] %v779_v6, 128 }
 0x169   : > { %804 = vxpose.xlu0.b32.cont [15/16] %v786_v20, 128 }
 0x16c   : > { %833 = vxpose.xlu1.b32.cont [12/16] %v781_v8, 128 }
 0x171   : > { %805 = vxpose.xlu0.b32.end [16/16] %v788_v23, 128 }
 0x174   : > { %834 = vxpose.xlu1.b32.cont [13/16] %v783_v11, 128 }
 0x17c   : > { %835 = vxpose.xlu1.b32.cont [14/16] %v785_v13, 128 }
 0x184   : > { %836 = vxpose.xlu1.b32.cont [15/16] %v787_v16, 128 }
 0x18c   : > { %837 = vxpose.xlu1.b32.end [16/16] %v789_v17, 128 }
 0x19d   : > { %v8412_v51 = vpop.trf.xlu0 }
 0x19e   : > { %12230 = vst [vmem:[#allocation19_spill] sm:$0xff] %v8412_v51 }
 0x1a5   : > { %v8415_v53 = vpop.trf.xlu0 }
 0x1a6   : > { %12231 = vst [vmem:[#allocation20_spill] sm:$0xff] %v8415_v53  ;;  %v854_v54 = vpack.c.bf16 %v8415_v53, %v8412_v51 }
 0x1a8   : > { %1070 = vmatmul.bf16.vlgmr.msra.gmra.mxu0 %v854_v54  ;;  %1159 = vmatmul.bf16.vlgmr.msra.gmra.mxu1 %v854_v54 }
 0x1a9   : > { %1248 = vmatmul.bf16.vlgmr.msra.gmra.mxu2 %v854_v54  ;;  %1337 = vmatmul.bf16.vlgmr.msra.gmra.mxu3 %v854_v54 }
 0x1ad   : > { %v8420_v56 = vpop.trf.xlu0 }
 0x1ae   : > { %12232 = vst [vmem:[#allocation21_spill] sm:$0xff] %v8420_v56 }
 0x1b5   : > { %v8423_v58 = vpop.trf.xlu0 }
 0x1b6   : > { %12233 = vst [vmem:[#allocation22_spill] sm:$0xff] %v8423_v58  ;;  %v855_v59 = vpack.c.bf16 %v8423_v58, %v8420_v56 }
 0x1b8   : > { %1075 = vmatmul.bf16.gmra.mxu0 %v855_v59  ;;  %1164 = vmatmul.bf16.gmra.mxu1 %v855_v59  ;;  %v8495_v39 = vpop.trf.xlu1 }
 0x1b9   : > { %1253 = vmatmul.bf16.gmra.mxu2 %v855_v59  ;;  %1342 = vmatmul.bf16.gmra.mxu3 %v855_v59  ;;  %12247 = vst [vmem:[#allocation35_spill] sm:$0xff] %v8495_v39 }
 0x1bd   : > { %v8428_v61 = vpop.trf.xlu0 }
 0x1be   : > { %12234 = vst [vmem:[#allocation23_spill] sm:$0xff] %v8428_v61 }
 0x1c0   : > { %v8513_v52 = vpop.trf.xlu1 }
 0x1c1   : > { %12248 = vst [vmem:[#allocation36_spill] sm:$0xff] %v8513_v52  ;;  %v862_v57 = vpack.c.bf16 %v8513_v52, %v8495_v39 }
 0x1c5   : > { %v8431_v63 = vpop.trf.xlu0 }
 0x1c6   : > { %12235 = vst [vmem:[#allocation24_spill] sm:$0xff] %v8431_v63  ;;  %v856_v0 = vpack.c.bf16 %v8431_v63, %v8428_v61 }
 0x1c8   : > { %1080 = vmatmul.bf16.gmra.mxu0 %v856_v0  ;;  %1169 = vmatmul.bf16.gmra.mxu1 %v856_v0  ;;  %v8685_v58 = vpop.trf.xlu1 }
 0x1c9   : > { %1258 = vmatmul.bf16.gmra.mxu2 %v856_v0  ;;  %1347 = vmatmul.bf16.gmra.mxu3 %v856_v0  ;;  %12255 = vst [vmem:[#allocation43_spill] sm:$0xff] %v8685_v58 }
 0x1cd   : > { %v8436_v2 = vpop.trf.xlu0 }
 0x1ce   : > { %12236 = vst [vmem:[#allocation25_spill] sm:$0xff] %v8436_v2 }
 0x1d5   : > { %v8439_v4 = vpop.trf.xlu0 }
 0x1d6   : > { %12237 = vst [vmem:[#allocation26_spill] sm:$0xff] %v8439_v4  ;;  %v857_v5 = vpack.c.bf16 %v8439_v4, %v8436_v2 }
 0x1d8   : > { %1085 = vmatmul.bf16.gmra.mxu0 %v857_v5  ;;  %1174 = vmatmul.bf16.gmra.mxu1 %v857_v5 }
 0x1d9   : > { %1263 = vmatmul.bf16.gmra.mxu2 %v857_v5  ;;  %1352 = vmatmul.bf16.gmra.mxu3 %v857_v5 }
 0x1dd   : > { %v8444_v7 = vpop.trf.xlu0 }
 0x1de   : > { %12238 = vst [vmem:[#allocation27_spill] sm:$0xff] %v8444_v7 }
 0x1e5   : > { %v8447_v9 = vpop.trf.xlu0 }
 0x1e6   : > { %12239 = vst [vmem:[#allocation28_spill] sm:$0xff] %v8447_v9  ;;  %v858_v10 = vpack.c.bf16 %v8447_v9, %v8444_v7 }
 0x1e8   : > { %1090 = vmatmul.bf16.gmra.mxu0 %v858_v10  ;;  %1179 = vmatmul.bf16.gmra.mxu1 %v858_v10 }
 0x1e9   : > { %1268 = vmatmul.bf16.gmra.mxu2 %v858_v10  ;;  %1357 = vmatmul.bf16.gmra.mxu3 %v858_v10 }
 0x1ed   : > { %v8452_v12 = vpop.trf.xlu0 }
 0x1ee   : > { %12240 = vst [vmem:[#allocation29_spill] sm:$0xff] %v8452_v12 }
 0x1f5   : > { %v8455_v14 = vpop.trf.xlu0 }
 0x1f6   : > { %12241 = vst [vmem:[#allocation30_spill] sm:$0xff] %v8455_v14  ;;  %v859_v15 = vpack.c.bf16 %v8455_v14, %v8452_v12 }
 0x1f8   : > { %1095 = vmatmul.bf16.gmra.mxu0 %v859_v15  ;;  %1184 = vmatmul.bf16.gmra.mxu1 %v859_v15 }
 0x1f9   : > { %1273 = vmatmul.bf16.gmra.mxu2 %v859_v15  ;;  %1362 = vmatmul.bf16.gmra.mxu3 %v859_v15 }
 0x1fd   : > { %v8461_v18 = vpop.trf.xlu0 }
 0x1fe   : > { %12242 = vst [vmem:[#allocation31_spill] sm:$0xff] %v8461_v18 }
 0x205   : > { %v8463_v19 = vpop.trf.xlu0 }
 0x206   : > { %12243 = vst [vmem:[#allocation32_spill] sm:$0xff] %v8463_v19  ;;  %v860_v20 = vpack.c.bf16 %v8463_v19, %v8461_v18 }
 0x208   : > { %1100 = vmatmul.bf16.gmra.mxu0 %v860_v20  ;;  %1189 = vmatmul.bf16.gmra.mxu1 %v860_v20 }
 0x209   : > { %1278 = vmatmul.bf16.gmra.mxu2 %v860_v20  ;;  %1367 = vmatmul.bf16.gmra.mxu3 %v860_v20 }
 0x20d   : > { %v8467_v21 = vpop.trf.xlu0 }
 0x20e   : > { %12244 = vst [vmem:[#allocation33_spill] sm:$0xff] %v8467_v21 }
 0x215   : > { %v8469_v22 = vpop.trf.xlu0 }
 0x216   : > { %12245 = vst [vmem:[#allocation34_spill] sm:$0xff] %v8469_v22  ;;  %v861_v23 = vpack.c.bf16 %v8469_v22, %v8467_v21 }
 0x218   : > { %1105 = vmatmul.bf16.gmra.mxu0 %v861_v23  ;;  %1194 = vmatmul.bf16.gmra.mxu1 %v861_v23 }
 0x219   : > { %1283 = vmatmul.bf16.gmra.mxu2 %v861_v23  ;;  %1372 = vmatmul.bf16.gmra.mxu3 %v861_v23 }
 0x225   : > { %v1071_v25 = vpop.f32.mrf.mxu0  ;;  %v1160_v27 = vpop.f32.mrf.mxu1 }
 0x226   : > { %v8481_v29 = vadd.f32 %v8476_v26, %v1071_v25  ;;  %v8484_v30 = vadd.f32 %v8478_v28, %v1160_v27 }
 0x228   : > { %v1556_v35 = vmin.f32 %v8481_v29, %v8484_v30  ;;  %1110 = vmatmul.bf16.gmra.mxu0 %v862_v57  ;;  %1199 = vmatmul.bf16.gmra.mxu1 %v862_v57 }
 0x229   : > { %1288 = vmatmul.bf16.gmra.mxu2 %v862_v57  ;;  %1377 = vmatmul.bf16.gmra.mxu3 %v862_v57 }
 0x22c   : > { %v1249_v33 = vpop.f32.mrf.mxu2  ;;  %v1338_v34 = vpop.f32.mrf.mxu3 }
 0x22d   : > { %v8493_v36 = vadd.f32 %v8486_v31, %v1249_v33  ;;  %v1073_v37 = vpop.f32.mrf.mxu0  ;;  %v1162_v38 = vpop.f32.mrf.mxu1  ;;  %v8498_v40 = vadd.f32 %v8488_v32, %v1338_v34 }
 0x22e   : > { %v8502_v42 = vadd.f32 %v8476_v26, %v1073_v37  ;;  %v8505_v43 = vadd.f32 %v8478_v28, %v1162_v38 }
 0x22f   : > { %v1557_v41 = vmin.f32 %v1556_v35, %v8493_v36 }
 0x230   : > { %v1561_v47 = vmin.f32 %v8502_v42, %v8505_v43 }
 0x231   : > { %v1558_v44 = vmin.f32 %v1557_v41, %v8498_v40 }
 0x233   : > { %1559 = vmin.xlane.f32.xlu2 %v1558_v44 }
 0x234   : > { %v1251_v45 = vpop.f32.mrf.mxu2  ;;  %v1340_v46 = vpop.f32.mrf.mxu3 }
 0x235   : > { %v8511_v48 = vadd.f32 %v8486_v31, %v1251_v45  ;;  %v1076_v49 = vpop.f32.mrf.mxu0  ;;  %v1165_v50 = vpop.f32.mrf.mxu1  ;;  %v8516_v54 = vadd.f32 %v8488_v32, %v1340_v46 }
 0x236   : > { %v8522_v59 = vadd.f32 %v8476_v26, %v1076_v49  ;;  %v8525_v60 = vadd.f32 %v8478_v28, %v1165_v50 }
 0x237   : > { %v1562_v55 = vmin.f32 %v1561_v47, %v8511_v48 }
 0x238   : > { %v1566_v3 = vmin.f32 %v8522_v59, %v8525_v60 }
 0x239   : > { %v1563_v62 = vmin.f32 %v1562_v55, %v8516_v54 }
 0x23b   : > { %1564 = vmin.xlane.f32.xlu2 %v1563_v62 }
 0x23c   : > { %v1254_v0 = vpop.f32.mrf.mxu2  ;;  %v1343_v1 = vpop.f32.mrf.mxu3 }
 0x23d   : > { %v8531_v5 = vadd.f32 %v8486_v31, %v1254_v0  ;;  %v1078_v6 = vpop.f32.mrf.mxu0  ;;  %v1167_v8 = vpop.f32.mrf.mxu1  ;;  %v8535_v11 = vadd.f32 %v8488_v32, %v1343_v1 }
 0x23e   : > { %v8538_v13 = vadd.f32 %v8476_v26, %v1078_v6  ;;  %v8541_v15 = vadd.f32 %v8478_v28, %v1167_v8 }
 0x23f   : > { %v1567_v10 = vmin.f32 %v1566_v3, %v8531_v5 }
 0x240   : > { %v1571_v23 = vmin.f32 %v8538_v13, %v8541_v15 }
 0x241   : > { %v1568_v16 = vmin.f32 %v1567_v10, %v8535_v11 }
 0x243   : > { %1569 = vmin.xlane.f32.xlu2 %v1568_v16 }
 0x244   : > { %v1256_v17 = vpop.f32.mrf.mxu2  ;;  %v1345_v20 = vpop.f32.mrf.mxu3 }
 0x245   : > { %v8547_v24 = vadd.f32 %v8486_v31, %v1256_v17  ;;  %v1081_v25 = vpop.f32.mrf.mxu0  ;;  %v1170_v27 = vpop.f32.mrf.mxu1  ;;  %v8550_v33 = vadd.f32 %v8488_v32, %v1345_v20 }
 0x246   : > { %v8554_v35 = vadd.f32 %v8476_v26, %v1081_v25  ;;  %v8557_v37 = vadd.f32 %v8478_v28, %v1170_v27 }
 0x247   : > { %v1572_v34 = vmin.f32 %v1571_v23, %v8547_v24 }
 0x248   : > { %v1576_v45 = vmin.f32 %v8554_v35, %v8557_v37 }
 0x249   : > { %v1573_v38 = vmin.f32 %v1572_v34, %v8550_v33 }
 0x24b   : > { %1574 = vmin.xlane.f32.xlu2 %v1573_v38 }
 0x24c   : > { %v1259_v41 = vpop.f32.mrf.mxu2  ;;  %v1348_v44 = vpop.f32.mrf.mxu3 }
 0x24d   : > { %v8563_v46 = vadd.f32 %v8486_v31, %v1259_v41  ;;  %v1083_v47 = vpop.f32.mrf.mxu0  ;;  %v1172_v49 = vpop.f32.mrf.mxu1  ;;  %v8567_v55 = vadd.f32 %v8488_v32, %v1348_v44 }
 0x24e   : > { %v8570_v57 = vadd.f32 %v8476_v26, %v1083_v47  ;;  %v8573_v62 = vadd.f32 %v8478_v28, %v1172_v49 }
 0x24f   : > { %v1577_v50 = vmin.f32 %v1576_v45, %v8563_v46 }
 0x250   : > { %v1581_v6 = vmin.f32 %v8570_v57, %v8573_v62 }
 0x251   : > { %v1578_v0 = vmin.f32 %v1577_v50, %v8567_v55 }
 0x253   : > { %1579 = vmin.xlane.f32.xlu2 %v1578_v0 }
 0x254   : > { %v1261_v1 = vpop.f32.mrf.mxu2  ;;  %v1350_v3 = vpop.f32.mrf.mxu3 }
 0x255   : > { %v8579_v8 = vadd.f32 %v8486_v31, %v1261_v1  ;;  %v1086_v10 = vpop.f32.mrf.mxu0  ;;  %v1175_v16 = vpop.f32.mrf.mxu1  ;;  %v8582_v17 = vadd.f32 %v8488_v32, %v1350_v3 }
 0x256   : > { %v8585_v20 = vadd.f32 %v8476_v26, %v1086_v10  ;;  %v8588_v23 = vadd.f32 %v8478_v28, %v1175_v16 }
 0x257   : > { %v1582_v25 = vmin.f32 %v1581_v6, %v8579_v8 }
 0x258   : > { %v1586_v34 = vmin.f32 %v8585_v20, %v8588_v23 }
 0x259   : > { %v1583_v27 = vmin.f32 %v1582_v25, %v8582_v17 }
 0x25b   : > { %1584 = vmin.xlane.f32.xlu2 %v1583_v27 }
 0x25c   : > { %v1264_v38 = vpop.f32.mrf.mxu2  ;;  %v1353_v41 = vpop.f32.mrf.mxu3 }
 0x25d   : > { %v8595_v44 = vadd.f32 %v8486_v31, %v1264_v38  ;;  %v8598_v45 = vadd.f32 %v8488_v32, %v1353_v41  ;;  %v1088_v47 = vpop.f32.mrf.mxu0  ;;  %v1177_v49 = vpop.f32.mrf.mxu1 }
 0x25e   : > { %v8602_v0 = vadd.f32 %v8476_v26, %v1088_v47  ;;  %v8605_v1 = vadd.f32 %v8478_v28, %v1177_v49 }
 0x25f   : > { %v1587_v50 = vmin.f32 %v1586_v34, %v8595_v44 }
 0x260   : > { %v1591_v16 = vmin.f32 %v8602_v0, %v8605_v1 }
 0x261   : > { %v1588_v3 = vmin.f32 %v1587_v50, %v8598_v45 }
 0x263   : > { %1589 = vmin.xlane.f32.xlu2 %v1588_v3 }
 0x264   : > { %v1266_v6 = vpop.f32.mrf.mxu2  ;;  %v1355_v10 = vpop.f32.mrf.mxu3 }
 0x265   : > { %v8611_v25 = vadd.f32 %v8486_v31, %v1266_v6  ;;  %v1091_v27 = vpop.f32.mrf.mxu0  ;;  %v1180_v38 = vpop.f32.mrf.mxu1  ;;  %v8614_v34 = vadd.f32 %v8488_v32, %v1355_v10 }
 0x266   : > { %v8617_v41 = vadd.f32 %v8476_v26, %v1091_v27  ;;  %v8620_v47 = vadd.f32 %v8478_v28, %v1180_v38 }
 0x267   : > { %v1592_v49 = vmin.f32 %v1591_v16, %v8611_v25 }
 0x268   : > { %v1596_v3 = vmin.f32 %v8617_v41, %v8620_v47 }
 0x269   : > { %v1593_v50 = vmin.f32 %v1592_v49, %v8614_v34 }
 0x26b   : > { %1594 = vmin.xlane.f32.xlu2 %v1593_v50 }
 0x26c   : > { %v1269_v6 = vpop.f32.mrf.mxu2  ;;  %v1358_v52 = vpop.f32.mrf.mxu3 }
 0x26d   : > { %v8627_v39 = vadd.f32 %v8486_v31, %v1269_v6  ;;  %v8630_v10 = vadd.f32 %v8488_v32, %v1358_v52  ;;  %v1093_v27 = vpop.f32.mrf.mxu0  ;;  %v1182_v22 = vpop.f32.mrf.mxu1 }
 0x26e   : > { %v8634_v16 = vadd.f32 %v8476_v26, %v1093_v27  ;;  %v8637_v49 = vadd.f32 %v8478_v28, %v1182_v22 }
 0x26f   : > { %v1597_v38 = vmin.f32 %v1596_v3, %v8627_v39 }
 0x270   : > { %v1601_v21 = vmin.f32 %v8634_v16, %v8637_v49 }
 0x271   : > { %v1598_v50 = vmin.f32 %v1597_v38, %v8630_v10 }
 0x273   : > { %1599 = vmin.xlane.f32.xlu2 %v1598_v50 }
 0x274   : > { %v1271_v6 = vpop.f32.mrf.mxu2  ;;  %v1360_v19 = vpop.f32.mrf.mxu3 }
 0x275   : > { %v8643_v52 = vadd.f32 %v8486_v31, %v1271_v6  ;;  %v8646_v18 = vadd.f32 %v8488_v32, %v1360_v19  ;;  %v1096_v3 = vpop.f32.mrf.mxu0  ;;  %v1185_v27 = vpop.f32.mrf.mxu1 }
 0x276   : > { %v8649_v14 = vadd.f32 %v8476_v26, %v1096_v3  ;;  %v8652_v22 = vadd.f32 %v8478_v28, %v1185_v27 }
 0x277   : > { %v1602_v38 = vmin.f32 %v1601_v21, %v8643_v52 }
 0x278   : > { %v1606_v12 = vmin.f32 %v8649_v14, %v8652_v22 }
 0x279   : > { %v1603_v50 = vmin.f32 %v1602_v38, %v8646_v18 }
 0x27b   : > { %1604 = vmin.xlane.f32.xlu2 %v1603_v50 }
 0x27c   : > { %v1274_v6 = vpop.f32.mrf.mxu2  ;;  %v1363_v9 = vpop.f32.mrf.mxu3 }
 0x27d   : > { %v8659_v19 = vadd.f32 %v8486_v31, %v1274_v6  ;;  %v8662_v7 = vadd.f32 %v8488_v32, %v1363_v9  ;;  %v1098_v3 = vpop.f32.mrf.mxu0  ;;  %v1187_v4 = vpop.f32.mrf.mxu1 }
 0x27e   : > { %v8666_v21 = vadd.f32 %v8476_v26, %v1098_v3  ;;  %v8669_v38 = vadd.f32 %v8478_v28, %v1187_v4  ;;  %v12068_v4 = vlaneseq }
 0x27f   : > { %12249 = vst [vmem:[#allocation37_spill] sm:$0xff] %v8662_v7  ;;  %v1607_v27 = vmin.f32 %v1606_v12, %v8659_v19 }
 0x280   : > { %12250 = vst [vmem:[#allocation38_spill] sm:$0xff] %v8666_v21  ;;  %v1611_v2 = vmin.f32 %v8666_v21, %v8669_v38 }
 0x281   : > { %12251 = vst [vmem:[#allocation39_spill] sm:$0xff] %v8669_v38  ;;  %v1608_v50 = vmin.f32 %v1607_v27, %v8662_v7  ;;  %v8683_v27 = vand.u32 127, %v12068_v4 }
 0x283   : > { %1609 = vmin.xlane.f32.xlu2 %v1608_v50  ;;  %12254 = vst [vmem:[#allocation42_spill] sm:$0xff] %v8683_v27  ;;  %v8688_v50 = vadd.s32 128, %v8683_v27 }
 0x284   : > { %v1276_v6 = vpop.f32.mrf.mxu2  ;;  %v1365_v63 = vpop.f32.mrf.mxu3 }
 0x285   : > { %v8675_v9 = vadd.f32 %v8486_v31, %v1276_v6  ;;  %v8678_v61 = vadd.f32 %v8488_v32, %v1365_v63  ;;  %12256 = vst [vmem:[#allocation44_spill] sm:$0xff] %v8688_v50  ;;  %v8691_v6 = vadd.s32 256, %v8683_v27  ;;  %v8704_v4 = vpop.f32.mrf.mxu0  ;;  %v8706_v53 = vpop.f32.mrf.mxu1 }
 0x287   : > { %12252 = vst [vmem:[#allocation40_spill] sm:$0xff] %v8675_v9  ;;  %v1612_v12 = vmin.f32 %v1611_v2, %v8675_v9 }
 0x288   : > { %12253 = vst [vmem:[#allocation41_spill] sm:$0xff] %v8678_v61 }
 0x289   : > { %v1613_v3 = vmin.f32 %v1612_v12, %v8678_v61  ;;  %v8699_v12 = vadd.s32 384, %v8683_v27 }
 0x28b   : > { %1614 = vmin.xlane.f32.xlu2 %v1613_v3  ;;  %v8701_v3 = vpop.trf.xlu1 }
 0x28c   : > { %12257 = vst [vmem:[#allocation45_spill] sm:$0xff] %v8701_v3  ;;  %v8714_v9 = vpop.f32.mrf.mxu2 }
 0x2a6   : > { %v1560_v56 = vpop.xlane.xlu2 %1559 }
 0x2a7   : > { %vm1721_vm0 = vcmp.eq.f32.partialorder %v8481_v29, %v1560_v56  ;;  %vm1722_vm1 = vcmp.eq.f32.partialorder %v8484_v30, %v1560_v56  ;;  %vm1723_vm2 = vcmp.eq.f32.partialorder %v8493_v36, %v1560_v56  ;;  %vm1724_vm3 = vcmp.eq.f32.partialorder %v8498_v40, %v1560_v56 }
 0x2a8   : > { %v1849_v63 = vsel %vm1721_vm0, %v8683_v27, 512  ;;  %v1850_v2 = vsel %vm1722_vm1, %v8688_v50, 512  ;;  %v863_v29 = vpack.c.bf16 %v8701_v3, %v8685_v58  ;;  %v1851_v30 = vsel %vm1723_vm2, %v8691_v6, 512 }
 0x2a9   : > { %vm1977_vm4 = vcmp.lt.s32.totalorder %v1849_v63, %v1850_v2  ;;  %v1852_v51 = vsel %vm1724_vm3, %v8699_v12, 512 }
 0x2aa   : > { %v1978_v36 = vsel %vm1977_vm4, %v1849_v63, %v1850_v2  ;;  %1293 = vmatmul.bf16.gmra.mxu2 %v863_v29  ;;  %1382 = vmatmul.bf16.gmra.mxu3 %v863_v29 }
 0x2ab   : > { %vm1979_vm5 = vcmp.lt.s32.totalorder %v1978_v36, %v1851_v30  ;;  %1115 = vmatmul.bf16.gmra.mxu0 %v863_v29  ;;  %1204 = vmatmul.bf16.gmra.mxu1 %v863_v29 }
 0x2ac   : > { %v1980_v61 = vsel %vm1979_vm5, %v1978_v36, %v1851_v30 }
 0x2ad   : > { %vm1981_vm6 = vcmp.lt.s32.totalorder %v1980_v61, %v1852_v51 }
 0x2ae   : > { %v1565_v56 = vpop.xlane.xlu2 %1564  ;;  %v8712_v40 = vsel %vm1981_vm6, %v1980_v61, %v1852_v51  ;;  %v8725_v51 = vpop.f32.mrf.mxu3 }
 0x2af   : > { %vm1725_vm7 = vcmp.eq.f32.partialorder %v8502_v42, %v1565_v56  ;;  %vm1726_vm8 = vcmp.eq.f32.partialorder %v8505_v43, %v1565_v56  ;;  %v1984_v63 = vshra.s32 %v8712_v40, 16  ;;  %vm1727_vm9 = vcmp.eq.f32.partialorder %v8511_v48, %v1565_v56  ;;  %v8729_v43 = vpop.f32.mrf.mxu0  ;;  %v8731_v48 = vpop.f32.mrf.mxu1 }
 0x2b0   : > { %v1853_v2 = vsel %vm1725_vm7, %v8683_v27, 512  ;;  %v1854_v30 = vsel %vm1726_vm8, %v8688_v50, 512  ;;  %vm1728_vm10 = vcmp.eq.f32.partialorder %v8516_v54, %v1565_v56  ;;  %v1855_v61 = vsel %vm1727_vm9, %v8691_v6, 512 }
 0x2b1   : > { %v8722_v36 = vcvt.s32.f32 %v1984_v63  ;;  %vm1997_vm11 = vcmp.lt.s32.totalorder %v1853_v2, %v1854_v30  ;;  %v1856_v29 = vsel %vm1728_vm10, %v8699_v12, 512 }
 0x2b2   : > { %v1998_v42 = vsel %vm1997_vm11, %v1853_v2, %v1854_v30  ;;  %v8742_v30 = vpop.f32.mrf.mxu2 }
 0x2b3   : > { %1987 = vmin.xlane.f32.xlu2 %v8722_v36  ;;  %vm1999_vm12 = vcmp.lt.s32.totalorder %v1998_v42, %v1855_v61 }
 0x2b4   : > { %v2000_v3 = vsel %vm1999_vm12, %v1998_v42, %v1855_v61 }
 0x2b5   : > { %vm2001_vm13 = vcmp.lt.s32.totalorder %v2000_v3, %v1856_v29 }
 0x2b6   : > { %v1570_v63 = vpop.xlane.xlu2 %1569  ;;  %v8734_v58 = vsel %vm2001_vm13, %v2000_v3, %v1856_v29 }
 0x2b7   : > { %vm1729_vm14 = vcmp.eq.f32.partialorder %v8522_v59, %v1570_v63  ;;  %vm1730_vm15 = vcmp.eq.f32.partialorder %v8525_v60, %v1570_v63  ;;  %v2004_v54 = vshra.s32 %v8734_v58, 16  ;;  %vm1731_vm0 = vcmp.eq.f32.partialorder %v8531_v5, %v1570_v63  ;;  %v8749_v60 = vpop.trf.xlu1  ;;  %v8751_v5 = vpop.f32.mrf.mxu3 }
 0x2b8   : > { %v1857_v56 = vsel %vm1729_vm14, %v8683_v27, 512  ;;  %v1858_v2 = vsel %vm1730_vm15, %v8688_v50, 512  ;;  %vm1732_vm1 = vcmp.eq.f32.partialorder %v8535_v11, %v1570_v63  ;;  %v1859_v3 = vsel %vm1731_vm0, %v8691_v6, 512  ;;  %12258 = vst [vmem:[#allocation46_spill] sm:$0xff] %v8749_v60  ;;  %v8754_v29 = vpop.f32.mrf.mxu0 }
 0x2b9   : > { %v8744_v7 = vcvt.s32.f32 %v2004_v54  ;;  %vm2017_vm2 = vcmp.lt.s32.totalorder %v1857_v56, %v1858_v2  ;;  %v1860_v61 = vsel %vm1732_vm1, %v8699_v12, 512  ;;  %v8756_v54 = vpop.f32.mrf.mxu1 }
 0x2ba   : > { %v2018_v59 = vsel %vm2017_vm2, %v1857_v56, %v1858_v2  ;;  %v8769_v38 = vpop.f32.mrf.mxu2 }
 0x2bb   : > { %2007 = vmin.xlane.f32.xlu2 %v8744_v7  ;;  %vm2019_vm3 = vcmp.lt.s32.totalorder %v2018_v59, %v1859_v3 }
 0x2bc   : > { %v2020_v42 = vsel %vm2019_vm3, %v2018_v59, %v1859_v3 }
 0x2bd   : > { %vm2021_vm4 = vcmp.lt.s32.totalorder %v2020_v42, %v1860_v61 }
 0x2be   : > { %v1575_v11 = vpop.xlane.xlu2 %1574  ;;  %v8758_v63 = vsel %vm2021_vm4, %v2020_v42, %v1860_v61 }
 0x2bf   : > { %vm1733_vm5 = vcmp.eq.f32.partialorder %v8538_v13, %v1575_v11  ;;  %vm1734_vm6 = vcmp.eq.f32.partialorder %v8541_v15, %v1575_v11  ;;  %v2024_v56 = vshra.s32 %v8758_v63, 16  ;;  %vm1735_vm7 = vcmp.eq.f32.partialorder %v8547_v24, %v1575_v11  ;;  %v8773_v15 = vpop.trf.xlu1 }
 0x2c0   : > { %v1861_v2 = vsel %vm1733_vm5, %v8683_v27, 512  ;;  %v1862_v3 = vsel %vm1734_vm6, %v8688_v50, 512  ;;  %vm1736_vm8 = vcmp.eq.f32.partialorder %v8550_v33, %v1575_v11  ;;  %v1863_v61 = vsel %vm1735_vm7, %v8691_v6, 512  ;;  %12259 = vst [vmem:[#allocation47_spill] sm:$0xff] %v8773_v15 }
 0x2c1   : > { %v8766_v59 = vcvt.s32.f32 %v2024_v56  ;;  %vm2037_vm9 = vcmp.lt.s32.totalorder %v1861_v2, %v1862_v3  ;;  %v1864_v24 = vsel %vm1736_vm8, %v8699_v12, 512  ;;  %v864_v56 = vpack.c.bf16 %v8773_v15, %v8749_v60 }
 0x2c2   : > { %v2038_v13 = vsel %vm2037_vm9, %v1861_v2, %v1862_v3  ;;  %v8780_v33 = vadd.f32 %v8476_v26, %v8704_v4  ;;  %v8784_v11 = vadd.f32 %v8478_v28, %v8706_v53  ;;  %v8786_v3 = vpop.f32.mrf.mxu3  ;;  %v8793_v4 = vpop.f32.mrf.mxu0  ;;  %v8800_v53 = vadd.f32 %v8486_v31, %v8714_v9 }
 0x2c3   : > { %2027 = vmin.xlane.f32.xlu2 %v8766_v59  ;;  %vm2039_vm10 = vcmp.lt.s32.totalorder %v2038_v13, %v1863_v61  ;;  %1298 = vmatmul.bf16.gmra.mxu2 %v864_v56  ;;  %v8819_v15 = vadd.f32 %v8478_v28, %v8731_v48 }
 0x2c4   : > { %v2040_v42 = vsel %vm2039_vm10, %v2038_v13, %v1863_v61  ;;  %12260 = vst [vmem:[#allocation48_spill] sm:$0xff] %v8780_v33  ;;  %1387 = vmatmul.bf16.gmra.mxu3 %v864_v56  ;;  %v8795_v13 = vpop.f32.mrf.mxu1  ;;  %1120 = vmatmul.bf16.gmra.mxu0 %v864_v56 }
 0x2c5   : > { %12261 = vst [vmem:[#allocation49_spill] sm:$0xff] %v8784_v11  ;;  %vm2041_vm11 = vcmp.lt.s32.totalorder %v2040_v42, %v1864_v24  ;;  %1209 = vmatmul.bf16.gmra.mxu1 %v864_v56  ;;  %v8815_v56 = vadd.f32 %v8476_v26, %v8729_v43 }
 0x2c6   : > { %v1580_v2 = vpop.xlane.xlu2 %1579  ;;  %v8788_v21 = vsel %vm2041_vm11, %v2040_v42, %v1864_v24  ;;  %12262 = vst [vmem:[#allocation50_spill] sm:$0xff] %v8800_v53 }
 0x2c7   : > { %vm1737_vm12 = vcmp.eq.f32.partialorder %v8554_v35, %v1580_v2  ;;  %vm1738_vm13 = vcmp.eq.f32.partialorder %v8557_v37, %v1580_v2  ;;  %v2044_v61 = vshra.s32 %v8788_v21, 16  ;;  %vm1739_vm14 = vcmp.eq.f32.partialorder %v8563_v46, %v1580_v2  ;;  %v8811_v9 = vpop.trf.xlu1 }
 0x2c8   : > { %v1865_v24 = vsel %vm1737_vm12, %v8683_v27, 512  ;;  %v1866_v35 = vsel %vm1738_vm13, %v8688_v50, 512  ;;  %v1616_v37 = vmin.f32 %v8780_v33, %v8784_v11  ;;  %vm1740_vm15 = vcmp.eq.f32.partialorder %v8567_v55, %v1580_v2  ;;  %12264 = vst [vmem:[#allocation52_spill] sm:$0xff] %v8811_v9 }
 0x2c9   : > { %v8806_v42 = vcvt.s32.f32 %v2044_v61  ;;  %vm2057_vm0 = vcmp.lt.s32.totalorder %v1865_v24, %v1866_v35  ;;  %v1867_v46 = vsel %vm1739_vm14, %v8691_v6, 512  ;;  %v8821_v61 = vpop.f32.mrf.mxu2  ;;  %v1868_v55 = vsel %vm1740_vm15, %v8699_v12, 512 }
 0x2ca   : > { %v2058_v60 = vsel %vm2057_vm0, %v1865_v24, %v1866_v35  ;;  %v1617_v24 = vmin.f32 %v1616_v37, %v8800_v53  ;;  %v8827_v35 = vadd.f32 %v8488_v32, %v8725_v51  ;;  %v1111_v48 = vpop.f32.mrf.mxu0  ;;  %v8839_v51 = vadd.f32 %v8486_v31, %v8742_v30 }
 0x2cb   : > { %12263 = vst [vmem:[#allocation51_spill] sm:$0xff] %v8806_v42  ;;  %2047 = vmin.xlane.f32.xlu2 %v8806_v42  ;;  %vm2059_vm1 = vcmp.lt.s32.totalorder %v2058_v60, %v1867_v46 }
 0x2cc   : > { %v2060_v2 = vsel %vm2059_vm1, %v2058_v60, %v1867_v46  ;;  %12265 = vst [vmem:[#allocation53_spill] sm:$0xff] %v8827_v35  ;;  %v1200_v42 = vpop.f32.mrf.mxu1  ;;  %v1621_v60 = vmin.f32 %v8815_v56, %v8819_v15 }
 0x2cd   : > { %vm2061_vm2 = vcmp.lt.s32.totalorder %v2060_v2, %v1868_v55 }
 0x2ce   : > { %v1585_v11 = vpop.xlane.xlu2 %1584  ;;  %v8829_v33 = vsel %vm2061_vm2, %v2060_v2, %v1868_v55  ;;  %v1618_v55 = vmin.f32 %v1617_v24, %v8827_v35  ;;  %v8853_v2 = vadd.f32 %v8478_v28, %v1200_v42  ;;  %v8861_v24 = vadd.f32 %v8488_v32, %v8751_v5 }
 0x2cf   : > { %vm1741_vm3 = vcmp.eq.f32.partialorder %v8570_v57, %v1585_v11  ;;  %vm1742_vm4 = vcmp.eq.f32.partialorder %v8573_v62, %v1585_v11  ;;  %v2064_v43 = vshra.s32 %v8829_v33, 16  ;;  %vm1743_vm5 = vcmp.eq.f32.partialorder %v8579_v8, %v1585_v11  ;;  %v8843_v57 = vpop.f32.mrf.mxu3 }
 0x2d0   : > { %v1869_v37 = vsel %vm1741_vm3, %v8683_v27, 512  ;;  %v1870_v46 = vsel %vm1742_vm4, %v8688_v50, 512  ;;  %vm1744_vm6 = vcmp.eq.f32.partialorder %v8582_v17, %v1585_v11  ;;  %v8850_v8 = vadd.f32 %v8476_v26, %v1111_v48 }
 0x2d1   : > { %v8845_v62 = vcvt.s32.f32 %v2064_v43  ;;  %vm2077_vm7 = vcmp.lt.s32.totalorder %v1869_v37, %v1870_v46  ;;  %v1871_v30 = vsel %vm1743_vm5, %v8691_v6, 512  ;;  %v8857_v43 = vpop.trf.xlu1  ;;  %v1872_v17 = vsel %vm1744_vm6, %v8699_v12, 512  ;;  %v1289_v48 = vpop.f32.mrf.mxu2 }
 0x2d2   : > { %v2078_v53 = vsel %vm2077_vm7, %v1869_v37, %v1870_v46  ;;  %12266 = vst [vmem:[#allocation54_spill] sm:$0xff] %v8857_v43  ;;  %v865_v42 = vpack.c.bf16 %v8857_v43, %v8811_v9  ;;  %v8868_v37 = vadd.f32 %v8476_v26, %v8754_v29  ;;  %v8872_v46 = vadd.f32 %v8478_v28, %v8756_v54 }
 0x2d3   : > { %2067 = vmin.xlane.f32.xlu0 %v8845_v62  ;;  %1619 = vmin.xlane.f32.xlu2 %v1618_v55  ;;  %vm2079_vm8 = vcmp.lt.s32.totalorder %v2078_v53, %v1871_v30  ;;  %v1622_v55 = vmin.f32 %v1621_v60, %v8839_v51  ;;  %v1636_v35 = vmin.f32 %v8850_v8, %v8853_v2 }
 0x2d4   : > { %v2080_v11 = vsel %vm2079_vm8, %v2078_v53, %v1871_v30  ;;  %1303 = vmatmul.bf16.gmra.mxu2 %v865_v42  ;;  %1392 = vmatmul.bf16.gmra.mxu3 %v865_v42  ;;  %v8883_v54 = vadd.f32 %v8486_v31, %v1289_v48  ;;  %v8903_v9 = vadd.f32 %v8488_v32, %v8786_v3 }
 0x2d5   : > { %vm2081_vm9 = vcmp.lt.s32.totalorder %v2080_v11, %v1872_v17  ;;  %1125 = vmatmul.bf16.gmra.mxu0 %v865_v42  ;;  %1214 = vmatmul.bf16.gmra.mxu1 %v865_v42 }
 0x2d6   : > { %v1590_v5 = vpop.xlane.xlu2 %1589  ;;  %v8877_v53 = vsel %vm2081_vm9, %v2080_v11, %v1872_v17  ;;  %12267 = vst [vmem:[#allocation55_spill] sm:$0xff] %v8883_v54  ;;  %v1626_v17 = vmin.f32 %v8868_v37, %v8872_v46  ;;  %v1623_v11 = vmin.f32 %v1622_v55, %v8861_v24  ;;  %v1637_v48 = vmin.f32 %v1636_v35, %v8883_v54 }
 0x2d7   : > { %vm1745_vm10 = vcmp.eq.f32.partialorder %v8585_v20, %v1590_v5  ;;  %vm1746_vm11 = vcmp.eq.f32.partialorder %v8588_v23, %v1590_v5  ;;  %v2084_v29 = vshra.s32 %v8877_v53, 16  ;;  %v1378_v43 = vpop.f32.mrf.mxu3  ;;  %v8891_v20 = vadd.f32 %v8486_v31, %v8769_v38 }
 0x2d8   : > { %v1873_v60 = vsel %vm1745_vm10, %v8683_v27, 512  ;;  %v1874_v30 = vsel %vm1746_vm11, %v8688_v50, 512  ;;  %v8899_v42 = vadd.f32 %v8488_v32, %v1378_v43  ;;  %v8912_v55 = vadd.f32 %v8478_v28, %v8795_v13 }
 0x2d9   : > { %v8893_v23 = vcvt.s32.f32 %v2084_v29  ;;  %vm2097_vm12 = vcmp.lt.s32.totalorder %v1873_v60, %v1874_v30  ;;  %v1627_v38 = vmin.f32 %v1626_v17, %v8891_v20  ;;  %v8908_v29 = vadd.f32 %v8476_v26, %v8793_v4  ;;  %v8921_v54 = vpop.trf.xlu1 }
 0x2da   : > { %12268 = vst [vmem:[#allocation56_spill] sm:$0xff] %v8899_v42  ;;  %vm1747_vm13 = vcmp.eq.f32.partialorder %v8595_v44, %v1590_v5  ;;  %v2098_v43 = vsel %vm2097_vm12, %v1873_v60, %v1874_v30  ;;  %v1638_v3 = vmin.f32 %v1637_v48, %v8899_v42  ;;  %v8927_v44 = vadd.f32 %v8486_v31, %v8821_v61 }
 0x2db   : > { %2087 = vmin.xlane.f32.xlu1 %v8893_v23  ;;  %1624 = vmin.xlane.f32.xlu2 %v1623_v11  ;;  %v1875_v4 = vsel %vm1747_vm13, %v8691_v6, 512  ;;  %12269 = vst [vmem:[#allocation57_spill] sm:$0xff] %v8921_v54  ;;  %v1631_v13 = vmin.f32 %v8908_v29, %v8912_v55  ;;  %vm1748_vm1 = vcmp.eq.f32.partialorder %v8598_v45, %v1590_v5 }
 0x2dc   : > { %vm2099_vm0 = vcmp.lt.s32.totalorder %v2098_v43, %v1875_v4  ;;  %v8933_v60 = vadd.f32 %v8488_v32, %v8843_v57  ;;  %v1876_v61 = vsel %vm1748_vm1, %v8699_v12, 512 }
 0x2dd   : > { %v1632_v30 = vmin.f32 %v1631_v13, %v8927_v44 }
 0x2de   : > { %v1595_v35 = vpop.xlane.xlu2 %1594 }
 0x2df   : > { %vm1749_vm14 = vcmp.eq.f32.partialorder %v8602_v0, %v1595_v35  ;;  %vm1750_vm15 = vcmp.eq.f32.partialorder %v8605_v1, %v1595_v35  ;;  %v1628_v0 = vmin.f32 %v1627_v38, %v8903_v9  ;;  %v2100_v1 = vsel %vm2099_vm0, %v2098_v43, %v1875_v4 }
 0x2e0   : > { %v1877_v17 = vsel %vm1749_vm14, %v8683_v27, 512  ;;  %v1878_v11 = vsel %vm1750_vm15, %v8688_v50, 512  ;;  %vm1751_vm3 = vcmp.eq.f32.partialorder %v8611_v25, %v1595_v35  ;;  %vm2101_vm6 = vcmp.lt.s32.totalorder %v2100_v1, %v1876_v61 }
 0x2e1   : > { %vm2117_vm2 = vcmp.lt.s32.totalorder %v1877_v17, %v1878_v11  ;;  %v1879_v57 = vsel %vm1751_vm3, %v8691_v6, 512  ;;  %v8943_v38 = vpop.trf.xlu1  ;;  %v1633_v43 = vmin.f32 %v1632_v30, %v8933_v60  ;;  %vm1752_vm8 = vcmp.eq.f32.partialorder %v8614_v34, %v1595_v35 }
 0x2e2   : > { %v2118_v42 = vsel %vm2117_vm2, %v1877_v17, %v1878_v11  ;;  %12270 = vst [vmem:[#allocation58_spill] sm:$0xff] %v8943_v38  ;;  %v866_v25 = vpack.c.bf16 %v8943_v38, %v8921_v54  ;;  %v1880_v11 = vsel %vm1752_vm8, %v8699_v12, 512 }
 0x2e3   : > { %1629 = vmin.xlane.f32.xlu2 %v1628_v0  ;;  %1639 = vmin.xlane.f32.xlu1 %v1638_v3  ;;  %vm2119_vm7 = vcmp.lt.s32.totalorder %v2118_v42, %v1879_v57  ;;  %v8948_v3 = vsel %vm2101_vm6, %v2100_v1, %v1876_v61 }
 0x2e4   : > { %1308 = vmatmul.bf16.gmra.mxu2 %v866_v25  ;;  %1397 = vmatmul.bf16.gmra.mxu3 %v866_v25 }
 0x2e5   : > { %1130 = vmatmul.bf16.gmra.mxu0 %v866_v25  ;;  %1219 = vmatmul.bf16.gmra.mxu1 %v866_v25 }
 0x2e6   : > { %v1600_v48 = vpop.xlane.xlu2 %1599 }
 0x2e7   : > { %vm1753_vm4 = vcmp.eq.f32.partialorder %v8617_v41, %v1600_v48  ;;  %vm1754_vm5 = vcmp.eq.f32.partialorder %v8620_v47, %v1600_v48  ;;  %v2120_v41 = vsel %vm2119_vm7, %v2118_v42, %v1879_v57  ;;  %v2104_v47 = vshra.s32 %v8948_v3, 16 }
 0x2e8   : > { %v1881_v45 = vsel %vm1753_vm4, %v8683_v27, 512  ;;  %v1882_v5 = vsel %vm1754_vm5, %v8688_v50, 512  ;;  %vm1755_vm10 = vcmp.eq.f32.partialorder %v8627_v39, %v1600_v48  ;;  %vm2121_vm13 = vcmp.lt.s32.totalorder %v2120_v41, %v1880_v11 }
 0x2e9   : > { %vm2137_vm9 = vcmp.lt.s32.totalorder %v1881_v45, %v1882_v5  ;;  %v1883_v35 = vsel %vm1755_vm10, %v8691_v6, 512  ;;  %v8959_v13 = vpop.trf.xlu1  ;;  %v8961_v0 = vcvt.s32.f32 %v2104_v47  ;;  %v8963_v39 = vsel %vm2121_vm13, %v2120_v41, %v1880_v11 }
 0x2ea   : > { %v2138_v4 = vsel %vm2137_vm9, %v1881_v45, %v1882_v5  ;;  %12271 = vst [vmem:[#allocation59_spill] sm:$0xff] %v8959_v13  ;;  %vm1756_vm15 = vcmp.eq.f32.partialorder %v8630_v10, %v1600_v48 }
 0x2eb   : > { %1634 = vmin.xlane.f32.xlu2 %v1633_v43  ;;  %vm2139_vm14 = vcmp.lt.s32.totalorder %v2138_v4, %v1883_v35  ;;  %v1884_v1 = vsel %vm1756_vm15, %v8699_v12, 512 }
 0x2ee   : > { %v1605_v17 = vpop.xlane.xlu2 %1604 }
 0x2ef   : > { %vm1757_vm11 = vcmp.eq.f32.partialorder %v8634_v16, %v1605_v17  ;;  %vm1758_vm12 = vcmp.eq.f32.partialorder %v8637_v49, %v1605_v17  ;;  %v2140_v16 = vsel %vm2139_vm14, %v2138_v4, %v1883_v35  ;;  %v2124_v49 = vshra.s32 %v8963_v39, 16 }
 0x2f0   : > { %v1885_v34 = vsel %vm1757_vm11, %v8683_v27, 512  ;;  %v1886_v42 = vsel %vm1758_vm12, %v8688_v50, 512  ;;  %vm1759_vm1 = vcmp.eq.f32.partialorder %v8643_v52, %v1605_v17  ;;  %vm2141_vm2 = vcmp.lt.s32.totalorder %v2140_v16, %v1884_v1 }
 0x2f1   : > { %vm2157_vm0 = vcmp.lt.s32.totalorder %v1885_v34, %v1886_v42  ;;  %v1887_v61 = vsel %vm1759_vm1, %v8691_v6, 512  ;;  %v8971_v45 = vpop.trf.xlu1  ;;  %v8973_v5 = vcvt.s32.f32 %v2124_v49  ;;  %v8977_v48 = vsel %vm2141_vm2, %v2140_v16, %v1884_v1 }
 0x2f2   : > { %v2158_v30 = vsel %vm2157_vm0, %v1885_v34, %v1886_v42  ;;  %12272 = vst [vmem:[#allocation60_spill] sm:$0xff] %v8971_v45  ;;  %v867_v10 = vpack.c.bf16 %v8971_v45, %v8959_v13  ;;  %vm1760_vm4 = vcmp.eq.f32.partialorder %v8646_v18, %v1605_v17  ;;  %v2144_v57 = vshra.s32 %v8977_v48, 16  ;;  %v12287_v13 = vld [vmem:[#allocation48_spill] sm:$0xff] }
 0x2f3   : > { %2107 = vmin.xlane.f32.xlu2 %v8961_v0  ;;  %vm2159_vm3 = vcmp.lt.s32.totalorder %v2158_v30, %v1887_v61  ;;  %v1888_v43 = vsel %vm1760_vm4, %v8699_v12, 512  ;;  %v1983_v1 = vand.u32 65535, %v8712_v40  ;;  %v2023_v40 = vand.u32 65535, %v8758_v63 }
 0x2f4   : > { %1313 = vmatmul.bf16.gmra.mxu2 %v867_v10  ;;  %v2160_v52 = vsel %vm2159_vm3, %v2158_v30, %v1887_v61  ;;  %1402 = vmatmul.bf16.gmra.mxu3 %v867_v10  ;;  %v8985_v41 = vcvt.s32.f32 %v2144_v57  ;;  %v2043_v63 = vand.u32 65535, %v8788_v21 }
 0x2f5   : > { %1135 = vmatmul.bf16.gmra.mxu0 %v867_v10  ;;  %1224 = vmatmul.bf16.gmra.mxu1 %v867_v10  ;;  %vm2161_vm5 = vcmp.lt.s32.totalorder %v2160_v52, %v1888_v43  ;;  %v1985_v61 = vcvt.s32.f32 %v1983_v1  ;;  %v1113_v1 = vpop.f32.mrf.mxu0 }
 0x2f6   : > { %v8987_v47 = vsel %vm2161_vm5, %v2160_v52, %v1888_v43  ;;  %v1610_v42 = vpop.xlane.xlu2 %1609  ;;  %v2003_v52 = vand.u32 65535, %v8734_v58  ;;  %v2025_v58 = vcvt.s32.f32 %v2023_v40 }
 0x2f7   : > { %v2164_v18 = vshra.s32 %v8987_v47, 16  ;;  %vm1761_vm8 = vcmp.eq.f32.partialorder %v8649_v14, %v1610_v42  ;;  %vm1762_vm9 = vcmp.eq.f32.partialorder %v8652_v22, %v1610_v42  ;;  %vm1763_vm12 = vcmp.eq.f32.partialorder %v8659_v19, %v1610_v42  ;;  %v12277_v14 = vld [vmem:[#allocation38_spill] sm:$0xff]  ;;  %v12278_v22 = vld [vmem:[#allocation39_spill] sm:$0xff] }
 0x2f8   : > { %v2005_v43 = vcvt.s32.f32 %v2003_v52  ;;  %v1291_v52 = vpop.f32.mrf.mxu2  ;;  %v2045_v19 = vcvt.s32.f32 %v2043_v63  ;;  %v2063_v63 = vand.u32 65535, %v8829_v33 }
 0x2f9   : > { %v8983_v25 = vpop.trf.xlu1  ;;  %v8991_v17 = vcvt.s32.f32 %v2164_v18 }
 0x2fa   : > { %12273 = vst [vmem:[#allocation61_spill] sm:$0xff] %v8983_v25 }
 0x2fb   : > { %2127 = vmin.xlane.f32.xlu2 %v8973_v5 }
 0x2fe   : > { %v9004_v49 = vpop.xlane.xlu2 %1614 }
 0x2ff   : > { %vm1765_vm13 = vcmp.eq.f32.partialorder %v12277_v14, %v9004_v49  ;;  %vm1766_vm14 = vcmp.eq.f32.partialorder %v12278_v22, %v9004_v49  ;;  %v12280_v14 = vld [vmem:[#allocation37_spill] sm:$0xff] }
 0x300   : > { %v1894_v21 = vsel %vm1766_vm14, %v8688_v50, 512  ;;  %vm1764_vm1 = vcmp.eq.f32.partialorder %v12280_v14, %v1610_v42  ;;  %v2065_v42 = vcvt.s32.f32 %v2063_v63 }
 0x301   : > { %v8993_v11 = vpop.trf.xlu1 }
 0x302   : > { %12274 = vst [vmem:[#allocation62_spill] sm:$0xff] %v8993_v11  ;;  %v868_v4 = vpack.c.bf16 %v8993_v11, %v8983_v25 }
 0x303   : > { %2147 = vmin.xlane.f32.xlu2 %v8985_v41 }
 0x304   : > { %1318 = vmatmul.bf16.gmra.mxu2 %v868_v4  ;;  %1407 = vmatmul.bf16.gmra.mxu3 %v868_v4 }
 0x305   : > { %1140 = vmatmul.bf16.gmra.mxu0 %v868_v4  ;;  %1229 = vmatmul.bf16.gmra.mxu1 %v868_v4  ;;  %v1890_v4 = vsel %vm1762_vm9, %v8688_v50, 512 }
 0x309   : > { %v8998_v34 = vpop.trf.xlu1 }
 0x30a   : > { %12275 = vst [vmem:[#allocation63_spill] sm:$0xff] %v8998_v34 }
 0x30b   : > { %2167 = vmin.xlane.f32.xlu2 %v8991_v17 }
 0x311   : > { %v9000_v35 = vpop.trf.xlu1 }
 0x312   : > { %12276 = vst [vmem:[#allocation64_spill] sm:$0xff] %v9000_v35  ;;  %v869_v16 = vpack.c.bf16 %v9000_v35, %v8998_v34 }
 0x314   : > { %1323 = vmatmul.bf16.gmra.mxu2 %v869_v16  ;;  %1412 = vmatmul.bf16.gmra.mxu3 %v869_v16 }
 0x315   : > { %1145 = vmatmul.bf16.gmra.mxu0 %v869_v16  ;;  %1234 = vmatmul.bf16.gmra.mxu1 %v869_v16 }
 0x326   : > { %v9007_v30 = vpop.xlane.xlu2 %1987 }
 0x327   : > { %vm1989_vm6 = vcmp.eq.f32.partialorder %v8722_v36, %v9007_v30  ;;  %v1889_v36 = vsel %vm1761_vm8, %v8683_v27, 512 }
 0x328   : > { %v1990_v10 = vsel %vm1989_vm6, %v1985_v61, inf  ;;  %vm2177_vm11 = vcmp.lt.s32.totalorder %v1889_v36, %v1890_v4 }
 0x329   : > { %1991 = vmin.xlane.f32.xlu2 %v1990_v10  ;;  %v9032_v10 = vadd.f32 %v8476_v26, %v1113_v1  ;;  %v9045_v1 = vadd.f32 %v8486_v31, %v1291_v52  ;;  %v12281_v52 = vld [vmem:[#allocation40_spill] sm:$0xff] }
 0x32a   : > { %vm1767_vm3 = vcmp.eq.f32.partialorder %v12281_v52, %v9004_v49 }
 0x32b   : > { %v1895_v33 = vsel %vm1767_vm3, %v8691_v6, 512 }
 0x32e   : > { %v9012_v57 = vpop.xlane.xlu2 %2007 }
 0x32f   : > { %vm2009_vm7 = vcmp.eq.f32.partialorder %v8744_v7, %v9012_v57  ;;  %v1202_v7 = vpop.f32.mrf.mxu1 }
 0x330   : > { %v2010_v18 = vsel %vm2009_vm7, %v2005_v43, inf  ;;  %v2178_v43 = vsel %vm2177_vm11, %v1889_v36, %v1890_v4  ;;  %v1380_v36 = vpop.f32.mrf.mxu3 }
 0x331   : > { %2011 = vmin.xlane.f32.xlu2 %v2010_v18  ;;  %v1893_v18 = vsel %vm1765_vm13, %v8683_v27, 512  ;;  %v9052_v35 = vadd.f32 %v8488_v32, %v1380_v36 }
 0x332   : > { %vm2197_vm2 = vcmp.lt.s32.totalorder %v1893_v18, %v1894_v21 }
 0x333   : > { %v2198_v11 = vsel %vm2197_vm2, %v1893_v18, %v1894_v21  ;;  %v12282_v18 = vld [vmem:[#allocation41_spill] sm:$0xff]  ;;  %v2083_v21 = vand.u32 65535, %v8877_v53 }
 0x334   : > { %vm2199_vm6 = vcmp.lt.s32.totalorder %v2198_v11, %v1895_v33  ;;  %vm1768_vm7 = vcmp.eq.f32.partialorder %v12282_v18, %v9004_v49 }
 0x335   : > { %v2200_v63 = vsel %vm2199_vm6, %v2198_v11, %v1895_v33  ;;  %v1896_v25 = vsel %vm1768_vm7, %v8699_v12, 512  ;;  %v2085_v45 = vcvt.s32.f32 %v2083_v21 }
 0x336   : > { %v9021_v16 = vpop.xlane.xlu2 %2027  ;;  %vm2201_vm8 = vcmp.lt.s32.totalorder %v2200_v63, %v1896_v25 }
 0x337   : > { %vm2029_vm10 = vcmp.eq.f32.partialorder %v8766_v59, %v9021_v16  ;;  %v9035_v59 = vadd.f32 %v8478_v28, %v1202_v7  ;;  %v12279_v7 = vld [vmem:[#allocation51_spill] sm:$0xff]  ;;  %v1205_v36 = vpop.f32.mrf.mxu1  ;;  %v9083_v33 = vsel %vm2201_vm8, %v2200_v63, %v1896_v25 }
 0x338   : > { %v2030_v61 = vsel %vm2029_vm10, %v2025_v58, inf  ;;  %v1891_v58 = vsel %vm1763_vm12, %v8691_v6, 512 }
 0x339   : > { %2031 = vmin.xlane.f32.xlu2 %v2030_v61  ;;  %v1641_v61 = vmin.f32 %v9032_v10, %v9035_v59  ;;  %vm2179_vm0 = vcmp.lt.s32.totalorder %v2178_v43, %v1891_v58 }
 0x33a   : > { %v2180_v22 = vsel %vm2179_vm0, %v2178_v43, %v1891_v58  ;;  %v1116_v58 = vpop.f32.mrf.mxu0 }
 0x33b   : > { %v1642_v34 = vmin.f32 %v1641_v61, %v9045_v1 }
 0x33d   : > { %v1643_v43 = vmin.f32 %v1642_v34, %v9052_v35  ;;  %v1294_v34 = vpop.f32.mrf.mxu2 }
 0x33e   : > { %v9039_v40 = vpop.xlane.xlu2 %2047  ;;  %v9097_v25 = vadd.f32 %v8486_v31, %v1294_v34 }
 0x33f   : > { %vm2049_vm15 = vcmp.eq.f32.partialorder %v12279_v7, %v9039_v40  ;;  %v1892_v7 = vsel %vm1764_vm1, %v8699_v12, 512 }
 0x340   : > { %v2050_v4 = vsel %vm2049_vm15, %v2045_v19, inf  ;;  %vm2181_vm4 = vcmp.lt.s32.totalorder %v2180_v22, %v1892_v7  ;;  %12285 = vst [vmem:[#allocation51_spill] sm:$0xff] %v9097_v25 }
 0x341   : > { %2051 = vmin.xlane.f32.xlu2 %v2050_v4  ;;  %v9066_v14 = vsel %vm2181_vm4, %v2180_v22, %v1892_v7  ;;  %v1383_v22 = vpop.f32.mrf.mxu3 }
 0x342   : > { %v2184_v52 = vshra.s32 %v9066_v14, 16 }
 0x344   : > { %v9079_v49 = vcvt.s32.f32 %v2184_v52 }
 0x345   : > { %v1296_v21 = vpop.f32.mrf.mxu2 }
 0x346   : > { %v9058_v19 = vpop.xlane.xlu2 %1619  ;;  %v9060_v4 = vpop.xlane.xlu0 %2067 }
 0x347   : > { %vm2069_vm5 = vcmp.eq.f32.partialorder %v8845_v62, %v9060_v4  ;;  %vm1769_vm0 = vcmp.eq.f32.partialorder %v12287_v13, %v9058_v19 }
 0x348   : > { %v2070_v61 = vsel %vm2069_vm5, %v2065_v42, inf }
 0x349   : > { %1644 = vmin.xlane.f32.xlu2 %v1643_v43  ;;  %2071 = vmin.xlane.f32.xlu1 %v2070_v61  ;;  %v1118_v43 = vpop.f32.mrf.mxu0  ;;  %v2204_v61 = vshra.s32 %v9083_v33, 16  ;;  %v1385_v34 = vpop.f32.mrf.mxu3 }
 0x34b   : > { %v9102_v52 = vcvt.s32.f32 %v2204_v61  ;;  %v12288_v61 = vld [vmem:[#allocation49_spill] sm:$0xff] }
 0x34c   : > { %vm1770_vm1 = vcmp.eq.f32.partialorder %v12288_v61, %v9058_v19 }
 0x34e   : > { %v9073_v62 = vpop.xlane.xlu1 %2087  ;;  %v1625_v42 = vpop.xlane.xlu2 %1624 }
 0x34f   : > { %vm1773_vm9 = vcmp.eq.f32.partialorder %v8815_v56, %v1625_v42  ;;  %vm1774_vm10 = vcmp.eq.f32.partialorder %v8819_v15, %v1625_v42  ;;  %vm2089_vm11 = vcmp.eq.f32.partialorder %v8893_v23, %v9073_v62  ;;  %v9087_v15 = vadd.f32 %v8476_v26, %v1116_v58  ;;  %v1207_v23 = vpop.f32.mrf.mxu1 }
 0x350   : > { %v1901_v53 = vsel %vm1773_vm9, %v8683_v27, 512  ;;  %v1902_v11 = vsel %vm1774_vm10, %v8688_v50, 512  ;;  %v2090_v7 = vsel %vm2089_vm11, %v2085_v45, inf  ;;  %v9090_v56 = vadd.f32 %v8478_v28, %v1205_v36 }
 0x351   : > { %2091 = vmin.xlane.f32.xlu2 %v2090_v7  ;;  %2187 = vmin.xlane.f32.xlu1 %v9079_v49  ;;  %vm2237_vm12 = vcmp.lt.s32.totalorder %v1901_v53, %v1902_v11  ;;  %12283 = vst [vmem:[#allocation38_spill] sm:$0xff] %v9087_v15  ;;  %vm1775_vm13 = vcmp.eq.f32.partialorder %v8839_v51, %v1625_v42  ;;  %v1121_v36 = vpop.f32.mrf.mxu0 }
 0x352   : > { %12284 = vst [vmem:[#allocation39_spill] sm:$0xff] %v9090_v56  ;;  %v2238_v18 = vsel %vm2237_vm12, %v1901_v53, %v1902_v11  ;;  %v1646_v45 = vmin.f32 %v9087_v15, %v9090_v56  ;;  %v1903_v58 = vsel %vm1775_vm13, %v8691_v6, 512  ;;  %vm1776_vm15 = vcmp.eq.f32.partialorder %v8861_v24, %v1625_v42  ;;  %v1299_v42 = vpop.f32.mrf.mxu2 }
 0x353   : > { %vm2239_vm14 = vcmp.lt.s32.totalorder %v2238_v18, %v1903_v58  ;;  %v9108_v53 = vadd.f32 %v8488_v32, %v1383_v22  ;;  %v1904_v38 = vsel %vm1776_vm15, %v8699_v12, 512  ;;  %v1898_v22 = vsel %vm1770_vm1, %v8688_v50, 512 }
 0x354   : > { %v1647_v51 = vmin.f32 %v1646_v45, %v9097_v25  ;;  %v2240_v7 = vsel %vm2239_vm14, %v2238_v18, %v1903_v58  ;;  %v1897_v45 = vsel %vm1769_vm0, %v8683_v27, 512  ;;  %v9125_v61 = vadd.f32 %v8476_v26, %v1121_v36  ;;  %v1388_v25 = vpop.f32.mrf.mxu3 }
 0x355   : > { %12286 = vst [vmem:[#allocation37_spill] sm:$0xff] %v9108_v53  ;;  %vm2241_vm2 = vcmp.lt.s32.totalorder %v2240_v7, %v1904_v38  ;;  %vm2217_vm6 = vcmp.lt.s32.totalorder %v1897_v45, %v1898_v22  ;;  %v9153_v56 = vadd.f32 %v8486_v31, %v1296_v21 }
 0x356   : > { %v9099_v63 = vpop.xlane.xlu2 %1629  ;;  %v1648_v24 = vmin.f32 %v1647_v51, %v9108_v53  ;;  %v9122_v58 = vsel %vm2241_vm2, %v2240_v7, %v1904_v38  ;;  %v9131_v53 = vadd.f32 %v8476_v26, %v1118_v43 }
 0x357   : > { %v1210_v11 = vpop.f32.mrf.mxu1  ;;  %12289 = vst [vmem:[#allocation40_spill] sm:$0xff] %v9122_v58  ;;  %v2244_v38 = vshra.s32 %v9122_v58, 16  ;;  %vm1777_vm14 = vcmp.eq.f32.partialorder %v8868_v37, %v9099_v63  ;;  %vm1778_vm15 = vcmp.eq.f32.partialorder %v8872_v46, %v9099_v63  ;;  %v6702_v37 = vld [vmem:[%s12295_s3 + $0x28] sm:$0xff] }
 0x358   : > { %v9128_v51 = vadd.f32 %v8478_v28, %v1210_v11  ;;  %12293 = vst [vmem:[#allocation49_spill] sm:$0xff] %v9153_v56  ;;  %v6710_v46 = vld [vmem:[%s12295_s3 + $0x68] sm:$0xff] }
 0x359   : > { %2207 = vmin.xlane.f32.xlu2 %v9102_v52  ;;  %v9138_v7 = vpop.f32.mrf.mxu0 }
 0x35a   : > { %12290 = vst [vmem:[#allocation41_spill] sm:$0xff] %v9128_v51  ;;  %v1656_v43 = vmin.f32 %v9125_v61, %v9128_v51  ;;  %v6719_v51 = vld [vmem:[%s12295_s3 + $0xb0] sm:$0xff] }
 0x35e   : > { %v1635_v54 = vpop.xlane.xlu2 %1634 }
 0x35f   : > { %vm1781_vm3 = vcmp.eq.f32.partialorder %v8908_v29, %v1635_v54  ;;  %vm1782_vm4 = vcmp.eq.f32.partialorder %v8912_v55, %v1635_v54  ;;  %v9134_v29 = vadd.f32 %v8478_v28, %v1207_v23  ;;  %v2103_v55 = vand.u32 65535, %v8948_v3  ;;  %v9141_v36 = vpop.f32.mrf.mxu1 }
 0x360   : > { %v1909_v13 = vsel %vm1781_vm3, %v8683_v27, 512  ;;  %v1910_v18 = vsel %vm1782_vm4, %v8688_v50, 512  ;;  %vm1783_vm7 = vcmp.eq.f32.partialorder %v8927_v44, %v1635_v54  ;;  %v9148_v23 = vadd.f32 %v8486_v31, %v1299_v42 }
 0x361   : > { %1649 = vmin.xlane.f32.xlu2 %v1648_v24  ;;  %vm2277_vm5 = vcmp.lt.s32.totalorder %v1909_v13, %v1910_v18  ;;  %v12291_v24 = vld [vmem:[#allocation50_spill] sm:$0xff]  ;;  %v2218_v3 = vsel %vm2217_vm6, %v1897_v45, %v1898_v22  ;;  %v1651_v58 = vmin.f32 %v9131_v53, %v9134_v29  ;;  %v2105_v15 = vcvt.s32.f32 %v2103_v55  ;;  %v9163_v22 = vpop.f32.mrf.mxu2 }
 0x362   : > { %v2278_v11 = vsel %vm2277_vm5, %v1909_v13, %v1910_v18  ;;  %vm1771_vm8 = vcmp.eq.f32.partialorder %v12291_v24, %v9058_v19  ;;  %12292 = vst [vmem:[#allocation48_spill] sm:$0xff] %v9148_v23  ;;  %v1911_v13 = vsel %vm1783_vm7, %v8691_v6, 512  ;;  %v9160_v18 = vcvt.s32.f32 %v2244_v38  ;;  %v12294_v24 = vld [vmem:[#allocation53_spill] sm:$0xff] }
 0x363   : > { %vm2279_vm10 = vcmp.lt.s32.totalorder %v2278_v11, %v1911_v13  ;;  %v1899_v42 = vsel %vm1771_vm8, %v8691_v6, 512  ;;  %v1657_v21 = vmin.f32 %v1656_v43, %v9148_v23  ;;  %v9168_v55 = vadd.f32 %v8488_v32, %v1388_v25  ;;  %v6720_v25 = vld [vmem:[%s12295_s3 + $0xb8] sm:$0xff]  ;;  %v9194_v43 = vpop.f32.mrf.mxu3 }
 0x364   : > { %vm2219_vm11 = vcmp.lt.s32.totalorder %v2218_v3, %v1899_v42  ;;  %vm1784_vm12 = vcmp.eq.f32.partialorder %v8933_v60, %v1635_v54  ;;  %v2280_v38 = vsel %vm2279_vm10, %v2278_v11, %v1911_v13  ;;  %vm1772_vm13 = vcmp.eq.f32.partialorder %v12294_v24, %v9058_v19  ;;  %v6728_v11 = vld [vmem:[%s12295_s3 + $0xf8] sm:$0xff]  ;;  %3947 = vmatpush.bf16.msrb.mxu2 %v6720_v25 }
 0x365   : > { %v9184_v54 = vadd.f32 %v8488_v32, %v1385_v34  ;;  %v1652_v60 = vmin.f32 %v1651_v58, %v9153_v56  ;;  %v1912_v13 = vsel %vm1784_vm12, %v8699_v12, 512  ;;  %v6703_v34 = vld [vmem:[%s12295_s3 + $0x30] sm:$0xff]  ;;  %v1900_v23 = vsel %vm1772_vm13, %v8699_v12, 512  ;;  %4036 = vmatpush.bf16.msrb.mxu3 %v6728_v11 }
 0x366   : > { %v9155_v44 = vpop.xlane.xlu2 %2107  ;;  %v6711_v58 = vld [vmem:[%s12295_s3 + $0x70] sm:$0xff]  ;;  %vm2281_vm0 = vcmp.lt.s32.totalorder %v2280_v38, %v1912_v13  ;;  %v1906_v19 = vsel %vm1778_vm15, %v8688_v50, 512  ;;  %vm1779_vm4 = vcmp.eq.f32.partialorder %v8891_v20, %v9099_v63  ;;  %vm1780_vm7 = vcmp.eq.f32.partialorder %v8903_v9, %v9099_v63 }
 0x367   : > { %vm2109_vm9 = vcmp.eq.f32.partialorder %v8961_v0, %v9155_v44  ;;  %v2123_v0 = vand.u32 65535, %v8963_v39  ;;  %v2220_v39 = vsel %vm2219_vm11, %v2218_v3, %v1899_v42  ;;  %v1658_v3 = vmin.f32 %v1657_v21, %v9168_v55  ;;  %v1126_v42 = vpop.f32.mrf.mxu0  ;;  %v1215_v56 = vpop.f32.mrf.mxu1 }
 0x368   : > { %v2110_v45 = vsel %vm2109_vm9, %v2105_v15, inf  ;;  %v6704_v15 = vld [vmem:[%s12295_s3 + $0x38] sm:$0xff]  ;;  %vm2221_vm1 = vcmp.lt.s32.totalorder %v2220_v39, %v1900_v23  ;;  %v1905_v21 = vsel %vm1777_vm14, %v8683_v27, 512  ;;  %v1653_v24 = vmin.f32 %v1652_v60, %v9184_v54  ;;  %3948 = vmatpush.bf16.msrb.mxu2 %v6719_v51 }
 0x369   : > { %2111 = vmin.xlane.f32.xlu0 %v2110_v45  ;;  %2247 = vmin.xlane.f32.xlu2 %v9160_v18  ;;  %v6712_v45 = vld [vmem:[%s12295_s3 + $0x78] sm:$0xff]  ;;  %v9227_v11 = vsel %vm2281_vm0, %v2280_v38, %v1912_v13  ;;  %v9239_v60 = vadd.f32 %v8478_v28, %v1215_v56  ;;  %v9242_v38 = vsel %vm2221_vm1, %v2220_v39, %v1900_v23  ;;  %v2143_v13 = vand.u32 65535, %v8977_v48  ;;  %v6726_v48 = vld [vmem:[%s12295_s3 + $0xe8] sm:$0xff] }
 0x36a   : > { %3769 = vmatpush.bf16.msrb.mxu0 %v6704_v15  ;;  %3858 = vmatpush.bf16.msrb.mxu1 %v6712_v45  ;;  %v2125_v45 = vcvt.s32.f32 %v2123_v0  ;;  %v6727_v0 = vld [vmem:[%s12295_s3 + $0xf0] sm:$0xff]  ;;  %vm2257_vm3 = vcmp.lt.s32.totalorder %v1905_v21, %v1906_v19  ;;  %v9254_v56 = vadd.f32 %v8478_v28, %v9141_v36  ;;  %v2284_v23 = vshra.s32 %v9227_v11, 16 }
 0x36b   : > { %12297 = vst [vmem:[#allocation53_spill] sm:$0xff] %v9239_v60  ;;  %4037 = vmatpush.bf16.msrb.mxu3 %v6727_v0  ;;  %v2224_v51 = vshra.s32 %v9242_v38, 16  ;;  %v2258_v39 = vsel %vm2257_vm3, %v1905_v21, %v1906_v19  ;;  %v1393_v0 = vpop.f32.mrf.mxu3 }
 0x36d   : > { %v9281_v19 = vcvt.s32.f32 %v2224_v51 }
 0x36e   : > { %v9208_v15 = vpop.xlane.xlu2 %2127  ;;  %3770 = vmatpush.bf16.msrb.mxu0 %v6703_v34  ;;  %3859 = vmatpush.bf16.msrb.mxu1 %v6711_v58  ;;  %v1304_v34 = vpop.f32.mrf.mxu2  ;;  %v6718_v58 = vld [vmem:[%s12295_s3 + $0xa8] sm:$0xff] }
 0x36f   : > { %vm2129_vm2 = vcmp.eq.f32.partialorder %v8973_v5, %v9208_v15  ;;  %v9236_v5 = vadd.f32 %v8476_v26, %v1126_v42  ;;  %v9266_v36 = vadd.f32 %v8486_v31, %v1304_v34  ;;  %v9270_v42 = vadd.f32 %v8486_v31, %v9163_v22  ;;  %3949 = vmatpush.bf16.msrb.mxu2 %v6718_v58 }
 0x370   : > { %v2130_v25 = vsel %vm2129_vm2, %v2125_v45, inf  ;;  %4038 = vmatpush.bf16.msrb.mxu3 %v6726_v48  ;;  %v1908_v48 = vsel %vm1780_vm7, %v8699_v12, 512 }
 0x371   : > { %1654 = vmin.xlane.f32.xlu0 %v1653_v24  ;;  %1659 = vmin.xlane.f32.xlu2 %v1658_v3  ;;  %12296 = vst [vmem:[#allocation50_spill] sm:$0xff] %v9236_v5  ;;  %v9250_v3 = vadd.f32 %v8476_v26, %v9138_v7  ;;  %v1666_v7 = vmin.f32 %v9236_v5, %v9239_v60  ;;  %v2145_v24 = vcvt.s32.f32 %v2143_v13  ;;  %v2183_v5 = vand.u32 65535, %v9066_v14 }
 0x372   : > { %2131 = vmin.xlane.f32.xlu1 %v2130_v25  ;;  %3771 = vmatpush.bf16.msrb.mxu0 %v6702_v37  ;;  %12298 = vst [vmem:[#allocation65_spill] sm:$0xff] %v9266_v36  ;;  %v9278_v25 = vcvt.s32.f32 %v2284_v23  ;;  %v1907_v37 = vsel %vm1779_vm4, %v8691_v6, 512  ;;  %v9294_v13 = vadd.f32 %v8488_v32, %v9194_v43  ;;  %v6701_v43 = vld [vmem:[%s12295_s3 + $0x20] sm:$0xff] }
 0x373   : > { %3860 = vmatpush.bf16.msrb.mxu1 %v6710_v46  ;;  %v1661_v20 = vmin.f32 %v9250_v3, %v9254_v56  ;;  %vm2259_vm6 = vcmp.lt.s32.totalorder %v2258_v39, %v1907_v37  ;;  %v1667_v22 = vmin.f32 %v1666_v7, %v9266_v36  ;;  %v9286_v46 = vadd.f32 %v8488_v32, %v1393_v0 }
 0x374   : > { %12300 = vst [vmem:[#allocation67_spill] sm:$0xff] %v9294_v13  ;;  %v2260_v58 = vsel %vm2259_vm6, %v2258_v39, %v1907_v37  ;;  %v6709_v39 = vld [vmem:[%s12295_s3 + $0x60] sm:$0xff]  ;;  %v6708_v37 = vld [vmem:[%s12295_s3 + $0x58] sm:$0xff] }
 0x375   : > { %12299 = vst [vmem:[#allocation66_spill] sm:$0xff] %v9286_v46  ;;  %v1662_v34 = vmin.f32 %v1661_v20, %v9270_v42  ;;  %v1668_v23 = vmin.f32 %v1667_v22, %v9286_v46  ;;  %vm2261_vm8 = vcmp.lt.s32.totalorder %v2260_v58, %v1908_v48  ;;  %v6700_v20 = vld [vmem:[%s12295_s3 + $0x18] sm:$0xff] }
 0x376   : > { %v9272_v45 = vpop.xlane.xlu2 %2147  ;;  %v9304_v63 = vsel %vm2261_vm8, %v2260_v58, %v1908_v48  ;;  %3772 = vmatpush.bf16.msrb.mxu0 %v6701_v43  ;;  %v6724_v22 = vld [vmem:[%s12295_s3 + $0xd8] sm:$0xff]  ;;  %v6707_v58 = vld [vmem:[%s12295_s3 + $0x50] sm:$0xff]  ;;  %v6722_v43 = vld [vmem:[%s12295_s3 + $0xc8] sm:$0xff] }
 0x377   : > { %vm2149_vm5 = vcmp.eq.f32.partialorder %v8985_v41, %v9272_v45  ;;  %v2163_v41 = vand.u32 65535, %v8987_v47  ;;  %v1663_v47 = vmin.f32 %v1662_v34, %v9294_v13  ;;  %v2264_v0 = vshra.s32 %v9304_v63, 16  ;;  %3861 = vmatpush.bf16.msrb.mxu1 %v6709_v39  ;;  %v6699_v34 = vld [vmem:[%s12295_s3 + $0x10] sm:$0xff]  ;;  %v6697_v39 = vld [vmem:[%s12295_s3] sm:$0xff] }
 0x378   : > { %v2150_v21 = vsel %vm2149_vm5, %v2145_v24, inf  ;;  %v6717_v24 = vld [vmem:[%s12295_s3 + $0xa0] sm:$0xff]  ;;  %v6723_v48 = vld [vmem:[%s12295_s3 + $0xd0] sm:$0xff] }
 0x379   : > { %2151 = vmin.xlane.f32.xlu0 %v2150_v21  ;;  %2287 = vmin.xlane.f32.xlu2 %v9278_v25  ;;  %v2165_v7 = vcvt.s32.f32 %v2163_v41  ;;  %v6716_v21 = vld [vmem:[%s12295_s3 + $0x98] sm:$0xff]  ;;  %v9331_v41 = vcvt.s32.f32 %v2264_v0  ;;  %v6721_v0 = vld [vmem:[%s12295_s3 + $0xc0] sm:$0xff] }
 0x37a   : > { %2227 = vmin.xlane.f32.xlu1 %v9281_v19  ;;  %3950 = vmatpush.bf16.msrb.mxu2 %v6717_v24  ;;  %v6705_v24 = vld [vmem:[%s12295_s3 + $0x40] sm:$0xff] }
 0x37b   : > { %3773 = vmatpush.bf16.msrb.mxu0 %v6700_v20  ;;  %3862 = vmatpush.bf16.msrb.mxu1 %v6708_v37  ;;  %v1994_v20 = vcvt.f32.s32 %v9007_v30 }
 0x37e   : > { %v9299_v51 = vpop.xlane.xlu2 %2167  ;;  %3951 = vmatpush.bf16.msrb.mxu2 %v6716_v21  ;;  %v1995_v21 = vshll.u32 %v1994_v20, 16 }
 0x37f   : > { %vm2169_vm9 = vcmp.eq.f32.partialorder %v8991_v17, %v9299_v51  ;;  %v6725_v17 = vld [vmem:[%s12295_s3 + $0xe0] sm:$0xff]  ;;  %3774 = vmatpush.bf16.msrb.mxu0 %v6699_v34  ;;  %3863 = vmatpush.bf16.msrb.mxu1 %v6707_v58  ;;  %v2014_v58 = vcvt.f32.s32 %v9012_v57 }
 0x380   : > { %v2170_v9 = vsel %vm2169_vm9, %v2165_v7, inf  ;;  %4039 = vmatpush.bf16.msrb.mxu3 %v6725_v17  ;;  %v6698_v7 = vld [vmem:[%s12295_s3 + $0x8] sm:$0xff]  ;;  %v6713_v17 = vld [vmem:[%s12295_s3 + $0x80] sm:$0xff] }
 0x381   : > { %1664 = vmin.xlane.f32.xlu0 %v1663_v47  ;;  %1669 = vmin.xlane.f32.xlu2 %v1668_v23  ;;  %v6715_v23 = vld [vmem:[%s12295_s3 + $0x90] sm:$0xff]  ;;  %v6706_v47 = vld [vmem:[%s12295_s3 + $0x48] sm:$0xff] }
 0x382   : > { %2171 = vmin.xlane.f32.xlu1 %v2170_v9  ;;  %3952 = vmatpush.bf16.msrb.mxu2 %v6715_v23  ;;  %v6714_v9 = vld [vmem:[%s12295_s3 + $0x88] sm:$0xff]  ;;  %v9377_v23 = vpop.xlane.xlu1 %1639 }
 0x383   : > { %3775 = vmatpush.bf16.msrb.mxu0 %v6698_v7  ;;  %3864 = vmatpush.bf16.msrb.mxu1 %v6706_v47  ;;  %vm1785_vm14 = vcmp.eq.f32.partialorder %v8850_v8, %v9377_v23  ;;  %vm1786_vm15 = vcmp.eq.f32.partialorder %v8853_v2, %v9377_v23 }
 0x384   : > { %4040 = vmatpush.bf16.msrb.mxu3 %v6724_v22 }
 0x386   : > { %3953 = vmatpush.bf16.msrb.mxu2 %v6714_v9 }
 0x387   : > { %3776 = vmatpush.bf16.msrb.mxu0 %v6697_v39  ;;  %3865 = vmatpush.bf16.msrb.mxu1 %v6705_v24  ;;  %v2015_v24 = vshll.u32 %v2014_v58, 16 }
 0x388   : > { %4041 = vmatpush.bf16.msrb.mxu3 %v6723_v48  ;;  %v12116_v48 = vmov 0.0  }
 0x38a   : > { %2267 = vmin.xlane.f32.xlu1 %v9331_v41  ;;  %3954 = vmatpush.bf16.msrb.mxu2 %v6713_v17 }
 0x38c   : > { %4042 = vmatpush.bf16.msrb.mxu3 %v6722_v43 }
 0x390   : > { %4043 = vmatpush.bf16.msrb.mxu3 %v6721_v0  ;;  %v2034_v0 = vcvt.f32.s32 %v9021_v16 }
 0x39c   : > { %v1992_v37 = vpop.xlane.xlu2 %1991 }
 0x39d   : > { %v1993_v22 = vcvt.f32.s32 %v1992_v37  ;;  %v1913_v37 = vsel %vm1785_vm14, %v8683_v27, 512 }
 0x39f   : > { %v1996_v34 = vadd.s32 %v1995_v21, %v1993_v22  ;;  %v1914_v21 = vsel %vm1786_vm15, %v8688_v50, 512 }
 0x3a0   : > { %vm2297_vm4 = vcmp.lt.s32.totalorder %v1913_v37, %v1914_v21 }
 0x3a1   : > { %vm2617_vm10 = vcmp.eq.s32.totalorder %v8683_v27, %v1996_v34  ;;  %vm2618_vm11 = vcmp.eq.s32.totalorder %v8688_v50, %v1996_v34  ;;  %vm2619_vm12 = vcmp.eq.s32.totalorder %v8691_v6, %v1996_v34  ;;  %vm2620_vm13 = vcmp.eq.s32.totalorder %v8699_v12, %v1996_v34 }
 0x3a2   : > { %v6182_v30 = vsel %vm2617_vm10, 1.0, %v12116_v48  ;;  %v6183_v7 = vsel %vm2618_vm11, 1.0, %v12116_v48  ;;  %v6184_v47 = vsel %vm2619_vm12, 1.0, %v12116_v48  ;;  %v6185_v9 = vsel %vm2620_vm13, 1.0, %v12116_v48 }
 0x3a3   : > { %v3001_v57 = vpack.c.bf16 %v6183_v7, %v6182_v30  ;;  %v3002_v43 = vpack.c.bf16 %v6185_v9, %v6184_v47  ;;  %v2035_v34 = vshll.u32 %v2034_v0, 16 }
 0x3a4   : > { %v2012_v39 = vpop.xlane.xlu2 %2011 }
 0x3a5   : > { %3065 = vst [vmem:[%s9387_s25] sm:$0xff] %v3001_v57  ;;  %v2013_v17 = vcvt.f32.s32 %v2012_v39  ;;  %v3321_v47 = vunpack.c.l.b16 %v3001_v57  ;;  %v3322_v9 = vunpack.c.h.b16 %v3001_v57  ;;  %v3323_v39 = vunpack.c.l.b16 %v3002_v43 }
 0x3a6   : > { %3066 = vst [vmem:[%s9387_s25 + $0x8] sm:$0xff] %v3002_v43  ;;  %v3324_v36 = vunpack.c.h.b16 %v3002_v43  ;;  %v2054_v57 = vcvt.f32.s32 %v9039_v40  ;;  %v2298_v43 = vsel %vm2297_vm4, %v1913_v37, %v1914_v21  ;;  %v12306_v40 = vmov 0.0  }
 0x3a7   : > { %v2016_v20 = vadd.s32 %v2015_v24, %v2013_v17  ;;  %v2074_v37 = vcvt.f32.s32 %v9060_v4  ;;  %v9442_v4 = vcvt.s32.f32 %v2183_v5 }
 0x3a9   : > { %vm2621_vm0 = vcmp.eq.s32.totalorder %v8683_v27, %v2016_v20  ;;  %vm2622_vm1 = vcmp.eq.s32.totalorder %v8688_v50, %v2016_v20  ;;  %vm2623_vm2 = vcmp.eq.s32.totalorder %v8691_v6, %v2016_v20  ;;  %vm2624_vm3 = vcmp.eq.s32.totalorder %v8699_v12, %v2016_v20 }
 0x3aa   : > { %v6186_v8 = vsel %vm2621_vm0, 1.0, %v12116_v48  ;;  %v6187_v2 = vsel %vm2622_vm1, 1.0, %v12116_v48  ;;  %v6188_v16 = vsel %vm2623_vm2, 1.0, %v12116_v48  ;;  %v6189_v22 = vsel %vm2624_vm3, 1.0, %v12116_v48 }
 0x3ab   : > { %v3003_v58 = vpack.c.bf16 %v6187_v2, %v6186_v8  ;;  %v3004_v30 = vpack.c.bf16 %v6189_v22, %v6188_v16  ;;  %v12304_v2 = vld [vmem:[#allocation55_spill] sm:$0xff]  ;;  %v1128_v16 = vpop.f32.mrf.mxu0 }
 0x3ac   : > { %v2032_v7 = vpop.xlane.xlu2 %2031  ;;  %vm1787_vm5 = vcmp.eq.f32.partialorder %v12304_v2, %v9377_v23  ;;  %v9448_v2 = vadd.f32 %v8476_v26, %v1128_v16 }
 0x3ad   : > { %3067 = vst [vmem:[%s9387_s25 + $0x10] sm:$0xff] %v3003_v58  ;;  %v2033_v24 = vcvt.f32.s32 %v2032_v7  ;;  %v3325_v17 = vunpack.c.l.b16 %v3003_v58  ;;  %v3326_v20 = vunpack.c.h.b16 %v3003_v58  ;;  %v3327_v46 = vunpack.c.l.b16 %v3004_v30  ;;  %v1217_v58 = vpop.f32.mrf.mxu1 }
 0x3ae   : > { %3068 = vst [vmem:[%s9387_s25 + $0x18] sm:$0xff] %v3004_v30  ;;  %v3328_v60 = vunpack.c.h.b16 %v3004_v30  ;;  %v1915_v30 = vsel %vm1787_vm5, %v8691_v6, 512 }
 0x3af   : > { %v2036_v13 = vadd.s32 %v2035_v34, %v2033_v24  ;;  %v9405_v48 = vpack.c.b16 %v3325_v17, %v3321_v47  ;;  %v9407_v0 = vpack.c.b16 %v3326_v20, %v3322_v9  ;;  %v9409_v8 = vpack.c.b16 %v3327_v46, %v3323_v39  ;;  %v12307_v9 = vld [vmem:[#allocation56_spill] sm:$0xff] }
 0x3b0   : > { %v9414_v22 = vpack.c.b16 %v3328_v60, %v3324_v36  ;;  %v2055_v47 = vshll.u32 %v2054_v57, 16  ;;  %vm1788_vm10 = vcmp.eq.f32.partialorder %v12307_v9, %v9377_v23  ;;  %vm2299_vm11 = vcmp.lt.s32.totalorder %v2298_v43, %v1915_v30  ;;  %v1306_v23 = vpop.f32.mrf.mxu2 }
 0x3b1   : > { %12301 = vst [vmem:[#allocation68_spill] sm:$0xff] %v9405_v48  ;;  %vm2625_vm6 = vcmp.eq.s32.totalorder %v8683_v27, %v2036_v13  ;;  %vm2626_vm7 = vcmp.eq.s32.totalorder %v8688_v50, %v2036_v13  ;;  %vm2627_vm8 = vcmp.eq.s32.totalorder %v8691_v6, %v2036_v13  ;;  %vm2628_vm9 = vcmp.eq.s32.totalorder %v8699_v12, %v2036_v13 }
 0x3b2   : > { %12302 = vst [vmem:[#allocation69_spill] sm:$0xff] %v9407_v0  ;;  %3777 = vmatmul.bf16.vlgmr.msrb.gmra.mxu0 %v9405_v48  ;;  %3866 = vmatmul.bf16.vlgmr.msrb.gmra.mxu1 %v9407_v0  ;;  %v6190_v14 = vsel %vm2625_vm6, 1.0, %v12306_v40  ;;  %v6191_v60 = vsel %vm2626_vm7, 1.0, %v12306_v40  ;;  %v6192_v36 = vsel %vm2627_vm8, 1.0, %v12306_v40  ;;  %v6193_v46 = vsel %vm2628_vm9, 1.0, %v12306_v40 }
 0x3b3   : > { %12303 = vst [vmem:[#allocation70_spill] sm:$0xff] %v9409_v8  ;;  %3955 = vmatmul.bf16.vlgmr.msrb.gmra.mxu2 %v9409_v8  ;;  %v2094_v13 = vcvt.f32.s32 %v9073_v62  ;;  %4044 = vmatmul.bf16.vlgmr.msrb.gmra.mxu3 %v9414_v22  ;;  %v3005_v21 = vpack.c.bf16 %v6191_v60, %v6190_v14  ;;  %v9431_v34 = vpack.c.bf16 %v6193_v46, %v6192_v36  ;;  %v2075_v62 = vshll.u32 %v2074_v37, 16  ;;  %v1131_v5 = vpop.f32.mrf.mxu0 }
 0x3b4   : > { %12305 = vst [vmem:[#allocation55_spill] sm:$0xff] %v9414_v22  ;;  %v2052_v7 = vpop.xlane.xlu2 %2051  ;;  %v9451_v57 = vadd.f32 %v8478_v28, %v1217_v58  ;;  %v9454_v14 = vsel %vm1788_vm10, %v8699_v12, 512  ;;  %v9456_v60 = vsel %vm2299_vm11, %v2298_v43, %v1915_v30  ;;  %v9467_v43 = vadd.f32 %v8486_v31, %v1306_v23 }
 0x3b5   : > { %v2053_v39 = vcvt.f32.s32 %v2052_v7  ;;  %3069 = vst [vmem:[%s9387_s25 + $0x20] sm:$0xff] %v3005_v21  ;;  %v9444_v24 = vshll.u32 %v2094_v13, 16  ;;  %v9470_v37 = vadd.f32 %v8476_v26, %v1131_v5  ;;  %v1220_v13 = vpop.f32.mrf.mxu1  ;;  %v3330_v20 = vunpack.c.h.b16 %v3005_v21 }
 0x3b6   : > { %3070 = vst [vmem:[%s9387_s25 + $0x28] sm:$0xff] %v9431_v34  ;;  %v3331_v22 = vunpack.c.l.b16 %v9431_v34  ;;  %vm2301_vm2 = vcmp.lt.s32.totalorder %v9456_v60, %v9454_v14  ;;  %v3332_v0 = vunpack.c.h.b16 %v9431_v34 }
 0x3b7   : > { %v2056_v17 = vadd.s32 %v2055_v47, %v2053_v39  ;;  %v9473_v47 = vadd.f32 %v8478_v28, %v1220_v13 }
 0x3b9   : > { %vm2629_vm12 = vcmp.eq.s32.totalorder %v8683_v27, %v2056_v17  ;;  %vm2630_vm13 = vcmp.eq.s32.totalorder %v8688_v50, %v2056_v17  ;;  %vm2631_vm14 = vcmp.eq.s32.totalorder %v8691_v6, %v2056_v17  ;;  %vm2632_vm15 = vcmp.eq.s32.totalorder %v8699_v12, %v2056_v17  ;;  %12308 = vst [vmem:[#allocation56_spill] sm:$0xff] %v9473_v47 }
 0x3ba   : > { %v6194_v16 = vsel %vm2629_vm12, 1.0, %v12306_v40  ;;  %v6195_v58 = vsel %vm2630_vm13, 1.0, %v12306_v40  ;;  %v6196_v36 = vsel %vm2631_vm14, 1.0, %v12306_v40  ;;  %v6197_v46 = vsel %vm2632_vm15, 1.0, %v12306_v40 }
 0x3bb   : > { %v3007_v30 = vpack.c.bf16 %v6195_v58, %v6194_v16  ;;  %v3008_v7 = vpack.c.bf16 %v6197_v46, %v6196_v36  ;;  %v3329_v17 = vunpack.c.l.b16 %v3005_v21 }
 0x3bc   : > { %v1645_v9 = vpop.xlane.xlu2 %1644  ;;  %v2072_v39 = vpop.xlane.xlu1 %2071 }
 0x3bd   : > { %vm1789_vm0 = vcmp.eq.f32.partialorder %v9032_v10, %v1645_v9  ;;  %vm1790_vm1 = vcmp.eq.f32.partialorder %v9035_v59, %v1645_v9  ;;  %v2073_v23 = vcvt.f32.s32 %v2072_v39  ;;  %3071 = vst [vmem:[%s9387_s25 + $0x30] sm:$0xff] %v3007_v30  ;;  %v3333_v5 = vunpack.c.l.b16 %v3007_v30  ;;  %v1395_v10 = vpop.f32.mrf.mxu3 }
 0x3be   : > { %v1917_v16 = vsel %vm1789_vm0, %v8683_v27, 512  ;;  %v1918_v58 = vsel %vm1790_vm1, %v8688_v50, 512  ;;  %v3334_v36 = vunpack.c.h.b16 %v3007_v30  ;;  %3072 = vst [vmem:[%s9387_s25 + $0x38] sm:$0xff] %v3008_v7  ;;  %v3335_v46 = vunpack.c.l.b16 %v3008_v7 }
 0x3bf   : > { %v2076_v21 = vadd.s32 %v2075_v62, %v2073_v23  ;;  %v9484_v13 = vpack.c.b16 %v3333_v5, %v3329_v17  ;;  %v3336_v8 = vunpack.c.h.b16 %v3008_v7  ;;  %vm1791_vm3 = vcmp.eq.f32.partialorder %v9045_v1, %v1645_v9 }
 0x3c0   : > { %v9487_v59 = vpack.c.b16 %v3334_v36, %v3330_v20  ;;  %v9489_v39 = vpack.c.b16 %v3335_v46, %v3331_v22  ;;  %vm1792_vm4 = vcmp.eq.f32.partialorder %v9052_v35, %v1645_v9  ;;  %v1919_v22 = vsel %vm1791_vm3, %v8691_v6, 512 }
 0x3c1   : > { %12309 = vst [vmem:[#allocation71_spill] sm:$0xff] %v9484_v13  ;;  %vm2633_vm5 = vcmp.eq.s32.totalorder %v8683_v27, %v2076_v21  ;;  %vm2634_vm6 = vcmp.eq.s32.totalorder %v8688_v50, %v2076_v21  ;;  %vm2635_vm7 = vcmp.eq.s32.totalorder %v8691_v6, %v2076_v21  ;;  %vm2636_vm8 = vcmp.eq.s32.totalorder %v8699_v12, %v2076_v21  ;;  %v1309_v21 = vpop.f32.mrf.mxu2 }
 0x3c2   : > { %12310 = vst [vmem:[#allocation72_spill] sm:$0xff] %v9487_v59  ;;  %3782 = vmatmul.bf16.gmra.mxu0 %v9484_v13  ;;  %3871 = vmatmul.bf16.gmra.mxu1 %v9487_v59  ;;  %v9500_v1 = vpack.c.b16 %v3336_v8, %v3332_v0  ;;  %vm2317_vm9 = vcmp.lt.s32.totalorder %v1917_v16, %v1918_v58  ;;  %v6198_v34 = vsel %vm2633_vm5, 1.0, %v12306_v40  ;;  %v6199_v20 = vsel %vm2634_vm6, 1.0, %v12306_v40 }
 0x3c3   : > { %12311 = vst [vmem:[#allocation73_spill] sm:$0xff] %v9489_v39  ;;  %3960 = vmatmul.bf16.gmra.mxu2 %v9489_v39  ;;  %v2318_v62 = vsel %vm2317_vm9, %v1917_v16, %v1918_v58  ;;  %v6200_v30 = vsel %vm2635_vm7, 1.0, %v12306_v40  ;;  %v6201_v7 = vsel %vm2636_vm8, 1.0, %v12306_v40  ;;  %v1671_v17 = vmin.f32 %v9448_v2, %v9451_v57 }
 0x3c4   : > { %12312 = vst [vmem:[#allocation74_spill] sm:$0xff] %v9500_v1  ;;  %4049 = vmatmul.bf16.gmra.mxu3 %v9500_v1  ;;  %v2092_v0 = vpop.xlane.xlu2 %2091  ;;  %v9510_v8 = vpop.xlane.xlu1 %2187  ;;  %vm2319_vm10 = vcmp.lt.s32.totalorder %v2318_v62, %v1919_v22  ;;  %v3009_v23 = vpack.c.bf16 %v6199_v20, %v6198_v34  ;;  %v3010_v5 = vpack.c.bf16 %v6201_v7, %v6200_v30  ;;  %v1920_v58 = vsel %vm1792_vm4, %v8699_v12, 512 }
 0x3c5   : > { %v2093_v16 = vcvt.f32.s32 %v2092_v0  ;;  %vm2189_vm11 = vcmp.eq.f32.partialorder %v9079_v49, %v9510_v8  ;;  %v2320_v36 = vsel %vm2319_vm10, %v2318_v62, %v1919_v22  ;;  %v1676_v46 = vmin.f32 %v9470_v37, %v9473_v47 }
 0x3c6   : > { %v2190_v1 = vsel %vm2189_vm11, %v9442_v4, inf  ;;  %vm2321_vm12 = vcmp.lt.s32.totalorder %v2320_v36, %v1920_v58  ;;  %3073 = vst [vmem:[%s9387_s25 + $0x40] sm:$0xff] %v3009_v23  ;;  %v9522_v34 = vadd.f32 %v8486_v31, %v1309_v21  ;;  %v12314_v35 = vand.u32 65535, %v9083_v33  ;;  %v1398_v33 = vpop.f32.mrf.mxu3 }
 0x3c7   : > { %v2096_v20 = vadd.s32 %v9444_v24, %v2093_v16  ;;  %2191 = vmin.xlane.f32.xlu0 %v2190_v1  ;;  %v9525_v49 = vsel %vm2321_vm12, %v2320_v36, %v1920_v58  ;;  %3074 = vst [vmem:[%s9387_s25 + $0x48] sm:$0xff] %v3010_v5  ;;  %v9531_v22 = vadd.f32 %v8488_v32, %v1395_v10  ;;  %v3337_v36 = vunpack.c.l.b16 %v3009_v23 }
 0x3c8   : > { %12313 = vst [vmem:[#allocation75_spill] sm:$0xff] %v9522_v34  ;;  %v2205_v9 = vcvt.s32.f32 %v12314_v35  ;;  %v2324_v62 = vshra.s32 %v9525_v49, 16  ;;  %v1672_v4 = vmin.f32 %v1671_v17, %v9467_v43  ;;  %v9540_v24 = vsel %vm2301_vm2, %v9456_v60, %v9454_v14  ;;  %v1133_v35 = vpop.f32.mrf.mxu0 }
 0x3c9   : > { %vm2637_vm13 = vcmp.eq.s32.totalorder %v8683_v27, %v2096_v20  ;;  %vm2638_vm14 = vcmp.eq.s32.totalorder %v8688_v50, %v2096_v20  ;;  %vm2639_vm15 = vcmp.eq.s32.totalorder %v8691_v6, %v2096_v20  ;;  %vm2640_vm0 = vcmp.eq.s32.totalorder %v8699_v12, %v2096_v20 }
 0x3ca   : > { %v9546_v10 = vcvt.s32.f32 %v2324_v62  ;;  %v6202_v1 = vsel %vm2637_vm13, 1.0, %v12306_v40  ;;  %v6203_v30 = vsel %vm2638_vm14, 1.0, %v12306_v40  ;;  %v6204_v7 = vsel %vm2639_vm15, 1.0, %v12306_v40  ;;  %v1222_v62 = vpop.f32.mrf.mxu1 }
 0x3cb   : > { %v1677_v14 = vmin.f32 %v1676_v46, %v9522_v34  ;;  %v9553_v60 = vadd.f32 %v8488_v32, %v1398_v33  ;;  %v3011_v17 = vpack.c.bf16 %v6203_v30, %v6202_v1  ;;  %v6205_v0 = vsel %vm2640_vm0, 1.0, %v12306_v40 }
 0x3cc   : > { %2327 = vmin.xlane.f32.xlu2 %v9546_v10  ;;  %v9557_v16 = vpop.xlane.xlu2 %2207  ;;  %v1673_v58 = vmin.f32 %v1672_v4, %v9531_v22  ;;  %v3338_v21 = vunpack.c.h.b16 %v3009_v23  ;;  %v3012_v20 = vpack.c.bf16 %v6205_v0, %v6204_v7  ;;  %v3339_v1 = vunpack.c.l.b16 %v3010_v5 }
 0x3cd   : > { %12315 = vst [vmem:[#allocation76_spill] sm:$0xff] %v9553_v60  ;;  %vm2209_vm1 = vcmp.eq.f32.partialorder %v9102_v52, %v9557_v16  ;;  %v3341_v46 = vunpack.c.l.b16 %v3011_v17  ;;  %v3342_v33 = vunpack.c.h.b16 %v3011_v17  ;;  %v3340_v48 = vunpack.c.h.b16 %v3010_v5 }
 0x3ce   : > { %3075 = vst [vmem:[%s9387_s25 + $0x50] sm:$0xff] %v3011_v17  ;;  %v2210_v30 = vsel %vm2209_vm1, %v2205_v9, inf  ;;  %v3343_v39 = vunpack.c.l.b16 %v3012_v20  ;;  %v3344_v59 = vunpack.c.h.b16 %v3012_v20  ;;  %v2304_v52 = vshra.s32 %v9540_v24, 16  ;;  %v12320_v17 = vld [vmem:[#allocation38_spill] sm:$0xff] }
 0x3cf   : > { %3076 = vst [vmem:[%s9387_s25 + $0x58] sm:$0xff] %v3012_v20  ;;  %2211 = vmin.xlane.f32.xlu1 %v2210_v30  ;;  %1674 = vmin.xlane.f32.xlu0 %v1673_v58  ;;  %v9564_v4 = vpack.c.b16 %v3341_v46, %v3337_v36  ;;  %v9566_v23 = vpack.c.b16 %v3342_v33, %v3338_v21  ;;  %v12323_v20 = vld [vmem:[#allocation37_spill] sm:$0xff]  ;;  %v1311_v46 = vpop.f32.mrf.mxu2  ;;  %v12324_v33 = vld [vmem:[#allocation40_spill] sm:$0xff]  ;;  %v2263_v13 = vand.u32 65535, %v9304_v63 }
 0x3d0   : > { %v9568_v7 = vpack.c.b16 %v3343_v39, %v3339_v1  ;;  %v9570_v0 = vpack.c.b16 %v3344_v59, %v3340_v48  ;;  %v1678_v9 = vmin.f32 %v1677_v14, %v9553_v60  ;;  %v12321_v39 = vld [vmem:[#allocation39_spill] sm:$0xff]  ;;  %v9580_v48 = vcvt.s32.f32 %v2304_v52  ;;  %v1136_v36 = vpop.f32.mrf.mxu0 }
 0x3d1   : > { %12316 = vst [vmem:[#allocation77_spill] sm:$0xff] %v9564_v4  ;;  %v12322_v59 = vld [vmem:[#allocation51_spill] sm:$0xff]  ;;  %v2243_v1 = vand.u32 65535, %v12324_v33 }
 0x3d2   : > { %12317 = vst [vmem:[#allocation78_spill] sm:$0xff] %v9566_v23  ;;  %3787 = vmatmul.bf16.gmra.mxu0 %v9564_v4  ;;  %3876 = vmatmul.bf16.gmra.mxu1 %v9566_v23  ;;  %v1225_v21 = vpop.f32.mrf.mxu1  ;;  %v2154_v23 = vcvt.f32.s32 %v9272_v45 }
 0x3d3   : > { %12318 = vst [vmem:[#allocation79_spill] sm:$0xff] %v9568_v7  ;;  %3965 = vmatmul.bf16.gmra.mxu2 %v9568_v7  ;;  %v2245_v7 = vcvt.s32.f32 %v2243_v1 }
 0x3d4   : > { %12319 = vst [vmem:[#allocation80_spill] sm:$0xff] %v9570_v0  ;;  %1679 = vmin.xlane.f32.xlu2 %v1678_v9  ;;  %4054 = vmatmul.bf16.gmra.mxu3 %v9570_v0  ;;  %v1650_v5 = vpop.xlane.xlu2 %1649  ;;  %v2114_v9 = vcvt.f32.s32 %v9155_v44  ;;  %v9595_v0 = vadd.f32 %v8478_v28, %v1222_v62  ;;  %v2283_v62 = vand.u32 65535, %v9227_v11  ;;  %v9620_v11 = vadd.f32 %v8478_v28, %v1225_v21 }
 0x3d5   : > { %vm1793_vm2 = vcmp.eq.f32.partialorder %v12320_v17, %v1650_v5  ;;  %vm1794_vm3 = vcmp.eq.f32.partialorder %v12321_v39, %v1650_v5  ;;  %vm1795_vm4 = vcmp.eq.f32.partialorder %v12322_v59, %v1650_v5  ;;  %vm1796_vm5 = vcmp.eq.f32.partialorder %v12323_v20, %v1650_v5  ;;  %v1400_v5 = vpop.f32.mrf.mxu3 }
 0x3d6   : > { %v1921_v58 = vsel %vm1793_vm2, %v8683_v27, 512  ;;  %v1922_v14 = vsel %vm1794_vm3, %v8688_v50, 512  ;;  %v1923_v30 = vsel %vm1795_vm4, %v8691_v6, 512  ;;  %v1924_v17 = vsel %vm1796_vm5, %v8699_v12, 512  ;;  %12326 = vst [vmem:[#allocation39_spill] sm:$0xff] %v9595_v0 }
 0x3d7   : > { %2307 = vmin.xlane.f32.xlu1 %v9580_v48  ;;  %vm2337_vm6 = vcmp.lt.s32.totalorder %v1921_v58, %v1922_v14  ;;  %v9592_v59 = vadd.f32 %v8476_v26, %v1133_v35  ;;  %v2134_v35 = vcvt.f32.s32 %v9208_v15  ;;  %v9617_v15 = vadd.f32 %v8476_v26, %v1136_v36  ;;  %12330 = vst [vmem:[#allocation81_spill] sm:$0xff] %v9620_v11 }
 0x3d8   : > { %v2338_v52 = vsel %vm2337_vm6, %v1921_v58, %v1922_v14  ;;  %v2223_v58 = vand.u32 65535, %v9242_v38  ;;  %v2115_v14 = vshll.u32 %v2114_v9, 16  ;;  %v9611_v38 = vadd.f32 %v8486_v31, %v1311_v46  ;;  %v1138_v45 = vpop.f32.mrf.mxu0  ;;  %v1314_v46 = vpop.f32.mrf.mxu2 }
 0x3d9   : > { %vm2339_vm7 = vcmp.lt.s32.totalorder %v2338_v52, %v1923_v30  ;;  %12325 = vst [vmem:[#allocation38_spill] sm:$0xff] %v9592_v59  ;;  %v1681_v1 = vmin.f32 %v9592_v59, %v9595_v0 }
 0x3da   : > { %v2340_v39 = vsel %vm2339_vm7, %v2338_v52, %v1923_v30  ;;  %12328 = vst [vmem:[#allocation37_spill] sm:$0xff] %v9611_v38 }
 0x3db   : > { %vm2341_vm8 = vcmp.lt.s32.totalorder %v2340_v39, %v1924_v17  ;;  %12329 = vst [vmem:[#allocation40_spill] sm:$0xff] %v9617_v15 }
 0x3dc   : > { %v9597_v20 = vpop.xlane.xlu2 %2247  ;;  %v2112_v33 = vpop.xlane.xlu0 %2111  ;;  %v9602_v30 = vsel %vm2341_vm8, %v2340_v39, %v1924_v17 }
 0x3dd   : > { %v2113_v44 = vcvt.f32.s32 %v2112_v33  ;;  %vm2249_vm9 = vcmp.eq.f32.partialorder %v9160_v18, %v9597_v20  ;;  %12327 = vst [vmem:[#allocation51_spill] sm:$0xff] %v9602_v30  ;;  %v9614_v18 = vadd.f32 %v8488_v32, %v1400_v5  ;;  %v2344_v63 = vshra.s32 %v9602_v30, 16 }
 0x3de   : > { %v2250_v52 = vsel %vm2249_vm9, %v2245_v7, inf  ;;  %v1227_v7 = vpop.f32.mrf.mxu1  ;;  %v2174_v5 = vcvt.f32.s32 %v9299_v51  ;;  %v9633_v33 = vadd.f32 %v8486_v31, %v1314_v46  ;;  %v9652_v46 = vmin.f32 %v1681_v1, %v9611_v38 }
 0x3df   : > { %v2116_v9 = vadd.s32 %v2115_v14, %v2113_v44  ;;  %2251 = vmin.xlane.f32.xlu1 %v2250_v52  ;;  %v1686_v52 = vmin.f32 %v9617_v15, %v9620_v11  ;;  %v9645_v4 = vadd.f32 %v8478_v28, %v1227_v7  ;;  %v2135_v11 = vshll.u32 %v2134_v35, 16  ;;  %v1403_v7 = vpop.f32.mrf.mxu3  ;;  %v12333_v35 = vld [vmem:[#allocation41_spill] sm:$0xff] }
 0x3e0   : > { %12331 = vst [vmem:[#allocation82_spill] sm:$0xff] %v9633_v33  ;;  %v2155_v15 = vshll.u32 %v2154_v23, 16  ;;  %v9664_v1 = vshll.u32 %v2174_v5, 16 }
 0x3e1   : > { %vm2641_vm10 = vcmp.eq.s32.totalorder %v8683_v27, %v2116_v9  ;;  %vm2642_vm11 = vcmp.eq.s32.totalorder %v8688_v50, %v2116_v9  ;;  %vm2643_vm12 = vcmp.eq.s32.totalorder %v8691_v6, %v2116_v9  ;;  %vm2644_vm13 = vcmp.eq.s32.totalorder %v8699_v12, %v2116_v9 }
 0x3e2   : > { %v6206_v17 = vsel %vm2641_vm10, 1.0, %v12306_v40  ;;  %v6207_v36 = vsel %vm2642_vm11, 1.0, %v12306_v40  ;;  %v6208_v21 = vsel %vm2643_vm12, 1.0, %v12306_v40  ;;  %v6209_v39 = vsel %vm2644_vm13, 1.0, %v12306_v40 }
 0x3e3   : > { %v9635_v14 = vpack.c.bf16 %v6207_v36, %v6206_v17  ;;  %v9637_v44 = vpack.c.bf16 %v6209_v39, %v6208_v21  ;;  %v9642_v9 = vadd.f32 %v8476_v26, %v1138_v45  ;;  %v9654_v36 = vcvt.s32.f32 %v2344_v63 }
 0x3e4   : > { %v9647_v0 = vpop.xlane.xlu2 %1659  ;;  %v9649_v51 = vpop.xlane.xlu0 %1654  ;;  %v2285_v21 = vcvt.s32.f32 %v2283_v62  ;;  %v2225_v39 = vcvt.s32.f32 %v2223_v58  ;;  %v9658_v45 = vcvt.s32.f32 %v2263_v13  ;;  %v9667_v63 = vadd.f32 %v8488_v32, %v1403_v7  ;;  %v12334_v7 = vld [vmem:[#allocation49_spill] sm:$0xff] }
 0x3e5   : > { %v2132_v17 = vpop.xlane.xlu1 %2131  ;;  %12332 = vst [vmem:[#allocation83_spill] sm:$0xff] %v9654_v36  ;;  %vm1801_vm14 = vcmp.eq.f32.partialorder %v9125_v61, %v9647_v0  ;;  %vm1797_vm15 = vcmp.eq.f32.partialorder %v9131_v53, %v9649_v51  ;;  %vm1798_vm0 = vcmp.eq.f32.partialorder %v9134_v29, %v9649_v51  ;;  %v9675_v13 = vmin.f32 %v1686_v52, %v9633_v33 }
 0x3e6   : > { %3077 = vst [vmem:[%s9387_s25 + $0x60] sm:$0xff] %v9635_v14  ;;  %v2133_v59 = vcvt.f32.s32 %v2132_v17  ;;  %vm1802_vm1 = vcmp.eq.f32.partialorder %v12333_v35, %v9647_v0  ;;  %v1929_v53 = vsel %vm1801_vm14, %v8683_v27, 512  ;;  %v1925_v62 = vsel %vm1797_vm15, %v8683_v27, 512 }
 0x3e7   : > { %3078 = vst [vmem:[%s9387_s25 + $0x68] sm:$0xff] %v9637_v44  ;;  %2347 = vmin.xlane.f32.xlu1 %v9654_v36  ;;  %v1926_v29 = vsel %vm1798_vm0, %v8688_v50, 512  ;;  %v1930_v17 = vsel %vm1802_vm1, %v8688_v50, 512  ;;  %vm1799_vm6 = vcmp.eq.f32.partialorder %v12334_v7, %v9649_v51  ;;  %v3345_v60 = vunpack.c.l.b16 %v9635_v14  ;;  %v1316_v36 = vpop.f32.mrf.mxu2 }
 0x3e8   : > { %v2136_v23 = vadd.s32 %v2135_v11, %v2133_v59  ;;  %vm2357_vm7 = vcmp.lt.s32.totalorder %v1925_v62, %v1926_v29  ;;  %v3348_v47 = vunpack.c.h.b16 %v9637_v44  ;;  %vm2377_vm10 = vcmp.lt.s32.totalorder %v1929_v53, %v1930_v17 }
 0x3e9   : > { %vm1800_vm11 = vcmp.eq.f32.partialorder %v9184_v54, %v9649_v51  ;;  %v12341_v54 = vld [vmem:[#allocation48_spill] sm:$0xff]  ;;  %vm1804_vm0 = vcmp.eq.f32.partialorder %v9168_v55, %v9647_v0 }
 0x3ea   : > { %vm2645_vm2 = vcmp.eq.s32.totalorder %v8683_v27, %v2136_v23  ;;  %vm2646_vm3 = vcmp.eq.s32.totalorder %v8688_v50, %v2136_v23  ;;  %vm2647_vm4 = vcmp.eq.s32.totalorder %v8691_v6, %v2136_v23  ;;  %vm2648_vm5 = vcmp.eq.s32.totalorder %v8699_v12, %v2136_v23 }
 0x3eb   : > { %v6210_v59 = vsel %vm2645_vm2, 1.0, %v12306_v40  ;;  %v6211_v11 = vsel %vm2646_vm3, 1.0, %v12306_v40  ;;  %v6212_v5 = vsel %vm2647_vm4, 1.0, %v12306_v40  ;;  %v6213_v52 = vsel %vm2648_vm5, 1.0, %v12306_v40 }
 0x3ec   : > { %v9697_v35 = vpop.xlane.xlu2 %2287  ;;  %v2152_v58 = vpop.xlane.xlu0 %2151  ;;  %v3015_v61 = vpack.c.bf16 %v6211_v11, %v6210_v59  ;;  %v3016_v33 = vpack.c.bf16 %v6213_v52, %v6212_v5  ;;  %v3346_v59 = vunpack.c.h.b16 %v9635_v14  ;;  %vm1803_vm12 = vcmp.eq.f32.partialorder %v12341_v54, %v9647_v0 }
 0x3ed   : > { %12335 = vst [vmem:[#allocation41_spill] sm:$0xff] %v9697_v35  ;;  %v9699_v23 = vpop.xlane.xlu1 %2227  ;;  %v2153_v38 = vcvt.f32.s32 %v2152_v58  ;;  %vm2289_vm8 = vcmp.eq.f32.partialorder %v9278_v25, %v9697_v35  ;;  %v3347_v58 = vunpack.c.l.b16 %v9637_v44  ;;  %v1405_v25 = vpop.f32.mrf.mxu3  ;;  %v2378_v44 = vsel %vm2377_vm10, %v1929_v53, %v1930_v17 }
 0x3ee   : > { %12336 = vst [vmem:[#allocation49_spill] sm:$0xff] %v9699_v23  ;;  %v2290_v34 = vsel %vm2289_vm8, %v2285_v21, inf  ;;  %vm2229_vm9 = vcmp.eq.f32.partialorder %v9281_v19, %v9699_v23  ;;  %v3349_v30 = vunpack.c.l.b16 %v3015_v61  ;;  %v3350_v52 = vunpack.c.h.b16 %v3015_v61 }
 0x3ef   : > { %3079 = vst [vmem:[%s9387_s25 + $0x70] sm:$0xff] %v3015_v61  ;;  %v9708_v11 = vadd.s32 %v2155_v15, %v2153_v38  ;;  %2291 = vmin.xlane.f32.xlu1 %v2290_v34  ;;  %v2230_v5 = vsel %vm2229_vm9, %v2225_v39, inf  ;;  %v3351_v21 = vunpack.c.l.b16 %v3016_v33  ;;  %v3352_v19 = vunpack.c.h.b16 %v3016_v33 }
 0x3f0   : > { %3080 = vst [vmem:[%s9387_s25 + $0x78] sm:$0xff] %v3016_v33  ;;  %2231 = vmin.xlane.f32.xlu0 %v2230_v5  ;;  %v9712_v35 = vpack.c.b16 %v3349_v30, %v3345_v60  ;;  %v9716_v23 = vadd.f32 %v8486_v31, %v1316_v36  ;;  %v1927_v34 = vsel %vm1799_vm6, %v8691_v6, 512  ;;  %v9725_v60 = vpack.c.b16 %v3350_v52, %v3346_v59 }
 0x3f1   : > { %v9727_v30 = vpack.c.b16 %v3351_v21, %v3347_v58  ;;  %v9729_v38 = vpack.c.b16 %v3352_v19, %v3348_v47  ;;  %v2358_v15 = vsel %vm2357_vm7, %v1925_v62, %v1926_v29  ;;  %v9733_v33 = vadd.f32 %v8488_v32, %v1405_v25 }
 0x3f2   : > { %12337 = vst [vmem:[#allocation84_spill] sm:$0xff] %v9712_v35  ;;  %3792 = vmatmul.bf16.gmra.mxu0 %v9712_v35  ;;  %vm2649_vm13 = vcmp.eq.s32.totalorder %v8683_v27, %v9708_v11  ;;  %vm2359_vm14 = vcmp.lt.s32.totalorder %v2358_v15, %v1927_v34  ;;  %vm2650_vm15 = vcmp.eq.s32.totalorder %v8688_v50, %v9708_v11  ;;  %v1928_v47 = vsel %vm1800_vm11, %v8699_v12, 512 }
 0x3f3   : > { %12338 = vst [vmem:[#allocation85_spill] sm:$0xff] %v9725_v60  ;;  %3881 = vmatmul.bf16.gmra.mxu1 %v9725_v60  ;;  %3970 = vmatmul.bf16.gmra.mxu2 %v9727_v30  ;;  %v2360_v14 = vsel %vm2359_vm14, %v2358_v15, %v1927_v34  ;;  %v1688_v39 = vmin.f32 %v9675_v13, %v9667_v63  ;;  %v1931_v53 = vsel %vm1803_vm12, %v8691_v6, 512  ;;  %v6214_v13 = vsel %vm2649_vm13, 1.0, %v12306_v40 }
 0x3f4   : > { %12339 = vst [vmem:[#allocation86_spill] sm:$0xff] %v9727_v30  ;;  %4059 = vmatmul.bf16.gmra.mxu3 %v9729_v38  ;;  %vm2361_vm1 = vcmp.lt.s32.totalorder %v2360_v14, %v1928_v47  ;;  %v9748_v36 = vpop.xlane.xlu0 %1664  ;;  %v12342_v61 = vmin.f32 %v9642_v9, %v9645_v4  ;;  %vm2651_vm2 = vcmp.eq.s32.totalorder %v8691_v6, %v9708_v11  ;;  %v6215_v59 = vsel %vm2650_vm15, 1.0, %v12306_v40 }
 0x3f5   : > { %12340 = vst [vmem:[#allocation87_spill] sm:$0xff] %v9729_v38  ;;  %v2172_v51 = vpop.xlane.xlu1 %2171  ;;  %v9764_v29 = vsel %vm2361_vm1, %v2360_v14, %v1928_v47  ;;  %vm2379_vm3 = vcmp.lt.s32.totalorder %v2378_v44, %v1931_v53  ;;  %vm2652_vm4 = vcmp.eq.s32.totalorder %v8699_v12, %v9708_v11  ;;  %vm1805_vm5 = vcmp.eq.f32.partialorder %v9250_v3, %v9748_v36  ;;  %v12344_v11 = vld [vmem:[#allocation67_spill] sm:$0xff] }
 0x3f6   : > { %v9756_v62 = vmin.f32 %v12342_v61, %v9716_v23  ;;  %v2364_v17 = vshra.s32 %v9764_v29, 16  ;;  %v2173_v7 = vcvt.f32.s32 %v2172_v51  ;;  %vm1806_vm6 = vcmp.eq.f32.partialorder %v9254_v56, %v9748_v36 }
 0x3f7   : > { %v1932_v5 = vsel %vm1804_vm0, %v8699_v12, 512  ;;  %v12343_v52 = vmin.f32 %v9652_v46, %v9614_v18  ;;  %v1933_v21 = vsel %vm1805_vm5, %v8683_v27, 512  ;;  %v1934_v3 = vsel %vm1806_vm6, %v8688_v50, 512 }
 0x3f8   : > { %v9788_v58 = vcvt.s32.f32 %v2364_v17  ;;  %v2176_v25 = vadd.s32 %v9664_v1, %v2173_v7  ;;  %vm1807_vm7 = vcmp.eq.f32.partialorder %v9270_v42, %v9748_v36  ;;  %v2380_v56 = vsel %vm2379_vm3, %v2378_v44, %v1931_v53  ;;  %v1141_v42 = vpop.f32.mrf.mxu0 }
 0x3f9   : > { %1684 = vmin.xlane.f32.xlu0 %v12343_v52  ;;  %v3017_v19 = vpack.c.bf16 %v6215_v59, %v6214_v13  ;;  %v6216_v55 = vsel %vm2651_vm2, 1.0, %v12306_v40  ;;  %vm2397_vm11 = vcmp.lt.s32.totalorder %v1933_v21, %v1934_v3  ;;  %vm2381_vm13 = vcmp.lt.s32.totalorder %v2380_v56, %v1932_v5 }
 0x3fa   : > { %2367 = vmin.xlane.f32.xlu2 %v9788_v58  ;;  %vm2653_vm8 = vcmp.eq.s32.totalorder %v8683_v27, %v2176_v25  ;;  %vm2654_vm9 = vcmp.eq.s32.totalorder %v8688_v50, %v2176_v25  ;;  %vm2655_vm10 = vcmp.eq.s32.totalorder %v8691_v6, %v2176_v25  ;;  %vm2656_vm12 = vcmp.eq.s32.totalorder %v8699_v12, %v2176_v25 }
 0x3fb   : > { %v6218_v0 = vsel %vm2653_vm8, 1.0, %v12306_v40  ;;  %v6219_v46 = vsel %vm2654_vm9, 1.0, %v12306_v40  ;;  %3081 = vst [vmem:[%s9387_s25 + $0x80] sm:$0xff] %v3017_v19  ;;  %v9807_v1 = vsel %vm2381_vm13, %v2380_v56, %v1932_v5  ;;  %v3353_v54 = vunpack.c.l.b16 %v3017_v19 }
 0x3fc   : > { %v3019_v15 = vpack.c.bf16 %v6219_v46, %v6218_v0  ;;  %v6217_v47 = vsel %vm2652_vm4, 1.0, %v12306_v40  ;;  %v2384_v14 = vshra.s32 %v9807_v1, 16  ;;  %v3354_v44 = vunpack.c.h.b16 %v3017_v19 }
 0x3fd   : > { %v9809_v34 = vpop.xlane.xlu1 %2267  ;;  %v6220_v51 = vsel %vm2655_vm10, 1.0, %v12306_v40  ;;  %v6221_v17 = vsel %vm2656_vm12, 1.0, %v12306_v40  ;;  %vm1808_vm15 = vcmp.eq.f32.partialorder %v12344_v11, %v9748_v36  ;;  %v2398_v25 = vsel %vm2397_vm11, %v1933_v21, %v1934_v3 }
 0x3fe   : > { %vm2269_vm14 = vcmp.eq.f32.partialorder %v9331_v41, %v9809_v34  ;;  %3083 = vst [vmem:[%s9387_s25 + $0x90] sm:$0xff] %v3019_v15  ;;  %v3357_v53 = vunpack.c.l.b16 %v3019_v15  ;;  %v3358_v13 = vunpack.c.h.b16 %v3019_v15  ;;  %v9826_v7 = vcvt.s32.f32 %v2384_v14 }
 0x3ff   : > { %v2270_v61 = vsel %vm2269_vm14, %v9658_v45, inf  ;;  %v3018_v41 = vpack.c.bf16 %v6217_v47, %v6216_v55  ;;  %v3020_v59 = vpack.c.bf16 %v6221_v17, %v6220_v51  ;;  %v1935_v45 = vsel %vm1807_vm7, %v8691_v6, 512  ;;  %v1230_v55 = vpop.f32.mrf.mxu1  ;;  %v1319_v51 = vpop.f32.mrf.mxu2 }
 0x400   : > { %v9832_v5 = vpack.c.b16 %v3357_v53, %v3353_v54  ;;  %v9834_v52 = vpack.c.b16 %v3358_v13, %v3354_v44  ;;  %2387 = vmin.xlane.f32.xlu1 %v9826_v7  ;;  %vm2399_vm0 = vcmp.lt.s32.totalorder %v2398_v25, %v1935_v45  ;;  %v1936_v21 = vsel %vm1808_vm15, %v8699_v12, 512  ;;  %v1408_v17 = vpop.f32.mrf.mxu3 }
 0x401   : > { %2271 = vmin.xlane.f32.xlu0 %v2270_v61  ;;  %3082 = vst [vmem:[%s9387_s25 + $0x88] sm:$0xff] %v3018_v41  ;;  %v3355_v56 = vunpack.c.l.b16 %v3018_v41  ;;  %v3359_v19 = vunpack.c.l.b16 %v3020_v59  ;;  %v3356_v0 = vunpack.c.h.b16 %v3018_v41  ;;  %v3360_v46 = vunpack.c.h.b16 %v3020_v59 }
 0x402   : > { %12345 = vst [vmem:[#allocation48_spill] sm:$0xff] %v9832_v5  ;;  %1689 = vmin.xlane.f32.xlu2 %v1688_v39  ;;  %3797 = vmatmul.bf16.gmra.mxu0 %v9832_v5  ;;  %v2400_v3 = vsel %vm2399_vm0, %v2398_v25, %v1935_v45  ;;  %v9851_v39 = vadd.f32 %v8476_v26, %v1141_v42 }
 0x403   : > { %12346 = vst [vmem:[#allocation67_spill] sm:$0xff] %v9834_v52  ;;  %3886 = vmatmul.bf16.gmra.mxu1 %v9834_v52  ;;  %v9842_v15 = vpack.c.b16 %v3359_v19, %v3355_v56  ;;  %v9844_v54 = vpack.c.b16 %v3360_v46, %v3356_v0  ;;  %v9854_v47 = vadd.f32 %v8478_v28, %v1230_v55 }
 0x404   : > { %3084 = vst [vmem:[%s9387_s25 + $0x98] sm:$0xff] %v3020_v59  ;;  %vm2401_vm1 = vcmp.lt.s32.totalorder %v2400_v3, %v1936_v21  ;;  %v1693_v44 = vmin.f32 %v9756_v62, %v9733_v33  ;;  %v9866_v53 = vadd.f32 %v8486_v31, %v1319_v51  ;;  %v9873_v41 = vadd.f32 %v8488_v32, %v1408_v17  ;;  %v1143_v59 = vpop.f32.mrf.mxu0 }
 0x405   : > { %12347 = vst [vmem:[#allocation88_spill] sm:$0xff] %v9842_v15  ;;  %3975 = vmatmul.bf16.gmra.mxu2 %v9842_v15  ;;  %4064 = vmatmul.bf16.gmra.mxu3 %v9844_v54  ;;  %v9858_v14 = vsel %vm2401_vm1, %v2400_v3, %v1936_v21  ;;  %v1696_v61 = vmin.f32 %v9851_v39, %v9854_v47  ;;  %v1670_v3 = vpop.xlane.xlu2 %1669 }
 0x406   : > { %12348 = vst [vmem:[#allocation89_spill] sm:$0xff] %v9844_v54  ;;  %v2404_v36 = vshra.s32 %v9858_v14, 16  ;;  %v12355_v54 = vld [vmem:[#allocation65_spill] sm:$0xff] }
 0x407   : > { %12349 = vst [vmem:[#allocation90_spill] sm:$0xff] %v9851_v39  ;;  %v1697_v11 = vmin.f32 %v1696_v61, %v9866_v53  ;;  %v1232_v45 = vpop.f32.mrf.mxu1  ;;  %v9876_v25 = vpop.f32.mrf.mxu2  ;;  %vm1811_vm5 = vcmp.eq.f32.partialorder %v12355_v54, %v1670_v3 }
 0x408   : > { %12350 = vst [vmem:[#allocation91_spill] sm:$0xff] %v9854_v47  ;;  %v9868_v13 = vcvt.s32.f32 %v2404_v36  ;;  %v9878_v56 = vpop.f32.mrf.mxu3  ;;  %v12354_v36 = vld [vmem:[#allocation53_spill] sm:$0xff]  ;;  %v1939_v5 = vsel %vm1811_vm5, %v8691_v6, 512  ;;  %v12359_v47 = vld [vmem:[#allocation66_spill] sm:$0xff] }
 0x409   : > { %1694 = vmin.xlane.f32.xlu0 %v1693_v44  ;;  %12351 = vst [vmem:[#allocation92_spill] sm:$0xff] %v9866_v53  ;;  %v1698_v62 = vmin.f32 %v1697_v11, %v9873_v41  ;;  %v12353_v44 = vld [vmem:[#allocation50_spill] sm:$0xff]  ;;  %vm1810_vm3 = vcmp.eq.f32.partialorder %v12354_v36, %v1670_v3  ;;  %v2194_v36 = vcvt.f32.s32 %v9510_v8  ;;  %vm1812_vm7 = vcmp.eq.f32.partialorder %v12359_v47, %v1670_v3 }
 0x40a   : > { %2407 = vmin.xlane.f32.xlu2 %v9868_v13  ;;  %12352 = vst [vmem:[#allocation93_spill] sm:$0xff] %v9873_v41  ;;  %vm1809_vm2 = vcmp.eq.f32.partialorder %v12353_v44, %v1670_v3  ;;  %v1940_v8 = vsel %vm1812_vm7, %v8699_v12, 512  ;;  %v9924_v47 = vadd.f32 %v8476_v26, %v1143_v59  ;;  %v6688_v3 = vld [vmem:[%s12362_s2 + $0xb8] sm:$0xff] }
 0x40b   : > { %v1937_v11 = vsel %vm1809_vm2, %v8683_v27, 512  ;;  %4495 = vmatpush.bf16.msra.mxu2 %v6688_v3 }
 0x40c   : > { %v9880_v19 = vpop.f32.mrf.mxu0 }
 0x40f   : > { %v9882_v0 = vpop.f32.mrf.mxu1  ;;  %v9884_v46 = vpop.f32.mrf.mxu2 }
 0x410   : > { %v9886_v42 = vpop.f32.mrf.mxu3 }
 0x412   : > { %1699 = vmin.xlane.f32.xlu2 %v1698_v62  ;;  %v1938_v62 = vsel %vm1810_vm3, %v8688_v50, 512 }
 0x413   : > { %vm2417_vm4 = vcmp.lt.s32.totalorder %v1937_v11, %v1938_v62 }
 0x414   : > { %v9888_v55 = vpop.f32.mrf.mxu0  ;;  %v2418_v60 = vsel %vm2417_vm4, %v1937_v11, %v1938_v62  ;;  %v2323_v11 = vand.u32 65535, %v9525_v49 }
 0x415   : > { %vm2419_vm6 = vcmp.lt.s32.totalorder %v2418_v60, %v1939_v5 }
 0x417   : > { %v9890_v21 = vpop.f32.mrf.mxu1  ;;  %v9894_v51 = vpop.f32.mrf.mxu2 }
 0x418   : > { %v9896_v61 = vpop.f32.mrf.mxu3 }
 0x42f   : > { %v3778_v17 = vpop.f32.mrf.mxu0  ;;  %v3867_v38 = vpop.f32.mrf.mxu1 }
 0x430   : > { %v3868_v30 = vadd.f32 %v3867_v38, %v3778_v17  ;;  %v2195_v17 = vshll.u32 %v2194_v36, 16 }
 0x436   : > { %v3956_v15 = vpop.f32.mrf.mxu2  ;;  %v4045_v44 = vpop.f32.mrf.mxu3 }
 0x437   : > { %v3957_v35 = vadd.f32 %v3956_v15, %v3868_v30  ;;  %v9901_v52 = vpop.f32.mrf.mxu0  ;;  %v9905_v41 = vpop.f32.mrf.mxu1  ;;  %v2420_v30 = vsel %vm2419_vm6, %v2418_v60, %v1939_v5  ;;  %v2325_v5 = vcvt.s32.f32 %v2323_v11 }
 0x438   : > { %12356 = vst [vmem:[#allocation50_spill] sm:$0xff] %v9901_v52  ;;  %v2214_v52 = vcvt.f32.s32 %v9557_v16  ;;  %vm2421_vm8 = vcmp.lt.s32.totalorder %v2420_v30, %v1940_v8 }
 0x439   : > { %12357 = vst [vmem:[#allocation53_spill] sm:$0xff] %v9905_v41  ;;  %v9907_v53 = vadd.f32 %v4045_v44, %v3957_v35  ;;  %v2303_v44 = vand.u32 65535, %v9540_v24  ;;  %v6672_v24 = vld [vmem:[%s12362_s2 + $0x38] sm:$0xff] }
 0x43a   : > { %v2192_v38 = vpop.xlane.xlu0 %2191  ;;  %4317 = vmatpush.bf16.msra.mxu0 %v6672_v24 }
 0x43b   : > { %12358 = vst [vmem:[#allocation65_spill] sm:$0xff] %v9907_v53  ;;  %v2193_v54 = vcvt.f32.s32 %v2192_v38  ;;  %v9935_v38 = vsel %vm2421_vm8, %v2420_v30, %v1940_v8 }
 0x43d   : > { %v2196_v15 = vadd.s32 %v2195_v17, %v2193_v54  ;;  %v9940_v54 = vadd.f32 %v8478_v28, %v1232_v45  ;;  %v2424_v45 = vshra.s32 %v9935_v38, 16 }
 0x43e   : > { %v9911_v62 = vpop.f32.mrf.mxu2  ;;  %v9915_v39 = vpop.f32.mrf.mxu3 }
 0x43f   : > { %12360 = vst [vmem:[#allocation66_spill] sm:$0xff] %v9911_v62  ;;  %v3783_v35 = vpop.f32.mrf.mxu0  ;;  %vm2657_vm9 = vcmp.eq.s32.totalorder %v8683_v27, %v2196_v15  ;;  %vm2658_vm10 = vcmp.eq.s32.totalorder %v8688_v50, %v2196_v15  ;;  %vm2659_vm11 = vcmp.eq.s32.totalorder %v8691_v6, %v2196_v15  ;;  %v9921_v49 = vpop.xlane.xlu2 %2327  ;;  %vm2660_vm12 = vcmp.eq.s32.totalorder %v8699_v12, %v2196_v15 }
 0x440   : > { %12361 = vst [vmem:[#allocation94_spill] sm:$0xff] %v9915_v39  ;;  %v3872_v60 = vpop.f32.mrf.mxu1  ;;  %vm2329_vm13 = vcmp.eq.f32.partialorder %v9546_v10, %v9921_v49  ;;  %v6222_v59 = vsel %vm2657_vm9, 1.0, %v12306_v40  ;;  %v6223_v17 = vsel %vm2658_vm10, 1.0, %v12306_v40  ;;  %v2215_v10 = vshll.u32 %v2214_v52, 16 }
 0x441   : > { %v3873_v16 = vadd.f32 %v3872_v60, %v3783_v35  ;;  %v2330_v36 = vsel %vm2329_vm13, %v2325_v5, inf  ;;  %v9944_v60 = vpack.c.bf16 %v6223_v17, %v6222_v59  ;;  %v6224_v30 = vsel %vm2659_vm11, 1.0, %v12306_v40 }
 0x442   : > { %2331 = vmin.xlane.f32.xlu1 %v2330_v36  ;;  %v2212_v11 = vpop.xlane.xlu1 %2211  ;;  %v9942_v35 = vpop.xlane.xlu0 %1674  ;;  %v6225_v52 = vsel %vm2660_vm12, 1.0, %v12306_v40  ;;  %v9976_v62 = vcvt.s32.f32 %v2424_v45 }
 0x443   : > { %v2213_v8 = vcvt.f32.s32 %v2212_v11  ;;  %vm1813_vm14 = vcmp.eq.f32.partialorder %v9448_v2, %v9942_v35  ;;  %vm1814_vm15 = vcmp.eq.f32.partialorder %v9451_v57, %v9942_v35  ;;  %3085 = vst [vmem:[%s9387_s25 + $0xa0] sm:$0xff] %v9944_v60  ;;  %v1701_v2 = vmin.f32 %v9924_v47, %v9940_v54 }
 0x444   : > { %v1941_v36 = vsel %vm1813_vm14, %v8683_v27, 512  ;;  %v1942_v24 = vsel %vm1814_vm15, %v8688_v50, 512  ;;  %v9965_v57 = vadd.f32 %v8486_v31, %v9876_v25  ;;  %v3022_v17 = vpack.c.bf16 %v6225_v52, %v6224_v30 }
 0x445   : > { %v2216_v5 = vadd.s32 %v2215_v10, %v2213_v8  ;;  %v2305_v11 = vcvt.s32.f32 %v2303_v44  ;;  %vm2437_vm3 = vcmp.lt.s32.totalorder %v1941_v36, %v1942_v24  ;;  %v9981_v25 = vadd.f32 %v8488_v32, %v9878_v56 }
 0x446   : > { %v3961_v59 = vpop.f32.mrf.mxu2  ;;  %3086 = vst [vmem:[%s9387_s25 + $0xa8] sm:$0xff] %v3022_v17  ;;  %vm1815_vm5 = vcmp.eq.f32.partialorder %v9467_v43, %v9942_v35  ;;  %v2254_v44 = vcvt.f32.s32 %v9597_v20  ;;  %v1702_v52 = vmin.f32 %v1701_v2, %v9965_v57  ;;  %v2438_v45 = vsel %vm2437_vm3, %v1941_v36, %v1942_v24 }
 0x447   : > { %v3962_v15 = vadd.f32 %v3961_v59, %v3873_v16  ;;  %v9967_v3 = vpop.f32.mrf.mxu0  ;;  %vm2661_vm0 = vcmp.eq.s32.totalorder %v8683_v27, %v2216_v5  ;;  %vm2662_vm1 = vcmp.eq.s32.totalorder %v8688_v50, %v2216_v5  ;;  %v4050_v10 = vpop.f32.mrf.mxu3  ;;  %vm2663_vm2 = vcmp.eq.s32.totalorder %v8691_v6, %v2216_v5 }
 0x448   : > { %12363 = vst [vmem:[#allocation95_spill] sm:$0xff] %v9967_v3  ;;  %v9974_v39 = vpop.f32.mrf.mxu1  ;;  %v9985_v16 = vadd.f32 %v8476_v26, %v9880_v19  ;;  %vm2664_vm4 = vcmp.eq.s32.totalorder %v8699_v12, %v2216_v5  ;;  %v6226_v56 = vsel %vm2661_vm0, 1.0, %v12306_v40  ;;  %v6227_v19 = vsel %vm2662_vm1, 1.0, %v12306_v40 }
 0x449   : > { %v9972_v8 = vadd.f32 %v4050_v10, %v3962_v15  ;;  %12365 = vst [vmem:[#allocation97_spill] sm:$0xff] %v9974_v39  ;;  %v3023_v43 = vpack.c.bf16 %v6227_v19, %v6226_v56  ;;  %v6228_v20 = vsel %vm2663_vm2, 1.0, %v12306_v40  ;;  %v1943_v59 = vsel %vm1815_vm5, %v8691_v6, 512  ;;  %v10010_v39 = vpop.xlane.xlu2 %1679 }
 0x44a   : > { %2427 = vmin.xlane.f32.xlu1 %v9976_v62  ;;  %v9992_v30 = vpop.xlane.xlu1 %2307  ;;  %v3361_v10 = vunpack.c.l.b16 %v9944_v60  ;;  %v3362_v5 = vunpack.c.h.b16 %v9944_v60  ;;  %vm1816_vm7 = vcmp.eq.f32.partialorder %v9531_v22, %v9942_v35  ;;  %v3363_v24 = vunpack.c.l.b16 %v3022_v17 }
 0x44b   : > { %12364 = vst [vmem:[#allocation96_spill] sm:$0xff] %v9972_v8  ;;  %vm2309_vm6 = vcmp.eq.f32.partialorder %v9580_v48, %v9992_v30  ;;  %v6229_v8 = vsel %vm2664_vm4, 1.0, %v12306_v40  ;;  %v3365_v48 = vunpack.c.l.b16 %v3023_v43  ;;  %v3366_v56 = vunpack.c.h.b16 %v3023_v43 }
 0x44c   : > { %v2310_v15 = vsel %vm2309_vm6, %v2305_v11, inf  ;;  %3087 = vst [vmem:[%s9387_s25 + $0xb0] sm:$0xff] %v3023_v43  ;;  %v3024_v19 = vpack.c.bf16 %v6229_v8, %v6228_v20  ;;  %v3364_v11 = vunpack.c.h.b16 %v3022_v17  ;;  %vm2439_vm8 = vcmp.lt.s32.totalorder %v2438_v45, %v1943_v59  ;;  %v12370_v8 = vld [vmem:[#allocation56_spill] sm:$0xff] }
 0x44d   : > { %2311 = vmin.xlane.f32.xlu0 %v2310_v15  ;;  %v10020_v53 = vpack.c.b16 %v3365_v48, %v3361_v10  ;;  %v10022_v41 = vpack.c.b16 %v3366_v56, %v3362_v5  ;;  %v10027_v60 = vadd.f32 %v8478_v28, %v9882_v0  ;;  %vm1817_vm9 = vcmp.eq.f32.partialorder %v9470_v37, %v10010_v39  ;;  %v6671_v5 = vld [vmem:[%s12362_s2 + $0x30] sm:$0xff]  ;;  %v6670_v37 = vld [vmem:[%s12362_s2 + $0x28] sm:$0xff] }
 0x44e   : > { %v10012_v2 = vpop.f32.mrf.mxu2  ;;  %3088 = vst [vmem:[%s9387_s25 + $0xb8] sm:$0xff] %v3024_v19  ;;  %v3367_v15 = vunpack.c.l.b16 %v3024_v19  ;;  %vm1818_vm10 = vcmp.eq.f32.partialorder %v12370_v8, %v10010_v39  ;;  %v2440_v43 = vsel %vm2439_vm8, %v2438_v45, %v1943_v59  ;;  %v1944_v0 = vsel %vm1816_vm7, %v8699_v12, 512  ;;  %v6687_v45 = vld [vmem:[%s12362_s2 + $0xb0] sm:$0xff]  ;;  %4318 = vmatpush.bf16.msra.mxu0 %v6671_v5 }
 0x44f   : > { %12366 = vst [vmem:[#allocation98_spill] sm:$0xff] %v10012_v2  ;;  %v3788_v36 = vpop.f32.mrf.mxu0  ;;  %v10018_v3 = vpop.f32.mrf.mxu3  ;;  %v3368_v2 = vunpack.c.h.b16 %v3024_v19  ;;  %3802 = vmatmul.bf16.gmra.mxu0 %v10020_v53  ;;  %3891 = vmatmul.bf16.gmra.mxu1 %v10022_v41  ;;  %v2255_v59 = vshll.u32 %v2254_v44, 16  ;;  %vm2441_vm11 = vcmp.lt.s32.totalorder %v2440_v43, %v1944_v0  ;;  %v1703_v19 = vmin.f32 %v1702_v52, %v9981_v25  ;;  %v12373_v5 = vld [vmem:[#allocation51_spill] sm:$0xff] }
 0x450   : > { %12367 = vst [vmem:[#allocation99_spill] sm:$0xff] %v10018_v3  ;;  %v3877_v17 = vpop.f32.mrf.mxu1  ;;  %v10035_v10 = vpack.c.b16 %v3367_v15, %v3363_v24  ;;  %v1946_v22 = vsel %vm1818_vm10, %v8688_v50, 512  ;;  %v10060_v35 = vsel %vm2441_vm11, %v2440_v43, %v1944_v0  ;;  %v10064_v52 = vadd.f32 %v8486_v31, %v9884_v46  ;;  %4496 = vmatpush.bf16.msra.mxu2 %v6687_v45 }
 0x451   : > { %12368 = vst [vmem:[#allocation100_spill] sm:$0xff] %v10020_v53  ;;  %v3878_v20 = vadd.f32 %v3877_v17, %v3788_v36  ;;  %v10037_v48 = vpack.c.b16 %v3368_v2, %v3364_v11  ;;  %v1945_v2 = vsel %vm1817_vm9, %v8683_v27, 512  ;;  %v2444_v36 = vshra.s32 %v10060_v35, 16  ;;  %v6686_v17 = vld [vmem:[%s12362_s2 + $0xa8] sm:$0xff] }
 0x452   : > { %12369 = vst [vmem:[#allocation101_spill] sm:$0xff] %v10022_v41  ;;  %v2252_v56 = vpop.xlane.xlu1 %2251  ;;  %3980 = vmatmul.bf16.gmra.mxu2 %v10035_v10  ;;  %v1706_v24 = vmin.f32 %v9985_v16, %v10027_v60  ;;  %v10074_v11 = vadd.f32 %v8476_v26, %v9888_v55  ;;  %v10078_v15 = vadd.f32 %v8478_v28, %v9890_v21  ;;  %v2343_v45 = vand.u32 65535, %v12373_v5 }
 0x453   : > { %12371 = vst [vmem:[#allocation56_spill] sm:$0xff] %v10035_v10  ;;  %4069 = vmatmul.bf16.gmra.mxu3 %v10037_v48  ;;  %v2253_v44 = vcvt.f32.s32 %v2252_v56  ;;  %vm2457_vm12 = vcmp.lt.s32.totalorder %v1945_v2, %v1946_v22  ;;  %v10083_v43 = vcvt.s32.f32 %v2444_v36  ;;  %v10092_v28 = vadd.f32 %v8488_v32, %v9886_v42  ;;  %4319 = vmatpush.bf16.msra.mxu0 %v6670_v37 }
 0x454   : > { %12372 = vst [vmem:[#allocation102_spill] sm:$0xff] %v10037_v48  ;;  %4497 = vmatpush.bf16.msra.mxu2 %v6686_v17  ;;  %v2345_v37 = vcvt.s32.f32 %v2343_v45  ;;  %v2458_v17 = vsel %vm2457_vm12, %v1945_v2, %v1946_v22  ;;  %v1711_v5 = vmin.f32 %v10074_v11, %v10078_v15  ;;  %v12376_v45 = vld [vmem:[#allocation83_spill] sm:$0xff]  ;;  %v6668_v22 = vld [vmem:[%s12362_s2 + $0x18] sm:$0xff] }
 0x455   : > { %v2256_v46 = vadd.s32 %v2255_v59, %v2253_v44  ;;  %1704 = vmin.xlane.f32.xlu0 %v1703_v19  ;;  %2447 = vmin.xlane.f32.xlu2 %v10083_v43  ;;  %v12375_v59 = vld [vmem:[#allocation75_spill] sm:$0xff]  ;;  %v1707_v44 = vmin.f32 %v1706_v24, %v10064_v52  ;;  %v10121_v24 = vadd.f32 %v8486_v31, %v9894_v51  ;;  %v6684_v31 = vld [vmem:[%s12362_s2 + $0x98] sm:$0xff] }
 0x456   : > { %v3966_v8 = vpop.f32.mrf.mxu2  ;;  %vm1819_vm1 = vcmp.eq.f32.partialorder %v12375_v59, %v10010_v39 }
 0x457   : > { %v3967_v0 = vadd.f32 %v3966_v8, %v3878_v20  ;;  %vm2669_vm13 = vcmp.eq.s32.totalorder %v8683_v27, %v2256_v46  ;;  %vm2670_vm14 = vcmp.eq.s32.totalorder %v8688_v50, %v2256_v46  ;;  %vm2671_vm15 = vcmp.eq.s32.totalorder %v8691_v6, %v2256_v46  ;;  %v4055_v26 = vpop.f32.mrf.mxu3  ;;  %v6685_v8 = vld [vmem:[%s12362_s2 + $0xa0] sm:$0xff] }
 0x458   : > { %vm2672_vm0 = vcmp.eq.s32.totalorder %v8699_v12, %v2256_v46  ;;  %v6234_v21 = vsel %vm2669_vm13, 1.0, %v12306_v40  ;;  %v6235_v20 = vsel %vm2670_vm14, 1.0, %v12306_v40  ;;  %v6236_v19 = vsel %vm2671_vm15, 1.0, %v12306_v40  ;;  %v6669_v46 = vld [vmem:[%s12362_s2 + $0x20] sm:$0xff]  ;;  %4498 = vmatpush.bf16.msra.mxu2 %v6685_v8 }
 0x459   : > { %v10095_v55 = vadd.f32 %v4055_v26, %v3967_v0  ;;  %v10101_v56 = vpack.c.bf16 %v6235_v20, %v6234_v21  ;;  %v6237_v42 = vsel %vm2672_vm0, 1.0, %v12306_v40  ;;  %v1947_v26 = vsel %vm1819_vm1, %v8691_v6, 512  ;;  %4320 = vmatpush.bf16.msra.mxu0 %v6669_v46  ;;  %v12377_v20 = vld [vmem:[#allocation41_spill] sm:$0xff] }
 0x45a   : > { %v10106_v36 = vpop.xlane.xlu1 %2347  ;;  %v10115_v0 = vpack.c.bf16 %v6237_v42, %v6236_v19  ;;  %vm2459_vm3 = vcmp.lt.s32.totalorder %v2458_v17, %v1947_v26  ;;  %v1708_v51 = vmin.f32 %v1707_v44, %v10092_v28  ;;  %v10142_v21 = vadd.f32 %v8488_v32, %v9896_v61  ;;  %v12378_v19 = vld [vmem:[#allocation76_spill] sm:$0xff] }
 0x45b   : > { %12374 = vst [vmem:[#allocation51_spill] sm:$0xff] %v10095_v55  ;;  %vm2349_vm2 = vcmp.eq.f32.partialorder %v12376_v45, %v10106_v36  ;;  %v2294_v59 = vcvt.f32.s32 %v12377_v20  ;;  %vm1820_vm4 = vcmp.eq.f32.partialorder %v12378_v19, %v10010_v39  ;;  %v1712_v42 = vmin.f32 %v1711_v5, %v10121_v24  ;;  %v6667_v44 = vld [vmem:[%s12362_s2 + $0x10] sm:$0xff] }
 0x45c   : > { %3091 = vst [vmem:[%s9387_s25 + $0xd0] sm:$0xff] %v10101_v56  ;;  %v2350_v2 = vsel %vm2349_vm2, %v2345_v37, inf  ;;  %v12379_v37 = vld [vmem:[#allocation49_spill] sm:$0xff]  ;;  %v2460_v8 = vsel %vm2459_vm3, %v2458_v17, %v1947_v26  ;;  %4499 = vmatpush.bf16.msra.mxu2 %v6684_v31  ;;  %v6683_v32 = vld [vmem:[%s12362_s2 + $0x90] sm:$0xff]  ;;  %v2363_v45 = vand.u32 65535, %v9764_v29  ;;  %v1948_v39 = vsel %vm1820_vm4, %v8699_v12, 512 }
 0x45d   : > { %3092 = vst [vmem:[%s9387_s25 + $0xd8] sm:$0xff] %v10115_v0  ;;  %2351 = vmin.xlane.f32.xlu0 %v2350_v2  ;;  %v2234_v46 = vcvt.f32.s32 %v12379_v37  ;;  %1709 = vmin.xlane.f32.xlu2 %v1708_v51  ;;  %v2295_v5 = vshll.u32 %v2294_v59, 16  ;;  %v1713_v17 = vmin.f32 %v1712_v42, %v10142_v21  ;;  %vm2461_vm5 = vcmp.lt.s32.totalorder %v2460_v8, %v1948_v39  ;;  %v6666_v31 = vld [vmem:[%s12362_s2 + $0x8] sm:$0xff] }
 0x45e   : > { %4321 = vmatpush.bf16.msra.mxu0 %v6668_v22  ;;  %v6682_v29 = vld [vmem:[%s12362_s2 + $0x88] sm:$0xff]  ;;  %v2365_v37 = vcvt.s32.f32 %v2363_v45  ;;  %v10165_v42 = vsel %vm2461_vm5, %v2460_v8, %v1948_v39  ;;  %v10177_v8 = vpop.f32.mrf.mxu1  ;;  %v3376_v59 = vunpack.c.h.b16 %v10115_v0 }
 0x45f   : > { %v2235_v26 = vshll.u32 %v2234_v46, 16  ;;  %v10167_v46 = vpop.f32.mrf.mxu0  ;;  %12381 = vst [vmem:[#allocation83_spill] sm:$0xff] %v10177_v8 }
 0x460   : > { %4500 = vmatpush.bf16.msra.mxu2 %v6683_v32  ;;  %12380 = vst [vmem:[#allocation75_spill] sm:$0xff] %v10167_v46  ;;  %v10215_v46 = vpop.f32.mrf.mxu2 }
 0x461   : > { %12385 = vst [vmem:[#allocation41_spill] sm:$0xff] %v10215_v46 }
 0x462   : > { %v2292_v61 = vpop.xlane.xlu1 %2291  ;;  %4322 = vmatpush.bf16.msra.mxu0 %v6667_v44  ;;  %v3373_v44 = vunpack.c.l.b16 %v10101_v56 }
 0x463   : > { %v2293_v2 = vcvt.f32.s32 %v2292_v61  ;;  %v2232_v20 = vpop.xlane.xlu0 %2231 }
 0x464   : > { %v2233_v22 = vcvt.f32.s32 %v2232_v20  ;;  %4501 = vmatpush.bf16.msra.mxu2 %v6682_v29  ;;  %v3374_v29 = vunpack.c.h.b16 %v10101_v56 }
 0x465   : > { %v2296_v51 = vadd.s32 %v2295_v5, %v2293_v2  ;;  %1714 = vmin.xlane.f32.xlu0 %v1713_v17  ;;  %v6665_v5 = vld [vmem:[%s12362_s2] sm:$0xff] }
 0x466   : > { %v2236_v19 = vadd.s32 %v2235_v26, %v2233_v22  ;;  %4323 = vmatpush.bf16.msra.mxu0 %v6666_v31  ;;  %v6681_v2 = vld [vmem:[%s12362_s2 + $0x80] sm:$0xff] }
 0x467   : > { %vm2677_vm6 = vcmp.eq.s32.totalorder %v8683_v27, %v2296_v51  ;;  %vm2678_vm7 = vcmp.eq.s32.totalorder %v8688_v50, %v2296_v51  ;;  %vm2679_vm8 = vcmp.eq.s32.totalorder %v8691_v6, %v2296_v51  ;;  %vm2680_vm13 = vcmp.eq.s32.totalorder %v8699_v12, %v2296_v51 }
 0x468   : > { %vm2665_vm9 = vcmp.eq.s32.totalorder %v8683_v27, %v2236_v19  ;;  %vm2666_vm10 = vcmp.eq.s32.totalorder %v8688_v50, %v2236_v19  ;;  %vm2667_vm11 = vcmp.eq.s32.totalorder %v8691_v6, %v2236_v19  ;;  %vm2668_vm12 = vcmp.eq.s32.totalorder %v8699_v12, %v2236_v19  ;;  %4502 = vmatpush.bf16.msra.mxu2 %v6681_v2  ;;  %v10225_v2 = vpop.f32.mrf.mxu3 }
 0x469   : > { %v6230_v32 = vsel %vm2665_vm9, 1.0, %v12306_v40  ;;  %v6231_v61 = vsel %vm2666_vm10, 1.0, %v12306_v40  ;;  %v6232_v45 = vsel %vm2667_vm11, 1.0, %v12306_v40  ;;  %v6233_v39 = vsel %vm2668_vm12, 1.0, %v12306_v40  ;;  %12387 = vst [vmem:[#allocation49_spill] sm:$0xff] %v10225_v2 }
 0x46a   : > { %v3025_v20 = vpack.c.bf16 %v6231_v61, %v6230_v32  ;;  %v3026_v17 = vpack.c.bf16 %v6233_v39, %v6232_v45  ;;  %v6242_v26 = vsel %vm2677_vm6, 1.0, %v12306_v40  ;;  %v6243_v22 = vsel %vm2678_vm7, 1.0, %v12306_v40  ;;  %v12382_v32 = vld [vmem:[#allocation38_spill] sm:$0xff]  ;;  %v12383_v61 = vld [vmem:[#allocation39_spill] sm:$0xff]  ;;  %v12384_v39 = vld [vmem:[#allocation37_spill] sm:$0xff]  ;;  %4324 = vmatpush.bf16.msra.mxu0 %v6665_v5 }
 0x46b   : > { %v3375_v19 = vunpack.c.l.b16 %v10115_v0  ;;  %v10198_v55 = vpack.c.bf16 %v6243_v22, %v6242_v26  ;;  %v6244_v45 = vsel %vm2679_vm8, 1.0, %v12306_v40  ;;  %v6245_v5 = vsel %vm2680_vm13, 1.0, %v12306_v40 }
 0x46c   : > { %v1685_v31 = vpop.xlane.xlu0 %1684  ;;  %3089 = vst [vmem:[%s9387_s25 + $0xc0] sm:$0xff] %v3025_v20  ;;  %v3369_v26 = vunpack.c.l.b16 %v3025_v20  ;;  %v3372_v8 = vunpack.c.h.b16 %v3026_v17 }
 0x46d   : > { %vm1821_vm14 = vcmp.eq.f32.partialorder %v12382_v32, %v1685_v31  ;;  %vm1822_vm15 = vcmp.eq.f32.partialorder %v12383_v61, %v1685_v31  ;;  %vm1823_vm0 = vcmp.eq.f32.partialorder %v12384_v39, %v1685_v31  ;;  %3090 = vst [vmem:[%s9387_s25 + $0xc8] sm:$0xff] %v3026_v17  ;;  %v10211_v22 = vpop.xlane.xlu2 %2367  ;;  %v3370_v32 = vunpack.c.h.b16 %v3025_v20 }
 0x46e   : > { %v1949_v56 = vsel %vm1821_vm14, %v8683_v27, 512  ;;  %v1950_v0 = vsel %vm1822_vm15, %v8688_v50, 512  ;;  %v3371_v61 = vunpack.c.l.b16 %v3026_v17  ;;  %3095 = vst [vmem:[%s9387_s25 + $0xf0] sm:$0xff] %v10198_v55  ;;  %vm2369_vm2 = vcmp.eq.f32.partialorder %v9788_v58, %v10211_v22 }
 0x46f   : > { %vm2477_vm1 = vcmp.lt.s32.totalorder %v1949_v56, %v1950_v0  ;;  %vm1824_vm3 = vcmp.eq.f32.partialorder %v9614_v18, %v1685_v31  ;;  %v3793_v3 = vpop.f32.mrf.mxu0  ;;  %v10220_v48 = vpack.c.b16 %v3373_v44, %v3369_v26  ;;  %v2370_v20 = vsel %vm2369_vm2, %v2365_v37, inf  ;;  %v12390_v31 = vld [vmem:[#allocation40_spill] sm:$0xff] }
 0x470   : > { %v10227_v17 = vpack.c.b16 %v3374_v29, %v3370_v32  ;;  %v10229_v10 = vpack.c.b16 %v3375_v19, %v3371_v61  ;;  %v10231_v46 = vpack.c.b16 %v3376_v59, %v3372_v8  ;;  %2371 = vmin.xlane.f32.xlu1 %v2370_v20  ;;  %v1951_v58 = vsel %vm1823_vm0, %v8691_v6, 512  ;;  %v3882_v44 = vpop.f32.mrf.mxu1 }
 0x471   : > { %12386 = vst [vmem:[#allocation76_spill] sm:$0xff] %v10220_v48  ;;  %3807 = vmatmul.bf16.gmra.mxu0 %v10220_v48  ;;  %v2478_v51 = vsel %vm2477_vm1, %v1949_v56, %v1950_v0  ;;  %v2383_v26 = vand.u32 65535, %v9807_v1  ;;  %v3883_v37 = vadd.f32 %v3882_v44, %v3793_v3  ;;  %v10241_v59 = vpack.c.bf16 %v6245_v5, %v6244_v45 }
 0x472   : > { %12388 = vst [vmem:[#allocation38_spill] sm:$0xff] %v10227_v17  ;;  %3896 = vmatmul.bf16.gmra.mxu1 %v10227_v17  ;;  %3985 = vmatmul.bf16.gmra.mxu2 %v10229_v10  ;;  %vm2479_vm4 = vcmp.lt.s32.totalorder %v2478_v51, %v1951_v58  ;;  %v2464_v8 = vshra.s32 %v10165_v42, 16  ;;  %v1952_v19 = vsel %vm1824_vm3, %v8699_v12, 512  ;;  %v12389_v1 = vcvt.f32.s32 %v9809_v34  ;;  %v12391_v34 = vld [vmem:[#allocation81_spill] sm:$0xff] }
 0x473   : > { %4074 = vmatmul.bf16.gmra.mxu3 %v10231_v46  ;;  %v2480_v39 = vsel %vm2479_vm4, %v2478_v51, %v1951_v58  ;;  %v2403_v0 = vand.u32 65535, %v9858_v14  ;;  %3096 = vst [vmem:[%s9387_s25 + $0xf8] sm:$0xff] %v10241_v59  ;;  %v10253_v45 = vpop.xlane.xlu1 %2387  ;;  %v2385_v5 = vcvt.s32.f32 %v2383_v26 }
 0x474   : > { %v2272_v29 = vpop.xlane.xlu0 %2271  ;;  %v2275_v3 = vshll.u32 %v12389_v1, 16  ;;  %vm2481_vm5 = vcmp.lt.s32.totalorder %v2480_v39, %v1952_v19  ;;  %vm2389_vm6 = vcmp.eq.f32.partialorder %v9826_v7, %v10253_v45  ;;  %v10261_v20 = vcvt.s32.f32 %v2464_v8 }
 0x475   : > { %v2273_v56 = vcvt.f32.s32 %v2272_v29  ;;  %v10255_v32 = vsel %vm2481_vm5, %v2480_v39, %v1952_v19  ;;  %v1690_v61 = vpop.xlane.xlu2 %1689  ;;  %v2405_v19 = vcvt.s32.f32 %v2403_v0  ;;  %v3381_v7 = vunpack.c.l.b16 %v10198_v55 }
 0x476   : > { %vm1825_vm7 = vcmp.eq.f32.partialorder %v12390_v31, %v1690_v61  ;;  %vm1826_vm8 = vcmp.eq.f32.partialorder %v12391_v34, %v1690_v61  ;;  %v3971_v14 = vpop.f32.mrf.mxu2  ;;  %v2484_v44 = vshra.s32 %v10255_v32, 16  ;;  %v2390_v39 = vsel %vm2389_vm6, %v2385_v5, inf }
 0x477   : > { %v2276_v18 = vadd.s32 %v2275_v3, %v2273_v56  ;;  %v10263_v58 = vpop.f32.mrf.mxu0  ;;  %v1953_v51 = vsel %vm1825_vm7, %v8683_v27, 512  ;;  %v1954_v29 = vsel %vm1826_vm8, %v8688_v50, 512  ;;  %v4060_v26 = vpop.f32.mrf.mxu3  ;;  %v3382_v1 = vunpack.c.h.b16 %v10198_v55  ;;  %v12394_v3 = vld [vmem:[#allocation82_spill] sm:$0xff]  ;;  %2391 = vmin.xlane.f32.xlu0 %v2390_v39 }
 0x478   : > { %12392 = vst [vmem:[#allocation39_spill] sm:$0xff] %v10263_v58  ;;  %vm2497_vm9 = vcmp.lt.s32.totalorder %v1953_v51, %v1954_v29  ;;  %2467 = vmin.xlane.f32.xlu1 %v10261_v20  ;;  %v10271_v8 = vpop.f32.mrf.mxu1  ;;  %vm1827_vm11 = vcmp.eq.f32.partialorder %v12394_v3, %v1690_v61  ;;  %vm1828_vm12 = vcmp.eq.f32.partialorder %v9667_v63, %v1690_v61  ;;  %v3383_v0 = vunpack.c.l.b16 %v10241_v59 }
 0x479   : > { %vm2673_vm10 = vcmp.eq.s32.totalorder %v8683_v27, %v2276_v18  ;;  %12393 = vst [vmem:[#allocation37_spill] sm:$0xff] %v10271_v8  ;;  %v3972_v56 = vadd.f32 %v3971_v14, %v3883_v37  ;;  %vm2674_vm13 = vcmp.eq.s32.totalorder %v8688_v50, %v2276_v18  ;;  %vm2675_vm14 = vcmp.eq.s32.totalorder %v8691_v6, %v2276_v18 }
 0x47a   : > { %v10279_v5 = vcvt.s32.f32 %v2484_v44  ;;  %v2498_v34 = vsel %vm2497_vm9, %v1953_v51, %v1954_v29  ;;  %v6238_v55 = vsel %vm2673_vm10, 1.0, %v12306_v40  ;;  %v1955_v37 = vsel %vm1827_vm11, %v8691_v6, 512 }
 0x47b   : > { %v10281_v58 = vadd.f32 %v4060_v26, %v3972_v56  ;;  %vm2676_vm1 = vcmp.eq.s32.totalorder %v8699_v12, %v2276_v18  ;;  %vm2499_vm3 = vcmp.lt.s32.totalorder %v2498_v34, %v1955_v37  ;;  %v6240_v3 = vsel %vm2675_vm14, 1.0, %v12306_v40 }
 0x47c   : > { %v1695_v31 = vpop.xlane.xlu0 %1694  ;;  %2487 = vmin.xlane.f32.xlu2 %v10279_v5  ;;  %v2500_v26 = vsel %vm2499_vm3, %v2498_v34, %v1955_v37  ;;  %v6241_v61 = vsel %vm2676_vm1, 1.0, %v12306_v40  ;;  %v3384_v37 = vunpack.c.h.b16 %v10241_v59 }
 0x47d   : > { %12395 = vst [vmem:[#allocation40_spill] sm:$0xff] %v10281_v58  ;;  %vm1829_vm15 = vcmp.eq.f32.partialorder %v9642_v9, %v1695_v31  ;;  %vm1830_vm0 = vcmp.eq.f32.partialorder %v9645_v4, %v1695_v31  ;;  %v10293_v51 = vpop.xlane.xlu2 %2407  ;;  %vm1831_vm2 = vcmp.eq.f32.partialorder %v9716_v23, %v1695_v31  ;;  %v1956_v4 = vsel %vm1828_vm12, %v8699_v12, 512 }
 0x47e   : > { %v1957_v14 = vsel %vm1829_vm15, %v8683_v27, 512  ;;  %v1958_v44 = vsel %vm1830_vm0, %v8688_v50, 512  ;;  %v6239_v9 = vsel %vm2674_vm13, 1.0, %v12306_v40  ;;  %vm2409_vm4 = vcmp.eq.f32.partialorder %v9868_v13, %v10293_v51  ;;  %v10304_v29 = vpop.f32.mrf.mxu2 }
 0x47f   : > { %12396 = vst [vmem:[#allocation81_spill] sm:$0xff] %v10304_v29  ;;  %v3029_v39 = vpack.c.bf16 %v6239_v9, %v6238_v55  ;;  %v2410_v56 = vsel %vm2409_vm4, %v2405_v19, inf  ;;  %vm2517_vm5 = vcmp.lt.s32.totalorder %v1957_v14, %v1958_v44  ;;  %v3798_v63 = vpop.f32.mrf.mxu0  ;;  %vm2501_vm6 = vcmp.lt.s32.totalorder %v2500_v26, %v1956_v4  ;;  %v10312_v58 = vpop.f32.mrf.mxu3 }
 0x480   : > { %2411 = vmin.xlane.f32.xlu1 %v2410_v56  ;;  %12397 = vst [vmem:[#allocation82_spill] sm:$0xff] %v10312_v58  ;;  %v3887_v13 = vpop.f32.mrf.mxu1  ;;  %v10314_v29 = vsel %vm2501_vm6, %v2500_v26, %v1956_v4  ;;  %vm1832_vm7 = vcmp.eq.f32.partialorder %v9733_v33, %v1695_v31  ;;  %v3030_v8 = vpack.c.bf16 %v6241_v61, %v6240_v3  ;;  %v1959_v18 = vsel %vm1831_vm2, %v8691_v6, 512  ;;  %v12403_v61 = vld [vmem:[#allocation93_spill] sm:$0xff] }
 0x481   : > { %3093 = vst [vmem:[%s9387_s25 + $0xe0] sm:$0xff] %v3029_v39  ;;  %v3377_v34 = vunpack.c.l.b16 %v3029_v39  ;;  %v3378_v55 = vunpack.c.h.b16 %v3029_v39  ;;  %v3888_v19 = vadd.f32 %v3887_v13, %v3798_v63  ;;  %v2504_v9 = vshra.s32 %v10314_v29, 16 }
 0x482   : > { %v2518_v4 = vsel %vm2517_vm5, %v1957_v14, %v1958_v44  ;;  %3094 = vst [vmem:[%s9387_s25 + $0xe8] sm:$0xff] %v3030_v8  ;;  %v3379_v59 = vunpack.c.l.b16 %v3030_v8  ;;  %v3380_v39 = vunpack.c.h.b16 %v3030_v8  ;;  %v1960_v33 = vsel %vm1832_vm7, %v8699_v12, 512  ;;  %v12400_v14 = vld [vmem:[#allocation90_spill] sm:$0xff]  ;;  %v12401_v8 = vld [vmem:[#allocation91_spill] sm:$0xff]  ;;  %v12402_v44 = vld [vmem:[#allocation92_spill] sm:$0xff] }
 0x483   : > { %v10323_v56 = vpack.c.b16 %v3381_v7, %v3377_v34  ;;  %v10325_v58 = vpack.c.b16 %v3382_v1, %v3378_v55  ;;  %v10328_v26 = vcvt.s32.f32 %v2504_v9  ;;  %vm2519_vm8 = vcmp.lt.s32.totalorder %v2518_v4, %v1959_v18 }
 0x484   : > { %v2520_v23 = vsel %vm2519_vm8, %v2518_v4, %v1959_v18  ;;  %v10335_v7 = vpack.c.b16 %v3383_v0, %v3379_v59  ;;  %v10337_v1 = vpack.c.b16 %v3384_v37, %v3380_v39 }
 0x485   : > { %12398 = vst [vmem:[#allocation103_spill] sm:$0xff] %v10323_v56  ;;  %3812 = vmatmul.bf16.gmra.mxu0 %v10323_v56  ;;  %3901 = vmatmul.bf16.gmra.mxu1 %v10325_v58  ;;  %v1700_v31 = vpop.xlane.xlu2 %1699  ;;  %vm2521_vm9 = vcmp.lt.s32.totalorder %v2520_v23, %v1960_v33 }
 0x486   : > { %12399 = vst [vmem:[#allocation104_spill] sm:$0xff] %v10325_v58  ;;  %2507 = vmin.xlane.f32.xlu2 %v10328_v26  ;;  %4878 = vmatpush.bf16.msrb.mxu0 %v10323_v56  ;;  %vm1833_vm10 = vcmp.eq.f32.partialorder %v12400_v14, %v1700_v31  ;;  %vm1834_vm11 = vcmp.eq.f32.partialorder %v12401_v8, %v1700_v31  ;;  %v12406_v14 = vld [vmem:[#allocation67_spill] sm:$0xff] }
 0x487   : > { %vm1835_vm12 = vcmp.eq.f32.partialorder %v12402_v44, %v1700_v31  ;;  %4904 = vmatpush.bf16.msrb.mxu2 %v10325_v58  ;;  %v1961_v3 = vsel %vm1833_vm10, %v8683_v27, 512  ;;  %v1962_v63 = vsel %vm1834_vm11, %v8688_v50, 512  ;;  %4079 = vmatmul.bf16.gmra.mxu3 %v10337_v1  ;;  %v10348_v0 = vsel %vm2521_vm9, %v2520_v23, %v1960_v33  ;;  %v12407_v44 = vld [vmem:[#allocation84_spill] sm:$0xff] }
 0x488   : > { %3990 = vmatmul.bf16.gmra.mxu2 %v10335_v7  ;;  %vm1836_vm13 = vcmp.eq.f32.partialorder %v12403_v61, %v1700_v31  ;;  %vm2537_vm14 = vcmp.lt.s32.totalorder %v1961_v3, %v1962_v63  ;;  %v3976_v13 = vpop.f32.mrf.mxu2  ;;  %v2524_v34 = vshra.s32 %v10348_v0, 16  ;;  %v1963_v55 = vsel %vm1835_vm12, %v8691_v6, 512  ;;  %v4065_v18 = vpop.f32.mrf.mxu3  ;;  %v12405_v31 = vld [vmem:[#allocation48_spill] sm:$0xff]  ;;  %v12410_v61 = vld [vmem:[#allocation78_spill] sm:$0xff] }
 0x489   : > { %v3977_v37 = vadd.f32 %v3976_v13, %v3888_v19  ;;  %v2538_v9 = vsel %vm2537_vm14, %v1961_v3, %v1962_v63  ;;  %v1964_v39 = vsel %vm1836_vm13, %v8699_v12, 512  ;;  %v12408_v3 = vld [vmem:[#allocation85_spill] sm:$0xff]  ;;  %v12411_v13 = vld [vmem:[#allocation71_spill] sm:$0xff] }
 0x48a   : > { %4879 = vmatpush.bf16.msrb.mxu0 %v10220_v48  ;;  %v10355_v4 = vcvt.s32.f32 %v2524_v34  ;;  %vm2539_vm15 = vcmp.lt.s32.totalorder %v2538_v9, %v1963_v55  ;;  %v12409_v63 = vld [vmem:[#allocation77_spill] sm:$0xff]  ;;  %v12412_v34 = vld [vmem:[#allocation72_spill] sm:$0xff] }
 0x48b   : > { %4905 = vmatpush.bf16.msrb.mxu2 %v10227_v17  ;;  %v10357_v59 = vadd.f32 %v4065_v18, %v3977_v37  ;;  %v2540_v33 = vsel %vm2539_vm15, %v2538_v9, %v1963_v55  ;;  %v12413_v55 = vld [vmem:[#allocation68_spill] sm:$0xff]  ;;  %v12414_v37 = vld [vmem:[#allocation69_spill] sm:$0xff]  ;;  %v2334_v9 = vcvt.f32.s32 %v9921_v49 }
 0x48c   : > { %2527 = vmin.xlane.f32.xlu0 %v10355_v4  ;;  %vm2541_vm0 = vcmp.lt.s32.totalorder %v2540_v33, %v1964_v39 }
 0x48d   : > { %12404 = vst [vmem:[#allocation90_spill] sm:$0xff] %v10357_v59  ;;  %v10362_v23 = vsel %vm2541_vm0, %v2540_v33, %v1964_v39  ;;  %v2335_v39 = vshll.u32 %v2334_v9, 16  ;;  %v2423_v59 = vand.u32 65535, %v9935_v38  ;;  %v2314_v38 = vcvt.f32.s32 %v9992_v30  ;;  %v10403_v30 = vpop.f32.mrf.mxu1 }
 0x48e   : > { %4880 = vmatpush.bf16.msrb.mxu0 %v10020_v53  ;;  %v2544_v19 = vshra.s32 %v10362_v23, 16  ;;  %12416 = vst [vmem:[#allocation92_spill] sm:$0xff] %v10403_v30 }
 0x48f   : > { %4906 = vmatpush.bf16.msrb.mxu2 %v10022_v41  ;;  %v2425_v56 = vcvt.s32.f32 %v2423_v59  ;;  %v2315_v48 = vshll.u32 %v2314_v38, 16 }
 0x490   : > { %v10368_v8 = vcvt.s32.f32 %v2544_v19 }
 0x492   : > { %4881 = vmatpush.bf16.msrb.mxu0 %v12405_v31 }
 0x493   : > { %4907 = vmatpush.bf16.msrb.mxu2 %v12406_v14  ;;  %v2443_v14 = vand.u32 65535, %v10060_v35 }
 0x494   : > { %2547 = vmin.xlane.f32.xlu0 %v10368_v8 }
 0x495   : > { %v2445_v59 = vcvt.s32.f32 %v2443_v14 }
 0x496   : > { %4882 = vmatpush.bf16.msrb.mxu0 %v12407_v44 }
 0x497   : > { %4908 = vmatpush.bf16.msrb.mxu2 %v12408_v3 }
 0x49a   : > { %4883 = vmatpush.bf16.msrb.mxu0 %v12409_v63 }
 0x49b   : > { %4909 = vmatpush.bf16.msrb.mxu2 %v12410_v61 }
 0x49e   : > { %4884 = vmatpush.bf16.msrb.mxu0 %v12411_v13 }
 0x49f   : > { %4910 = vmatpush.bf16.msrb.mxu2 %v12412_v34 }
 0x4a2   : > { %4885 = vmatpush.bf16.msrb.mxu0 %v12413_v55 }
 0x4a3   : > { %4911 = vmatpush.bf16.msrb.mxu2 %v12414_v37 }
 0x4b5   : > { %v2332_v18 = vpop.xlane.xlu1 %2331 }
 0x4b6   : > { %v2333_v33 = vcvt.f32.s32 %v2332_v18 }
 0x4b8   : > { %v2336_v19 = vadd.s32 %v2335_v39, %v2333_v33 }
 0x4ba   : > { %vm2685_vm1 = vcmp.eq.s32.totalorder %v8683_v27, %v2336_v19  ;;  %vm2686_vm2 = vcmp.eq.s32.totalorder %v8688_v50, %v2336_v19  ;;  %vm2687_vm3 = vcmp.eq.s32.totalorder %v8691_v6, %v2336_v19  ;;  %vm2688_vm4 = vcmp.eq.s32.totalorder %v8699_v12, %v2336_v19 }
 0x4bb   : > { %v6250_v2 = vsel %vm2685_vm1, 1.0, %v12306_v40  ;;  %v6251_v49 = vsel %vm2686_vm2, 1.0, %v12306_v40  ;;  %v6252_v9 = vsel %vm2687_vm3, 1.0, %v12306_v40  ;;  %v6253_v18 = vsel %vm2688_vm4, 1.0, %v12306_v40 }
 0x4bc   : > { %v3035_v39 = vpack.c.bf16 %v6251_v49, %v6250_v2  ;;  %v3036_v33 = vpack.c.bf16 %v6253_v18, %v6252_v9 }
 0x4bd   : > { %v10390_v58 = vpop.xlane.xlu1 %2427 }
 0x4be   : > { %vm2429_vm5 = vcmp.eq.f32.partialorder %v9976_v62, %v10390_v58  ;;  %3099 = vst [vmem:[%s9387_s25 + $0x110] sm:$0xff] %v3035_v39  ;;  %v10401_v62 = vpop.f32.mrf.mxu0  ;;  %v3389_v9 = vunpack.c.l.b16 %v3035_v39  ;;  %v3390_v18 = vunpack.c.h.b16 %v3035_v39  ;;  %v3392_v38 = vunpack.c.h.b16 %v3036_v33 }
 0x4bf   : > { %v2430_v19 = vsel %vm2429_vm5, %v2425_v56, inf  ;;  %3100 = vst [vmem:[%s9387_s25 + $0x118] sm:$0xff] %v3036_v33 }
 0x4c0   : > { %2431 = vmin.xlane.f32.xlu1 %v2430_v19  ;;  %v2312_v17 = vpop.xlane.xlu0 %2311  ;;  %12415 = vst [vmem:[#allocation91_spill] sm:$0xff] %v10401_v62 }
 0x4c1   : > { %v2313_v41 = vcvt.f32.s32 %v2312_v17 }
 0x4c3   : > { %v2316_v53 = vadd.s32 %v2315_v48, %v2313_v41 }
 0x4c5   : > { %vm2681_vm6 = vcmp.eq.s32.totalorder %v8683_v27, %v2316_v53  ;;  %vm2682_vm7 = vcmp.eq.s32.totalorder %v8688_v50, %v2316_v53  ;;  %vm2683_vm8 = vcmp.eq.s32.totalorder %v8691_v6, %v2316_v53  ;;  %vm2684_vm9 = vcmp.eq.s32.totalorder %v8699_v12, %v2316_v53 }
 0x4c6   : > { %v6246_v2 = vsel %vm2681_vm6, 1.0, %v12306_v40  ;;  %v6247_v17 = vsel %vm2682_vm7, 1.0, %v12306_v40  ;;  %v6248_v41 = vsel %vm2683_vm8, 1.0, %v12306_v40  ;;  %v6249_v48 = vsel %vm2684_vm9, 1.0, %v12306_v40 }
 0x4c7   : > { %v3033_v35 = vpack.c.bf16 %v6247_v17, %v6246_v2  ;;  %v3034_v56 = vpack.c.bf16 %v6249_v48, %v6248_v41  ;;  %v3391_v53 = vunpack.c.l.b16 %v3036_v33  ;;  %v10424_v33 = vpop.f32.mrf.mxu2 }
 0x4c8   : > { %v1705_v49 = vpop.xlane.xlu0 %1704  ;;  %v10416_v2 = vpop.xlane.xlu2 %2447  ;;  %12417 = vst [vmem:[#allocation93_spill] sm:$0xff] %v10424_v33 }
 0x4c9   : > { %vm1837_vm10 = vcmp.eq.f32.partialorder %v9924_v47, %v1705_v49  ;;  %vm1838_vm11 = vcmp.eq.f32.partialorder %v9940_v54, %v1705_v49  ;;  %3097 = vst [vmem:[%s9387_s25 + $0x100] sm:$0xff] %v3033_v35  ;;  %vm1839_vm12 = vcmp.eq.f32.partialorder %v9965_v57, %v1705_v49  ;;  %v3385_v62 = vunpack.c.l.b16 %v3033_v35 }
 0x4ca   : > { %v1965_v19 = vsel %vm1837_vm10, %v8683_v27, 512  ;;  %v1966_v30 = vsel %vm1838_vm11, %v8688_v50, 512  ;;  %3098 = vst [vmem:[%s9387_s25 + $0x108] sm:$0xff] %v3034_v56  ;;  %v3386_v14 = vunpack.c.h.b16 %v3033_v35  ;;  %v3387_v39 = vunpack.c.l.b16 %v3034_v56 }
 0x4cb   : > { %vm2557_vm13 = vcmp.lt.s32.totalorder %v1965_v19, %v1966_v30  ;;  %v3388_v17 = vunpack.c.h.b16 %v3034_v56  ;;  %v2354_v47 = vcvt.f32.s32 %v10106_v36  ;;  %vm2449_vm14 = vcmp.eq.f32.partialorder %v10083_v43, %v10416_v2 }
 0x4cc   : > { %vm1840_vm15 = vcmp.eq.f32.partialorder %v9981_v25, %v1705_v49  ;;  %v10422_v54 = vpack.c.b16 %v3389_v9, %v3385_v62  ;;  %v2450_v41 = vsel %vm2449_vm14, %v2445_v59, inf  ;;  %v10426_v48 = vpack.c.b16 %v3390_v18, %v3386_v14  ;;  %v3803_v35 = vpop.f32.mrf.mxu0  ;;  %v3892_v43 = vpop.f32.mrf.mxu1 }
 0x4cd   : > { %v10428_v31 = vpack.c.b16 %v3391_v53, %v3387_v39  ;;  %v10430_v3 = vpack.c.b16 %v3392_v38, %v3388_v17  ;;  %2451 = vmin.xlane.f32.xlu2 %v2450_v41  ;;  %v1967_v36 = vsel %vm1839_vm12, %v8691_v6, 512  ;;  %v2558_v62 = vsel %vm2557_vm13, %v1965_v19, %v1966_v30  ;;  %v10439_v59 = vpop.f32.mrf.mxu3 }
 0x4ce   : > { %3817 = vmatmul.bf16.gmra.mxu0 %v10422_v54  ;;  %v3893_v56 = vadd.f32 %v3892_v43, %v3803_v35  ;;  %3906 = vmatmul.bf16.gmra.mxu1 %v10426_v48  ;;  %vm2559_vm0 = vcmp.lt.s32.totalorder %v2558_v62, %v1967_v36  ;;  %12418 = vst [vmem:[#allocation77_spill] sm:$0xff] %v10439_v59  ;;  %v1968_v57 = vsel %vm1840_vm15, %v8699_v12, 512  ;;  %v2355_v53 = vshll.u32 %v2354_v47, 16 }
 0x4cf   : > { %3995 = vmatmul.bf16.gmra.mxu2 %v10428_v31  ;;  %4084 = vmatmul.bf16.gmra.mxu3 %v10430_v3  ;;  %v2560_v18 = vsel %vm2559_vm0, %v2558_v62, %v1967_v36 }
 0x4d0   : > { %v2352_v9 = vpop.xlane.xlu0 %2351  ;;  %vm2561_vm1 = vcmp.lt.s32.totalorder %v2560_v18, %v1968_v57  ;;  %v1710_v19 = vpop.xlane.xlu2 %1709 }
 0x4d1   : > { %v2353_v38 = vcvt.f32.s32 %v2352_v9  ;;  %v10445_v30 = vsel %vm2561_vm1, %v2560_v18, %v1968_v57  ;;  %vm1841_vm2 = vcmp.eq.f32.partialorder %v9985_v16, %v1710_v19  ;;  %vm1842_vm3 = vcmp.eq.f32.partialorder %v10027_v60, %v1710_v19 }
 0x4d2   : > { %v2564_v39 = vshra.s32 %v10445_v30, 16  ;;  %vm1843_vm4 = vcmp.eq.f32.partialorder %v10064_v52, %v1710_v19  ;;  %v1969_v17 = vsel %vm1841_vm2, %v8683_v27, 512  ;;  %v1970_v25 = vsel %vm1842_vm3, %v8688_v50, 512 }
 0x4d3   : > { %v2356_v14 = vadd.s32 %v2355_v53, %v2353_v38  ;;  %vm1844_vm6 = vcmp.eq.f32.partialorder %v10092_v28, %v1710_v19  ;;  %vm2577_vm7 = vcmp.lt.s32.totalorder %v1969_v17, %v1970_v25  ;;  %v1971_v47 = vsel %vm1843_vm4, %v8691_v6, 512 }
 0x4d4   : > { %v10457_v16 = vcvt.s32.f32 %v2564_v39  ;;  %v2578_v60 = vsel %vm2577_vm7, %v1969_v17, %v1970_v25  ;;  %v1972_v57 = vsel %vm1844_vm6, %v8699_v12, 512  ;;  %v2374_v25 = vcvt.f32.s32 %v10211_v22 }
 0x4d5   : > { %vm2689_vm5 = vcmp.eq.s32.totalorder %v8683_v27, %v2356_v14  ;;  %vm2690_vm8 = vcmp.eq.s32.totalorder %v8688_v50, %v2356_v14  ;;  %v3981_v49 = vpop.f32.mrf.mxu2  ;;  %vm2691_vm9 = vcmp.eq.s32.totalorder %v8691_v6, %v2356_v14  ;;  %vm2579_vm10 = vcmp.lt.s32.totalorder %v2578_v60, %v1971_v47 }
 0x4d6   : > { %v3982_v41 = vadd.f32 %v3981_v49, %v3893_v56  ;;  %v4070_v52 = vpop.f32.mrf.mxu3  ;;  %v6254_v35 = vsel %vm2689_vm5, 1.0, %v12306_v40  ;;  %v6255_v43 = vsel %vm2690_vm8, 1.0, %v12306_v40  ;;  %vm2692_vm11 = vcmp.eq.s32.totalorder %v8699_v12, %v2356_v14  ;;  %2567 = vmin.xlane.f32.xlu1 %v10457_v16 }
 0x4d7   : > { %v2580_v18 = vsel %vm2579_vm10, %v2578_v60, %v1971_v47  ;;  %v10473_v53 = vpack.c.bf16 %v6255_v43, %v6254_v35  ;;  %v6256_v38 = vsel %vm2691_vm9, 1.0, %v12306_v40  ;;  %v6680_v47 = vld [vmem:[%s12362_s2 + $0x78] sm:$0xff]  ;;  %v2375_v60 = vshll.u32 %v2374_v25, 16  ;;  %v10502_v43 = vpop.f32.mrf.mxu0 }
 0x4d8   : > { %v1715_v36 = vpop.xlane.xlu0 %1714  ;;  %v10463_v62 = vadd.f32 %v4070_v52, %v3982_v41  ;;  %vm2581_vm15 = vcmp.lt.s32.totalorder %v2580_v18, %v1972_v57  ;;  %v2463_v41 = vand.u32 65535, %v10165_v42  ;;  %4406 = vmatpush.bf16.msra.mxu1 %v6680_v47  ;;  %12420 = vst [vmem:[#allocation71_spill] sm:$0xff] %v10502_v43  ;;  %v2394_v22 = vcvt.f32.s32 %v10253_v45 }
 0x4d9   : > { %vm1845_vm12 = vcmp.eq.f32.partialorder %v10074_v11, %v1715_v36  ;;  %vm1846_vm13 = vcmp.eq.f32.partialorder %v10078_v15, %v1715_v36  ;;  %v6257_v11 = vsel %vm2692_vm11, 1.0, %v12306_v40  ;;  %v6696_v15 = vld [vmem:[%s12362_s2 + $0xf8] sm:$0xff]  ;;  %v10482_v39 = vsel %vm2581_vm15, %v2580_v18, %v1972_v57  ;;  %3101 = vst [vmem:[%s9387_s25 + $0x120] sm:$0xff] %v10473_v53 }
 0x4da   : > { %12419 = vst [vmem:[#allocation78_spill] sm:$0xff] %v10463_v62  ;;  %v1973_v56 = vsel %vm1845_vm12, %v8683_v27, 512  ;;  %v1974_v9 = vsel %vm1846_vm13, %v8688_v50, 512  ;;  %v10486_v28 = vpack.c.bf16 %v6257_v11, %v6256_v38  ;;  %vm1847_vm0 = vcmp.eq.f32.partialorder %v10121_v24, %v1715_v36  ;;  %4584 = vmatpush.bf16.msra.mxu3 %v6696_v15 }
 0x4db   : > { %vm2597_vm14 = vcmp.lt.s32.totalorder %v1973_v56, %v1974_v9  ;;  %v2584_v19 = vshra.s32 %v10482_v39, 16  ;;  %v1975_v49 = vsel %vm1847_vm0, %v8691_v6, 512  ;;  %vm1848_vm2 = vcmp.eq.f32.partialorder %v10142_v21, %v1715_v36 }
 0x4dc   : > { %3102 = vst [vmem:[%s9387_s25 + $0x128] sm:$0xff] %v10486_v28  ;;  %v2598_v14 = vsel %vm2597_vm14, %v1973_v56, %v1974_v9  ;;  %v10505_v56 = vpop.f32.mrf.mxu1  ;;  %v1976_v57 = vsel %vm1848_vm2, %v8699_v12, 512  ;;  %v2465_v18 = vcvt.s32.f32 %v2463_v41  ;;  %v2395_v38 = vshll.u32 %v2394_v22, 16 }
 0x4dd   : > { %v10492_v17 = vcvt.s32.f32 %v2584_v19  ;;  %vm2599_vm1 = vcmp.lt.s32.totalorder %v2598_v14, %v1975_v49  ;;  %12421 = vst [vmem:[#allocation72_spill] sm:$0xff] %v10505_v56  ;;  %v2483_v19 = vand.u32 65535, %v10255_v32  ;;  %v3393_v25 = vunpack.c.l.b16 %v10473_v53  ;;  %v10523_v41 = vpop.f32.mrf.mxu2 }
 0x4de   : > { %v2600_v35 = vsel %vm2599_vm1, %v2598_v14, %v1975_v49  ;;  %v3394_v49 = vunpack.c.h.b16 %v10473_v53  ;;  %v3395_v47 = vunpack.c.l.b16 %v10486_v28  ;;  %12422 = vst [vmem:[#allocation68_spill] sm:$0xff] %v10523_v41 }
 0x4df   : > { %2587 = vmin.xlane.f32.xlu1 %v10492_v17  ;;  %vm2601_vm3 = vcmp.lt.s32.totalorder %v2600_v35, %v1976_v57 }
 0x4e0   : > { %v10529_v32 = vsel %vm2601_vm3, %v2600_v35, %v1976_v57 }
 0x4e3   : > { %v2372_v24 = vpop.xlane.xlu1 %2371 }
 0x4e4   : > { %v2373_v52 = vcvt.f32.s32 %v2372_v24  ;;  %v3396_v24 = vunpack.c.h.b16 %v10486_v28 }
 0x4e6   : > { %v2376_v9 = vadd.s32 %v2375_v60, %v2373_v52 }
 0x4e8   : > { %vm2693_vm4 = vcmp.eq.s32.totalorder %v8683_v27, %v2376_v9  ;;  %vm2694_vm5 = vcmp.eq.s32.totalorder %v8688_v50, %v2376_v9  ;;  %vm2695_vm6 = vcmp.eq.s32.totalorder %v8691_v6, %v2376_v9  ;;  %vm2696_vm7 = vcmp.eq.s32.totalorder %v8699_v12, %v2376_v9 }
 0x4e9   : > { %v6258_v21 = vsel %vm2693_vm4, 1.0, %v12306_v40  ;;  %v6259_v42 = vsel %vm2694_vm5, 1.0, %v12306_v40  ;;  %v6260_v45 = vsel %vm2695_vm6, 1.0, %v12306_v40  ;;  %v6261_v36 = vsel %vm2696_vm7, 1.0, %v12306_v40 }
 0x4ea   : > { %v3039_v11 = vpack.c.bf16 %v6259_v42, %v6258_v21  ;;  %v3040_v15 = vpack.c.bf16 %v6261_v36, %v6260_v45  ;;  %v2392_v60 = vpop.xlane.xlu0 %2391  ;;  %v10532_v36 = vpop.f32.mrf.mxu3 }
 0x4eb   : > { %v10517_v14 = vpop.xlane.xlu1 %2467  ;;  %v2393_v9 = vcvt.f32.s32 %v2392_v60  ;;  %12423 = vst [vmem:[#allocation69_spill] sm:$0xff] %v10532_v36 }
 0x4ec   : > { %vm2469_vm8 = vcmp.eq.f32.partialorder %v10261_v20, %v10517_v14  ;;  %3103 = vst [vmem:[%s9387_s25 + $0x130] sm:$0xff] %v3039_v11  ;;  %v3397_v52 = vunpack.c.l.b16 %v3039_v11  ;;  %v3398_v22 = vunpack.c.h.b16 %v3039_v11  ;;  %v3399_v53 = vunpack.c.l.b16 %v3040_v15 }
 0x4ed   : > { %v2470_v21 = vsel %vm2469_vm8, %v2465_v18, inf  ;;  %3104 = vst [vmem:[%s9387_s25 + $0x138] sm:$0xff] %v3040_v15  ;;  %v3400_v42 = vunpack.c.h.b16 %v3040_v15  ;;  %v2396_v62 = vadd.s32 %v2395_v38, %v2393_v9  ;;  %v2414_v18 = vcvt.f32.s32 %v10293_v51 }
 0x4ee   : > { %v3808_v45 = vpop.f32.mrf.mxu0  ;;  %2471 = vmin.xlane.f32.xlu2 %v2470_v21  ;;  %v10534_v28 = vpack.c.b16 %v3397_v52, %v3393_v25  ;;  %v10536_v41 = vpack.c.b16 %v3398_v22, %v3394_v49  ;;  %v10538_v56 = vpack.c.b16 %v3399_v53, %v3395_v47  ;;  %v2485_v15 = vcvt.s32.f32 %v2483_v19 }
 0x4ef   : > { %v3897_v20 = vpop.f32.mrf.mxu1  ;;  %v10540_v11 = vpack.c.b16 %v3400_v42, %v3396_v24  ;;  %v10542_v35 = vpop.xlane.xlu2 %2487  ;;  %v2604_v25 = vshra.s32 %v10529_v32, 16  ;;  %vm2697_vm10 = vcmp.eq.s32.totalorder %v8683_v27, %v2396_v62  ;;  %vm2698_vm11 = vcmp.eq.s32.totalorder %v8688_v50, %v2396_v62  ;;  %v6695_v42 = vld [vmem:[%s12362_s2 + $0xf0] sm:$0xff] }
 0x4f0   : > { %v3898_v57 = vadd.f32 %v3897_v20, %v3808_v45  ;;  %3822 = vmatmul.bf16.gmra.mxu0 %v10534_v28  ;;  %3911 = vmatmul.bf16.gmra.mxu1 %v10536_v41  ;;  %vm2489_vm9 = vcmp.eq.f32.partialorder %v10279_v5, %v10542_v35  ;;  %vm2699_vm12 = vcmp.eq.s32.totalorder %v8691_v6, %v2396_v62  ;;  %v6262_v38 = vsel %vm2697_vm10, 1.0, %v12306_v40 }
 0x4f1   : > { %vm2700_vm13 = vcmp.eq.s32.totalorder %v8699_v12, %v2396_v62  ;;  %4000 = vmatmul.bf16.gmra.mxu2 %v10538_v56  ;;  %4089 = vmatmul.bf16.gmra.mxu3 %v10540_v11  ;;  %v2490_v51 = vsel %vm2489_vm9, %v2485_v15, inf  ;;  %v6263_v5 = vsel %vm2698_vm11, 1.0, %v12306_v40  ;;  %v2503_v49 = vand.u32 65535, %v10314_v29  ;;  %v6679_v29 = vld [vmem:[%s12362_s2 + $0x70] sm:$0xff] }
 0x4f2   : > { %2491 = vmin.xlane.f32.xlu0 %v2490_v51  ;;  %v3041_v47 = vpack.c.bf16 %v6263_v5, %v6262_v38  ;;  %v6264_v24 = vsel %vm2699_vm12, 1.0, %v12306_v40  ;;  %v6265_v62 = vsel %vm2700_vm13, 1.0, %v12306_v40  ;;  %v2415_v60 = vshll.u32 %v2414_v18, 16  ;;  %4585 = vmatpush.bf16.msra.mxu3 %v6695_v42 }
 0x4f3   : > { %v2412_v19 = vpop.xlane.xlu1 %2411  ;;  %v10561_v22 = vcvt.s32.f32 %v2604_v25  ;;  %v3042_v21 = vpack.c.bf16 %v6265_v62, %v6264_v24  ;;  %4407 = vmatpush.bf16.msra.mxu1 %v6679_v29 }
 0x4f4   : > { %v2413_v52 = vcvt.f32.s32 %v2412_v19  ;;  %3105 = vst [vmem:[%s9387_s25 + $0x140] sm:$0xff] %v3041_v47  ;;  %v3402_v42 = vunpack.c.h.b16 %v3041_v47 }
 0x4f5   : > { %v3986_v9 = vpop.f32.mrf.mxu2  ;;  %3106 = vst [vmem:[%s9387_s25 + $0x148] sm:$0xff] %v3042_v21 }
 0x4f6   : > { %v3987_v53 = vadd.f32 %v3986_v9, %v3898_v57  ;;  %v2416_v45 = vadd.s32 %v2415_v60, %v2413_v52  ;;  %2607 = vmin.xlane.f32.xlu2 %v10561_v22  ;;  %v4075_v20 = vpop.f32.mrf.mxu3  ;;  %v10574_v15 = vpop.f32.mrf.mxu0  ;;  %v2505_v57 = vcvt.s32.f32 %v2503_v49  ;;  %v2523_v52 = vand.u32 65535, %v10348_v0 }
 0x4f7   : > { %12425 = vst [vmem:[#allocation106_spill] sm:$0xff] %v10574_v15  ;;  %v10576_v25 = vpop.f32.mrf.mxu1  ;;  %v3401_v9 = vunpack.c.l.b16 %v3041_v47 }
 0x4f8   : > { %v10572_v18 = vadd.f32 %v4075_v20, %v3987_v53  ;;  %12426 = vst [vmem:[#allocation107_spill] sm:$0xff] %v10576_v25  ;;  %vm2701_vm14 = vcmp.eq.s32.totalorder %v8683_v27, %v2416_v45  ;;  %vm2702_vm15 = vcmp.eq.s32.totalorder %v8688_v50, %v2416_v45  ;;  %vm2703_vm0 = vcmp.eq.s32.totalorder %v8691_v6, %v2416_v45 }
 0x4f9   : > { %vm2704_vm1 = vcmp.eq.s32.totalorder %v8699_v12, %v2416_v45  ;;  %v10582_v51 = vpop.xlane.xlu2 %2507  ;;  %v6266_v38 = vsel %vm2701_vm14, 1.0, %v12306_v40  ;;  %v6267_v5 = vsel %vm2702_vm15, 1.0, %v12306_v40  ;;  %v6268_v24 = vsel %vm2703_vm0, 1.0, %v12306_v40 }
 0x4fa   : > { %12424 = vst [vmem:[#allocation105_spill] sm:$0xff] %v10572_v18  ;;  %vm2509_vm2 = vcmp.eq.f32.partialorder %v10328_v26, %v10582_v51  ;;  %v3043_v49 = vpack.c.bf16 %v6267_v5, %v6266_v38  ;;  %v6269_v62 = vsel %vm2704_vm1, 1.0, %v12306_v40  ;;  %v3403_v26 = vunpack.c.l.b16 %v3042_v21 }
 0x4fb   : > { %v2510_v19 = vsel %vm2509_vm2, %v2505_v57, inf  ;;  %v3044_v60 = vpack.c.bf16 %v6269_v62, %v6268_v24  ;;  %v3404_v20 = vunpack.c.h.b16 %v3042_v21  ;;  %v2525_v0 = vcvt.s32.f32 %v2523_v52 }
 0x4fc   : > { %2511 = vmin.xlane.f32.xlu0 %v2510_v19  ;;  %3107 = vst [vmem:[%s9387_s25 + $0x150] sm:$0xff] %v3043_v49  ;;  %v3405_v53 = vunpack.c.l.b16 %v3043_v49  ;;  %v3406_v29 = vunpack.c.h.b16 %v3043_v49  ;;  %v2543_v52 = vand.u32 65535, %v10362_v23  ;;  %v6678_v23 = vld [vmem:[%s12362_s2 + $0x68] sm:$0xff] }
 0x4fd   : > { %3108 = vst [vmem:[%s9387_s25 + $0x158] sm:$0xff] %v3044_v60  ;;  %v3407_v45 = vunpack.c.l.b16 %v3044_v60  ;;  %v3408_v18 = vunpack.c.h.b16 %v3044_v60  ;;  %v10605_v47 = vpop.f32.mrf.mxu2  ;;  %4408 = vmatpush.bf16.msra.mxu1 %v6678_v23 }
 0x4fe   : > { %v10593_v57 = vpack.c.b16 %v3405_v53, %v3401_v9  ;;  %v10595_v38 = vpack.c.b16 %v3406_v29, %v3402_v42  ;;  %12427 = vst [vmem:[#allocation108_spill] sm:$0xff] %v10605_v47  ;;  %v2545_v53 = vcvt.s32.f32 %v2543_v52 }
 0x4ff   : > { %v10597_v5 = vpack.c.b16 %v3407_v45, %v3403_v26  ;;  %v10599_v19 = vpack.c.b16 %v3408_v18, %v3404_v20  ;;  %v10601_v24 = vpop.xlane.xlu0 %2527  ;;  %v10611_v18 = vpop.f32.mrf.mxu3  ;;  %v6694_v20 = vld [vmem:[%s12362_s2 + $0xe8] sm:$0xff] }
 0x500   : > { %3827 = vmatmul.bf16.gmra.mxu0 %v10593_v57  ;;  %3916 = vmatmul.bf16.gmra.mxu1 %v10595_v38  ;;  %vm2529_vm3 = vcmp.eq.f32.partialorder %v10355_v4, %v10601_v24  ;;  %12428 = vst [vmem:[#allocation109_spill] sm:$0xff] %v10611_v18 }
 0x501   : > { %4005 = vmatmul.bf16.gmra.mxu2 %v10597_v5  ;;  %v2530_v62 = vsel %vm2529_vm3, %v2525_v0, inf  ;;  %4094 = vmatmul.bf16.gmra.mxu3 %v10599_v19  ;;  %v2434_v0 = vcvt.f32.s32 %v10390_v58  ;;  %v6677_v58 = vld [vmem:[%s12362_s2 + $0x60] sm:$0xff] }
 0x502   : > { %v3813_v21 = vpop.f32.mrf.mxu0  ;;  %v3902_v49 = vpop.f32.mrf.mxu1  ;;  %2531 = vmin.xlane.f32.xlu1 %v2530_v62  ;;  %4586 = vmatpush.bf16.msra.mxu3 %v6694_v20  ;;  %v2454_v20 = vcvt.f32.s32 %v10416_v2 }
 0x503   : > { %v3903_v60 = vadd.f32 %v3902_v49, %v3813_v21  ;;  %v2435_v21 = vshll.u32 %v2434_v0, 16  ;;  %4409 = vmatpush.bf16.msra.mxu1 %v6677_v58 }
 0x504   : > { %v2455_v0 = vshll.u32 %v2454_v20, 16 }
 0x507   : > { %v10614_v9 = vpop.xlane.xlu0 %2547 }
 0x508   : > { %vm2549_vm4 = vcmp.eq.f32.partialorder %v10368_v8, %v10614_v9 }
 0x509   : > { %v2550_v4 = vsel %vm2549_vm4, %v2545_v53, inf }
 0x50a   : > { %2551 = vmin.xlane.f32.xlu2 %v2550_v4  ;;  %v4080_v26 = vpop.f32.mrf.mxu3 }
 0x50b   : > { %v3991_v42 = vpop.f32.mrf.mxu2 }
 0x50c   : > { %v3992_v29 = vadd.f32 %v3991_v42, %v3903_v60  ;;  %v6693_v60 = vld [vmem:[%s12362_s2 + $0xe0] sm:$0xff] }
 0x50d   : > { %4587 = vmatpush.bf16.msra.mxu3 %v6693_v60 }
 0x50e   : > { %v10618_v45 = vadd.f32 %v4080_v26, %v3992_v29 }
 0x510   : > { %12429 = vst [vmem:[#allocation110_spill] sm:$0xff] %v10618_v45  ;;  %v2563_v45 = vand.u32 65535, %v10445_v30 }
 0x512   : > { %v10660_v18 = vpop.f32.mrf.mxu3  ;;  %v2565_v25 = vcvt.s32.f32 %v2563_v45 }
 0x513   : > { %12433 = vst [vmem:[#allocation114_spill] sm:$0xff] %v10660_v18 }
 0x533   : > { %v2432_v8 = vpop.xlane.xlu1 %2431 }
 0x534   : > { %v2433_v49 = vcvt.f32.s32 %v2432_v8 }
 0x536   : > { %v2436_v62 = vadd.s32 %v2435_v21, %v2433_v49  ;;  %v10644_v21 = vpop.f32.mrf.mxu0  ;;  %v10646_v49 = vpop.f32.mrf.mxu1 }
 0x537   : > { %12430 = vst [vmem:[#allocation111_spill] sm:$0xff] %v10644_v21 }
 0x538   : > { %vm2705_vm5 = vcmp.eq.s32.totalorder %v8683_v27, %v2436_v62  ;;  %vm2706_vm6 = vcmp.eq.s32.totalorder %v8688_v50, %v2436_v62  ;;  %vm2707_vm7 = vcmp.eq.s32.totalorder %v8691_v6, %v2436_v62  ;;  %vm2708_vm8 = vcmp.eq.s32.totalorder %v8699_v12, %v2436_v62  ;;  %12431 = vst [vmem:[#allocation112_spill] sm:$0xff] %v10646_v49 }
 0x539   : > { %v6270_v52 = vsel %vm2705_vm5, 1.0, %v12306_v40  ;;  %v6271_v53 = vsel %vm2706_vm6, 1.0, %v12306_v40  ;;  %v6272_v4 = vsel %vm2707_vm7, 1.0, %v12306_v40  ;;  %v6273_v42 = vsel %vm2708_vm8, 1.0, %v12306_v40 }
 0x53a   : > { %v3045_v29 = vpack.c.bf16 %v6271_v53, %v6270_v52  ;;  %v3046_v26 = vpack.c.bf16 %v6273_v42, %v6272_v4 }
 0x53c   : > { %3109 = vst [vmem:[%s9387_s25 + $0x160] sm:$0xff] %v3045_v29  ;;  %v3409_v4 = vunpack.c.l.b16 %v3045_v29  ;;  %v3410_v42 = vunpack.c.h.b16 %v3045_v29  ;;  %v3411_v20 = vunpack.c.l.b16 %v3046_v26 }
 0x53d   : > { %3110 = vst [vmem:[%s9387_s25 + $0x168] sm:$0xff] %v3046_v26 }
 0x540   : > { %v2452_v23 = vpop.xlane.xlu2 %2451 }
 0x541   : > { %v2453_v8 = vcvt.f32.s32 %v2452_v23  ;;  %v3412_v23 = vunpack.c.h.b16 %v3046_v26 }
 0x543   : > { %v2456_v62 = vadd.s32 %v2455_v0, %v2453_v8  ;;  %v10657_v0 = vpop.f32.mrf.mxu2 }
 0x544   : > { %12432 = vst [vmem:[#allocation113_spill] sm:$0xff] %v10657_v0 }
 0x545   : > { %vm2709_vm9 = vcmp.eq.s32.totalorder %v8683_v27, %v2456_v62  ;;  %vm2710_vm10 = vcmp.eq.s32.totalorder %v8688_v50, %v2456_v62  ;;  %vm2711_vm11 = vcmp.eq.s32.totalorder %v8691_v6, %v2456_v62  ;;  %vm2712_vm12 = vcmp.eq.s32.totalorder %v8699_v12, %v2456_v62 }
 0x546   : > { %v6274_v2 = vsel %vm2709_vm9, 1.0, %v12306_v40  ;;  %v6275_v60 = vsel %vm2710_vm10, 1.0, %v12306_v40  ;;  %v6276_v58 = vsel %vm2711_vm11, 1.0, %v12306_v40  ;;  %v6277_v52 = vsel %vm2712_vm12, 1.0, %v12306_v40 }
 0x547   : > { %v3047_v53 = vpack.c.bf16 %v6275_v60, %v6274_v2  ;;  %v3048_v30 = vpack.c.bf16 %v6277_v52, %v6276_v58 }
 0x549   : > { %3111 = vst [vmem:[%s9387_s25 + $0x170] sm:$0xff] %v3047_v53  ;;  %v3413_v8 = vunpack.c.l.b16 %v3047_v53  ;;  %v3414_v62 = vunpack.c.h.b16 %v3047_v53  ;;  %v3415_v49 = vunpack.c.l.b16 %v3048_v30  ;;  %v3416_v21 = vunpack.c.h.b16 %v3048_v30  ;;  %v10671_v26 = vpop.xlane.xlu1 %2567 }
 0x54a   : > { %3112 = vst [vmem:[%s9387_s25 + $0x178] sm:$0xff] %v3048_v30  ;;  %vm2569_vm13 = vcmp.eq.f32.partialorder %v10457_v16, %v10671_v26 }
 0x54b   : > { %v3818_v47 = vpop.f32.mrf.mxu0  ;;  %v10663_v15 = vpack.c.b16 %v3413_v8, %v3409_v4  ;;  %v10665_v2 = vpack.c.b16 %v3414_v62, %v3410_v42  ;;  %v10667_v60 = vpack.c.b16 %v3415_v49, %v3411_v20  ;;  %v10669_v29 = vpack.c.b16 %v3416_v21, %v3412_v23  ;;  %v3907_v58 = vpop.f32.mrf.mxu1  ;;  %v6692_v20 = vld [vmem:[%s12362_s2 + $0xd8] sm:$0xff] }
 0x54c   : > { %v3908_v52 = vadd.f32 %v3907_v58, %v3818_v47  ;;  %v2570_v45 = vsel %vm2569_vm13, %v2565_v25, inf  ;;  %v2583_v21 = vand.u32 65535, %v10482_v39  ;;  %v2474_v25 = vcvt.f32.s32 %v10517_v14  ;;  %v6676_v39 = vld [vmem:[%s12362_s2 + $0x58] sm:$0xff]  ;;  %4588 = vmatpush.bf16.msra.mxu3 %v6692_v20 }
 0x54d   : > { %3832 = vmatmul.bf16.gmra.mxu0 %v10663_v15  ;;  %3921 = vmatmul.bf16.gmra.mxu1 %v10665_v2  ;;  %v2494_v23 = vcvt.f32.s32 %v10542_v35 }
 0x54e   : > { %4010 = vmatmul.bf16.gmra.mxu2 %v10667_v60  ;;  %4099 = vmatmul.bf16.gmra.mxu3 %v10669_v29  ;;  %v2585_v16 = vcvt.s32.f32 %v2583_v21  ;;  %v2475_v62 = vshll.u32 %v2474_v25, 16 }
 0x54f   : > { %2571 = vmin.xlane.f32.xlu0 %v2570_v45  ;;  %4410 = vmatpush.bf16.msra.mxu1 %v6676_v39  ;;  %v2603_v45 = vand.u32 65535, %v10529_v32 }
 0x552   : > { %v3996_v49 = vpop.f32.mrf.mxu2  ;;  %v4085_v30 = vpop.f32.mrf.mxu3 }
 0x553   : > { %v3997_v53 = vadd.f32 %v3996_v49, %v3908_v52  ;;  %v10682_v47 = vpop.xlane.xlu1 %2587  ;;  %v2495_v52 = vshll.u32 %v2494_v23, 16  ;;  %v10695_v14 = vpop.f32.mrf.mxu0  ;;  %v2514_v23 = vcvt.f32.s32 %v10582_v51 }
 0x554   : > { %vm2589_vm14 = vcmp.eq.f32.partialorder %v10492_v17, %v10682_v47  ;;  %12435 = vst [vmem:[#allocation116_spill] sm:$0xff] %v10695_v14  ;;  %v10697_v21 = vpop.f32.mrf.mxu1 }
 0x555   : > { %v10680_v4 = vadd.f32 %v4085_v30, %v3997_v53  ;;  %v2590_v42 = vsel %vm2589_vm14, %v2585_v16, inf  ;;  %12436 = vst [vmem:[#allocation117_spill] sm:$0xff] %v10697_v21 }
 0x556   : > { %2591 = vmin.xlane.f32.xlu1 %v2590_v42 }
 0x557   : > { %12434 = vst [vmem:[#allocation115_spill] sm:$0xff] %v10680_v4 }
 0x561   : > { %v2472_v8 = vpop.xlane.xlu2 %2471 }
 0x562   : > { %v2473_v58 = vcvt.f32.s32 %v2472_v8  ;;  %v2605_v8 = vcvt.s32.f32 %v2603_v45 }
 0x564   : > { %v2476_v17 = vadd.s32 %v2475_v62, %v2473_v58  ;;  %v10718_v62 = vpop.f32.mrf.mxu2  ;;  %v10720_v58 = vpop.f32.mrf.mxu3 }
 0x565   : > { %v2492_v35 = vpop.xlane.xlu0 %2491  ;;  %12437 = vst [vmem:[#allocation118_spill] sm:$0xff] %v10718_v62 }
 0x566   : > { %vm2713_vm15 = vcmp.eq.s32.totalorder %v8683_v27, %v2476_v17  ;;  %vm2714_vm0 = vcmp.eq.s32.totalorder %v8688_v50, %v2476_v17  ;;  %vm2715_vm1 = vcmp.eq.s32.totalorder %v8691_v6, %v2476_v17  ;;  %vm2716_vm2 = vcmp.eq.s32.totalorder %v8699_v12, %v2476_v17  ;;  %12438 = vst [vmem:[#allocation119_spill] sm:$0xff] %v10720_v58 }
 0x567   : > { %v2493_v49 = vcvt.f32.s32 %v2492_v35  ;;  %v6278_v53 = vsel %vm2713_vm15, 1.0, %v12306_v40  ;;  %v6279_v32 = vsel %vm2714_vm0, 1.0, %v12306_v40  ;;  %v6280_v30 = vsel %vm2715_vm1, 1.0, %v12306_v40 }
 0x568   : > { %v3049_v16 = vpack.c.bf16 %v6279_v32, %v6278_v53  ;;  %v6281_v42 = vsel %vm2716_vm2, 1.0, %v12306_v40  ;;  %v2515_v32 = vshll.u32 %v2514_v23, 16 }
 0x569   : > { %v10707_v25 = vpop.xlane.xlu2 %2607  ;;  %v2496_v20 = vadd.s32 %v2495_v52, %v2493_v49  ;;  %v3050_v39 = vpack.c.bf16 %v6281_v42, %v6280_v30 }
 0x56a   : > { %vm2609_vm3 = vcmp.eq.f32.partialorder %v10561_v22, %v10707_v25  ;;  %3113 = vst [vmem:[%s9387_s25 + $0x180] sm:$0xff] %v3049_v16  ;;  %v3418_v4 = vunpack.c.h.b16 %v3049_v16 }
 0x56b   : > { %vm2717_vm4 = vcmp.eq.s32.totalorder %v8683_v27, %v2496_v20  ;;  %vm2718_vm5 = vcmp.eq.s32.totalorder %v8688_v50, %v2496_v20  ;;  %vm2719_vm6 = vcmp.eq.s32.totalorder %v8691_v6, %v2496_v20  ;;  %vm2720_vm7 = vcmp.eq.s32.totalorder %v8699_v12, %v2496_v20  ;;  %3114 = vst [vmem:[%s9387_s25 + $0x188] sm:$0xff] %v3050_v39 }
 0x56c   : > { %v2610_v51 = vsel %vm2609_vm3, %v2605_v8, inf  ;;  %v6282_v17 = vsel %vm2717_vm4, 1.0, %v12306_v40  ;;  %v6283_v22 = vsel %vm2718_vm5, 1.0, %v12306_v40  ;;  %v6284_v49 = vsel %vm2719_vm6, 1.0, %v12306_v40 }
 0x56d   : > { %2611 = vmin.xlane.f32.xlu2 %v2610_v51  ;;  %v3823_v52 = vpop.f32.mrf.mxu0  ;;  %v3912_v45 = vpop.f32.mrf.mxu1  ;;  %v3051_v35 = vpack.c.bf16 %v6283_v22, %v6282_v17  ;;  %v6285_v53 = vsel %vm2720_vm7, 1.0, %v12306_v40  ;;  %v3417_v20 = vunpack.c.l.b16 %v3049_v16  ;;  %v6691_v51 = vld [vmem:[%s12362_s2 + $0xd0] sm:$0xff]  ;;  %v3419_v22 = vunpack.c.l.b16 %v3050_v39  ;;  %v6674_v16 = vld [vmem:[%s12362_s2 + $0x48] sm:$0xff] }
 0x56e   : > { %v3913_v30 = vadd.f32 %v3912_v45, %v3823_v52  ;;  %v3052_v58 = vpack.c.bf16 %v6285_v53, %v6284_v49  ;;  %v6675_v17 = vld [vmem:[%s12362_s2 + $0x50] sm:$0xff]  ;;  %v3420_v52 = vunpack.c.h.b16 %v3050_v39  ;;  %4589 = vmatpush.bf16.msra.mxu3 %v6691_v51  ;;  %v6690_v39 = vld [vmem:[%s12362_s2 + $0xc8] sm:$0xff] }
 0x56f   : > { %v2512_v42 = vpop.xlane.xlu0 %2511  ;;  %3115 = vst [vmem:[%s9387_s25 + $0x190] sm:$0xff] %v3051_v35  ;;  %v3421_v8 = vunpack.c.l.b16 %v3051_v35  ;;  %v3422_v21 = vunpack.c.h.b16 %v3051_v35  ;;  %4411 = vmatpush.bf16.msra.mxu1 %v6675_v17  ;;  %v2534_v35 = vcvt.f32.s32 %v10601_v24 }
 0x570   : > { %v2513_v62 = vcvt.f32.s32 %v2512_v42  ;;  %3116 = vst [vmem:[%s9387_s25 + $0x198] sm:$0xff] %v3052_v58  ;;  %v3423_v23 = vunpack.c.l.b16 %v3052_v58  ;;  %v3424_v45 = vunpack.c.h.b16 %v3052_v58 }
 0x571   : > { %v10734_v49 = vpack.c.b16 %v3421_v8, %v3417_v20  ;;  %v10736_v53 = vpack.c.b16 %v3422_v21, %v3418_v4 }
 0x572   : > { %v2516_v14 = vadd.s32 %v2515_v32, %v2513_v62  ;;  %v10742_v42 = vpack.c.b16 %v3423_v23, %v3419_v22  ;;  %v10744_v18 = vpack.c.b16 %v3424_v45, %v3420_v52  ;;  %4590 = vmatpush.bf16.msra.mxu3 %v6690_v39  ;;  %v2535_v23 = vshll.u32 %v2534_v35, 16 }
 0x573   : > { %3837 = vmatmul.bf16.gmra.mxu0 %v10734_v49  ;;  %3926 = vmatmul.bf16.gmra.mxu1 %v10736_v53 }
 0x574   : > { %vm2721_vm8 = vcmp.eq.s32.totalorder %v8683_v27, %v2516_v14  ;;  %vm2722_vm9 = vcmp.eq.s32.totalorder %v8688_v50, %v2516_v14  ;;  %vm2723_vm10 = vcmp.eq.s32.totalorder %v8691_v6, %v2516_v14  ;;  %vm2724_vm11 = vcmp.eq.s32.totalorder %v8699_v12, %v2516_v14  ;;  %v4001_v4 = vpop.f32.mrf.mxu2  ;;  %4015 = vmatmul.bf16.gmra.mxu2 %v10742_v42  ;;  %v4090_v20 = vpop.f32.mrf.mxu3 }
 0x575   : > { %v6286_v24 = vsel %vm2721_vm8, 1.0, %v12306_v40  ;;  %v6287_v21 = vsel %vm2722_vm9, 1.0, %v12306_v40  ;;  %v6288_v62 = vsel %vm2723_vm10, 1.0, %v12306_v40  ;;  %v6289_v58 = vsel %vm2724_vm11, 1.0, %v12306_v40  ;;  %v10760_v14 = vpop.f32.mrf.mxu0  ;;  %4104 = vmatmul.bf16.gmra.mxu3 %v10744_v18  ;;  %4412 = vmatpush.bf16.msra.mxu1 %v6674_v16  ;;  %v10763_v17 = vpop.f32.mrf.mxu1 }
 0x576   : > { %v4002_v32 = vadd.f32 %v4001_v4, %v3913_v30  ;;  %12439 = vst [vmem:[#allocation120_spill] sm:$0xff] %v10760_v14  ;;  %v3053_v8 = vpack.c.bf16 %v6287_v21, %v6286_v24  ;;  %v3054_v51 = vpack.c.bf16 %v6289_v58, %v6288_v62  ;;  %v2532_v22 = vpop.xlane.xlu1 %2531  ;;  %v2554_v30 = vcvt.f32.s32 %v10614_v9 }
 0x577   : > { %12440 = vst [vmem:[#allocation121_spill] sm:$0xff] %v10763_v17  ;;  %v2533_v45 = vcvt.f32.s32 %v2532_v22 }
 0x578   : > { %v10765_v52 = vadd.f32 %v4090_v20, %v4002_v32  ;;  %3117 = vst [vmem:[%s9387_s25 + $0x1a0] sm:$0xff] %v3053_v8  ;;  %v2555_v32 = vshll.u32 %v2554_v30, 16  ;;  %v3425_v22 = vunpack.c.l.b16 %v3053_v8  ;;  %v3427_v17 = vunpack.c.l.b16 %v3054_v51 }
 0x579   : > { %3118 = vst [vmem:[%s9387_s25 + $0x1a8] sm:$0xff] %v3054_v51  ;;  %v2536_v0 = vadd.s32 %v2535_v23, %v2533_v45  ;;  %v3426_v23 = vunpack.c.h.b16 %v3053_v8  ;;  %v3428_v43 = vunpack.c.h.b16 %v3054_v51 }
 0x57a   : > { %12441 = vst [vmem:[#allocation122_spill] sm:$0xff] %v10765_v52 }
 0x57b   : > { %vm2725_vm12 = vcmp.eq.s32.totalorder %v8683_v27, %v2536_v0  ;;  %vm2726_vm13 = vcmp.eq.s32.totalorder %v8688_v50, %v2536_v0  ;;  %vm2727_vm14 = vcmp.eq.s32.totalorder %v8691_v6, %v2536_v0  ;;  %vm2728_vm15 = vcmp.eq.s32.totalorder %v8699_v12, %v2536_v0 }
 0x57c   : > { %v10774_v16 = vpop.f32.mrf.mxu2  ;;  %v6290_v35 = vsel %vm2725_vm12, 1.0, %v12306_v40  ;;  %v6291_v39 = vsel %vm2726_vm13, 1.0, %v12306_v40  ;;  %v6292_v4 = vsel %vm2727_vm14, 1.0, %v12306_v40  ;;  %v6293_v24 = vsel %vm2728_vm15, 1.0, %v12306_v40  ;;  %v10780_v9 = vpop.f32.mrf.mxu3 }
 0x57d   : > { %12442 = vst [vmem:[#allocation123_spill] sm:$0xff] %v10774_v16  ;;  %v3828_v21 = vpop.f32.mrf.mxu0  ;;  %v3055_v62 = vpack.c.bf16 %v6291_v39, %v6290_v35  ;;  %v3056_v58 = vpack.c.bf16 %v6293_v24, %v6292_v4  ;;  %v3917_v20 = vpop.f32.mrf.mxu1  ;;  %v6689_v4 = vld [vmem:[%s12362_s2 + $0xc0] sm:$0xff]  ;;  %v2574_v24 = vcvt.f32.s32 %v10671_v26 }
 0x57e   : > { %12443 = vst [vmem:[#allocation124_spill] sm:$0xff] %v10780_v9  ;;  %v2552_v0 = vpop.xlane.xlu2 %2551  ;;  %v3918_v45 = vadd.f32 %v3917_v20, %v3828_v21  ;;  %4591 = vmatpush.bf16.msra.mxu3 %v6689_v4 }
 0x57f   : > { %v2553_v16 = vcvt.f32.s32 %v2552_v0  ;;  %3119 = vst [vmem:[%s9387_s25 + $0x1b0] sm:$0xff] %v3055_v62  ;;  %v3429_v52 = vunpack.c.l.b16 %v3055_v62  ;;  %v3430_v14 = vunpack.c.h.b16 %v3055_v62  ;;  %v3431_v36 = vunpack.c.l.b16 %v3056_v58 }
 0x580   : > { %3120 = vst [vmem:[%s9387_s25 + $0x1b8] sm:$0xff] %v3056_v58  ;;  %v3432_v59 = vunpack.c.h.b16 %v3056_v58 }
 0x581   : > { %v2556_v33 = vadd.s32 %v2555_v32, %v2553_v16  ;;  %v10784_v9 = vpack.c.b16 %v3429_v52, %v3425_v22  ;;  %v10786_v35 = vpack.c.b16 %v3430_v14, %v3426_v23  ;;  %v10788_v30 = vpack.c.b16 %v3431_v36, %v3427_v17  ;;  %v6673_v22 = vld [vmem:[%s12362_s2 + $0x40] sm:$0xff] }
 0x582   : > { %v10790_v39 = vpack.c.b16 %v3432_v59, %v3428_v43  ;;  %v2575_v32 = vshll.u32 %v2574_v24, 16  ;;  %v2594_v23 = vcvt.f32.s32 %v10682_v47  ;;  %4413 = vmatpush.bf16.msra.mxu1 %v6673_v22 }
 0x583   : > { %vm2729_vm0 = vcmp.eq.s32.totalorder %v8683_v27, %v2556_v33  ;;  %vm2730_vm1 = vcmp.eq.s32.totalorder %v8688_v50, %v2556_v33  ;;  %vm2731_vm2 = vcmp.eq.s32.totalorder %v8691_v6, %v2556_v33  ;;  %vm2732_vm3 = vcmp.eq.s32.totalorder %v8699_v12, %v2556_v33  ;;  %3842 = vmatmul.bf16.gmra.mxu0 %v10784_v9 }
 0x584   : > { %v4006_v8 = vpop.f32.mrf.mxu2  ;;  %3931 = vmatmul.bf16.gmra.mxu1 %v10786_v35  ;;  %4020 = vmatmul.bf16.gmra.mxu2 %v10788_v30  ;;  %v6294_v59 = vsel %vm2729_vm0, 1.0, %v12306_v40  ;;  %v6295_v43 = vsel %vm2730_vm1, 1.0, %v12306_v40  ;;  %v6296_v36 = vsel %vm2731_vm2, 1.0, %v12306_v40  ;;  %v6297_v14 = vsel %vm2732_vm3, 1.0, %v12306_v40  ;;  %v4095_v52 = vpop.f32.mrf.mxu3 }
 0x585   : > { %v4007_v51 = vadd.f32 %v4006_v8, %v3918_v45  ;;  %4109 = vmatmul.bf16.gmra.mxu3 %v10790_v39  ;;  %v3057_v33 = vpack.c.bf16 %v6295_v43, %v6294_v59  ;;  %v3058_v17 = vpack.c.bf16 %v6297_v14, %v6296_v36  ;;  %v10812_v21 = vpop.f32.mrf.mxu0  ;;  %v10814_v62 = vpop.f32.mrf.mxu1 }
 0x586   : > { %12445 = vst [vmem:[#allocation126_spill] sm:$0xff] %v10812_v21  ;;  %v2595_v21 = vshll.u32 %v2594_v23, 16 }
 0x587   : > { %v10804_v16 = vadd.f32 %v4095_v52, %v4007_v51  ;;  %3121 = vst [vmem:[%s9387_s25 + $0x1c0] sm:$0xff] %v3057_v33  ;;  %v3433_v52 = vunpack.c.l.b16 %v3057_v33  ;;  %v3434_v4 = vunpack.c.h.b16 %v3057_v33  ;;  %v3435_v24 = vunpack.c.l.b16 %v3058_v17 }
 0x588   : > { %3122 = vst [vmem:[%s9387_s25 + $0x1c8] sm:$0xff] %v3058_v17 }
 0x589   : > { %12444 = vst [vmem:[#allocation125_spill] sm:$0xff] %v10804_v16 }
 0x58a   : > { %12446 = vst [vmem:[#allocation127_spill] sm:$0xff] %v10814_v62 }
 0x58c   : > { %v10828_v43 = vpop.f32.mrf.mxu2 }
 0x58d   : > { %12447 = vst [vmem:[#allocation128_spill] sm:$0xff] %v10828_v43  ;;  %v3436_v43 = vunpack.c.h.b16 %v3058_v17 }
 0x5c2   : > { %v2572_v58 = vpop.xlane.xlu0 %2571 }
 0x5c3   : > { %v2573_v20 = vcvt.f32.s32 %v2572_v58  ;;  %v10830_v58 = vpop.f32.mrf.mxu3 }
 0x5c5   : > { %v2576_v0 = vadd.s32 %v2575_v32, %v2573_v20 }
 0x5c7   : > { %vm2733_vm4 = vcmp.eq.s32.totalorder %v8683_v27, %v2576_v0  ;;  %vm2734_vm5 = vcmp.eq.s32.totalorder %v8688_v50, %v2576_v0  ;;  %vm2735_vm6 = vcmp.eq.s32.totalorder %v8691_v6, %v2576_v0  ;;  %vm2736_vm7 = vcmp.eq.s32.totalorder %v8699_v12, %v2576_v0 }
 0x5c8   : > { %v6298_v26 = vsel %vm2733_vm4, 1.0, %v12306_v40  ;;  %v6299_v45 = vsel %vm2734_vm5, 1.0, %v12306_v40  ;;  %v6300_v8 = vsel %vm2735_vm6, 1.0, %v12306_v40  ;;  %v6301_v59 = vsel %vm2736_vm7, 1.0, %v12306_v40 }
 0x5c9   : > { %v3059_v47 = vpack.c.bf16 %v6299_v45, %v6298_v26  ;;  %v3060_v36 = vpack.c.bf16 %v6301_v59, %v6300_v8  ;;  %v2592_v20 = vpop.xlane.xlu1 %2591 }
 0x5ca   : > { %v3833_v14 = vpop.f32.mrf.mxu0  ;;  %v3922_v51 = vpop.f32.mrf.mxu1  ;;  %v2593_v16 = vcvt.f32.s32 %v2592_v20 }
 0x5cb   : > { %v3923_v32 = vadd.f32 %v3922_v51, %v3833_v14  ;;  %3123 = vst [vmem:[%s9387_s25 + $0x1d0] sm:$0xff] %v3059_v47  ;;  %v3437_v0 = vunpack.c.l.b16 %v3059_v47  ;;  %v3438_v22 = vunpack.c.h.b16 %v3059_v47  ;;  %v3439_v62 = vunpack.c.l.b16 %v3060_v36 }
 0x5cc   : > { %3124 = vst [vmem:[%s9387_s25 + $0x1d8] sm:$0xff] %v3060_v36  ;;  %v3440_v26 = vunpack.c.h.b16 %v3060_v36  ;;  %v2596_v33 = vadd.s32 %v2595_v21, %v2593_v16 }
 0x5cd   : > { %v10834_v45 = vpack.c.b16 %v3437_v0, %v3433_v52  ;;  %v10836_v8 = vpack.c.b16 %v3438_v22, %v3434_v4  ;;  %v10838_v59 = vpack.c.b16 %v3439_v62, %v3435_v24  ;;  %v2614_v52 = vcvt.f32.s32 %v10707_v25 }
 0x5ce   : > { %v10840_v44 = vpack.c.b16 %v3440_v26, %v3436_v43  ;;  %vm2737_vm8 = vcmp.eq.s32.totalorder %v8683_v27, %v2596_v33  ;;  %vm2738_vm9 = vcmp.eq.s32.totalorder %v8688_v50, %v2596_v33  ;;  %vm2739_vm10 = vcmp.eq.s32.totalorder %v8691_v6, %v2596_v33 }
 0x5cf   : > { %3847 = vmatmul.bf16.gmra.mxu0 %v10834_v45  ;;  %3936 = vmatmul.bf16.gmra.mxu1 %v10836_v8  ;;  %vm2740_vm11 = vcmp.eq.s32.totalorder %v8699_v12, %v2596_v33  ;;  %v6302_v16 = vsel %vm2737_vm8, 1.0, %v12306_v40  ;;  %v6303_v21 = vsel %vm2738_vm9, 1.0, %v12306_v40  ;;  %v6304_v62 = vsel %vm2739_vm10, 1.0, %v12306_v40 }
 0x5d0   : > { %4025 = vmatmul.bf16.gmra.mxu2 %v10838_v59  ;;  %4114 = vmatmul.bf16.gmra.mxu3 %v10840_v44  ;;  %v6305_v23 = vsel %vm2740_vm11, 1.0, %v12306_v40  ;;  %v3061_v47 = vpack.c.bf16 %v6303_v21, %v6302_v16  ;;  %v2615_v24 = vshll.u32 %v2614_v52, 16 }
 0x5d1   : > { %v4011_v17 = vpop.f32.mrf.mxu2  ;;  %v3062_v36 = vpack.c.bf16 %v6305_v23, %v6304_v62  ;;  %v4100_v14 = vpop.f32.mrf.mxu3 }
 0x5d2   : > { %v4012_v43 = vadd.f32 %v4011_v17, %v3923_v32  ;;  %3125 = vst [vmem:[%s9387_s25 + $0x1e0] sm:$0xff] %v3061_v47  ;;  %v10867_v16 = vpop.f32.mrf.mxu0  ;;  %v3441_v21 = vunpack.c.l.b16 %v3061_v47  ;;  %v3442_v62 = vunpack.c.h.b16 %v3061_v47 }
 0x5d3   : > { %3126 = vst [vmem:[%s9387_s25 + $0x1e8] sm:$0xff] %v3062_v36  ;;  %v3443_v23 = vunpack.c.l.b16 %v3062_v36 }
 0x5d4   : > { %v10854_v51 = vadd.f32 %v4100_v14, %v4012_v43  ;;  %v3444_v43 = vunpack.c.h.b16 %v3062_v36 }
 0x5d9   : > { %v10885_v47 = vpop.f32.mrf.mxu2  ;;  %v10889_v36 = vpop.f32.mrf.mxu3 }
 0x5e0   : > { %v2612_v4 = vpop.xlane.xlu2 %2611 }
 0x5e1   : > { %v2613_v20 = vcvt.f32.s32 %v2612_v4 }
 0x5e3   : > { %v2616_v0 = vadd.s32 %v2615_v24, %v2613_v20 }
 0x5e5   : > { %vm2741_vm12 = vcmp.eq.s32.totalorder %v8683_v27, %v2616_v0  ;;  %vm2742_vm13 = vcmp.eq.s32.totalorder %v8688_v50, %v2616_v0  ;;  %vm2743_vm14 = vcmp.eq.s32.totalorder %v8691_v6, %v2616_v0  ;;  %vm2744_vm15 = vcmp.eq.s32.totalorder %v8699_v12, %v2616_v0  ;;  %v10869_v6 = vpop.f32.mrf.mxu1  ;;  %v12459_v50 = vld [vmem:[#allocation79_spill] sm:$0xff]  ;;  %v12460_v27 = vld [vmem:[#allocation80_spill] sm:$0xff] }
 0x5e6   : > { %v6306_v32 = vsel %vm2741_vm12, 1.0, %v12306_v40  ;;  %v6307_v22 = vsel %vm2742_vm13, 1.0, %v12306_v40  ;;  %v6308_v25 = vsel %vm2743_vm14, 1.0, %v12306_v40  ;;  %v6309_v26 = vsel %vm2744_vm15, 1.0, %v12306_v40 }
 0x5e7   : > { %v3063_v33 = vpack.c.bf16 %v6307_v22, %v6306_v32  ;;  %v3064_v17 = vpack.c.bf16 %v6309_v26, %v6308_v25 }
 0x5e9   : > { %3127 = vst [vmem:[%s9387_s25 + $0x1f0] sm:$0xff] %v3063_v33  ;;  %v3445_v12 = vunpack.c.l.b16 %v3063_v33  ;;  %v3446_v14 = vunpack.c.h.b16 %v3063_v33  ;;  %v3447_v52 = vunpack.c.l.b16 %v3064_v17  ;;  %v3448_v4 = vunpack.c.h.b16 %v3064_v17 }
 0x5ea   : > { %3128 = vst [vmem:[%s9387_s25 + $0x1f8] sm:$0xff] %v3064_v17 }
 0x5eb   : > { %v10873_v24 = vpack.c.b16 %v3445_v12, %v3441_v21  ;;  %v10875_v20 = vpack.c.b16 %v3446_v14, %v3442_v62  ;;  %v10877_v40 = vpack.c.b16 %v3447_v52, %v3443_v23  ;;  %v10879_v0 = vpack.c.b16 %v3448_v4, %v3444_v43  ;;  %v12448_v43 = vld [vmem:[#allocation70_spill] sm:$0xff]  ;;  %v12449_v12 = vld [vmem:[#allocation55_spill] sm:$0xff] }
 0x5ed   : > { %3852 = vmatmul.bf16.gmra.mxu0 %v10873_v24  ;;  %3941 = vmatmul.bf16.gmra.mxu1 %v10875_v20 }
 0x5ee   : > { %4030 = vmatmul.bf16.gmra.mxu2 %v10877_v40  ;;  %4119 = vmatmul.bf16.gmra.mxu3 %v10879_v0 }
 0x5ef   : > { %4891 = vmatpush.bf16.msrb.mxu1 %v10873_v24  ;;  %4917 = vmatpush.bf16.msrb.mxu3 %v10875_v20 }
 0x5f0   : > { %v3838_v32 = vpop.f32.mrf.mxu0  ;;  %v3927_v22 = vpop.f32.mrf.mxu1 }
 0x5f1   : > { %v3928_v25 = vadd.f32 %v3927_v22, %v3838_v32  ;;  %v12450_v22 = vld [vmem:[#allocation56_spill] sm:$0xff] }
 0x5f3   : > { %4892 = vmatpush.bf16.msrb.mxu1 %v10834_v45  ;;  %4918 = vmatpush.bf16.msrb.mxu3 %v10836_v8 }
 0x5f7   : > { %4893 = vmatpush.bf16.msrb.mxu1 %v10784_v9  ;;  %4919 = vmatpush.bf16.msrb.mxu3 %v10786_v35  ;;  %v4016_v26 = vpop.f32.mrf.mxu2 }
 0x5f8   : > { %v4017_v33 = vadd.f32 %v4016_v26, %v3928_v25  ;;  %v4105_v17 = vpop.f32.mrf.mxu3  ;;  %v10895_v21 = vpop.f32.mrf.mxu0  ;;  %v12451_v25 = vld [vmem:[#allocation102_spill] sm:$0xff] }
 0x5f9   : > { %v10897_v62 = vpop.f32.mrf.mxu1 }
 0x5fa   : > { %v10899_v23 = vadd.f32 %v4105_v17, %v4017_v33 }
 0x5fb   : > { %4894 = vmatpush.bf16.msrb.mxu1 %v10734_v49  ;;  %4920 = vmatpush.bf16.msrb.mxu3 %v10736_v53 }
 0x5fd   : > { %4325 = vmatmul.bf16.vlgmr.msra.gmra.mxu0 %v12413_v55  ;;  %4414 = vmatmul.bf16.vlgmr.msra.gmra.mxu1 %v12414_v37 }
 0x5fe   : > { %4503 = vmatmul.bf16.vlgmr.msra.gmra.mxu2 %v12448_v43  ;;  %4592 = vmatmul.bf16.vlgmr.msra.gmra.mxu3 %v12449_v12 }
 0x5ff   : > { %4895 = vmatpush.bf16.msrb.mxu1 %v10663_v15  ;;  %4921 = vmatpush.bf16.msrb.mxu3 %v10665_v2  ;;  %v10909_v14 = vpop.f32.mrf.mxu2 }
 0x600   : > { %4930 = vmatpush.bf16.msra.mxu0 %v10335_v7  ;;  %4956 = vmatpush.bf16.msra.mxu2 %v10337_v1  ;;  %v10913_v52 = vpop.f32.mrf.mxu3  ;;  %v3843_v4 = vpop.f32.mrf.mxu0 }
 0x601   : > { %v3932_v55 = vpop.f32.mrf.mxu1 }
 0x602   : > { %v3933_v32 = vadd.f32 %v3932_v55, %v3843_v4  ;;  %v12453_v4 = vld [vmem:[#allocation88_spill] sm:$0xff]  ;;  %v12454_v55 = vld [vmem:[#allocation89_spill] sm:$0xff] }
 0x603   : > { %4896 = vmatpush.bf16.msrb.mxu1 %v10593_v57  ;;  %4922 = vmatpush.bf16.msrb.mxu3 %v10595_v38 }
 0x604   : > { %4931 = vmatpush.bf16.msra.mxu0 %v10229_v10  ;;  %4957 = vmatpush.bf16.msra.mxu2 %v10231_v46 }
 0x607   : > { %4897 = vmatpush.bf16.msrb.mxu1 %v10534_v28  ;;  %4923 = vmatpush.bf16.msrb.mxu3 %v10536_v41  ;;  %v4021_v37 = vpop.f32.mrf.mxu2 }
 0x608   : > { %4932 = vmatpush.bf16.msra.mxu0 %v12450_v22  ;;  %4958 = vmatpush.bf16.msra.mxu2 %v12451_v25  ;;  %v4022_v26 = vadd.f32 %v4021_v37, %v3933_v32  ;;  %v4110_v33 = vpop.f32.mrf.mxu3  ;;  %v12455_v32 = vld [vmem:[#allocation73_spill] sm:$0xff]  ;;  %v12456_v37 = vld [vmem:[#allocation74_spill] sm:$0xff] }
 0x60a   : > { %v10923_v17 = vadd.f32 %v4110_v33, %v4022_v26  ;;  %v12457_v26 = vld [vmem:[#allocation86_spill] sm:$0xff]  ;;  %v12458_v33 = vld [vmem:[#allocation87_spill] sm:$0xff] }
 0x60b   : > { %4898 = vmatpush.bf16.msrb.mxu1 %v10422_v54  ;;  %4924 = vmatpush.bf16.msrb.mxu3 %v10426_v48 }
 0x60c   : > { %12452 = vst [vmem:[#allocation70_spill] sm:$0xff] %v10923_v17  ;;  %4933 = vmatpush.bf16.msra.mxu0 %v12453_v4  ;;  %4959 = vmatpush.bf16.msra.mxu2 %v12454_v55 }
 0x60d   : > { %4330 = vmatmul.bf16.gmra.mxu0 %v12411_v13  ;;  %4419 = vmatmul.bf16.gmra.mxu1 %v12412_v34  ;;  %v12461_v13 = vld [vmem:[#allocation84_spill] sm:$0xff]  ;;  %v10971_v34 = vpop.f32.mrf.mxu1 }
 0x60e   : > { %4508 = vmatmul.bf16.gmra.mxu2 %v12455_v32  ;;  %4597 = vmatmul.bf16.gmra.mxu3 %v12456_v37  ;;  %12466 = vst [vmem:[#allocation56_spill] sm:$0xff] %v10971_v34  ;;  %v12483_v34 = vld [vmem:[#allocation66_spill] sm:$0xff] }
 0x60f   : > { %4943 = vmatpush.bf16.msra.mxu1 %v10877_v40  ;;  %4969 = vmatpush.bf16.msra.mxu3 %v10879_v0 }
 0x610   : > { %4934 = vmatpush.bf16.msra.mxu0 %v12457_v26  ;;  %4960 = vmatpush.bf16.msra.mxu2 %v12458_v33 }
 0x613   : > { %4944 = vmatpush.bf16.msra.mxu1 %v10838_v59  ;;  %4970 = vmatpush.bf16.msra.mxu3 %v10840_v44 }
 0x614   : > { %4935 = vmatpush.bf16.msra.mxu0 %v12459_v50  ;;  %4961 = vmatpush.bf16.msra.mxu2 %v12460_v27 }
 0x617   : > { %4945 = vmatpush.bf16.msra.mxu1 %v10788_v30  ;;  %4971 = vmatpush.bf16.msra.mxu3 %v10790_v39 }
 0x618   : > { %4936 = vmatpush.bf16.msra.mxu0 %v12455_v32  ;;  %4962 = vmatpush.bf16.msra.mxu2 %v12456_v37  ;;  %v10975_v37 = vpop.f32.mrf.mxu3 }
 0x619   : > { %12468 = vst [vmem:[#allocation88_spill] sm:$0xff] %v10975_v37  ;;  %v12481_v37 = vld [vmem:[#allocation53_spill] sm:$0xff] }
 0x61b   : > { %4946 = vmatpush.bf16.msra.mxu1 %v10742_v42  ;;  %4972 = vmatpush.bf16.msra.mxu3 %v10744_v18 }
 0x61c   : > { %4937 = vmatpush.bf16.msra.mxu0 %v12448_v43  ;;  %4963 = vmatpush.bf16.msra.mxu2 %v12449_v12  ;;  %v10973_v43 = vpop.f32.mrf.mxu2 }
 0x61d   : > { %4335 = vmatmul.bf16.gmra.mxu0 %v12409_v63  ;;  %4424 = vmatmul.bf16.gmra.mxu1 %v12410_v61  ;;  %v12462_v63 = vld [vmem:[#allocation85_spill] sm:$0xff]  ;;  %v10969_v61 = vpop.f32.mrf.mxu0  ;;  %12467 = vst [vmem:[#allocation102_spill] sm:$0xff] %v10973_v43  ;;  %v12473_v43 = vld [vmem:[#allocation38_spill] sm:$0xff] }
 0x61e   : > { %4513 = vmatmul.bf16.gmra.mxu2 %v12459_v50  ;;  %4602 = vmatmul.bf16.gmra.mxu3 %v12460_v27  ;;  %v12463_v27 = vld [vmem:[#allocation48_spill] sm:$0xff]  ;;  %v12464_v50 = vld [vmem:[#allocation67_spill] sm:$0xff]  ;;  %12465 = vst [vmem:[#allocation55_spill] sm:$0xff] %v10969_v61 }
 0x61f   : > { %4947 = vmatpush.bf16.msra.mxu1 %v10667_v60  ;;  %4973 = vmatpush.bf16.msra.mxu3 %v10669_v29 }
 0x623   : > { %4948 = vmatpush.bf16.msra.mxu1 %v10597_v5  ;;  %4974 = vmatpush.bf16.msra.mxu3 %v10599_v19 }
 0x627   : > { %4949 = vmatpush.bf16.msra.mxu1 %v10538_v56  ;;  %4975 = vmatpush.bf16.msra.mxu3 %v10540_v11 }
 0x62b   : > { %4950 = vmatpush.bf16.msra.mxu1 %v10428_v31  ;;  %4976 = vmatpush.bf16.msra.mxu3 %v10430_v3 }
 0x62d   : > { %4340 = vmatmul.bf16.gmra.mxu0 %v12461_v13  ;;  %4429 = vmatmul.bf16.gmra.mxu1 %v12462_v63  ;;  %v12470_v13 = vld [vmem:[#allocation101_spill] sm:$0xff] }
 0x62e   : > { %4518 = vmatmul.bf16.gmra.mxu2 %v12457_v26  ;;  %4607 = vmatmul.bf16.gmra.mxu3 %v12458_v33  ;;  %v12469_v33 = vld [vmem:[#allocation100_spill] sm:$0xff] }
 0x63d   : > { %4345 = vmatmul.bf16.gmra.mxu0 %v12463_v27  ;;  %4434 = vmatmul.bf16.gmra.mxu1 %v12464_v50  ;;  %v12472_v50 = vld [vmem:[#allocation76_spill] sm:$0xff] }
 0x63e   : > { %4523 = vmatmul.bf16.gmra.mxu2 %v12453_v4  ;;  %4612 = vmatmul.bf16.gmra.mxu3 %v12454_v55 }
 0x64c   : > { %v3848_v12 = vpop.f32.mrf.mxu0  ;;  %v3937_v32 = vpop.f32.mrf.mxu1 }
 0x64d   : > { %v3938_v26 = vadd.f32 %v3937_v32, %v3848_v12  ;;  %4350 = vmatmul.bf16.gmra.mxu0 %v12469_v33  ;;  %4439 = vmatmul.bf16.gmra.mxu1 %v12470_v13 }
 0x64e   : > { %4528 = vmatmul.bf16.gmra.mxu2 %v12450_v22  ;;  %4617 = vmatmul.bf16.gmra.mxu3 %v12451_v25 }
 0x653   : > { %v4026_v4 = vpop.f32.mrf.mxu2  ;;  %v4115_v63 = vpop.f32.mrf.mxu3 }
 0x654   : > { %v4027_v55 = vadd.f32 %v4026_v4, %v3938_v26  ;;  %v10987_v12 = vpop.f32.mrf.mxu0  ;;  %v10989_v32 = vpop.f32.mrf.mxu1  ;;  %v12478_v4 = vld [vmem:[#allocation103_spill] sm:$0xff] }
 0x655   : > { %12474 = vst [vmem:[#allocation73_spill] sm:$0xff] %v10987_v12 }
 0x656   : > { %v10981_v27 = vadd.f32 %v4115_v63, %v4027_v55  ;;  %12475 = vst [vmem:[#allocation74_spill] sm:$0xff] %v10989_v32  ;;  %v12479_v55 = vld [vmem:[#allocation104_spill] sm:$0xff] }
 0x658   : > { %12471 = vst [vmem:[#allocation89_spill] sm:$0xff] %v10981_v27 }
 0x65b   : > { %v10991_v22 = vpop.f32.mrf.mxu2  ;;  %v10993_v25 = vpop.f32.mrf.mxu3 }
 0x65c   : > { %12476 = vst [vmem:[#allocation86_spill] sm:$0xff] %v10991_v22 }
 0x65d   : > { %4355 = vmatmul.bf16.gmra.mxu0 %v12472_v50  ;;  %4444 = vmatmul.bf16.gmra.mxu1 %v12473_v43  ;;  %12477 = vst [vmem:[#allocation87_spill] sm:$0xff] %v10993_v25 }
 0x65e   : > { %4533 = vmatmul.bf16.gmra.mxu2 %v10229_v10  ;;  %4622 = vmatmul.bf16.gmra.mxu3 %v10231_v46 }
 0x66a   : > { %v3853_v26 = vpop.f32.mrf.mxu0  ;;  %v3942_v33 = vpop.f32.mrf.mxu1 }
 0x66b   : > { %v3943_v13 = vadd.f32 %v3942_v33, %v3853_v26 }
 0x66d   : > { %4360 = vmatmul.bf16.gmra.mxu0 %v12478_v4  ;;  %4449 = vmatmul.bf16.gmra.mxu1 %v12479_v55  ;;  %v12480_v4 = vld [vmem:[#allocation50_spill] sm:$0xff] }
 0x66e   : > { %4538 = vmatmul.bf16.gmra.mxu2 %v10335_v7  ;;  %4627 = vmatmul.bf16.gmra.mxu3 %v10337_v1  ;;  %v3870_v55 = vadd.f32 %v12481_v37, %v12480_v4  ;;  %v12482_v7 = vld [vmem:[#allocation65_spill] sm:$0xff] }
 0x670   : > { %v3959_v61 = vadd.f32 %v12483_v34, %v3870_v55 }
 0x671   : > { %v4031_v10 = vpop.f32.mrf.mxu2  ;;  %v4120_v46 = vpop.f32.mrf.mxu3 }
 0x672   : > { %v4032_v43 = vadd.f32 %v4031_v10, %v3943_v13  ;;  %v3855_v63 = vpop.f32.mrf.mxu0  ;;  %v3944_v50 = vpop.f32.mrf.mxu1  ;;  %v12484_v10 = vld [vmem:[#allocation94_spill] sm:$0xff] }
 0x673   : > { %v3945_v27 = vadd.f32 %v3944_v50, %v3855_v63  ;;  %v12485_v50 = vld [vmem:[#allocation19_spill] sm:$0xff] }
 0x674   : > { %v10999_v22 = vadd.f32 %v4120_v46, %v4032_v43  ;;  %v4048_v46 = vadd.f32 %v12484_v10, %v3959_v61  ;;  %v12489_v10 = vld [vmem:[#allocation20_spill] sm:$0xff] }
 0x679   : > { %v4033_v25 = vpop.f32.mrf.mxu2  ;;  %v4122_v32 = vpop.f32.mrf.mxu3 }
 0x67a   : > { %v4034_v12 = vadd.f32 %v4033_v25, %v3945_v27  ;;  %v4326_v26 = vpop.f32.mrf.mxu0  ;;  %v4415_v33 = vpop.f32.mrf.mxu1 }
 0x67b   : > { %v4327_v1 = vadd.f32 %v4326_v26, %v12482_v7  ;;  %v12486_v7 = vld [vmem:[#allocation95_spill] sm:$0xff] }
 0x67c   : > { %v11003_v17 = vadd.f32 %v4122_v32, %v4034_v12 }
 0x67d   : > { %4365 = vmatmul.bf16.gmra.mxu0 %v10422_v54  ;;  %4454 = vmatmul.bf16.gmra.mxu1 %v10426_v48  ;;  %v4416_v27 = vadd.f32 %v4415_v33, %v4327_v1  ;;  %v12487_v1 = vld [vmem:[#allocation97_spill] sm:$0xff] }
 0x67e   : > { %4543 = vmatmul.bf16.gmra.mxu2 %v10428_v31  ;;  %4632 = vmatmul.bf16.gmra.mxu3 %v10430_v3  ;;  %v3875_v61 = vadd.f32 %v12487_v1, %v12486_v7 }
 0x681   : > { %v4504_v25 = vpop.f32.mrf.mxu2  ;;  %v4593_v13 = vpop.f32.mrf.mxu3 }
 0x682   : > { %v4505_v37 = vadd.f32 %v4504_v25, %v4416_v27  ;;  %v4328_v12 = vpop.f32.mrf.mxu0  ;;  %v4417_v32 = vpop.f32.mrf.mxu1  ;;  %v12488_v27 = vld [vmem:[#allocation96_spill] sm:$0xff] }
 0x683   : > { %v4329_v63 = vadd.f32 %v4328_v12, %v4048_v46  ;;  %v12490_v46 = vld [vmem:[#allocation98_spill] sm:$0xff] }
 0x684   : > { %v4594_v43 = vadd.f32 %v4593_v13, %v4505_v37  ;;  %v3964_v37 = vadd.f32 %v12490_v46, %v3875_v61  ;;  %v12493_v61 = vld [vmem:[#allocation75_spill] sm:$0xff] }
 0x685   : > { %v4418_v26 = vadd.f32 %v4417_v32, %v4329_v63 }
 0x686   : > { %v5001_v34 = vsub.f32 %v4594_v43, %v12485_v50  ;;  %4673 = vxpose.xlu0.b32.start [1/16] %v4594_v43, 128  ;;  %v12491_v50 = vld [vmem:[#allocation99_spill] sm:$0xff] }
 0x688   : > { %v5033_v54 = vmul.f32 %v5001_v34, %v5001_v34  ;;  %v4053_v34 = vadd.f32 %v12491_v50, %v3964_v37  ;;  %v12496_v37 = vld [vmem:[#allocation41_spill] sm:$0xff] }
 0x689   : > { %v4506_v48 = vpop.f32.mrf.mxu2  ;;  %v4595_v4 = vpop.f32.mrf.mxu3 }
 0x68a   : > { %v4507_v31 = vadd.f32 %v4506_v48, %v4418_v26  ;;  %5065 = vadd.xlane.f32.xlu2 %v5033_v54  ;;  %v4331_v3 = vpop.f32.mrf.mxu0  ;;  %v4420_v33 = vpop.f32.mrf.mxu1 }
 0x68b   : > { %v4332_v25 = vadd.f32 %v4331_v3, %v12488_v27  ;;  %v12494_v27 = vld [vmem:[#allocation83_spill] sm:$0xff] }
 0x68c   : > { %v4596_v55 = vadd.f32 %v4595_v4, %v4507_v31 }
 0x68d   : > { %4370 = vmatmul.bf16.gmra.mxu0 %v10534_v28  ;;  %4459 = vmatmul.bf16.gmra.mxu1 %v10536_v41  ;;  %v4421_v32 = vadd.f32 %v4420_v33, %v4332_v25  ;;  %v12492_v41 = vld [vmem:[#allocation21_spill] sm:$0xff]  ;;  %v3880_v25 = vadd.f32 %v12494_v27, %v12493_v61 }
 0x68e   : > { %v5002_v13 = vsub.f32 %v4596_v55, %v12489_v10  ;;  %4548 = vmatmul.bf16.gmra.mxu2 %v10538_v56  ;;  %4637 = vmatmul.bf16.gmra.mxu3 %v10540_v11  ;;  %v12501_v61 = vld [vmem:[#allocation37_spill] sm:$0xff] }
 0x68f   : > { %4674 = vxpose.xlu0.b32.cont [2/16] %v4596_v55, 128 }
 0x690   : > { %v5034_v12 = vmul.f32 %v5002_v13, %v5002_v13  ;;  %v12495_v13 = vld [vmem:[#allocation51_spill] sm:$0xff] }
 0x691   : > { %v4509_v43 = vpop.f32.mrf.mxu2  ;;  %v4598_v63 = vpop.f32.mrf.mxu3 }
 0x692   : > { %5067 = vadd.xlane.f32.xlu2 %v5034_v12  ;;  %v4510_v54 = vadd.f32 %v4509_v43, %v4421_v32  ;;  %v4333_v26 = vpop.f32.mrf.mxu0  ;;  %v4422_v48 = vpop.f32.mrf.mxu1  ;;  %v3969_v12 = vadd.f32 %v12496_v37, %v3880_v25  ;;  %v12497_v32 = vld [vmem:[#allocation22_spill] sm:$0xff] }
 0x693   : > { %v4334_v4 = vadd.f32 %v4333_v26, %v4053_v34  ;;  %v12498_v26 = vld [vmem:[#allocation49_spill] sm:$0xff] }
 0x694   : > { %v4599_v28 = vadd.f32 %v4598_v63, %v4510_v54 }
 0x695   : > { %v4423_v56 = vadd.f32 %v4422_v48, %v4334_v4  ;;  %v4058_v48 = vadd.f32 %v12498_v26, %v3969_v12  ;;  %v12504_v12 = vld [vmem:[#allocation24_spill] sm:$0xff] }
 0x696   : > { %v5003_v31 = vsub.f32 %v4599_v28, %v12492_v41 }
 0x697   : > { %4675 = vxpose.xlu0.b32.cont [3/16] %v4599_v28, 128 }
 0x698   : > { %v5035_v3 = vmul.f32 %v5003_v31, %v5003_v31  ;;  %v12499_v31 = vld [vmem:[#allocation23_spill] sm:$0xff] }
 0x699   : > { %v4511_v7 = vpop.f32.mrf.mxu2  ;;  %v4600_v11 = vpop.f32.mrf.mxu3 }
 0x69a   : > { %v4512_v55 = vadd.f32 %v4511_v7, %v4423_v56  ;;  %5069 = vadd.xlane.f32.xlu2 %v5035_v3  ;;  %v4336_v33 = vpop.f32.mrf.mxu0  ;;  %v4425_v1 = vpop.f32.mrf.mxu1 }
 0x69b   : > { %v4337_v46 = vadd.f32 %v4336_v33, %v12495_v13 }
 0x69c   : > { %v4601_v10 = vadd.f32 %v4600_v11, %v4512_v55 }
 0x69d   : > { %4375 = vmatmul.bf16.gmra.mxu0 %v10593_v57  ;;  %4464 = vmatmul.bf16.gmra.mxu1 %v10595_v38  ;;  %v4426_v63 = vadd.f32 %v4425_v1, %v4337_v46  ;;  %v12500_v1 = vld [vmem:[#allocation39_spill] sm:$0xff]  ;;  %v12503_v46 = vld [vmem:[#allocation81_spill] sm:$0xff] }
 0x69e   : > { %v5004_v43 = vsub.f32 %v4601_v10, %v12497_v32  ;;  %4553 = vmatmul.bf16.gmra.mxu2 %v10597_v5  ;;  %4642 = vmatmul.bf16.gmra.mxu3 %v10599_v19  ;;  %v3885_v27 = vadd.f32 %v12501_v61, %v12500_v1  ;;  %v12510_v61 = vld [vmem:[#allocation93_spill] sm:$0xff] }
 0x69f   : > { %4676 = vxpose.xlu0.b32.cont [4/16] %v4601_v10, 128  ;;  %v12502_v10 = vld [vmem:[#allocation40_spill] sm:$0xff] }
 0x6a0   : > { %v5036_v50 = vmul.f32 %v5004_v43, %v5004_v43  ;;  %v3974_v37 = vadd.f32 %v12503_v46, %v3885_v27 }
 0x6a1   : > { %v4514_v34 = vpop.f32.mrf.mxu2  ;;  %v4603_v54 = vpop.f32.mrf.mxu3 }
 0x6a2   : > { %v4515_v28 = vadd.f32 %v4514_v34, %v4426_v63  ;;  %5071 = vadd.xlane.f32.xlu2 %v5036_v50  ;;  %v4338_v57 = vpop.f32.mrf.mxu0  ;;  %v4427_v4 = vpop.f32.mrf.mxu1 }
 0x6a3   : > { %v4339_v41 = vadd.f32 %v4338_v57, %v4058_v48 }
 0x6a4   : > { %v4604_v38 = vadd.f32 %v4603_v54, %v4515_v28  ;;  %v12505_v54 = vld [vmem:[#allocation82_spill] sm:$0xff] }
 0x6a5   : > { %v4428_v5 = vadd.f32 %v4427_v4, %v4339_v41  ;;  %v4063_v26 = vadd.f32 %v12505_v54, %v3974_v37  ;;  %v12506_v4 = vld [vmem:[#allocation25_spill] sm:$0xff]  ;;  %v12513_v54 = vld [vmem:[#allocation27_spill] sm:$0xff] }
 0x6a6   : > { %v5005_v3 = vsub.f32 %v4604_v38, %v12499_v31 }
 0x6a7   : > { %4677 = vxpose.xlu0.b32.cont [5/16] %v4604_v38, 128 }
 0x6a8   : > { %v5037_v56 = vmul.f32 %v5005_v3, %v5005_v3 }
 0x6a9   : > { %v4516_v7 = vpop.f32.mrf.mxu2  ;;  %v4605_v19 = vpop.f32.mrf.mxu3 }
 0x6aa   : > { %v4517_v11 = vadd.f32 %v4516_v7, %v4428_v5  ;;  %5073 = vadd.xlane.f32.xlu2 %v5037_v56  ;;  %v4341_v55 = vpop.f32.mrf.mxu0  ;;  %v4430_v33 = vpop.f32.mrf.mxu1  ;;  %v12507_v7 = vld [vmem:[#allocation91_spill] sm:$0xff] }
 0x6ab   : > { %v4342_v13 = vadd.f32 %v4341_v55, %v12502_v10 }
 0x6ac   : > { %v4606_v25 = vadd.f32 %v4605_v19, %v4517_v11  ;;  %v12508_v19 = vld [vmem:[#allocation92_spill] sm:$0xff] }
 0x6ad   : > { %4380 = vmatmul.bf16.gmra.mxu0 %v10663_v15  ;;  %4469 = vmatmul.bf16.gmra.mxu1 %v10665_v2  ;;  %v4431_v43 = vadd.f32 %v4430_v33, %v4342_v13  ;;  %v3890_v11 = vadd.f32 %v12508_v19, %v12507_v7  ;;  %v12509_v33 = vld [vmem:[#allocation90_spill] sm:$0xff] }
 0x6ae   : > { %v5006_v32 = vsub.f32 %v4606_v25, %v12504_v12  ;;  %4558 = vmatmul.bf16.gmra.mxu2 %v10667_v60  ;;  %4647 = vmatmul.bf16.gmra.mxu3 %v10669_v29 }
 0x6af   : > { %4678 = vxpose.xlu0.b32.cont [6/16] %v4606_v25, 128  ;;  %v3979_v27 = vadd.f32 %v12510_v61, %v3890_v11  ;;  %v12511_v25 = vld [vmem:[#allocation26_spill] sm:$0xff] }
 0x6b0   : > { %v5038_v63 = vmul.f32 %v5006_v32, %v5006_v32  ;;  %v12512_v32 = vld [vmem:[#allocation77_spill] sm:$0xff] }
 0x6b1   : > { %v4519_v50 = vpop.f32.mrf.mxu2  ;;  %v4608_v34 = vpop.f32.mrf.mxu3 }
 0x6b2   : > { %v4520_v48 = vadd.f32 %v4519_v50, %v4431_v43  ;;  %5075 = vadd.xlane.f32.xlu2 %v5038_v63  ;;  %v4343_v15 = vpop.f32.mrf.mxu0  ;;  %v4432_v28 = vpop.f32.mrf.mxu1  ;;  %v4068_v43 = vadd.f32 %v12512_v32, %v3979_v27 }
 0x6b3   : > { %v4344_v57 = vadd.f32 %v4343_v15, %v4063_v26 }
 0x6b4   : > { %v4609_v2 = vadd.f32 %v4608_v34, %v4520_v48 }
 0x6b5   : > { %v4433_v60 = vadd.f32 %v4432_v28, %v4344_v57 }
 0x6b6   : > { %v5007_v38 = vsub.f32 %v4609_v2, %v12506_v4  ;;  %v12514_v4 = vld [vmem:[#allocation71_spill] sm:$0xff] }
 0x6b7   : > { %4679 = vxpose.xlu0.b32.cont [7/16] %v4609_v2, 128 }
 0x6b8   : > { %v5039_v41 = vmul.f32 %v5007_v38, %v5007_v38  ;;  %v12515_v38 = vld [vmem:[#allocation72_spill] sm:$0xff] }
 0x6b9   : > { %v4521_v31 = vpop.f32.mrf.mxu2  ;;  %v4610_v29 = vpop.f32.mrf.mxu3 }
 0x6ba   : > { %v4522_v3 = vadd.f32 %v4521_v31, %v4433_v60  ;;  %5077 = vadd.xlane.f32.xlu2 %v5039_v41  ;;  %v4346_v56 = vpop.f32.mrf.mxu0  ;;  %v4435_v5 = vpop.f32.mrf.mxu1  ;;  %v3895_v41 = vadd.f32 %v12515_v38, %v12514_v4  ;;  %v12516_v31 = vld [vmem:[#allocation78_spill] sm:$0xff]  ;;  %v12526_v38 = vld [vmem:[#allocation109_spill] sm:$0xff] }
 0x6bb   : > { %v4347_v1 = vadd.f32 %v4346_v56, %v12509_v33 }
 0x6bc   : > { %v4611_v55 = vadd.f32 %v4610_v29, %v4522_v3  ;;  %v12517_v3 = vld [vmem:[#allocation68_spill] sm:$0xff] }
 0x6bd   : > { %4385 = vmatmul.bf16.gmra.mxu0 %v10734_v49  ;;  %4474 = vmatmul.bf16.gmra.mxu1 %v10736_v53  ;;  %v4436_v13 = vadd.f32 %v4435_v5, %v4347_v1  ;;  %v3984_v56 = vadd.f32 %v12517_v3, %v3895_v41  ;;  %v12518_v5 = vld [vmem:[#allocation28_spill] sm:$0xff]  ;;  %v12519_v1 = vld [vmem:[#allocation69_spill] sm:$0xff]  ;;  %v12527_v3 = vld [vmem:[#allocation31_spill] sm:$0xff] }
 0x6be   : > { %v5008_v10 = vsub.f32 %v4611_v55, %v12511_v25  ;;  %4563 = vmatmul.bf16.gmra.mxu2 %v10742_v42  ;;  %4652 = vmatmul.bf16.gmra.mxu3 %v10744_v18 }
 0x6bf   : > { %4680 = vxpose.xlu0.b32.cont [8/16] %v4611_v55, 128  ;;  %v4073_v61 = vadd.f32 %v12519_v1, %v3984_v56  ;;  %v12529_v1 = vld [vmem:[#allocation112_spill] sm:$0xff] }
 0x6c0   : > { %v5040_v46 = vmul.f32 %v5008_v10, %v5008_v10 }
 0x6c1   : > { %v4524_v37 = vpop.f32.mrf.mxu2  ;;  %v4613_v12 = vpop.f32.mrf.mxu3 }
 0x6c2   : > { %v4525_v63 = vadd.f32 %v4524_v37, %v4436_v13  ;;  %5079 = vadd.xlane.f32.xlu2 %v5040_v46  ;;  %v4348_v49 = vpop.f32.mrf.mxu0  ;;  %v4437_v50 = vpop.f32.mrf.mxu1  ;;  %v12520_v13 = vld [vmem:[#allocation29_spill] sm:$0xff] }
 0x6c3   : > { %v4349_v34 = vadd.f32 %v4348_v49, %v4068_v43  ;;  %v12521_v49 = vld [vmem:[#allocation106_spill] sm:$0xff] }
 0x6c4   : > { %v4614_v53 = vadd.f32 %v4613_v12, %v4525_v63 }
 0x6c5   : > { %v4438_v42 = vadd.f32 %v4437_v50, %v4349_v34  ;;  %v12522_v50 = vld [vmem:[#allocation107_spill] sm:$0xff] }
 0x6c6   : > { %v5009_v26 = vsub.f32 %v4614_v53, %v12513_v54  ;;  %v12523_v54 = vld [vmem:[#allocation105_spill] sm:$0xff] }
 0x6c7   : > { %4681 = vxpose.xlu0.b32.cont [9/16] %v4614_v53, 128  ;;  %v3900_v53 = vadd.f32 %v12522_v50, %v12521_v49 }
 0x6c8   : > { %v5041_v48 = vmul.f32 %v5009_v26, %v5009_v26 }
 0x6c9   : > { %v4526_v15 = vpop.f32.mrf.mxu2  ;;  %v4615_v18 = vpop.f32.mrf.mxu3 }
 0x6ca   : > { %v4527_v28 = vadd.f32 %v4526_v15, %v4438_v42  ;;  %5081 = vadd.xlane.f32.xlu2 %v5041_v48  ;;  %v4351_v2 = vpop.f32.mrf.mxu0  ;;  %v4440_v57 = vpop.f32.mrf.mxu1  ;;  %v12524_v48 = vld [vmem:[#allocation108_spill] sm:$0xff]  ;;  %v12525_v15 = vld [vmem:[#allocation30_spill] sm:$0xff] }
 0x6cb   : > { %v4352_v29 = vadd.f32 %v4351_v2, %v12516_v31  ;;  %v3989_v42 = vadd.f32 %v12524_v48, %v3900_v53  ;;  %v12534_v53 = vld [vmem:[#allocation33_spill] sm:$0xff] }
 0x6cc   : > { %v4616_v60 = vadd.f32 %v4615_v18, %v4527_v28 }
 0x6cd   : > { %4390 = vmatmul.bf16.gmra.mxu0 %v10784_v9  ;;  %4479 = vmatmul.bf16.gmra.mxu1 %v10786_v35  ;;  %v4441_v19 = vadd.f32 %v4440_v57, %v4352_v29  ;;  %v4078_v41 = vadd.f32 %v12526_v38, %v3989_v42  ;;  %v12537_v38 = vld [vmem:[#allocation117_spill] sm:$0xff] }
 0x6ce   : > { %v5010_v7 = vsub.f32 %v4616_v60, %v12518_v5  ;;  %4568 = vmatmul.bf16.gmra.mxu2 %v10788_v30  ;;  %4657 = vmatmul.bf16.gmra.mxu3 %v10790_v39 }
 0x6cf   : > { %4682 = vxpose.xlu0.b32.cont [10/16] %v4616_v60, 128 }
 0x6d0   : > { %v5042_v11 = vmul.f32 %v5010_v7, %v5010_v7 }
 0x6d1   : > { %v4529_v55 = vpop.f32.mrf.mxu2  ;;  %v4618_v33 = vpop.f32.mrf.mxu3 }
 0x6d2   : > { %v4530_v27 = vadd.f32 %v4529_v55, %v4441_v19  ;;  %5083 = vadd.xlane.f32.xlu2 %v5042_v11  ;;  %v4353_v9 = vpop.f32.mrf.mxu0  ;;  %v4442_v25 = vpop.f32.mrf.mxu1 }
 0x6d3   : > { %v4354_v10 = vadd.f32 %v4353_v9, %v4073_v61  ;;  %v12530_v9 = vld [vmem:[#allocation110_spill] sm:$0xff] }
 0x6d4   : > { %v4619_v35 = vadd.f32 %v4618_v33, %v4530_v27  ;;  %v12528_v33 = vld [vmem:[#allocation111_spill] sm:$0xff] }
 0x6d5   : > { %v4443_v30 = vadd.f32 %v4442_v25, %v4354_v10  ;;  %v3905_v61 = vadd.f32 %v12529_v1, %v12528_v33  ;;  %v12541_v33 = vld [vmem:[#allocation119_spill] sm:$0xff] }
 0x6d6   : > { %v5011_v46 = vsub.f32 %v4619_v35, %v12520_v13  ;;  %v12532_v13 = vld [vmem:[#allocation32_spill] sm:$0xff] }
 0x6d7   : > { %4683 = vxpose.xlu0.b32.cont [11/16] %v4619_v35, 128  ;;  %v12531_v35 = vld [vmem:[#allocation113_spill] sm:$0xff] }
 0x6d8   : > { %v5043_v37 = vmul.f32 %v5011_v46, %v5011_v46  ;;  %v3994_v10 = vadd.f32 %v12531_v35, %v3905_v61 }
 0x6d9   : > { %v4531_v12 = vpop.f32.mrf.mxu2  ;;  %v4620_v39 = vpop.f32.mrf.mxu3 }
 0x6da   : > { %v4532_v32 = vadd.f32 %v4531_v12, %v4443_v30  ;;  %5085 = vadd.xlane.f32.xlu2 %v5043_v37  ;;  %v4356_v43 = vpop.f32.mrf.mxu0  ;;  %v4445_v63 = vpop.f32.mrf.mxu1 }
 0x6db   : > { %v4357_v26 = vadd.f32 %v4356_v43, %v12523_v54 }
 0x6dc   : > { %v4621_v34 = vadd.f32 %v4620_v39, %v4532_v32  ;;  %v12533_v32 = vld [vmem:[#allocation114_spill] sm:$0xff] }
 0x6dd   : > { %4395 = vmatmul.bf16.gmra.mxu0 %v10834_v45  ;;  %4484 = vmatmul.bf16.gmra.mxu1 %v10836_v8  ;;  %v4446_v28 = vadd.f32 %v4445_v63, %v4357_v26  ;;  %v4083_v43 = vadd.f32 %v12533_v32, %v3994_v10 }
 0x6de   : > { %v5012_v18 = vsub.f32 %v4621_v34, %v12525_v15  ;;  %4573 = vmatmul.bf16.gmra.mxu2 %v10838_v59  ;;  %4662 = vmatmul.bf16.gmra.mxu3 %v10840_v44 }
 0x6df   : > { %4684 = vxpose.xlu0.b32.cont [12/16] %v4621_v34, 128 }
 0x6e0   : > { %v5044_v2 = vmul.f32 %v5012_v18, %v5012_v18 }
 0x6e1   : > { %v4534_v57 = vpop.f32.mrf.mxu2  ;;  %v4623_v4 = vpop.f32.mrf.mxu3 }
 0x6e2   : > { %v4535_v60 = vadd.f32 %v4534_v57, %v4446_v28  ;;  %5087 = vadd.xlane.f32.xlu2 %v5044_v2  ;;  %v4358_v45 = vpop.f32.mrf.mxu0  ;;  %v4447_v31 = vpop.f32.mrf.mxu1  ;;  %v11095_v57 = vstv %s6566_s24 }
 0x6e3   : > { %v4359_v29 = vadd.f32 %v4358_v45, %v4078_v41  ;;  %v12538_v45 = vld [vmem:[#allocation115_spill] sm:$0xff] }
 0x6e4   : > { %v4624_v8 = vadd.f32 %v4623_v4, %v4535_v60  ;;  %v12536_v4 = vld [vmem:[#allocation116_spill] sm:$0xff] }
 0x6e5   : > { %v4448_v59 = vadd.f32 %v4447_v31, %v4359_v29  ;;  %v3910_v41 = vadd.f32 %v12537_v38, %v12536_v4  ;;  %v12539_v29 = vld [vmem:[#allocation118_spill] sm:$0xff]  ;;  %v12547_v38 = vld [vmem:[#allocation36_spill] sm:$0xff] }
 0x6e6   : > { %v5013_v56 = vsub.f32 %v4624_v8, %v12527_v3 }
 0x6e7   : > { %4685 = vxpose.xlu0.b32.cont [13/16] %v4624_v8, 128  ;;  %v3999_v3 = vadd.f32 %v12539_v29, %v3910_v41 }
 0x6e8   : > { %v5045_v5 = vmul.f32 %v5013_v56, %v5013_v56  ;;  %v12540_v56 = vld [vmem:[#allocation34_spill] sm:$0xff] }
 0x6e9   : > { %v4536_v7 = vpop.f32.mrf.mxu2  ;;  %v4625_v44 = vpop.f32.mrf.mxu3  ;;  %v4088_v1 = vadd.f32 %v12541_v33, %v3999_v3 }
 0x6ea   : > { %v4537_v19 = vadd.f32 %v4536_v7, %v4448_v59  ;;  %5089 = vadd.xlane.f32.xlu2 %v5045_v5  ;;  %v4361_v11 = vpop.f32.mrf.mxu0  ;;  %v4450_v55 = vpop.f32.mrf.mxu1 }
 0x6eb   : > { %v4362_v25 = vadd.f32 %v4361_v11, %v12530_v9 }
 0x6ec   : > { %v4626_v27 = vadd.f32 %v4625_v44, %v4537_v19 }
 0x6ed   : > { %4400 = vmatmul.bf16.gmra.mxu0 %v10873_v24  ;;  %4489 = vmatmul.bf16.gmra.mxu1 %v10875_v20  ;;  %v4451_v30 = vadd.f32 %v4450_v55, %v4362_v25 }
 0x6ee   : > { %v5014_v46 = vsub.f32 %v4626_v27, %v12532_v13  ;;  %4578 = vmatmul.bf16.gmra.mxu2 %v10877_v40  ;;  %4667 = vmatmul.bf16.gmra.mxu3 %v10879_v0  ;;  %v12535_v0 = vlaneseq }
 0x6ef   : > { %4686 = vxpose.xlu0.b32.cont [14/16] %v4626_v27, 128 }
 0x6f0   : > { %v5046_v37 = vmul.f32 %v5014_v46, %v5014_v46  ;;  %v11092_v26 = vshrl.u32 %v12535_v0, 7 }
 0x6f1   : > { %v4539_v12 = vpop.f32.mrf.mxu2  ;;  %v4628_v39 = vpop.f32.mrf.mxu3 }
 0x6f2   : > { %v4540_v63 = vadd.f32 %v4539_v12, %v4451_v30  ;;  %5091 = vadd.xlane.f32.xlu2 %v5046_v37  ;;  %v4363_v24 = vpop.f32.mrf.mxu0  ;;  %v4452_v20 = vpop.f32.mrf.mxu1  ;;  %v4772_v2 = vadd.s32 8, %v11092_v26  ;;  %v4804_v59 = vadd.s32 %v11095_v57, %v11092_v26  ;;  %v4773_v25 = vadd.s32 16, %v11092_v26  ;;  %v12542_v30 = vld [vmem:[#allocation35_spill] sm:$0xff] }
 0x6f3   : > { %v4364_v50 = vadd.f32 %v4363_v24, %v4083_v43 }
 0x6f4   : > { %v4629_v49 = vadd.f32 %v4628_v39, %v4540_v63  ;;  %v4805_v7 = vadd.s32 %v11095_v57, %v4772_v2  ;;  %vm4836_vm0 = vcmp.lt.s32.totalorder %v4804_v59, 320  ;;  %v4806_v32 = vadd.s32 %v11095_v57, %v4773_v25  ;;  %v12546_v2 = vld [vmem:[#allocation123_spill] sm:$0xff] }
 0x6f5   : > { %v4453_v54 = vadd.f32 %v4452_v20, %v4364_v50 }
 0x6f6   : > { %v5015_v34 = vsub.f32 %v4629_v49, %v12534_v53  ;;  %vm4837_vm1 = vcmp.lt.s32.totalorder %v4805_v7, 320  ;;  %vm4838_vm2 = vcmp.lt.s32.totalorder %v4806_v32, 320 }
 0x6f7   : > { %4687 = vxpose.xlu0.b32.cont [15/16] %v4629_v49, 128 }
 0x6f8   : > { %v5047_v40 = vmul.f32 %v5015_v34, %v5015_v34  ;;  %v4774_v34 = vadd.s32 24, %v11092_v26 }
 0x6f9   : > { %v4541_v48 = vpop.f32.mrf.mxu2  ;;  %v4630_v42 = vpop.f32.mrf.mxu3 }
 0x6fa   : > { %v4542_v15 = vadd.f32 %v4541_v48, %v4453_v54  ;;  %5093 = vadd.xlane.f32.xlu2 %v5047_v40  ;;  %v4366_v18 = vpop.f32.mrf.mxu0  ;;  %v4455_v28 = vpop.f32.mrf.mxu1  ;;  %v12543_v40 = vld [vmem:[#allocation120_spill] sm:$0xff]  ;;  %v12544_v54 = vld [vmem:[#allocation121_spill] sm:$0xff] }
 0x6fb   : > { %v4367_v31 = vadd.f32 %v4366_v18, %v12538_v45  ;;  %v3915_v48 = vadd.f32 %v12544_v54, %v12543_v40  ;;  %v12553_v54 = vld [vmem:[#allocation128_spill] sm:$0xff] }
 0x6fc   : > { %v4631_v60 = vadd.f32 %v4630_v42, %v4542_v15  ;;  %v12545_v15 = vld [vmem:[#allocation122_spill] sm:$0xff] }
 0x6fd   : > { %v5066_v8 = vpop.xlane.xlu2 %5065  ;;  %v4456_v19 = vadd.f32 %v4455_v28, %v4367_v31  ;;  %v4004_v4 = vadd.f32 %v12546_v2, %v3915_v48  ;;  %v4807_v31 = vadd.s32 %v11095_v57, %v4774_v34 }
 0x6fe   : > { %v5016_v5 = vsub.f32 %v4631_v60, %v12540_v56  ;;  %v5129_v46 = vsel %vm4836_vm0, %v5066_v8, 0.0 }
 0x6ff   : > { %4688 = vxpose.xlu0.b32.end [16/16] %v4631_v60, 128  ;;  %vm4839_vm3 = vcmp.lt.s32.totalorder %v4807_v31, 320 }
 0x700   : > { %v5048_v44 = vmul.f32 %v5016_v5, %v5016_v5  ;;  %v12548_v5 = vld [vmem:[#allocation124_spill] sm:$0xff] }
 0x701   : > { %v4544_v11 = vpop.f32.mrf.mxu2  ;;  %v4633_v55 = vpop.f32.mrf.mxu3  ;;  %v4093_v59 = vadd.f32 %v12548_v5, %v4004_v4 }
 0x702   : > { %v4545_v61 = vadd.f32 %v4544_v11, %v4456_v19  ;;  %5095 = vadd.xlane.f32.xlu2 %v5048_v44  ;;  %v4368_v27 = vpop.f32.mrf.mxu0  ;;  %v4457_v9 = vpop.f32.mrf.mxu1  ;;  %v4775_v11 = vadd.s32 32, %v11092_v26 }
 0x703   : > { %v4369_v10 = vadd.f32 %v4368_v27, %v4088_v1 }
 0x704   : > { %v11107_v35 = vadd.f32 %v4633_v55, %v4545_v61  ;;  %v12549_v61 = vld [vmem:[#allocation43_spill] sm:$0xff] }
 0x705   : > { %v5068_v13 = vpop.xlane.xlu2 %5067  ;;  %v4458_v63 = vadd.f32 %v4457_v9, %v4369_v10  ;;  %v4808_v10 = vadd.s32 %v11095_v57, %v4775_v11 }
 0x706   : > { %v5130_v37 = vsel %vm4837_vm1, %v5068_v13, 0.0  ;;  %v5017_v12 = vsub.f32 %v11107_v35, %v12542_v30 }
 0x707   : > { %v5161_v39 = vadd.f32 %v5130_v37, %v5129_v46  ;;  %vm4840_vm4 = vcmp.lt.s32.totalorder %v4808_v10, 320 }
 0x708   : > { %v5049_v43 = vmul.f32 %v5017_v12, %v5017_v12 }
 0x709   : > { %v4546_v24 = vpop.f32.mrf.mxu2  ;;  %v4635_v20 = vpop.f32.mrf.mxu3 }
 0x70a   : > { %v4547_v49 = vadd.f32 %v4546_v24, %v4458_v63  ;;  %5097 = vadd.xlane.f32.xlu2 %v5049_v43  ;;  %v4371_v50 = vpop.f32.mrf.mxu0  ;;  %v4460_v53 = vpop.f32.mrf.mxu1  ;;  %v12550_v43 = vld [vmem:[#allocation125_spill] sm:$0xff]  ;;  %v4776_v24 = vadd.s32 40, %v11092_v26 }
 0x70b   : > { %v4372_v18 = vadd.f32 %v4371_v50, %v12545_v15  ;;  %v12554_v15 = vld [vmem:[#allocation45_spill] sm:$0xff] }
 0x70c   : > { %v11115_v42 = vadd.f32 %v4635_v20, %v4547_v49  ;;  %v12551_v20 = vld [vmem:[#allocation126_spill] sm:$0xff]  ;;  %v12552_v49 = vld [vmem:[#allocation127_spill] sm:$0xff]  ;;  %v4809_v4 = vadd.s32 %v11095_v57, %v4776_v24 }
 0x70d   : > { %v5070_v28 = vpop.xlane.xlu2 %5069  ;;  %v4461_v29 = vadd.f32 %v4460_v53, %v4372_v18  ;;  %v3920_v50 = vadd.f32 %v12552_v49, %v12551_v20 }
 0x70e   : > { %v5018_v41 = vsub.f32 %v11115_v42, %v12547_v38  ;;  %v5131_v60 = vsel %vm4838_vm2, %v5070_v28, 0.0  ;;  %vm4841_vm5 = vcmp.lt.s32.totalorder %v4809_v4, 320 }
 0x70f   : > { %v5162_v45 = vadd.f32 %v5161_v39, %v5131_v60  ;;  %v4009_v48 = vadd.f32 %v12553_v54, %v3920_v50 }
 0x710   : > { %v5050_v8 = vmul.f32 %v5018_v41, %v5018_v41 }
 0x711   : > { %v4549_v3 = vpop.f32.mrf.mxu2  ;;  %v4638_v56 = vpop.f32.mrf.mxu3 }
 0x712   : > { %v4550_v7 = vadd.f32 %v4549_v3, %v4461_v29  ;;  %5099 = vadd.xlane.f32.xlu2 %v5050_v8  ;;  %v4373_v44 = vpop.f32.mrf.mxu0  ;;  %v4462_v19 = vpop.f32.mrf.mxu1  ;;  %v4777_v3 = vadd.s32 48, %v11092_v26 }
 0x713   : > { %v4374_v33 = vadd.f32 %v4373_v44, %v4093_v59 }
 0x714   : > { %v11124_v55 = vadd.f32 %v4638_v56, %v4550_v7 }
 0x715   : > { %v5072_v1 = vpop.xlane.xlu2 %5071  ;;  %v4463_v46 = vadd.f32 %v4462_v19, %v4374_v33  ;;  %v4810_v19 = vadd.s32 %v11095_v57, %v4777_v3 }
 0x716   : > { %v5019_v27 = vsub.f32 %v11124_v55, %v12549_v61  ;;  %v5132_v9 = vsel %vm4839_vm3, %v5072_v1, 0.0 }
 0x717   : > { %v5163_v25 = vadd.f32 %v5162_v45, %v5132_v9  ;;  %v4098_v45 = vadd.f32 %v10830_v58, %v4009_v48  ;;  %vm4842_vm6 = vcmp.lt.s32.totalorder %v4810_v19, 320  ;;  %v4778_v9 = vadd.s32 56, %v11092_v26  ;;  %v12556_v48 = vld [vmem:[#allocation52_spill] sm:$0xff] }
 0x718   : > { %v5051_v13 = vmul.f32 %v5019_v27, %v5019_v27 }
 0x719   : > { %v4551_v37 = vpop.f32.mrf.mxu2  ;;  %v4640_v30 = vpop.f32.mrf.mxu3 }
 0x71a   : > { %v4552_v12 = vadd.f32 %v4551_v37, %v4463_v46  ;;  %5101 = vadd.xlane.f32.xlu2 %v5051_v13  ;;  %v4376_v39 = vpop.f32.mrf.mxu0  ;;  %v4465_v32 = vpop.f32.mrf.mxu1 }
 0x71b   : > { %v4377_v63 = vadd.f32 %v4376_v39, %v12550_v43  ;;  %v4811_v43 = vadd.s32 %v11095_v57, %v4778_v9 }
 0x71c   : > { %v11133_v53 = vadd.f32 %v4640_v30, %v4552_v12  ;;  %v12555_v30 = vld [vmem:[#allocation47_spill] sm:$0xff] }
 0x71d   : > { %v4466_v34 = vadd.f32 %v4465_v32, %v4377_v63  ;;  %v5074_v40 = vpop.xlane.xlu2 %5073  ;;  %vm4843_vm7 = vcmp.lt.s32.totalorder %v4811_v43, 320 }
 0x71e   : > { %v5020_v18 = vsub.f32 %v11133_v53, %v12554_v15  ;;  %v5133_v28 = vsel %vm4840_vm4, %v5074_v40, 0.0 }
 0x71f   : > { %v5164_v2 = vadd.f32 %v5163_v25, %v5133_v28  ;;  %v3925_v25 = vadd.f32 %v10869_v6, %v10867_v16 }
 0x720   : > { %v5052_v38 = vmul.f32 %v5020_v18, %v5020_v18 }
 0x721   : > { %v4554_v41 = vpop.f32.mrf.mxu2  ;;  %v4643_v60 = vpop.f32.mrf.mxu3  ;;  %v4014_v37 = vadd.f32 %v10885_v47, %v3925_v25  ;;  %v4779_v47 = vadd.s32 64, %v11092_v26 }
 0x722   : > { %v4555_v31 = vadd.f32 %v4554_v41, %v4466_v34  ;;  %5103 = vadd.xlane.f32.xlu2 %v5052_v38  ;;  %v4378_v8 = vpop.f32.mrf.mxu0  ;;  %v4467_v29 = vpop.f32.mrf.mxu1 }
 0x723   : > { %v4379_v5 = vadd.f32 %v4378_v8, %v4098_v45  ;;  %v4103_v16 = vadd.f32 %v10889_v36, %v4014_v37  ;;  %v4780_v8 = vadd.s32 72, %v11092_v26 }
 0x724   : > { %v11141_v56 = vadd.f32 %v4643_v60, %v4555_v31 }
 0x725   : > { %v5076_v59 = vpop.xlane.xlu2 %5075  ;;  %v4468_v11 = vadd.f32 %v4467_v29, %v4379_v5  ;;  %v3930_v29 = vadd.f32 %v10897_v62, %v10895_v21 }
 0x726   : > { %v5134_v7 = vsel %vm4841_vm5, %v5076_v59, 0.0 }
 0x727   : > { %v5165_v44 = vadd.f32 %v5164_v2, %v5134_v7  ;;  %v4812_v2 = vadd.s32 %v11095_v57, %v4779_v47  ;;  %v4019_v7 = vadd.f32 %v10909_v14, %v3930_v29  ;;  %v4781_v14 = vadd.s32 80, %v11092_v26  ;;  %v12559_v47 = vld [vmem:[#allocation55_spill] sm:$0xff] }
 0x729   : > { %v4556_v33 = vpop.f32.mrf.mxu2  ;;  %v4645_v1 = vpop.f32.mrf.mxu3  ;;  %vm4844_vm8 = vcmp.lt.s32.totalorder %v4812_v2, 320  ;;  %v4108_v21 = vadd.f32 %v10913_v52, %v4019_v7  ;;  %v4814_v43 = vadd.s32 %v11095_v57, %v4781_v14  ;;  %v12562_v2 = vld [vmem:[#allocation102_spill] sm:$0xff]  ;;  %v12564_v7 = vld [vmem:[#allocation88_spill] sm:$0xff] }
 0x72a   : > { %v4557_v61 = vadd.f32 %v4556_v33, %v4468_v11  ;;  %v4381_v58 = vpop.f32.mrf.mxu0  ;;  %v4470_v27 = vpop.f32.mrf.mxu1 }
 0x72b   : > { %v4382_v13 = vadd.f32 %v4381_v58, %v10854_v51  ;;  %vm4846_vm10 = vcmp.lt.s32.totalorder %v4814_v43, 320 }
 0x72c   : > { %v11147_v10 = vadd.f32 %v4645_v1, %v4557_v61  ;;  %v4813_v1 = vadd.s32 %v11095_v57, %v4780_v8 }
 0x72d   : > { %v5078_v46 = vpop.xlane.xlu2 %5077  ;;  %v4471_v24 = vadd.f32 %v4470_v27, %v4382_v13 }
 0x72e   : > { %v5022_v12 = vsub.f32 %v11147_v10, %v12555_v30  ;;  %v5135_v39 = vsel %vm4842_vm6, %v5078_v46, 0.0  ;;  %vm4845_vm9 = vcmp.lt.s32.totalorder %v4813_v1, 320  ;;  %v4783_v1 = vadd.s32 96, %v11092_v26 }
 0x72f   : > { %v5166_v32 = vadd.f32 %v5165_v44, %v5135_v39  ;;  %v12557_v44 = vld [vmem:[#allocation54_spill] sm:$0xff] }
 0x730   : > { %v5054_v63 = vmul.f32 %v5022_v12, %v5022_v12  ;;  %v12558_v12 = vld [vmem:[#allocation57_spill] sm:$0xff] }
 0x731   : > { %v4559_v20 = vpop.f32.mrf.mxu2  ;;  %v4648_v49 = vpop.f32.mrf.mxu3 }
 0x732   : > { %v4560_v6 = vadd.f32 %v4559_v20, %v4471_v24  ;;  %5107 = vadd.xlane.f32.xlu2 %v5054_v63  ;;  %v4383_v50 = vpop.f32.mrf.mxu0  ;;  %v4472_v51 = vpop.f32.mrf.mxu1 }
 0x733   : > { %v4384_v40 = vadd.f32 %v4383_v50, %v4103_v16  ;;  %v4689_v24 = vpop.trf.xlu0 }
 0x734   : > { %v11156_v34 = vadd.f32 %v4648_v49, %v4560_v6  ;;  %4737 = vst [vmem:[%s11180_s20] sm:$0xff] %v4689_v24  ;;  %v12567_v24 = vld [vmem:[#allocation74_spill] sm:$0xff] }
 0x735   : > { %v5080_v54 = vpop.xlane.xlu2 %5079  ;;  %v4473_v36 = vadd.f32 %v4472_v51, %v4384_v40  ;;  %v4782_v51 = vadd.s32 88, %v11092_v26  ;;  %v12560_v40 = vld [vmem:[#allocation56_spill] sm:$0xff] }
 0x736   : > { %v5023_v15 = vsub.f32 %v11156_v34, %v12556_v48  ;;  %v5136_v18 = vsel %vm4843_vm7, %v5080_v54, 0.0  ;;  %v3935_v54 = vadd.f32 %v12560_v40, %v12559_v47  ;;  %v12570_v40 = vld [vmem:[#allocation60_spill] sm:$0xff] }
 0x737   : > { %v5167_v28 = vadd.f32 %v5166_v32, %v5136_v18 }
 0x738   : > { %v5055_v4 = vmul.f32 %v5023_v15, %v5023_v15  ;;  %v12561_v15 = vld [vmem:[#allocation70_spill] sm:$0xff] }
 0x739   : > { %v4561_v38 = vpop.f32.mrf.mxu2  ;;  %v4650_v41 = vpop.f32.mrf.mxu3 }
 0x73a   : > { %v4562_v60 = vadd.f32 %v4561_v38, %v4473_v36  ;;  %5109 = vadd.xlane.f32.xlu2 %v5055_v4  ;;  %v4386_v45 = vpop.f32.mrf.mxu0  ;;  %v4475_v31 = vpop.f32.mrf.mxu1  ;;  %v4024_v4 = vadd.f32 %v12562_v2, %v3935_v54  ;;  %v12563_v36 = vld [vmem:[#allocation58_spill] sm:$0xff] }
 0x73b   : > { %v4387_v5 = vadd.f32 %v4386_v45, %v10899_v23  ;;  %v4815_v45 = vadd.s32 %v11095_v57, %v4782_v51  ;;  %v4690_v29 = vpop.trf.xlu0  ;;  %v12569_v51 = vld [vmem:[#allocation86_spill] sm:$0xff] }
 0x73c   : > { %v11164_v3 = vadd.f32 %v4650_v41, %v4562_v60  ;;  %4739 = vst [vmem:[%s11180_s20 + $0x10] sm:$0xff] %v4690_v29 }
 0x73d   : > { %v5082_v59 = vpop.xlane.xlu2 %5081  ;;  %v4476_v58 = vadd.f32 %v4475_v31, %v4387_v5  ;;  %vm4847_vm11 = vcmp.lt.s32.totalorder %v4815_v45, 320 }
 0x73e   : > { %v5024_v19 = vsub.f32 %v11164_v3, %v12557_v44  ;;  %v5137_v11 = vsel %vm4844_vm8, %v5082_v59, 0.0  ;;  %v4113_v44 = vadd.f32 %v12564_v7, %v4024_v4 }
 0x73f   : > { %v5168_v33 = vadd.f32 %v5167_v28, %v5137_v11 }
 0x740   : > { %v5056_v61 = vmul.f32 %v5024_v19, %v5024_v19 }
 0x741   : > { %v4564_v27 = vpop.f32.mrf.mxu2  ;;  %v4653_v9 = vpop.f32.mrf.mxu3 }
 0x742   : > { %v4565_v62 = vadd.f32 %v4564_v27, %v4476_v58  ;;  %5111 = vadd.xlane.f32.xlu2 %v5056_v61  ;;  %v4388_v25 = vpop.f32.mrf.mxu0  ;;  %v4477_v23 = vpop.f32.mrf.mxu1 }
 0x743   : > { %v4389_v46 = vadd.f32 %v4388_v25, %v4108_v21 }
 0x744   : > { %v11173_v13 = vadd.f32 %v4653_v9, %v4565_v62  ;;  %v12565_v9 = vld [vmem:[#allocation59_spill] sm:$0xff] }
 0x745   : > { %v5084_v37 = vpop.xlane.xlu2 %5083  ;;  %v4478_v52 = vadd.f32 %v4477_v23, %v4389_v46  ;;  %v4816_v23 = vadd.s32 %v11095_v57, %v4783_v1 }
 0x746   : > { %v5138_v30 = vsel %vm4845_vm9, %v5084_v37, 0.0  ;;  %v5025_v39 = vsub.f32 %v11173_v13, %v12558_v12  ;;  %v4691_v37 = vpop.trf.xlu0 }
 0x747   : > { %v5169_v32 = vadd.f32 %v5168_v33, %v5138_v30  ;;  %4741 = vst [vmem:[%s11180_s20 + $0x20] sm:$0xff] %v4691_v37  ;;  %vm4848_vm12 = vcmp.lt.s32.totalorder %v4816_v23, 320  ;;  %v12573_v23 = vld [vmem:[#allocation46_spill] sm:$0xff] }
 0x748   : > { %v5057_v63 = vmul.f32 %v5025_v39, %v5025_v39 }
 0x749   : > { %v4566_v20 = vpop.f32.mrf.mxu2  ;;  %v4655_v49 = vpop.f32.mrf.mxu3 }
 0x74a   : > { %v4567_v16 = vadd.f32 %v4566_v20, %v4478_v52  ;;  %5113 = vadd.xlane.f32.xlu1 %v5057_v63  ;;  %v4391_v6 = vpop.f32.mrf.mxu0  ;;  %v4480_v50 = vpop.f32.mrf.mxu1  ;;  %v4784_v52 = vadd.s32 104, %v11092_v26  ;;  %v12566_v63 = vld [vmem:[#allocation73_spill] sm:$0xff] }
 0x74b   : > { %v4392_v18 = vadd.f32 %v4391_v6, %v12561_v15  ;;  %v3940_v20 = vadd.f32 %v12567_v24, %v12566_v63  ;;  %v12574_v63 = vld [vmem:[#allocation62_spill] sm:$0xff] }
 0x74c   : > { %v11186_v48 = vadd.f32 %v4655_v49, %v4567_v16  ;;  %v12568_v16 = vld [vmem:[#allocation89_spill] sm:$0xff] }
 0x74d   : > { %v5086_v28 = vpop.xlane.xlu2 %5085  ;;  %v4481_v8 = vadd.f32 %v4480_v50, %v4392_v18  ;;  %v4029_v47 = vadd.f32 %v12569_v51, %v3940_v20 }
 0x74e   : > { %v5026_v38 = vsub.f32 %v11186_v48, %v12563_v36  ;;  %v5139_v41 = vsel %vm4846_vm10, %v5086_v28, 0.0  ;;  %v4817_v28 = vadd.s32 %v11095_v57, %v4784_v52  ;;  %v4692_v36 = vpop.trf.xlu0 }
 0x74f   : > { %v5170_v60 = vadd.f32 %v5169_v32, %v5139_v41  ;;  %4743 = vst [vmem:[%s11180_s20 + $0x30] sm:$0xff] %v4692_v36  ;;  %v12575_v36 = vld [vmem:[#allocation63_spill] sm:$0xff] }
 0x750   : > { %v5058_v31 = vmul.f32 %v5026_v38, %v5026_v38  ;;  %vm4849_vm13 = vcmp.lt.s32.totalorder %v4817_v28, 320 }
 0x751   : > { %v4569_v5 = vpop.f32.mrf.mxu2  ;;  %v4658_v59 = vpop.f32.mrf.mxu3 }
 0x752   : > { %v4570_v19 = vadd.f32 %v4569_v5, %v4481_v8  ;;  %5115 = vadd.xlane.f32.xlu2 %v5058_v31  ;;  %v4393_v11 = vpop.f32.mrf.mxu0  ;;  %v4482_v33 = vpop.f32.mrf.mxu1  ;;  %v4785_v5 = vadd.s32 112, %v11092_v26 }
 0x753   : > { %v4394_v58 = vadd.f32 %v4393_v11, %v4113_v44 }
 0x754   : > { %v11196_v61 = vadd.f32 %v4658_v59, %v4570_v19  ;;  %v12572_v19 = vld [vmem:[#allocation61_spill] sm:$0xff] }
 0x755   : > { %v5088_v27 = vpop.xlane.xlu2 %5087  ;;  %v4483_v46 = vadd.f32 %v4482_v33, %v4394_v58  ;;  %v4818_v58 = vadd.s32 %v11095_v57, %v4785_v5 }
 0x756   : > { %v5027_v21 = vsub.f32 %v11196_v61, %v12565_v9  ;;  %v5140_v62 = vsel %vm4847_vm11, %v5088_v27, 0.0 }
 0x757   : > { %v5171_v25 = vadd.f32 %v5170_v60, %v5140_v62  ;;  %v12571_v60 = vld [vmem:[#allocation87_spill] sm:$0xff]  ;;  %vm4850_vm14 = vcmp.lt.s32.totalorder %v4818_v58, 320 }
 0x758   : > { %v5059_v14 = vmul.f32 %v5027_v21, %v5027_v21  ;;  %v4118_v45 = vadd.f32 %v12571_v60, %v4029_v47  ;;  %v4693_v21 = vpop.trf.xlu0 }
 0x759   : > { %v4571_v30 = vpop.f32.mrf.mxu2  ;;  %v4660_v12 = vpop.f32.mrf.mxu3  ;;  %4745 = vst [vmem:[%s11180_s20 + $0x40] sm:$0xff] %v4693_v21 }
 0x75a   : > { %v4572_v39 = vadd.f32 %v4571_v30, %v4483_v46  ;;  %5117 = vadd.xlane.f32.xlu2 %v5059_v14  ;;  %v4396_v32 = vpop.f32.mrf.mxu0  ;;  %v4485_v43 = vpop.f32.mrf.mxu1  ;;  %v5021_v14 = vsub.f32 %v11141_v56, %v12573_v23  ;;  %v4786_v30 = vadd.s32 120, %v11092_v26 }
 0x75b   : > { %v4397_v6 = vadd.f32 %v4396_v32, %v12568_v16 }
 0x75c   : > { %v11205_v49 = vadd.f32 %v4660_v12, %v4572_v39  ;;  %v5053_v52 = vmul.f32 %v5021_v14, %v5021_v14 }
 0x75d   : > { %v5090_v50 = vpop.xlane.xlu2 %5089  ;;  %v4486_v4 = vadd.f32 %v4485_v43, %v4397_v6  ;;  %v4819_v6 = vadd.s32 %v11095_v57, %v4786_v30 }
 0x75e   : > { %v5028_v54 = vsub.f32 %v11205_v49, %v12570_v40  ;;  %v5141_v15 = vsel %vm4848_vm12, %v5090_v50, 0.0 }
 0x75f   : > { %v5172_v18 = vadd.f32 %v5171_v25, %v5141_v15  ;;  %vm4851_vm15 = vcmp.lt.s32.totalorder %v4819_v6, 320 }
 0x760   : > { %v5060_v2 = vmul.f32 %v5028_v54, %v5028_v54  ;;  %v4694_v47 = vpop.trf.xlu0 }
 0x761   : > { %v4574_v38 = vpop.f32.mrf.mxu2  ;;  %v4663_v41 = vpop.f32.mrf.mxu3  ;;  %4747 = vst [vmem:[%s11180_s20 + $0x50] sm:$0xff] %v4694_v47 }
 0x762   : > { %v4575_v31 = vadd.f32 %v4574_v38, %v4486_v4  ;;  %5119 = vadd.xlane.f32.xlu2 %v5060_v2  ;;  %v4398_v8 = vpop.f32.mrf.mxu0  ;;  %v4487_v29 = vpop.f32.mrf.mxu1 }
 0x763   : > { %v4399_v7 = vadd.f32 %v4398_v8, %v4118_v45 }
 0x764   : > { %v11215_v59 = vadd.f32 %v4663_v41, %v4575_v31 }
 0x765   : > { %v5092_v44 = vpop.xlane.xlu2 %5091  ;;  %v4488_v9 = vadd.f32 %v4487_v29, %v4399_v7 }
 0x766   : > { %v5029_v11 = vsub.f32 %v11215_v59, %v12572_v19  ;;  %v5142_v33 = vsel %vm4849_vm13, %v5092_v44, 0.0 }
 0x767   : > { %v5173_v1 = vadd.f32 %v5172_v18, %v5142_v33  ;;  %v4787_v18 = vadd.s32 128, %v11092_v26 }
 0x768   : > { %v5061_v27 = vmul.f32 %v5029_v11, %v5029_v11  ;;  %v4695_v5 = vpop.trf.xlu0 }
 0x769   : > { %v4576_v62 = vpop.f32.mrf.mxu2  ;;  %v4665_v25 = vpop.f32.mrf.mxu3  ;;  %v4820_v31 = vadd.s32 %v11095_v57, %v4787_v18  ;;  %4749 = vst [vmem:[%s11180_s20 + $0x60] sm:$0xff] %v4695_v5  ;;  %v4796_v5 = vadd.s32 200, %v11092_v26 }
 0x76a   : > { %v4577_v46 = vadd.f32 %v4576_v62, %v4488_v9  ;;  %5121 = vadd.xlane.f32.xlu2 %v5061_v27  ;;  %v4401_v37 = vpop.f32.mrf.mxu0  ;;  %v4490_v32 = vpop.f32.mrf.mxu1 }
 0x76b   : > { %v4402_v39 = vadd.f32 %v4401_v37, %v10999_v22  ;;  %vm4852_vm0 = vcmp.lt.s32.totalorder %v4820_v31, 320  ;;  %v4795_v31 = vadd.s32 192, %v11092_v26 }
 0x76c   : > { %v11224_v12 = vadd.f32 %v4665_v25, %v4577_v46 }
 0x76d   : > { %v5094_v43 = vpop.xlane.xlu2 %5093  ;;  %v4491_v51 = vadd.f32 %v4490_v32, %v4402_v39 }
 0x76e   : > { %v5030_v24 = vsub.f32 %v11224_v12, %v12574_v63  ;;  %v5143_v20 = vsel %vm4850_vm14, %v5094_v43, 0.0 }
 0x76f   : > { %v5174_v16 = vadd.f32 %v5173_v1, %v5143_v20  ;;  %v12576_v1 = vld [vmem:[#allocation64_spill] sm:$0xff] }
 0x770   : > { %v5062_v50 = vmul.f32 %v5030_v24, %v5030_v24  ;;  %5105 = vadd.xlane.f32.xlu0 %v5053_v52  ;;  %v4696_v25 = vpop.trf.xlu0 }
 0x771   : > { %v4579_v40 = vpop.f32.mrf.mxu2  ;;  %v4668_v54 = vpop.f32.mrf.mxu3  ;;  %4751 = vst [vmem:[%s11180_s20 + $0x70] sm:$0xff] %v4696_v25 }
 0x772   : > { %v4580_v15 = vadd.f32 %v4579_v40, %v4491_v51  ;;  %5123 = vadd.xlane.f32.xlu2 %v5062_v50  ;;  %v4403_v22 = vpop.f32.mrf.mxu0  ;;  %v4492_v60 = vpop.f32.mrf.mxu1  ;;  %v12577_v51 = vld [vmem:[#allocation42_spill] sm:$0xff] }
 0x773   : > { %v4404_v2 = vadd.f32 %v4403_v22, %v11003_v17  ;;  %v4788_v17 = vadd.s32 136, %v11092_v26  ;;  %v4868_v47 = vadd.s32 %v11095_v57, %v12577_v51 }
 0x774   : > { %v11232_v28 = vadd.f32 %v4668_v54, %v4580_v15  ;;  %v4792_v54 = vadd.s32 168, %v11092_v26  ;;  %v4793_v15 = vadd.s32 176, %v11092_v26 }
 0x775   : > { %v5096_v4 = vpop.xlane.xlu2 %5095  ;;  %v4493_v29 = vadd.f32 %v4492_v60, %v4404_v2  ;;  %v4821_v21 = vadd.s32 %v11095_v57, %v4788_v17  ;;  %vm4870_vm3 = vcmp.lt.s32.totalorder %v4868_v47, 320  ;;  %v7508_v2 = vmov 1.0|1.0  }
 0x776   : > { %v5031_v38 = vsub.f32 %v11232_v28, %v12575_v36  ;;  %v5144_v41 = vsel %vm4851_vm15, %v5096_v4, 0.0  ;;  %vm11284_vm5 = vmpackc.low %vm4870_vm3, %vm4870_vm3  ;;  %v4825_v36 = vadd.s32 %v11095_v57, %v4792_v54  ;;  %v4797_v17 = vadd.s32 208, %v11092_v26 }
 0x777   : > { %v5175_v45 = vadd.f32 %v5174_v16, %v5144_v41  ;;  %vm4853_vm1 = vcmp.lt.s32.totalorder %v4821_v21, 320  ;;  %v4789_v16 = vadd.s32 144, %v11092_v26  ;;  %6574 = vmatmul.msk.bf16.vlgmr.msrb.gmra.mxu2 %vm11284_vm5, %v7508_v2  ;;  %6570 = vmatmul.msk.bf16.vlgmr.msrb.gmra.mxu0 %vm11284_vm5, %v7508_v2 }
 0x778   : > { %v5063_v8 = vmul.f32 %v5031_v38, %v5031_v38  ;;  %v4697_v37 = vpop.trf.xlu0  ;;  %v4794_v38 = vadd.s32 184, %v11092_v26  ;;  %vm4857_vm9 = vcmp.lt.s32.totalorder %v4825_v36, 320 }
 0x779   : > { %v4581_v7 = vpop.f32.mrf.mxu2  ;;  %v4670_v19 = vpop.f32.mrf.mxu3  ;;  %4753 = vst [vmem:[%s11180_s20 + $0x80] sm:$0xff] %v4697_v37 }
 0x77a   : > { %v4582_v44 = vadd.f32 %v4581_v7, %v4493_v29  ;;  %5125 = vadd.xlane.f32.xlu2 %v5063_v8  ;;  %v4827_v29 = vadd.s32 %v11095_v57, %v4794_v38 }
 0x77c   : > { %v11240_v11 = vadd.f32 %v4670_v19, %v4582_v44  ;;  %v4828_v19 = vadd.s32 %v11095_v57, %v4795_v31  ;;  %vm4859_vm11 = vcmp.lt.s32.totalorder %v4827_v29, 320 }
 0x77d   : > { %v5098_v33 = vpop.xlane.xlu2 %5097 }
 0x77e   : > { %v5032_v58 = vsub.f32 %v11240_v11, %v12576_v1  ;;  %v5145_v27 = vsel %vm4852_vm0, %v5098_v33, 0.0  ;;  %vm4860_vm12 = vcmp.lt.s32.totalorder %v4828_v19, 320 }
 0x77f   : > { %v5176_v9 = vadd.f32 %v5175_v45, %v5145_v27  ;;  %v4826_v45 = vadd.s32 %v11095_v57, %v4793_v15  ;;  %v4829_v27 = vadd.s32 %v11095_v57, %v4796_v5 }
 0x780   : > { %v5064_v62 = vmul.f32 %v5032_v58, %v5032_v58  ;;  %v4698_v30 = vpop.trf.xlu0 }
 0x781   : > { %4755 = vst [vmem:[%s11180_s20 + $0x90] sm:$0xff] %v4698_v30  ;;  %vm4858_vm10 = vcmp.lt.s32.totalorder %v4826_v45, 320  ;;  %vm4861_vm13 = vcmp.lt.s32.totalorder %v4829_v27, 320 }
 0x782   : > { %5127 = vadd.xlane.f32.xlu2 %v5064_v62 }
 0x784   : > { %4705 = vxpose.xlu1.b32.start [1/16] %v11107_v35, 128 }
 0x785   : > { %v5100_v23 = vpop.xlane.xlu2 %5099 }
 0x786   : > { %v5146_v14 = vsel %vm4853_vm1, %v5100_v23, 0.0  ;;  %v4830_v23 = vadd.s32 %v11095_v57, %v4797_v17 }
 0x787   : > { %v5177_v46 = vadd.f32 %v5176_v9, %v5146_v14  ;;  %v4798_v9 = vadd.s32 216, %v11092_v26  ;;  %6582 = vmatmul.msk.bf16.vlgmr.msra.gmra.mxu2 %vm11284_vm5, %v7508_v2  ;;  %6578 = vmatmul.msk.bf16.vlgmr.msra.gmra.mxu0 %vm11284_vm5, %v7508_v2  ;;  %vm4991_vm5 = vcmask 1042434  }
 0x788   : > { %v4699_v32 = vpop.trf.xlu0  ;;  %vm4862_vm14 = vcmp.lt.s32.totalorder %v4830_v23, 320 }
 0x789   : > { %4757 = vst [vmem:[%s11180_s20 + $0xa0] sm:$0xff] %v4699_v32  ;;  %v4831_v37 = vadd.s32 %v11095_v57, %v4798_v9 }
 0x78b   : > { %vm4863_vm15 = vcmp.lt.s32.totalorder %v4831_v37, 320 }
 0x78c   : > { %4706 = vxpose.xlu1.b32.cont [2/16] %v11115_v42, 128 }
 0x78d   : > { %v5102_v39 = vpop.xlane.xlu2 %5101 }
 0x790   : > { %v4700_v35 = vpop.trf.xlu0 }
 0x791   : > { %4759 = vst [vmem:[%s11180_s20 + $0xb0] sm:$0xff] %v4700_v35 }
 0x794   : > { %4707 = vxpose.xlu1.b32.cont [3/16] %v11124_v55, 128 }
 0x795   : > { %v5104_v43 = vpop.xlane.xlu2 %5103 }
 0x798   : > { %v4701_v52 = vpop.trf.xlu0 }
 0x799   : > { %4761 = vst [vmem:[%s11180_s20 + $0xc0] sm:$0xff] %v4701_v52  ;;  %v4801_v52 = vadd.s32 240, %v11092_v26 }
 0x79c   : > { %4708 = vxpose.xlu1.b32.cont [4/16] %v11133_v53, 128 }
 0x7a0   : > { %v4702_v42 = vpop.trf.xlu0 }
 0x7a1   : > { %4763 = vst [vmem:[%s11180_s20 + $0xd0] sm:$0xff] %v4702_v42 }
 0x7a4   : > { %4709 = vxpose.xlu1.b32.cont [5/16] %v11141_v56, 128 }
 0x7a5   : > { %v5108_v63 = vpop.xlane.xlu2 %5107 }
 0x7a6   : > { %v5150_v58 = vsel %vm4857_vm9, %v5108_v63, 0.0 }
 0x7a8   : > { %v4703_v24 = vpop.trf.xlu0 }
 0x7a9   : > { %4765 = vst [vmem:[%s11180_s20 + $0xe0] sm:$0xff] %v4703_v24  ;;  %v4802_v24 = vadd.s32 248, %v11092_v26 }
 0x7ac   : > { %4710 = vxpose.xlu1.b32.cont [6/16] %v11147_v10, 128 }
 0x7ad   : > { %v5110_v55 = vpop.xlane.xlu2 %5109 }
 0x7ae   : > { %v5151_v62 = vsel %vm4858_vm10, %v5110_v55, 0.0 }
 0x7b0   : > { %v4704_v20 = vpop.trf.xlu0 }
 0x7b1   : > { %4767 = vst [vmem:[%s11180_s20 + $0xf0] sm:$0xff] %v4704_v20 }
 0x7b4   : > { %4711 = vxpose.xlu1.b32.cont [7/16] %v11156_v34, 128  ;;  %v4790_v34 = vadd.s32 152, %v11092_v26 }
 0x7b5   : > { %v11261_v53 = vpop.xlane.xlu2 %5111 }
 0x7b6   : > { %v4823_v50 = vadd.s32 %v11095_v57, %v4790_v34 }
 0x7b8   : > { %vm4855_vm6 = vcmp.lt.s32.totalorder %v4823_v50, 320 }
 0x7b9   : > { %v5148_v41 = vsel %vm4855_vm6, %v5104_v43, 0.0  ;;  %vm4993_vm6 = vcmask 1041408  }
 0x7bc   : > { %4712 = vxpose.xlu1.b32.cont [8/16] %v11164_v3, 128  ;;  %v4822_v3 = vadd.s32 %v11095_v57, %v4789_v16  ;;  %v4834_v16 = vadd.s32 %v11095_v57, %v4801_v52 }
 0x7bd   : > { %v5114_v25 = vpop.xlane.xlu1 %5113 }
 0x7be   : > { %vm4854_vm2 = vcmp.lt.s32.totalorder %v4822_v3, 320  ;;  %v5153_v32 = vsel %vm4860_vm12, %v5114_v25, 0.0  ;;  %v4835_v3 = vadd.s32 %v11095_v57, %v4802_v24 }
 0x7c0   : > { %vm4867_vm3 = vcmp.lt.s32.totalorder %v4835_v3, 320 }
 0x7c4   : > { %4713 = vxpose.xlu1.b32.cont [9/16] %v11173_v13, 128  ;;  %v4791_v13 = vadd.s32 160, %v11092_v26 }
 0x7c5   : > { %v11265_v56 = vpop.xlane.xlu2 %5115 }
 0x7c6   : > { %v4824_v18 = vadd.s32 %v11095_v57, %v4791_v13  ;;  %v5154_v42 = vsel %vm4861_vm13, %v11265_v56, 0.0 }
 0x7c8   : > { %vm4856_vm8 = vcmp.lt.s32.totalorder %v4824_v18, 320 }
 0x7cc   : > { %4714 = vxpose.xlu1.b32.cont [10/16] %v11186_v48, 128  ;;  %v12578_v48 = vld [vmem:[#allocation44_spill] sm:$0xff] }
 0x7cd   : > { %v11268_v10 = vpop.xlane.xlu2 %5117  ;;  %v4869_v40 = vadd.s32 %v11095_v57, %v12578_v48 }
 0x7cf   : > { %vm4871_vm4 = vcmp.lt.s32.totalorder %v4869_v40, 320 }
 0x7d0   : > { %vm11294_vm7 = vmpackc.low %vm4871_vm4, %vm4871_vm4  ;;  %vm4989_vm4 = vcmask 1040384  }
 0x7d1   : > { %6576 = vmatmul.msk.bf16.vlgmr.msrb.gmra.mxu3 %vm11294_vm7, %v7508_v2  ;;  %6572 = vmatmul.msk.bf16.vlgmr.msrb.gmra.mxu1 %vm11294_vm7, %v7508_v2 }
 0x7d4   : > { %4715 = vxpose.xlu1.b32.cont [11/16] %v11196_v61, 128 }
 0x7d5   : > { %v11273_v6 = vpop.xlane.xlu2 %5119 }
 0x7d6   : > { %v5156_v56 = vsel %vm4863_vm15, %v11273_v6, 0.0 }
 0x7dc   : > { %4716 = vxpose.xlu1.b32.cont [12/16] %v11205_v49, 128  ;;  %v5147_v49 = vsel %vm4854_vm2, %v5102_v39, 0.0  ;;  %v4800_v39 = vadd.s32 232, %v11092_v26  ;;  %vm4866_vm2 = vcmp.lt.s32.totalorder %v4834_v16, 320 }
 0x7dd   : > { %v11289_v22 = vpop.xlane.xlu2 %5121  ;;  %v5178_v60 = vadd.f32 %v5177_v46, %v5147_v49  ;;  %v5152_v46 = vsel %vm4859_vm11, %v11261_v53, 0.0  ;;  %v5155_v53 = vsel %vm4862_vm14, %v11268_v10, 0.0 }
 0x7df   : > { %v5179_v8 = vadd.f32 %v5178_v60, %v5148_v41 }
 0x7e1   : > { %6584 = vmatmul.msk.bf16.vlgmr.msra.gmra.mxu3 %vm11294_vm7, %v7508_v2  ;;  %6580 = vmatmul.msk.bf16.vlgmr.msra.gmra.mxu1 %vm11294_vm7, %v7508_v2  ;;  %vm4998_vm7 = vcmp.lt.s32.totalorder %v12535_v0, 512 }
 0x7e3   : > { %v5106_v7 = vpop.xlane.xlu0 %5105 }
 0x7e4   : > { %v5149_v44 = vsel %vm4856_vm8, %v5106_v7, 0.0  ;;  %4717 = vxpose.xlu1.b32.cont [13/16] %v11215_v59, 128  ;;  %v4799_v59 = vadd.s32 224, %v11092_v26 }
 0x7e5   : > { %v5180_v33 = vadd.f32 %v5179_v8, %v5149_v44  ;;  %v5124_v1 = vpop.xlane.xlu2 %5123 }
 0x7e6   : > { %v4832_v35 = vadd.s32 %v11095_v57, %v4799_v59 }
 0x7e7   : > { %v5181_v21 = vadd.f32 %v5180_v33, %v5150_v58 }
 0x7e8   : > { %vm4864_vm0 = vcmp.lt.s32.totalorder %v4832_v35, 320 }
 0x7e9   : > { %v5182_v14 = vadd.f32 %v5181_v21, %v5151_v62  ;;  %v5157_v50 = vsel %vm4864_vm0, %v11289_v22, 0.0 }
 0x7eb   : > { %v5183_v30 = vadd.f32 %v5182_v14, %v5152_v46 }
 0x7ec   : > { %4718 = vxpose.xlu1.b32.cont [14/16] %v11224_v12, 128  ;;  %v4833_v12 = vadd.s32 %v11095_v57, %v4800_v39 }
 0x7ed   : > { %v5184_v43 = vadd.f32 %v5183_v30, %v5153_v32  ;;  %v5126_v63 = vpop.xlane.xlu2 %5125 }
 0x7ee   : > { %vm4865_vm1 = vcmp.lt.s32.totalorder %v4833_v12, 320  ;;  %v5159_v47 = vsel %vm4866_vm2, %v5126_v63, 0.0 }
 0x7ef   : > { %v5185_v55 = vadd.f32 %v5184_v43, %v5154_v42  ;;  %v5158_v26 = vsel %vm4865_vm1, %v5124_v1, 0.0 }
 0x7f1   : > { %v5186_v20 = vadd.f32 %v5185_v55, %v5155_v53 }
 0x7f3   : > { %v5187_v34 = vadd.f32 %v5186_v20, %v5156_v56 }
 0x7f4   : > { %4719 = vxpose.xlu1.b32.cont [15/16] %v11232_v28, 128  ;;  %v4887_v41 = vpop.f32.mrf.mxu0 }
 0x7f5   : > { %v5188_v13 = vadd.f32 %v5187_v34, %v5157_v50  ;;  %v5128_v51 = vpop.xlane.xlu2 %5127 }
 0x7f6   : > { %v5160_v48 = vsel %vm4867_vm3, %v5128_v51, 0.0 }
 0x7f7   : > { %v5189_v10 = vadd.f32 %v5188_v13, %v5158_v26 }
 0x7f9   : > { %v5190_v6 = vadd.f32 %v5189_v10, %v5159_v47 }
 0x7fa   : > { %v4913_v31 = vpop.f32.mrf.mxu2 }
 0x7fb   : > { %v5191_v40 = vadd.f32 %v5190_v6, %v5160_v48 }
 0x7fc   : > { %4720 = vxpose.xlu1.b32.end [16/16] %v11240_v11, 128  ;;  %v4889_v29 = vpop.f32.mrf.mxu0 }
 0x7fd   : > { %v5192_v57 = vrot.slane %v5191_v40, 4 }
 0x7ff   : > { %v5193_v28 = vadd.f32 %v5192_v57, %v5191_v40 }
 0x801   : > { %v5194_v54 = vrot.slane %v5193_v28, 2 }
 0x802   : > { %v4915_v44 = vpop.f32.mrf.mxu2 }
 0x803   : > { %v5195_v61 = vadd.f32 %v5194_v54, %v5193_v28 }
 0x804   : > { %v4939_v17 = vpop.f32.mrf.mxu0 }
 0x805   : > { %v5196_v15 = vrot.slane %v5195_v61, 1 }
 0x807   : > { %v5197_v22 = vadd.f32 %v5196_v15, %v5195_v61 }
 0x809   : > { %5198 = vst [vmem:[%s12190_s23] sm:$0x1] %v5197_v22 }
 0x80a   : > { %v4965_v62 = vpop.f32.mrf.mxu2 }
 0x80c   : > { %v4941_v14 = vpop.f32.mrf.mxu0 }
 0x812   : > { %v4967_v43 = vpop.f32.mrf.mxu2 }
 0x828   : > { %v4721_v18 = vpop.trf.xlu1 }
 0x829   : > { %4738 = vst [vmem:[%s11180_s20 + $0x8] sm:$0xff] %v4721_v18 }
 0x830   : > { %v4722_v2 = vpop.trf.xlu1 }
 0x831   : > { %4740 = vst [vmem:[%s11180_s20 + $0x18] sm:$0xff] %v4722_v2 }
 0x838   : > { %v4723_v11 = vpop.trf.xlu1 }
 0x839   : > { %4742 = vst [vmem:[%s11180_s20 + $0x28] sm:$0xff] %v4723_v11 }
 0x840   : > { %v4724_v4 = vpop.trf.xlu1 }
 0x841   : > { %4744 = vst [vmem:[%s11180_s20 + $0x38] sm:$0xff] %v4724_v4 }
 0x848   : > { %v4725_v49 = vpop.trf.xlu1 }
 0x849   : > { %4746 = vst [vmem:[%s11180_s20 + $0x48] sm:$0xff] %v4725_v49 }
 0x84e   : > { %v4900_v60 = vpop.f32.mrf.mxu1 }
 0x84f   : > { %v4901_v9 = vadd.f32 %v4900_v60, %v4887_v41 }
 0x850   : > { %v4726_v36 = vpop.trf.xlu1 }
 0x851   : > { %4748 = vst [vmem:[%s11180_s20 + $0x58] sm:$0xff] %v4726_v36 }
 0x854   : > { %v4926_v8 = vpop.f32.mrf.mxu3 }
 0x855   : > { %v4927_v1 = vadd.f32 %v4926_v8, %v4913_v31 }
 0x856   : > { %v4902_v5 = vpop.f32.mrf.mxu1 }
 0x857   : > { %v4986_v21 = vrot.slane %v4927_v1, 7 }
 0x858   : > { %v4727_v38 = vpop.trf.xlu1 }
 0x859   : > { %4750 = vst [vmem:[%s11180_s20 + $0x68] sm:$0xff] %v4727_v38  ;;  %v4990_v37 = vsel %vm4989_vm4, %v4901_v9, %v4986_v21 }
 0x85c   : > { %v4928_v19 = vpop.f32.mrf.mxu3 }
 0x85e   : > { %v4952_v33 = vpop.f32.mrf.mxu1 }
 0x85f   : > { %v4953_v58 = vadd.f32 %v4952_v33, %v4939_v17 }
 0x860   : > { %v4728_v45 = vpop.trf.xlu1 }
 0x861   : > { %4752 = vst [vmem:[%s11180_s20 + $0x78] sm:$0xff] %v4728_v45  ;;  %v4987_v23 = vrot.slane %v4953_v58, 6 }
 0x864   : > { %v4978_v25 = vpop.f32.mrf.mxu3 }
 0x865   : > { %v4979_v59 = vadd.f32 %v4978_v25, %v4965_v62 }
 0x866   : > { %v4954_v46 = vpop.f32.mrf.mxu1 }
 0x867   : > { %v4988_v30 = vrot.slane %v4979_v59, 5 }
 0x868   : > { %v4729_v7 = vpop.trf.xlu1 }
 0x869   : > { %4754 = vst [vmem:[%s11180_s20 + $0x88] sm:$0xff] %v4729_v7  ;;  %v4992_v39 = vsel %vm4991_vm5, %v4987_v23, %v4988_v30 }
 0x86a   : > { %v4994_v32 = vsel %vm4993_vm6, %v4990_v37, %v4992_v39 }
 0x86b   : > { %5000 = vst.msk [vmem:[%s11360_s10] sm:$0xf] %vm4998_vm7, %v4994_v32 }
 0x86c   : > { %v4980_v52 = vpop.f32.mrf.mxu3 }
 0x870   : > { %v4730_v27 = vpop.trf.xlu1 }
 0x871   : > { %4756 = vst [vmem:[%s11180_s20 + $0x98] sm:$0xff] %v4730_v27 }
 0x878   : > { %v4731_v35 = vpop.trf.xlu1 }
 0x879   : > { %4758 = vst [vmem:[%s11180_s20 + $0xa8] sm:$0xff] %v4731_v35 }
 0x880   : > { %v4732_v63 = vpop.trf.xlu1 }
 0x881   : > { %4760 = vst [vmem:[%s11180_s20 + $0xb8] sm:$0xff] %v4732_v63 }
 0x888   : > { %v4733_v42 = vpop.trf.xlu1 }
 0x889   : > { %4762 = vst [vmem:[%s11180_s20 + $0xc8] sm:$0xff] %v4733_v42 }
 0x890   : > { %v4734_v12 = vpop.trf.xlu1 }
 0x891   : > { %4764 = vst [vmem:[%s11180_s20 + $0xd8] sm:$0xff] %v4734_v12 }
 0x898   : > { %v4735_v0 = vpop.trf.xlu1 }
 0x899   : > { %4766 = vst [vmem:[%s11180_s20 + $0xe8] sm:$0xff] %v4735_v0 }
 0x89d   : > { %5219 = sbr.rel (!%p7623_p8) target bundleno = 2406 (0x966), region = 110 }
 0x8a0   : > { %v4736_v55 = vpop.trf.xlu1 }
 0x8a1   : > { %4768 = vst [vmem:[%s11180_s20 + $0xf8] sm:$0xff] %v4736_v55 }
 0x8a2   : > { %s12640_s14 = smov (!%p5222_p7, %s5221_s14), 2 }
 0x8a3   : > { %s6589_s24 = sshll.u32 %s12640_s14, 7  ;;  %s11380_s13 = sshll.u32 %s12640_s14, 3 }
 0x8a4   : > { %p6593_p10 = scmp.eq.s32.totalorder %s6589_s24, 0 }
 0x8a5   : > { %p5234_p11 = scmp.lt.u32.totalorder (!%p6593_p10), %s11380_s13, 8 }
 0x8a6   : > { %5233 = sbr.rel (%p6593_p10) target bundleno = 2406 (0x966), region = 114 }
 0x8ab   : > { %5237 = sbr.rel (%p5234_p11) target bundleno = 2382 (0x94e), region = 118  ;;  %s11384_s17 = sand.u32 (!%p5234_p11), 7, %s11380_s13  }
 0x8ac   : > { %p5284_p12 = scmp.eq.s32.totalorder (!%p5234_p11), %s11384_s17, 0  ;;  %p6594_p13 = scmp.ne.s32.totalorder (!%p5234_p11), %s11384_s17, 0 }
 0x8b0   : > { %5287 = sbr.rel (%p6594_p13) target bundleno = 2293 (0x8f5), region = 133  ;;  %s5288_s15 = sshrl.u32 (!%p6594_p13), %s11380_s13, 3 }
 0x8b1   : > { %s11391_s21 = sshrl.u32 (!%p6594_p13), %s5288_s15, 1 }
 0x8b2   : > { %p6595_p0 = scmp.le.s32.totalorder (!%p6594_p13), %s11391_s21, 0 }
 0x8b5   : > { %5906 = sbr.rel (%p6595_p0) target bundleno = 2267 (0x8db), region = 330  ;;  %s12584_s14 = smov (!%p6595_p0), %s11378_s27 }
 0x8b6   : > { %s12585_s0 = smov (!%p6595_p0), %s11180_s20  ;;  %s11400_s26 = smov (!%p6595_p0), 0  }
 0x8b7   : > { %s11402_s22 = smov (!%p6595_p0), 0  }
 0x8ba LB: >> { %v5299_v24 = vld [vmem:[%s7447_s0] sm:$0xff]  ;;  %v5301_v53 = vld [vmem:[%s7447_s0 + $0x8] sm:$0xff]  ;;  %v5303_v20 = vld [vmem:[%s7447_s0 + $0x10] sm:$0xff]  ;;  %s5363_s8 = sadd.s32 1, %s7451_s26  ;;  %s5293_s22 = sadd.s32 1, %s7455_s22   ;;  %s7455_s22 = sphi %s11402_s22, %s5293_s22   ;;  %s7451_s26 = sphi %s11400_s26, %s12588_s26   ;;  %s7447_s0 = sphi %s12585_s0, %s12587_s0   ;;  %s7443_s14 = sphi %s12584_s14, %s12586_s14  }
 0x8bb   : >> { %5300 = vst [vmem:[%s7443_s14] sm:$0xff] %v5299_v24  ;;  %v5305_v16 = vld [vmem:[%s7447_s0 + $0x18] sm:$0xff]  ;;  %p5364_p1 = scmp.ge.s32.totalorder %s5363_s8, %s11391_s21  ;;  %v5307_v56 = vld [vmem:[%s7447_s0 + $0x20] sm:$0xff]  ;;  %v5309_v34 = vld [vmem:[%s7447_s0 + $0x28] sm:$0xff]  ;;  %p5292_p2 = scmp.ge.s32.totalorder %s5293_s22, %s11391_s21 }
 0x8bc   : >> { %5302 = vst [vmem:[%s7443_s14 + $0x8] sm:$0xff] %v5301_v53  ;;  %v5311_v3 = vld [vmem:[%s7447_s0 + $0x30] sm:$0xff]  ;;  %v5313_v50 = vld [vmem:[%s7447_s0 + $0x38] sm:$0xff]  ;;  %v5315_v13 = vld [vmem:[%s7447_s0 + $0x40] sm:$0xff] }
 0x8bd   : >> { %5304 = vst [vmem:[%s7443_s14 + $0x18] sm:$0xff] %v5303_v20  ;;  %s12642_s8 = smov (%p5364_p1, %s5363_s8), 0  ;;  %v5317_v26 = vld [vmem:[%s7447_s0 + $0x48] sm:$0xff]  ;;  %v5319_v10 = vld [vmem:[%s7447_s0 + $0x50] sm:$0xff]  ;;  %v5321_v51 = vld [vmem:[%s7447_s0 + $0x58] sm:$0xff] }
 0x8be   : >> { %5306 = vst [vmem:[%s7443_s14 + $0x20] sm:$0xff] %v5305_v16  ;;  %s6596_s24 = sshll.u32 %s12642_s8, 4  ;;  %v5323_v47 = vld [vmem:[%s7447_s0 + $0x60] sm:$0xff]  ;;  %v5325_v6 = vld [vmem:[%s7447_s0 + $0x68] sm:$0xff]  ;;  %v5327_v48 = vld [vmem:[%s7447_s0 + $0x70] sm:$0xff] }
 0x8bf   : >> { %5308 = vst [vmem:[%s7443_s14 + $0x30] sm:$0xff] %v5307_v56  ;;  %s11434_s26 = scalar_lea.vmem %s11180_s20, %s6596_s24 [#allocation3]   ;;  %s11437_s23 = scalar_lea.vmem %s11378_s27, %s6596_s24   ;;  %v5329_v40 = vld [vmem:[%s7447_s0 + $0x78] sm:$0xff]  ;;  %v5331_v57 = vld [vmem:[%s7447_s0 + $0x80] sm:$0xff]  ;;  %v5333_v28 = vld [vmem:[%s7447_s0 + $0x88] sm:$0xff] }
 0x8c0   : >> { %5310 = vst [vmem:[%s7443_s14 + $0x38] sm:$0xff] %v5309_v34  ;;  %v5335_v54 = vld [vmem:[%s7447_s0 + $0x90] sm:$0xff]  ;;  %v5337_v61 = vld [vmem:[%s7447_s0 + $0x98] sm:$0xff]  ;;  %v5339_v15 = vld [vmem:[%s7447_s0 + $0xa0] sm:$0xff] }
 0x8c1   : >> { %5312 = vst [vmem:[%s7443_s14 + $0x48] sm:$0xff] %v5311_v3  ;;  %v5341_v22 = vld [vmem:[%s7447_s0 + $0xa8] sm:$0xff]  ;;  %v5343_v18 = vld [vmem:[%s7447_s0 + $0xb0] sm:$0xff]  ;;  %v5345_v2 = vld [vmem:[%s7447_s0 + $0xb8] sm:$0xff] }
 0x8c2   : >> { %5314 = vst [vmem:[%s7443_s14 + $0x50] sm:$0xff] %v5313_v50  ;;  %v5347_v11 = vld [vmem:[%s7447_s0 + $0xc0] sm:$0xff]  ;;  %v5349_v4 = vld [vmem:[%s7447_s0 + $0xc8] sm:$0xff]  ;;  %v5351_v49 = vld [vmem:[%s7447_s0 + $0xd0] sm:$0xff] }
 0x8c3   : >> { %5316 = vst [vmem:[%s7443_s14 + $0x60] sm:$0xff] %v5315_v13  ;;  %v5353_v36 = vld [vmem:[%s7447_s0 + $0xd8] sm:$0xff]  ;;  %v5355_v38 = vld [vmem:[%s7447_s0 + $0xe0] sm:$0xff]  ;;  %v5357_v41 = vld [vmem:[%s7447_s0 + $0xe8] sm:$0xff] }
 0x8c4   : >> { %5318 = vst [vmem:[%s7443_s14 + $0x68] sm:$0xff] %v5317_v26  ;;  %v5359_v60 = vld [vmem:[%s7447_s0 + $0xf0] sm:$0xff]  ;;  %v5361_v45 = vld [vmem:[%s7447_s0 + $0xf8] sm:$0xff]  ;;  %s12587_s0 = smov %s11434_s26  ;;  %s12588_s26 = smov %s12642_s8 }
 0x8c5   : >> { %5320 = vst [vmem:[%s7443_s14 + $0x78] sm:$0xff] %v5319_v10 }
 0x8c6   : >> { %5322 = vst [vmem:[%s7443_s14 + $0x80] sm:$0xff] %v5321_v51 }
 0x8c7   : >> { %5324 = vst [vmem:[%s7443_s14 + $0x90] sm:$0xff] %v5323_v47 }
 0x8c8   : >> { %5326 = vst [vmem:[%s7443_s14 + $0x98] sm:$0xff] %v5325_v6 }
 0x8c9   : >> { %5328 = vst [vmem:[%s7443_s14 + $0xa8] sm:$0xff] %v5327_v48 }
 0x8ca   : >> { %5330 = vst [vmem:[%s7443_s14 + $0xb0] sm:$0xff] %v5329_v40 }
 0x8cb   : >> { %5332 = vst [vmem:[%s7443_s14 + $0xc0] sm:$0xff] %v5331_v57 }
 0x8cc   : >> { %5334 = vst [vmem:[%s7443_s14 + $0xc8] sm:$0xff] %v5333_v28 }
 0x8cd   : >> { %5336 = vst [vmem:[%s7443_s14 + $0xd8] sm:$0xff] %v5335_v54 }
 0x8ce   : >> { %5338 = vst [vmem:[%s7443_s14 + $0xe0] sm:$0xff] %v5337_v61 }
 0x8cf   : >> { %5340 = vst [vmem:[%s7443_s14 + $0xf0] sm:$0xff] %v5339_v15 }
 0x8d0   : >> { %5342 = vst [vmem:[%s7443_s14 + $0xf8] sm:$0xff] %v5341_v22 }
 0x8d1   : >> { %5344 = vst [vmem:[%s7443_s14 + $0x108] sm:$0xff] %v5343_v18 }
 0x8d2   : >> { %5346 = vst [vmem:[%s7443_s14 + $0x110] sm:$0xff] %v5345_v2 }
 0x8d3   : >> { %5348 = vst [vmem:[%s7443_s14 + $0x120] sm:$0xff] %v5347_v11 }
 0x8d4   : >> { %5350 = vst [vmem:[%s7443_s14 + $0x128] sm:$0xff] %v5349_v4 }
 0x8d5   : >> { %5352 = vst [vmem:[%s7443_s14 + $0x138] sm:$0xff] %v5351_v49 }
 0x8d6   : >> { %5354 = vst [vmem:[%s7443_s14 + $0x140] sm:$0xff] %v5353_v36  ;;  %5295 = sbr.rel (!%p5292_p2) target bundleno = 2234 (0x8ba), region = 336 }
 0x8d7   : >> { %5356 = vst [vmem:[%s7443_s14 + $0x150] sm:$0xff] %v5355_v38 }
 0x8d8   : >> { %5358 = vst [vmem:[%s7443_s14 + $0x158] sm:$0xff] %v5357_v41 }
 0x8d9   : >> { %5360 = vst [vmem:[%s7443_s14 + $0x168] sm:$0xff] %v5359_v60 }
 0x8da   : >> { %5362 = vst [vmem:[%s7443_s14 + $0x170] sm:$0xff] %v5361_v45  ;;  %s12586_s14 = smov %s11437_s23 }
 0x8db PF: > { %s11503_s24 = sand.u32 1, %s5288_s15   ;;  %s6729_s29 = sshll.u32 %s11391_s21, 4 }
 0x8dc   : > { %s11507_s11 = scalar_lea.vmem %s11180_s20, %s6729_s29 [#allocation3]   ;;  %s11510_s1 = scalar_lea.vmem %s11378_s27, %s6729_s29  }
 0x8dd   : > { %p6601_p3 = scmp.le.s32.totalorder %s11503_s24, 0 }
 0x8de   : > { %s12589_s23 = smov (!%p6601_p3), %s11510_s1  ;;  %s12590_s14 = smov (!%p6601_p3), %s11507_s11 }
 0x8df   : > { %5920 = sbr.rel (%p6601_p3) target bundleno = 2293 (0x8f5), region = 341  ;;  %s11519_s0 = smov (!%p6601_p3), 0  }
 0x8e0   : > { %s11521_s22 = smov (!%p6601_p3), 0  }
 0x8e4 LB: >> { %v5386_v31 = vld [vmem:[%s7463_s14] sm:$0xff]  ;;  %v5388_v8 = vld [vmem:[%s7463_s14 + $0x10] sm:$0xff]  ;;  %s5418_s29 = sadd.s32 1, %s7467_s0  ;;  %s5380_s22 = sadd.s32 1, %s7471_s22   ;;  %s7471_s22 = sphi %s11521_s22, %s5380_s22   ;;  %s7467_s0 = sphi %s11519_s0, %s12593_s0   ;;  %s7463_s14 = sphi %s12590_s14, %s12592_s14   ;;  %s7459_s23 = sphi %s12589_s23, %s12591_s23  }
 0x8e5   : >> { %v5390_v29 = vld [vmem:[%s7463_s14 + $0x20] sm:$0xff]  ;;  %5387 = vst [vmem:[%s7459_s23] sm:$0xff] %v5386_v31  ;;  %v5392_v5 = vld [vmem:[%s7463_s14 + $0x30] sm:$0xff]  ;;  %p5419_p4 = scmp.ge.s32.totalorder %s5418_s29, %s11503_s24  ;;  %p5379_p5 = scmp.ge.s32.totalorder %s5380_s22, %s11503_s24 }
 0x8e6   : >> { %5389 = vst [vmem:[%s7459_s23 + $0x18] sm:$0xff] %v5388_v8  ;;  %v5394_v7 = vld [vmem:[%s7463_s14 + $0x40] sm:$0xff]  ;;  %v5396_v44 = vld [vmem:[%s7463_s14 + $0x50] sm:$0xff] }
 0x8e7   : >> { %5391 = vst [vmem:[%s7459_s23 + $0x30] sm:$0xff] %v5390_v29  ;;  %s12644_s29 = smov (%p5419_p4, %s5418_s29), 0  ;;  %v5398_v19 = vld [vmem:[%s7463_s14 + $0x60] sm:$0xff]  ;;  %v5400_v17 = vld [vmem:[%s7463_s14 + $0x70] sm:$0xff] }
 0x8e8   : >> { %5393 = vst [vmem:[%s7459_s23 + $0x48] sm:$0xff] %v5392_v5  ;;  %s6602_s15 = sshll.u32 %s12644_s29, 3  ;;  %v5402_v33 = vld [vmem:[%s7463_s14 + $0x80] sm:$0xff]  ;;  %v5404_v1 = vld [vmem:[%s7463_s14 + $0x90] sm:$0xff]  ;;  %s12593_s0 = smov %s12644_s29 }
 0x8e9   : >> { %5395 = vst [vmem:[%s7459_s23 + $0x60] sm:$0xff] %v5394_v7  ;;  %s5423_s21 = scalar_lea.vmem %s11507_s11, %s6602_s15 [#allocation3]   ;;  %s5424_s8 = scalar_lea.vmem %s11510_s1, %s6602_s15   ;;  %v5406_v58 = vld [vmem:[%s7463_s14 + $0xa0] sm:$0xff]  ;;  %v5408_v27 = vld [vmem:[%s7463_s14 + $0xb0] sm:$0xff] }
 0x8ea   : >> { %5397 = vst [vmem:[%s7459_s23 + $0x78] sm:$0xff] %v5396_v44  ;;  %v5410_v9 = vld [vmem:[%s7463_s14 + $0xc0] sm:$0xff]  ;;  %v5412_v21 = vld [vmem:[%s7463_s14 + $0xd0] sm:$0xff] }
 0x8eb   : >> { %5399 = vst [vmem:[%s7459_s23 + $0x90] sm:$0xff] %v5398_v19  ;;  %v5414_v62 = vld [vmem:[%s7463_s14 + $0xe0] sm:$0xff]  ;;  %v5416_v25 = vld [vmem:[%s7463_s14 + $0xf0] sm:$0xff]  ;;  %s12592_s14 = smov %s5423_s21 }
 0x8ec   : >> { %5401 = vst [vmem:[%s7459_s23 + $0xa8] sm:$0xff] %v5400_v17 }
 0x8ed   : >> { %5403 = vst [vmem:[%s7459_s23 + $0xc0] sm:$0xff] %v5402_v33 }
 0x8ee   : >> { %5405 = vst [vmem:[%s7459_s23 + $0xd8] sm:$0xff] %v5404_v1 }
 0x8ef   : >> { %5407 = vst [vmem:[%s7459_s23 + $0xf0] sm:$0xff] %v5406_v58 }
 0x8f0   : >> { %5409 = vst [vmem:[%s7459_s23 + $0x108] sm:$0xff] %v5408_v27  ;;  %5382 = sbr.rel (!%p5379_p5) target bundleno = 2276 (0x8e4), region = 347 }
 0x8f1   : >> { %5411 = vst [vmem:[%s7459_s23 + $0x120] sm:$0xff] %v5410_v9 }
 0x8f2   : >> { %5413 = vst [vmem:[%s7459_s23 + $0x138] sm:$0xff] %v5412_v21 }
 0x8f3   : >> { %5415 = vst [vmem:[%s7459_s23 + $0x150] sm:$0xff] %v5414_v62 }
 0x8f4   : >> { %5417 = vst [vmem:[%s7459_s23 + $0x168] sm:$0xff] %v5416_v25  ;;  %s12591_s23 = smov %s5424_s8 }
 0x8f5 PF: > { %5427 = sbr.rel (%p5284_p12) target bundleno = 2382 (0x94e), region = 151  ;;  %s5429_s26 = ssub.s32 (!%p5284_p12), %s11380_s13, %s11384_s17 }
 0x8f6   : > { %s5433_s15 = sshrl.u32 (!%p5284_p12), %s11380_s13, 3  ;;  %s11588_s8 = scalar_lea.vmem (!%p5284_p12), %s11180_s20, %s5429_s26 [#allocation3] }
 0x8f7   : > { %s11591_s21 = scalar_lea.vmem (!%p5284_p12), %s11378_s27, %s5429_s26  ;;  %s11595_s22 = sshrl.u32 (!%p5284_p12), %s5433_s15, 1 }
 0x8f8   : > { %p6604_p6 = scmp.le.s32.totalorder (!%p5284_p12), %s11595_s22, 0 }
 0x8fa   : > { %5934 = sbr.rel (%p6604_p6) target bundleno = 2336 (0x920), region = 352  ;;  %s12594_s1 = smov (!%p6604_p6), %s11378_s27 }
 0x8fb   : > { %s12595_s11 = smov (!%p6604_p6), %s11180_s20  ;;  %s11604_s24 = smov (!%p6604_p6), 0  }
 0x8fc   : > { %s11606_s23 = smov (!%p6604_p6), 0  }
 0x8ff LB: >> { %v5444_v23 = vld [vmem:[%s7479_s11] sm:$0xff]  ;;  %v5446_v59 = vld [vmem:[%s7479_s11 + $0x8] sm:$0xff]  ;;  %v5448_v14 = vld [vmem:[%s7479_s11 + $0x10] sm:$0xff]  ;;  %s5508_s14 = sadd.s32 1, %s7483_s24  ;;  %s5438_s23 = sadd.s32 1, %s7487_s23   ;;  %s7487_s23 = sphi %s11606_s23, %s5438_s23   ;;  %s7483_s24 = sphi %s11604_s24, %s12598_s24   ;;  %s7479_s11 = sphi %s12595_s11, %s12597_s11   ;;  %s7475_s1 = sphi %s12594_s1, %s12596_s1  }
 0x900   : >> { %5445 = vst [vmem:[%s7475_s1] sm:$0xff] %v5444_v23  ;;  %v5450_v46 = vld [vmem:[%s7479_s11 + $0x18] sm:$0xff]  ;;  %p5509_p7 = scmp.ge.s32.totalorder %s5508_s14, %s11595_s22  ;;  %v5452_v37 = vld [vmem:[%s7479_s11 + $0x20] sm:$0xff]  ;;  %v5454_v30 = vld [vmem:[%s7479_s11 + $0x28] sm:$0xff]  ;;  %p5437_p10 = scmp.ge.s32.totalorder %s5438_s23, %s11595_s22 }
 0x901   : >> { %5447 = vst [vmem:[%s7475_s1 + $0x8] sm:$0xff] %v5446_v59  ;;  %v5456_v39 = vld [vmem:[%s7479_s11 + $0x30] sm:$0xff]  ;;  %v5458_v32 = vld [vmem:[%s7479_s11 + $0x38] sm:$0xff]  ;;  %v5460_v35 = vld [vmem:[%s7479_s11 + $0x40] sm:$0xff] }
 0x902   : >> { %5449 = vst [vmem:[%s7475_s1 + $0x18] sm:$0xff] %v5448_v14  ;;  %s12646_s14 = smov (%p5509_p7, %s5508_s14), 0  ;;  %v5462_v43 = vld [vmem:[%s7479_s11 + $0x48] sm:$0xff]  ;;  %v5464_v52 = vld [vmem:[%s7479_s11 + $0x50] sm:$0xff]  ;;  %v5466_v63 = vld [vmem:[%s7479_s11 + $0x58] sm:$0xff] }
 0x903   : >> { %5451 = vst [vmem:[%s7475_s1 + $0x20] sm:$0xff] %v5450_v46  ;;  %s6605_s0 = sshll.u32 %s12646_s14, 4  ;;  %v5468_v42 = vld [vmem:[%s7479_s11 + $0x60] sm:$0xff]  ;;  %v5470_v12 = vld [vmem:[%s7479_s11 + $0x68] sm:$0xff]  ;;  %v5472_v0 = vld [vmem:[%s7479_s11 + $0x70] sm:$0xff]  ;;  %s12598_s24 = smov %s12646_s14 }
 0x904   : >> { %5453 = vst [vmem:[%s7475_s1 + $0x30] sm:$0xff] %v5452_v37  ;;  %s11638_s29 = scalar_lea.vmem %s11180_s20, %s6605_s0 [#allocation3]   ;;  %s11641_s26 = scalar_lea.vmem %s11378_s27, %s6605_s0   ;;  %v5474_v55 = vld [vmem:[%s7479_s11 + $0x78] sm:$0xff]  ;;  %v5476_v24 = vld [vmem:[%s7479_s11 + $0x80] sm:$0xff]  ;;  %v5478_v53 = vld [vmem:[%s7479_s11 + $0x88] sm:$0xff] }
 0x905   : >> { %5455 = vst [vmem:[%s7475_s1 + $0x38] sm:$0xff] %v5454_v30  ;;  %v5480_v20 = vld [vmem:[%s7479_s11 + $0x90] sm:$0xff]  ;;  %v5482_v16 = vld [vmem:[%s7479_s11 + $0x98] sm:$0xff]  ;;  %v5484_v56 = vld [vmem:[%s7479_s11 + $0xa0] sm:$0xff] }
 0x906   : >> { %5457 = vst [vmem:[%s7475_s1 + $0x48] sm:$0xff] %v5456_v39  ;;  %v5486_v34 = vld [vmem:[%s7479_s11 + $0xa8] sm:$0xff]  ;;  %v5488_v3 = vld [vmem:[%s7479_s11 + $0xb0] sm:$0xff]  ;;  %v5490_v50 = vld [vmem:[%s7479_s11 + $0xb8] sm:$0xff] }
 0x907   : >> { %5459 = vst [vmem:[%s7475_s1 + $0x50] sm:$0xff] %v5458_v32  ;;  %v5492_v13 = vld [vmem:[%s7479_s11 + $0xc0] sm:$0xff]  ;;  %v5494_v26 = vld [vmem:[%s7479_s11 + $0xc8] sm:$0xff]  ;;  %v5496_v10 = vld [vmem:[%s7479_s11 + $0xd0] sm:$0xff] }
 0x908   : >> { %5461 = vst [vmem:[%s7475_s1 + $0x60] sm:$0xff] %v5460_v35  ;;  %v5498_v51 = vld [vmem:[%s7479_s11 + $0xd8] sm:$0xff]  ;;  %v5500_v47 = vld [vmem:[%s7479_s11 + $0xe0] sm:$0xff]  ;;  %v5502_v6 = vld [vmem:[%s7479_s11 + $0xe8] sm:$0xff] }
 0x909   : >> { %5463 = vst [vmem:[%s7475_s1 + $0x68] sm:$0xff] %v5462_v43  ;;  %v5504_v48 = vld [vmem:[%s7479_s11 + $0xf0] sm:$0xff]  ;;  %v5506_v40 = vld [vmem:[%s7479_s11 + $0xf8] sm:$0xff]  ;;  %s12597_s11 = smov %s11638_s29 }
 0x90a   : >> { %5465 = vst [vmem:[%s7475_s1 + $0x78] sm:$0xff] %v5464_v52 }
 0x90b   : >> { %5467 = vst [vmem:[%s7475_s1 + $0x80] sm:$0xff] %v5466_v63 }
 0x90c   : >> { %5469 = vst [vmem:[%s7475_s1 + $0x90] sm:$0xff] %v5468_v42 }
 0x90d   : >> { %5471 = vst [vmem:[%s7475_s1 + $0x98] sm:$0xff] %v5470_v12 }
 0x90e   : >> { %5473 = vst [vmem:[%s7475_s1 + $0xa8] sm:$0xff] %v5472_v0 }
 0x90f   : >> { %5475 = vst [vmem:[%s7475_s1 + $0xb0] sm:$0xff] %v5474_v55 }
 0x910   : >> { %5477 = vst [vmem:[%s7475_s1 + $0xc0] sm:$0xff] %v5476_v24 }
 0x911   : >> { %5479 = vst [vmem:[%s7475_s1 + $0xc8] sm:$0xff] %v5478_v53 }
 0x912   : >> { %5481 = vst [vmem:[%s7475_s1 + $0xd8] sm:$0xff] %v5480_v20 }
 0x913   : >> { %5483 = vst [vmem:[%s7475_s1 + $0xe0] sm:$0xff] %v5482_v16 }
 0x914   : >> { %5485 = vst [vmem:[%s7475_s1 + $0xf0] sm:$0xff] %v5484_v56 }
 0x915   : >> { %5487 = vst [vmem:[%s7475_s1 + $0xf8] sm:$0xff] %v5486_v34 }
 0x916   : >> { %5489 = vst [vmem:[%s7475_s1 + $0x108] sm:$0xff] %v5488_v3 }
 0x917   : >> { %5491 = vst [vmem:[%s7475_s1 + $0x110] sm:$0xff] %v5490_v50 }
 0x918   : >> { %5493 = vst [vmem:[%s7475_s1 + $0x120] sm:$0xff] %v5492_v13 }
 0x919   : >> { %5495 = vst [vmem:[%s7475_s1 + $0x128] sm:$0xff] %v5494_v26 }
 0x91a   : >> { %5497 = vst [vmem:[%s7475_s1 + $0x138] sm:$0xff] %v5496_v10 }
 0x91b   : >> { %5499 = vst [vmem:[%s7475_s1 + $0x140] sm:$0xff] %v5498_v51  ;;  %5440 = sbr.rel (!%p5437_p10) target bundleno = 2303 (0x8ff), region = 358 }
 0x91c   : >> { %5501 = vst [vmem:[%s7475_s1 + $0x150] sm:$0xff] %v5500_v47 }
 0x91d   : >> { %5503 = vst [vmem:[%s7475_s1 + $0x158] sm:$0xff] %v5502_v6 }
 0x91e   : >> { %5505 = vst [vmem:[%s7475_s1 + $0x168] sm:$0xff] %v5504_v48 }
 0x91f   : >> { %5507 = vst [vmem:[%s7475_s1 + $0x170] sm:$0xff] %v5506_v40  ;;  %s12596_s1 = smov %s11641_s26 }
 0x920 PF: > { %s11707_s0 = sand.u32 1, %s5433_s15   ;;  %s6731_s2 = sshll.u32 %s11595_s22, 4 }
 0x921   : > { %s11711_s3 = scalar_lea.vmem %s11180_s20, %s6731_s2 [#allocation3]   ;;  %s11714_s4 = scalar_lea.vmem %s11378_s27, %s6731_s2  }
 0x922   : > { %p6610_p11 = scmp.le.s32.totalorder %s11707_s0, 0 }
 0x923   : > { %s12599_s23 = smov (!%p6610_p11), %s11714_s4  ;;  %s12600_s1 = smov (!%p6610_p11), %s11711_s3 }
 0x924   : > { %5948 = sbr.rel (%p6610_p11) target bundleno = 2362 (0x93a), region = 363  ;;  %s11723_s11 = smov (!%p6610_p11), 0  }
 0x925   : > { %s11725_s24 = smov (!%p6610_p11), 0  }
 0x929 LB: >> { %v5531_v57 = vld [vmem:[%s7495_s1] sm:$0xff]  ;;  %v5533_v28 = vld [vmem:[%s7495_s1 + $0x10] sm:$0xff]  ;;  %s5563_s2 = sadd.s32 1, %s7499_s11  ;;  %s5525_s24 = sadd.s32 1, %s7503_s24   ;;  %s7503_s24 = sphi %s11725_s24, %s5525_s24   ;;  %s7499_s11 = sphi %s11723_s11, %s12603_s11   ;;  %s7495_s1 = sphi %s12600_s1, %s12602_s1   ;;  %s7491_s23 = sphi %s12599_s23, %s12601_s23  }
 0x92a   : >> { %v5535_v54 = vld [vmem:[%s7495_s1 + $0x20] sm:$0xff]  ;;  %5532 = vst [vmem:[%s7491_s23] sm:$0xff] %v5531_v57  ;;  %v5537_v61 = vld [vmem:[%s7495_s1 + $0x30] sm:$0xff]  ;;  %p5564_p12 = scmp.ge.s32.totalorder %s5563_s2, %s11707_s0  ;;  %p5524_p13 = scmp.ge.s32.totalorder %s5525_s24, %s11707_s0 }
 0x92b   : >> { %5534 = vst [vmem:[%s7491_s23 + $0x18] sm:$0xff] %v5533_v28  ;;  %v5539_v15 = vld [vmem:[%s7495_s1 + $0x40] sm:$0xff]  ;;  %v5541_v22 = vld [vmem:[%s7495_s1 + $0x50] sm:$0xff] }
 0x92c   : >> { %5536 = vst [vmem:[%s7491_s23 + $0x30] sm:$0xff] %v5535_v54  ;;  %s12648_s2 = smov (%p5564_p12, %s5563_s2), 0  ;;  %v5543_v18 = vld [vmem:[%s7495_s1 + $0x60] sm:$0xff]  ;;  %v5545_v2 = vld [vmem:[%s7495_s1 + $0x70] sm:$0xff] }
 0x92d   : >> { %5538 = vst [vmem:[%s7491_s23 + $0x48] sm:$0xff] %v5537_v61  ;;  %s6611_s15 = sshll.u32 %s12648_s2, 3  ;;  %v5547_v11 = vld [vmem:[%s7495_s1 + $0x80] sm:$0xff]  ;;  %v5549_v4 = vld [vmem:[%s7495_s1 + $0x90] sm:$0xff]  ;;  %s12603_s11 = smov %s12648_s2 }
 0x92e   : >> { %5540 = vst [vmem:[%s7491_s23 + $0x60] sm:$0xff] %v5539_v15  ;;  %s5568_s22 = scalar_lea.vmem %s11711_s3, %s6611_s15 [#allocation3]   ;;  %s5569_s14 = scalar_lea.vmem %s11714_s4, %s6611_s15   ;;  %v5551_v49 = vld [vmem:[%s7495_s1 + $0xa0] sm:$0xff]  ;;  %v5553_v36 = vld [vmem:[%s7495_s1 + $0xb0] sm:$0xff] }
 0x92f   : >> { %5542 = vst [vmem:[%s7491_s23 + $0x78] sm:$0xff] %v5541_v22  ;;  %v5555_v38 = vld [vmem:[%s7495_s1 + $0xc0] sm:$0xff]  ;;  %v5557_v41 = vld [vmem:[%s7495_s1 + $0xd0] sm:$0xff] }
 0x930   : >> { %5544 = vst [vmem:[%s7491_s23 + $0x90] sm:$0xff] %v5543_v18  ;;  %v5559_v60 = vld [vmem:[%s7495_s1 + $0xe0] sm:$0xff]  ;;  %v5561_v45 = vld [vmem:[%s7495_s1 + $0xf0] sm:$0xff]  ;;  %s12602_s1 = smov %s5568_s22 }
 0x931   : >> { %5546 = vst [vmem:[%s7491_s23 + $0xa8] sm:$0xff] %v5545_v2 }
 0x932   : >> { %5548 = vst [vmem:[%s7491_s23 + $0xc0] sm:$0xff] %v5547_v11 }
 0x933   : >> { %5550 = vst [vmem:[%s7491_s23 + $0xd8] sm:$0xff] %v5549_v4 }
 0x934   : >> { %5552 = vst [vmem:[%s7491_s23 + $0xf0] sm:$0xff] %v5551_v49 }
 0x935   : >> { %5554 = vst [vmem:[%s7491_s23 + $0x108] sm:$0xff] %v5553_v36  ;;  %5527 = sbr.rel (!%p5524_p13) target bundleno = 2345 (0x929), region = 369 }
 0x936   : >> { %5556 = vst [vmem:[%s7491_s23 + $0x120] sm:$0xff] %v5555_v38 }
 0x937   : >> { %5558 = vst [vmem:[%s7491_s23 + $0x138] sm:$0xff] %v5557_v41 }
 0x938   : >> { %5560 = vst [vmem:[%s7491_s23 + $0x150] sm:$0xff] %v5559_v60 }
 0x939   : >> { %5562 = vst [vmem:[%s7491_s23 + $0x168] sm:$0xff] %v5561_v45  ;;  %s12601_s23 = smov %s5569_s14 }
 0x93a PF: > { %s7509_s29 = smov 1  }
 0x93b   : > { %s5570_s26 = sshll.u32 %s7509_s29, %s11384_s17 }
 0x93c   : > { %s11787_s24 = sadd.s32 4294967295, %s5570_s26 }
 0x93d   : > { %v5580_v31 = vld [vmem:[%s11588_s8] sm:%s11787_s24]  ;;  %v5582_v8 = vld [vmem:[%s11588_s8 + $0x10] sm:%s11787_s24] }
 0x93e   : > { %5581 = vst [vmem:[%s11591_s21] sm:%s11787_s24] %v5580_v31  ;;  %v5584_v29 = vld [vmem:[%s11588_s8 + $0x20] sm:%s11787_s24] }
 0x93f   : > { %5583 = vst [vmem:[%s11591_s21 + $0x18] sm:%s11787_s24] %v5582_v8  ;;  %v5586_v5 = vld [vmem:[%s11588_s8 + $0x30] sm:%s11787_s24] }
 0x940   : > { %5585 = vst [vmem:[%s11591_s21 + $0x30] sm:%s11787_s24] %v5584_v29  ;;  %v5588_v7 = vld [vmem:[%s11588_s8 + $0x40] sm:%s11787_s24] }
 0x941   : > { %5587 = vst [vmem:[%s11591_s21 + $0x48] sm:%s11787_s24] %v5586_v5  ;;  %v5590_v44 = vld [vmem:[%s11588_s8 + $0x50] sm:%s11787_s24] }
 0x942   : > { %5589 = vst [vmem:[%s11591_s21 + $0x60] sm:%s11787_s24] %v5588_v7  ;;  %v5592_v19 = vld [vmem:[%s11588_s8 + $0x60] sm:%s11787_s24] }
 0x943   : > { %5591 = vst [vmem:[%s11591_s21 + $0x78] sm:%s11787_s24] %v5590_v44  ;;  %v5594_v17 = vld [vmem:[%s11588_s8 + $0x70] sm:%s11787_s24] }
 0x944   : > { %5593 = vst [vmem:[%s11591_s21 + $0x90] sm:%s11787_s24] %v5592_v19  ;;  %v5596_v33 = vld [vmem:[%s11588_s8 + $0x80] sm:%s11787_s24] }
 0x945   : > { %5595 = vst [vmem:[%s11591_s21 + $0xa8] sm:%s11787_s24] %v5594_v17  ;;  %v5598_v1 = vld [vmem:[%s11588_s8 + $0x90] sm:%s11787_s24] }
 0x946   : > { %5597 = vst [vmem:[%s11591_s21 + $0xc0] sm:%s11787_s24] %v5596_v33  ;;  %v5600_v58 = vld [vmem:[%s11588_s8 + $0xa0] sm:%s11787_s24] }
 0x947   : > { %5599 = vst [vmem:[%s11591_s21 + $0xd8] sm:%s11787_s24] %v5598_v1  ;;  %v5602_v27 = vld [vmem:[%s11588_s8 + $0xb0] sm:%s11787_s24] }
 0x948   : > { %5601 = vst [vmem:[%s11591_s21 + $0xf0] sm:%s11787_s24] %v5600_v58  ;;  %v5604_v9 = vld [vmem:[%s11588_s8 + $0xc0] sm:%s11787_s24] }
 0x949   : > { %5603 = vst [vmem:[%s11591_s21 + $0x108] sm:%s11787_s24] %v5602_v27  ;;  %v5606_v21 = vld [vmem:[%s11588_s8 + $0xd0] sm:%s11787_s24] }
 0x94a   : > { %5605 = vst [vmem:[%s11591_s21 + $0x120] sm:%s11787_s24] %v5604_v9  ;;  %v5608_v62 = vld [vmem:[%s11588_s8 + $0xe0] sm:%s11787_s24] }
 0x94b   : > { %5607 = vst [vmem:[%s11591_s21 + $0x138] sm:%s11787_s24] %v5606_v21  ;;  %v5610_v25 = vld [vmem:[%s11588_s8 + $0xf0] sm:%s11787_s24] }
 0x94c   : > { %5609 = vst [vmem:[%s11591_s21 + $0x150] sm:%s11787_s24] %v5608_v62 }
 0x94d   : > { %5611 = vst [vmem:[%s11591_s21 + $0x168] sm:%s11787_s24] %v5610_v25 }
 0x94e PF: > { %p6614_p0 = scmp.ge.u32.totalorder %s11380_s13, 8 }
 0x94f   : > { %s7510_s3 = smov (!%p6614_p0), 1  }
 0x950   : > { %5240 = sbr.rel (%p6614_p0) target bundleno = 2406 (0x966), region = 122  ;;  %s5241_s4 = sshll.u32 (!%p6614_p0), %s7510_s3, %s11380_s13 }
 0x951   : > { %s11855_s17 = sadd.s32 (!%p6614_p0), 4294967295, %s5241_s4 }
 0x955   : > { %v5251_v23 = vld [vmem:[%s11180_s20] sm:%s11855_s17]  ;;  %v5253_v59 = vld [vmem:[%s11180_s20 + $0x10] sm:%s11855_s17] }
 0x956   : > { %5252 = vst [vmem:[%s11378_s27] sm:%s11855_s17] %v5251_v23  ;;  %v5255_v14 = vld [vmem:[%s11180_s20 + $0x20] sm:%s11855_s17] }
 0x957   : > { %5254 = vst [vmem:[%s11378_s27 + $0x18] sm:%s11855_s17] %v5253_v59  ;;  %v5257_v46 = vld [vmem:[%s11180_s20 + $0x30] sm:%s11855_s17] }
 0x958   : > { %5256 = vst [vmem:[%s11378_s27 + $0x30] sm:%s11855_s17] %v5255_v14  ;;  %v5259_v37 = vld [vmem:[%s11180_s20 + $0x40] sm:%s11855_s17] }
 0x959   : > { %5258 = vst [vmem:[%s11378_s27 + $0x48] sm:%s11855_s17] %v5257_v46  ;;  %v5261_v30 = vld [vmem:[%s11180_s20 + $0x50] sm:%s11855_s17] }
 0x95a   : > { %5260 = vst [vmem:[%s11378_s27 + $0x60] sm:%s11855_s17] %v5259_v37  ;;  %v5263_v39 = vld [vmem:[%s11180_s20 + $0x60] sm:%s11855_s17] }
 0x95b   : > { %5262 = vst [vmem:[%s11378_s27 + $0x78] sm:%s11855_s17] %v5261_v30  ;;  %v5265_v32 = vld [vmem:[%s11180_s20 + $0x70] sm:%s11855_s17] }
 0x95c   : > { %5264 = vst [vmem:[%s11378_s27 + $0x90] sm:%s11855_s17] %v5263_v39  ;;  %v5267_v35 = vld [vmem:[%s11180_s20 + $0x80] sm:%s11855_s17] }
 0x95d   : > { %5266 = vst [vmem:[%s11378_s27 + $0xa8] sm:%s11855_s17] %v5265_v32  ;;  %v5269_v43 = vld [vmem:[%s11180_s20 + $0x90] sm:%s11855_s17] }
 0x95e   : > { %5268 = vst [vmem:[%s11378_s27 + $0xc0] sm:%s11855_s17] %v5267_v35  ;;  %v5271_v52 = vld [vmem:[%s11180_s20 + $0xa0] sm:%s11855_s17] }
 0x95f   : > { %5270 = vst [vmem:[%s11378_s27 + $0xd8] sm:%s11855_s17] %v5269_v43  ;;  %v5273_v63 = vld [vmem:[%s11180_s20 + $0xb0] sm:%s11855_s17] }
 0x960   : > { %5272 = vst [vmem:[%s11378_s27 + $0xf0] sm:%s11855_s17] %v5271_v52  ;;  %v5275_v42 = vld [vmem:[%s11180_s20 + $0xc0] sm:%s11855_s17] }
 0x961   : > { %5274 = vst [vmem:[%s11378_s27 + $0x108] sm:%s11855_s17] %v5273_v63  ;;  %v5277_v12 = vld [vmem:[%s11180_s20 + $0xd0] sm:%s11855_s17] }
 0x962   : > { %5276 = vst [vmem:[%s11378_s27 + $0x120] sm:%s11855_s17] %v5275_v42  ;;  %v5279_v0 = vld [vmem:[%s11180_s20 + $0xe0] sm:%s11855_s17] }
 0x963   : > { %5278 = vst [vmem:[%s11378_s27 + $0x138] sm:%s11855_s17] %v5277_v12  ;;  %v5281_v55 = vld [vmem:[%s11180_s20 + $0xf0] sm:%s11855_s17] }
 0x964   : > { %5280 = vst [vmem:[%s11378_s27 + $0x150] sm:%s11855_s17] %v5279_v0 }
 0x965   : > { %5282 = vst [vmem:[%s11378_s27 + $0x168] sm:%s11855_s17] %v5281_v55 }
 0x966 PF: > { %5615 = sbr.rel (!%p7623_p8) target bundleno = 2444 (0x98c), region = 176  ;;  %s6616_s13 = sshll.u32 (%p7623_p8), %s7359_s30, 5 }
 0x967   : > { %s5617_s8 = ssub.s32 (%p7623_p8), 40, %s6616_s13  ;;  %s12604_s20 = scalar_lea.sflag (%p7623_p8), [#allocation5], %s8194_s18 }
 0x968   : > { %p5618_p1 = scmp.lt.s32.totalorder (%p7623_p8), %s5617_s8, 32 }
 0x96b   : > { %s12650_s8 = smov (!%p5618_p1, %s5617_s8), 32 }
 0x96c   : > { %s6733_s21 = sshll.u32 %s12650_s8, 4 }
 0x96d   : > { %s5622_s0 = ssub.s32 512, %s6733_s21 }
 0x96e   : > { %s5623_s23 = sshll.u32 %s5622_s0, 4 }
 0x96f   : > { %5624 = vsyncadd %s12604_s20, %s5623_s23  ;;  %s6734_s27 = sshll.u32 %s7359_s30, 7  ;;  %s6737_s1 = smul.u32 160, %s7363_s9 }
 0x970   : > { %s5632_s11 = sshll.u32 %s9387_s25, 4  ;;  %p11932_p2 = scmp.ne.s32.totalorder %s6733_s21, 0  ;;  %s11936_s11 = int_to_ptr.vmem [resolvable:$true] %s5632_s11 }
 0x971   : > { %s5628_s15 = sadd.s32 %s6737_s1, %s6734_s27  ;;  %s6623_s22 = sshll.u32 %s12650_s8, 8 }
 0x972   : > { %s6621_s14 = sshll.u32 %s5628_s15, 2  ;;  %s7082_s4 = sshra.s32 %s11936_s11, 4  ;;  %s7083_s4 = int_to_ptr.vmem [resolvable:$true] %s7082_s4 }
 0x973   : > { %s5630_s24 = scalar_lea.hbm %s12039_s6, %s6621_s14  ;;  %s7084_s25 = sshrl.u32 %s6623_s22, 4 }
 0x974   : > { %s5634_s3 = sshll.u32 %s5630_s24, 4  ;;  %s7089_s17 = scalar_lea.vmem %s7083_s4, %s7084_s25  ;;  %s11942_s3 = int_to_ptr.hbm [resolvable:$true] %s5634_s3 }
 0x975   : > { %p7090_p3 = scmp.ne.s32.totalorder %s7083_s4, %s7089_s17  ;;  %s7511_s13 = smov [#allocation4]  }
 0x976   : > { %s7093_s21 = scalar_lea.vmem %s7511_s13, 1024 }
 0x977   : > { %p7091_p4 = pnand %p7090_p3, %p11932_p2  ;;  %p7095_p6 = scmp.lt.s32.totalorder %s7093_s21, %s7089_s17 }
 0x979   : > { %p7092_p5 = pneg %p7091_p4 }
 0x97b   : > { %p7097_p7 = pnand %p7095_p6, %p7092_p5 }
 0x97d   : > { %7100 = shalt.err (!%p7097_p7)
}
 0x97e   : > { %s7101_s0 = sshra.s32 %s11942_s3, 4  ;;  %s7112_s1 = scalar_lea.hbm %s12039_s6, 1280  ;;  %s7102_s0 = int_to_ptr.hbm [resolvable:$true] %s7101_s0 }
 0x97f   : > { %s7108_s23 = scalar_lea.hbm %s7102_s0, %s7084_s25  ;;  %p7113_p13 = scmp.lt.s32.totalorder %s7102_s0, %s12039_s6 }
 0x980   : > { %p7109_p10 = scmp.ne.s32.totalorder %s7102_s0, %s7108_s23  ;;  %p7114_p0 = scmp.lt.s32.totalorder %s7112_s1, %s7108_s23 }
 0x982   : > { %p7110_p11 = pnand %p7109_p10, %p11932_p2  ;;  %p7115_p1 = por %p7114_p0, %p7113_p13 }
 0x984   : > { %p7111_p12 = pneg %p7110_p11 }
 0x986   : > { %p7116_p3 = pnand %p7115_p1, %p7111_p12 }
 0x988   : > { %7119 = shalt.err (!%p7116_p3)
}
 0x989   : > { %s7512_s29 = smov 256   ;;  %s7513_s26 = smov 16  }
 0x98a   : > { %s12606_s24 = scalar_lea.sflag [#allocation5], %s8194_s18 }
 0x98b   : > { %5640 = dma.vmem_to_hbm [thread:$0]  (%p11932_p2), %s11936_s11, %s6623_s22, %s11942_s3, %s12606_s24, %s7512_s29, %s7512_s29, %s7513_s26  }
 0x98c PF: > { %s6624_s4 = sshll.u32 %s7359_s30, 2  ;;  %s6625_s25 = sshll.u32 %s7363_s9, 3 }
 0x98d   : > { %s5648_s17 = sadd.s32 %s6625_s25, %s6624_s4  ;;  %s5651_s13 = sshll.u32 %s11360_s10, 4  ;;  %s5652_s13 = int_to_ptr.vmem [resolvable:$true] %s5651_s13 }
 0x98e   : > { %s5649_s23 = scalar_lea.hbm %s12040_s7, %s5648_s17  ;;  %s6626_s20 = sshll.u32 %s7363_s9, 1 }
 0x98f   : > { %s5653_s2 = sshll.u32 %s5649_s23, 4  ;;  %s5663_s8 = sadd.s32 %s7359_s30, %s6626_s20  ;;  %s5654_s2 = int_to_ptr.hbm [resolvable:$true] %s5653_s2 }
 0x990   : > { %s7135_s11 = sshra.s32 %s5654_s2, 4  ;;  %s7141_s10 = scalar_lea.hbm %s12040_s7, 16  ;;  %s7136_s11 = int_to_ptr.hbm [resolvable:$true] %s7135_s11 }
 0x991   : > { %s7137_s22 = scalar_lea.hbm %s7136_s11, 4  ;;  %p7142_p6 = scmp.lt.s32.totalorder %s7136_s11, %s12040_s7 }
 0x992   : > { %p7138_p2 = scmp.ne.s32.totalorder %s7136_s11, %s7137_s22  ;;  %p7143_p7 = scmp.lt.s32.totalorder %s7141_s10, %s7137_s22 }
 0x994   : > { %p7139_p4 = pnand %p7138_p2, %p7623_p8  ;;  %p7144_p10 = por %p7143_p7, %p7142_p6 }
 0x996   : > { %p7140_p5 = pneg %p7139_p4 }
 0x998   : > { %p7145_p11 = pnand %p7144_p10, %p7140_p5 }
 0x99a   : > { %7148 = shalt.err (!%p7145_p11)
}
 0x99b   : > { %s12607_s30 = scalar_lea.sflag [#allocation7], %s11346_s16  ;;  %s12608_s29 = sld [smem:[#allocation134_spill]] }
 0x99c   : > { %6738 = dma.vmem_to_hbm [thread:$0]  (%p7623_p8), %s5652_s13, 64, %s5654_s2, %s12607_s30  }
 0x99d   : > { %s12610_s4 = scalar_lea.vmem [#allocation8], %s8194_s18 }
 0x99e   : > { %s5666_s25 = sshll.u32 %s12610_s4, 4  ;;  %s5667_s25 = int_to_ptr.vmem [resolvable:$true] %s5666_s25 }
 0x9a1   : > { %s12609_s26 = smov %s12608_s29  ;;  %s5664_s24 = scalar_lea.hbm %s12608_s29, %s5663_s8 }
 0x9a2   : > { %s5668_s17 = sshll.u32 %s5664_s24, 4  ;;  %s7169_s13 = scalar_lea.hbm %s12609_s26, 4  ;;  %s5669_s17 = int_to_ptr.hbm [resolvable:$true] %s5668_s17 }
 0x9a3   : > { %s7163_s21 = sshra.s32 %s5669_s17, 4  ;;  %s7164_s21 = int_to_ptr.hbm [resolvable:$true] %s7163_s21 }
 0x9a4   : > { %s7165_s0 = scalar_lea.hbm %s7164_s21, 1  ;;  %p7170_p1 = scmp.lt.s32.totalorder %s7164_s21, %s12609_s26 }
 0x9a5   : > { %p7166_p12 = scmp.ne.s32.totalorder %s7164_s21, %s7165_s0  ;;  %p7171_p3 = scmp.lt.s32.totalorder %s7169_s13, %s7165_s0 }
 0x9a7   : > { %p7167_p13 = pnand %p7166_p12, %p7623_p8  ;;  %p7172_p2 = por %p7171_p3, %p7170_p1 }
 0x9a9   : > { %p7168_p0 = pneg %p7167_p13 }
 0x9ab   : > { %p7173_p4 = pnand %p7172_p2, %p7168_p0 }
 0x9ad   : > { %7176 = shalt.err (!%p7173_p4)
}
 0x9ae   : > { %s12611_s18 = smov %s12607_s30 }
 0x9af   : > { %6739 = dma.vmem_to_hbm [thread:$0]  (%p7623_p8), %s5667_s25, 16, %s5669_s17, %s12611_s18  }
 0x9b0 PF: > { %s12612_s8 = sld [smem:[#allocation11_spill]]  ;;  %p6753_p5 = scmp.ge.s32.totalorder %s7375_s12, 2 }
 0x9b2   : > { %p6744_p6 = pnand %p6753_p5, %p7627_p9 }
 0x9b4   : > { %p6745_p7 = pneg %p6744_p6 }
 0x9b6   : > { %s5687_s3 = sand.u32 1, %s12612_s8  }
 0x9b7   : > { %s5688_s27 = scalar_lea.sflag [#allocation5], %s5687_s3 }
 0x9b8   : > { %7338 = dma.done.wait (%p6745_p7), %s5688_s27, 8192  }
 0x9b9   : > { %7340 = vsyncadd (%p6745_p7), %s5688_s27, 4294959104  ;;  %s12614_s10 = sadd.s32 4294967294, %s7375_s12  }
 0x9ba   : > { %s5697_s1 = sand.u32 1, %s12614_s10  }
 0x9bb   : > { %s5698_s15 = scalar_lea.sflag [#allocation7], %s5697_s1 }
 0x9bc   : > { %7342 = dma.done.wait (%p6745_p7), %s5698_s15, 80  }
 0x9bd   : > { %7344 = vsyncadd (%p6745_p7), %s5698_s15, 4294967216  ;;  %s25_s12 = sadd.s32 1, %s7375_s12   ;;  %s12615_s19 = sld [smem:[#allocation12_spill]] }
 0x9be   : > { %p22_p8 = scmp.ge.s32.totalorder %s25_s12, 6   ;;  %s12616_s29 = sld [smem:[#allocation18_spill]] }
 0x9bf   : > { %s12617_s30 = sld [smem:[#allocation13_spill]]  ;;  %s12621_s27 = smov %s7351_s28 }
 0x9c0   : > { %s12618_s9 = sld [smem:[#allocation14_spill]]  ;;  %24 = sbr.rel (!%p22_p8) target bundleno = 14 (0xe), region = 380 }
 0x9c1   : > { %s12619_s10 = sld [smem:[#allocation15_spill]] }
 0x9c2   : > { %s12620_s11 = sld [smem:[#allocation16_spill]] }
 0x9c3   : > { %s12622_s28 = smov %s12615_s19 }
 0x9c5   :  { %5713 = vsyncpa [#allocation5], 1 }
 0x9c6   :  { %5715 = vsyncpa [#allocation5 + $0x1], 1 }
 0x9c7   :  { %5716 = vsyncpa [#allocation7], 1 }
 0x9c8   :  { %5718 = vsyncpa [#allocation7 + $0x1], 1 }

</bundles_post_ra>
